<compile_context>
chip_gen: v7x
topology: tpu7x:2x2x1
jax: 0.10.0
libtpu: 0.0.40
codegen_flags: <defaults>
</compile_context>

<pallas_src>
import jax
import jax.numpy as jnp
from jax.experimental import pallas as pl
from jax.experimental.pallas import tpu as pltpu

LN_EPS = 1e-5                  # torch.nn.LayerNorm default
LANE = 128                     # TPU lane width
X_TILE_BYTE_BUDGET = 2 << 20   # bf16 feature bytes per grid step, summed over heads


def _fem_head(x_ref, w_ref, b_ref, o_ref):
    """Pool + LayerNorm(no affine) + Linear for one head on one B-tile.

    x_ref : (Bt, S, C) bf16   channels-last feature rows
    w_ref : (C, D)     bf16   linear weight, stored (in, out)
    b_ref : (1, D)     f32    linear bias
    o_ref : (Bt, 1, D) f32    output embeddings
    """
    x = x_ref[...]                                        # (Bt, S, C)
    # Global max pool over the spatial axis: sublane-wise vmax (VPU), C on lanes.
    pooled = jnp.max(x, axis=1).astype(jnp.float32)       # (Bt, C)
    # LayerNorm over C, elementwise_affine=False, biased variance (torch semantics).
    mean = jnp.mean(pooled, axis=-1, keepdims=True)
    centered = pooled - mean
    var = jnp.mean(centered * centered, axis=-1, keepdims=True)
    normed = centered * jax.lax.rsqrt(var + LN_EPS)
    # Linear on the MXU: one batched (Bt, C) x (C, D) bf16 matmul, f32 accumulate.
    out = jnp.dot(normed.astype(jnp.bfloat16), w_ref[...],
                  preferred_element_type=jnp.float32)
    out = out + b_ref[...]
    o_ref[...] = out[:, None, :]                          # (Bt, 1, D)


def fem_fused_kernel(x2_ref, x3_ref, x4_ref,
                     w2_ref, w3_ref, w4_ref,
                     b2_ref, b3_ref, b4_ref,
                     o2_ref, o3_ref, o4_ref):
    _fem_head(x2_ref, w2_ref, b2_ref, o2_ref)
    _fem_head(x3_ref, w3_ref, b3_ref, o3_ref)
    _fem_head(x4_ref, w4_ref, b4_ref, o4_ref)


def fem_fused(xs_nhwc, weights, biases, out_dims):
    """All three FEM heads in a single pallas_call.

    xs_nhwc : [(B, H_i, W_i, C_i)] NHWC backbone feature maps
    weights : [(C_i, D_i)] bf16, D_i a multiple of 128 (padded)
    biases  : [(D_i,)] f32 (zero-padded)
    out_dims: true output widths (outputs sliced to them outside the kernel)
    """
    B = xs_nhwc[0].shape[0]
    xs, sc = [], []
    for x in xs_nhwc:
        b, h, w, c = x.shape
        assert b == B
        # Free reshape of NHWC; cast to bf16 halves the dominant x DMA (on a real
        # TPU pipeline the backbone would already emit bf16 activations).
        xs.append(x.reshape(B, h * w, c).astype(jnp.bfloat16))
        sc.append((h * w, c))

    per_sample_bytes = sum(2 * s * c for s, c in sc)
    bt = int(max(1, min(B, X_TILE_BYTE_BUDGET // per_sample_bytes)))
    n_b = pl.cdiv(B, bt)

    in_specs = []
    for s, c in sc:
        in_specs.append(pl.BlockSpec((bt, s, c), lambda i: (i, 0, 0)))
    for w in weights:                       # grid-invariant weight blocks
        in_specs.append(pl.BlockSpec(w.shape, lambda i: (0, 0)))
    for bias in biases:
        in_specs.append(pl.BlockSpec((1, bias.shape[-1]), lambda i: (0, 0)))

    out_shape = tuple(jax.ShapeDtypeStruct((B, 1, w.shape[1]), jnp.float32)
                      for w in weights)
    out_specs = [pl.BlockSpec((bt, 1, w.shape[1]), lambda i: (i, 0, 0))
                 for w in weights]

    # Conservative footprint (double-buffer everything) -> scoped VMEM limit.
    est = 2 * (sum(bt * s * c * 2 for s, c in sc)
               + sum(w.size * 2 for w in weights)
               + sum(bias.size * 4 for bias in biases)
               + sum(bt * w.shape[1] * 4 for w in weights))
    vmem_limit = int(min(64 << 20, max(32 << 20, est + (8 << 20))))

    # Splitting a tiny batch across v7x's two TensorCores duplicates the weight DMA
    # for ~no compute win; only go parallel when there are enough B-tiles.
    dim_sem = ("parallel",) if n_b >= 8 else ("arbitrary",)

    b2d = [bias.reshape(1, -1).astype(jnp.float32) for bias in biases]

    outs = pl.pallas_call(
        fem_fused_kernel,
        out_shape=out_shape,
        grid_spec=pltpu.PrefetchScalarGridSpec(
            num_scalar_prefetch=0,
            grid=(n_b,),
            in_specs=in_specs,
            out_specs=out_specs,
        ),
        compiler_params=pltpu.CompilerParams(
            dimension_semantics=dim_sem,
            vmem_limit_bytes=vmem_limit),
    )(*xs, *weights, *b2d)

    return tuple(o.reshape(B, -1)[:, :d] for o, d in zip(outs, out_dims))


def fem_reference(x_nhwc, weight_bf16, bias, out_dim):
    """Pure-JAX reference mirroring the kernel's precision choices (bf16 pooling and
    bf16-weight matmul, f32 LayerNorm/accumulation).  Drift vs. the full-f32 torch
    Linear (up to ~1e-2 relative) is intentional."""
    B, H, W, C = x_nhwc.shape
    pooled = jnp.max(x_nhwc.astype(jnp.bfloat16).reshape(B, H * W, C),
                     axis=1).astype(jnp.float32)
    mean = jnp.mean(pooled, axis=-1, keepdims=True)
    var = jnp.mean((pooled - mean) ** 2, axis=-1, keepdims=True)
    normed = (pooled - mean) / jnp.sqrt(var + LN_EPS)
    out = jnp.dot(normed.astype(jnp.bfloat16), weight_bf16,
                  preferred_element_type=jnp.float32) + bias.astype(jnp.float32)
    return out[:, :out_dim]


def _round_up(n, m):
    return ((n + m - 1) // m) * m


def init_linear(key, in_features, out_features):
    """torch.nn.Linear default init: U(-1/sqrt(in), 1/sqrt(in)) for W and b.

    Stored (in, out) (transposed vs torch's (out, in)), zero-padded on the out dim
    to a lane multiple, weight cast to bf16 (halves weight DMA / VMEM)."""
    kw, kb = jax.random.split(key)
    bound = 1.0 / (in_features ** 0.5)
    w = jax.random.uniform(kw, (in_features, out_features), jnp.float32, -bound, bound)
    b = jax.random.uniform(kb, (out_features,), jnp.float32, -bound, bound)
    d_pad = _round_up(out_features, LANE)
    if d_pad != out_features:
        w = jnp.pad(w, ((0, 0), (0, d_pad - out_features)))
        b = jnp.pad(b, (0, d_pad - out_features))
    return w.astype(jnp.bfloat16), b.astype(jnp.float32), out_features


class FeatureHeads:
    """FEM heads of `Feature` (linear2/linear3/linear4 + affine-free LayerNorms).
    Feature maps are expected in NHWC (the natural TPU conv layout)."""

    def __init__(self, key, dim3=1024, dim4=1024):
        k2, k3, k4 = jax.random.split(key, 3)
        self.w2, self.b2, self.d2 = init_linear(k2, 512, 341)
        self.w3, self.b3, self.d3 = init_linear(k3, 1024, dim3)
        self.w4, self.b4, self.d4 = init_linear(k4, 2048, dim4)

    def __call__(self, x2, x3, x4):
        return fem_fused(
            [x2, x3, x4],
            [self.w2, self.w3, self.w4],
            [self.b2, self.b3, self.b4],
            [self.d2, self.d3, self.d4])

    def reference(self, x2, x3, x4):
        e2 = fem_reference(x2, self.w2, self.b2, self.d2)
        e3 = fem_reference(x3, self.w3, self.b3, self.d3)
        e4 = fem_reference(x4, self.w4, self.b4, self.d4)
        return e2, e3, e4


if __name__ == "__main__":
    key = jax.random.PRNGKey(0)
    k_params, k2, k3, k4 = jax.random.split(key, 4)

    # Small synthetic ResNet50 intermediate feature maps in NHWC (channels-last is
    # what XLA:TPU convolutions produce), consistent with a 2x64x64x3 image pushed
    # through layer2 / layer3 / layer4.
    B = 2
    x2 = jax.random.normal(k2, (B, 8, 8, 512), jnp.float32)
    x3 = jax.random.normal(k3, (B, 4, 4, 1024), jnp.float32)
    x4 = jax.random.normal(k4, (B, 2, 2, 2048), jnp.float32)

    heads = FeatureHeads(k_params, dim3=1024, dim4=1024)

    e2, e3, e4 = heads(x2, x3, x4)
    jax.block_until_ready((e2, e3, e4))

    # Correctness check against a pure-JAX reference using the same precision choices.
    r2, r3, r4 = heads.reference(x2, x3, x4)
    assert e2.shape == (B, 341) and e3.shape == (B, 1024) and e4.shape == (B, 1024)
    for got, ref in ((e2, r2), (e3, r3), (e4, r4)):
        max_err = float(jnp.max(jnp.abs(got - ref)))
        assert jnp.allclose(got, ref, atol=2e-3, rtol=2e-3), max_err

    print("KERNEL_OK")
</pallas_src>

<mosaic_0001>
module attributes {stable_mosaic.version = 11 : i64} {
  func.func @fem_fused_kernel(%arg0: i32, %arg1: memref<2x64x512xbf16, #tpu.memory_space<vmem>>, %arg2: memref<2x16x1024xbf16, #tpu.memory_space<vmem>>, %arg3: memref<2x4x2048xbf16, #tpu.memory_space<vmem>>, %arg4: memref<512x384xbf16, #tpu.memory_space<vmem>>, %arg5: memref<1024x1024xbf16, #tpu.memory_space<vmem>>, %arg6: memref<2048x1024xbf16, #tpu.memory_space<vmem>>, %arg7: memref<1x384xf32, #tpu.memory_space<vmem>>, %arg8: memref<1x1024xf32, #tpu.memory_space<vmem>>, %arg9: memref<1x1024xf32, #tpu.memory_space<vmem>>, %arg10: memref<2x1x384xf32, #tpu.memory_space<vmem>>, %arg11: memref<2x1x1024xf32, #tpu.memory_space<vmem>>, %arg12: memref<2x1x1024xf32, #tpu.memory_space<vmem>>) attributes {dimension_semantics = [#tpu.dimension_semantics<arbitrary>], iteration_bounds = array<i64: 1>, scalar_prefetch = 0 : i64, scratch_operands = 0 : i64, tpu.core_type = #tpu.core_type<tc>, window_params = [{transform_indices = @transform_0, window_bounds = array<i64: 2, 64, 512>}, {transform_indices = @transform_1, window_bounds = array<i64: 2, 16, 1024>}, {transform_indices = @transform_2, window_bounds = array<i64: 2, 4, 2048>}, {pipeline_mode = #tpu.pipeline_mode<synchronous>, transform_indices = @transform_3, window_bounds = array<i64: 512, 384>}, {pipeline_mode = #tpu.pipeline_mode<synchronous>, transform_indices = @transform_4, window_bounds = array<i64: 1024, 1024>}, {pipeline_mode = #tpu.pipeline_mode<synchronous>, transform_indices = @transform_5, window_bounds = array<i64: 2048, 1024>}, {pipeline_mode = #tpu.pipeline_mode<synchronous>, transform_indices = @transform_6, window_bounds = array<i64: 1, 384>}, {pipeline_mode = #tpu.pipeline_mode<synchronous>, transform_indices = @transform_7, window_bounds = array<i64: 1, 1024>}, {pipeline_mode = #tpu.pipeline_mode<synchronous>, transform_indices = @transform_8, window_bounds = array<i64: 1, 1024>}, {transform_indices = @transform_9, window_bounds = array<i64: 2, 1, 384>}, {transform_indices = @transform_10, window_bounds = array<i64: 2, 1, 1024>}, {transform_indices = @transform_11, window_bounds = array<i64: 2, 1, 1024>}]} {
    %c0 = arith.constant 0 : index
    %c0_0 = arith.constant 0 : index
    %c0_1 = arith.constant 0 : index
    %0 = vector.load %arg1[%c0, %c0_0, %c0_1] : memref<2x64x512xbf16, #tpu.memory_space<vmem>>, vector<2x64x512xbf16>
    %cst = arith.constant dense<0xFF80> : vector<2x512xbf16>
    %1 = vector.multi_reduction <maximumf>, %0, %cst [1] : vector<2x64x512xbf16> to vector<2x512xbf16>
    %2 = arith.extf %1 : vector<2x512xbf16> to vector<2x512xf32>
    %cst_2 = arith.constant dense<0.000000e+00> : vector<2xf32>
    %3 = vector.multi_reduction <add>, %2, %cst_2 [1] : vector<2x512xf32> to vector<2xf32>
    %4 = vector.shape_cast %3 : vector<2xf32> to vector<2x1xf32>
    %cst_3 = arith.constant 5.120000e+02 : f32
    %5 = vector.broadcast %cst_3 : f32 to vector<2x1xf32>
    %6 = arith.divf %4, %5 : vector<2x1xf32>
    %7 = vector.broadcast %6 : vector<2x1xf32> to vector<2x512xf32>
    %8 = arith.subf %2, %7 : vector<2x512xf32>
    %9 = arith.mulf %8, %8 : vector<2x512xf32>
    %cst_4 = arith.constant dense<0.000000e+00> : vector<2xf32>
    %10 = vector.multi_reduction <add>, %9, %cst_4 [1] : vector<2x512xf32> to vector<2xf32>
    %11 = vector.shape_cast %10 : vector<2xf32> to vector<2x1xf32>
    %cst_5 = arith.constant 5.120000e+02 : f32
    %12 = vector.broadcast %cst_5 : f32 to vector<2x1xf32>
    %13 = arith.divf %11, %12 : vector<2x1xf32>
    %cst_6 = arith.constant 9.99999974E-6 : f32
    %14 = vector.broadcast %cst_6 : f32 to vector<2x1xf32>
    %15 = arith.addf %13, %14 : vector<2x1xf32>
    %16 = math.rsqrt %15 : vector<2x1xf32>
    %17 = vector.broadcast %16 : vector<2x1xf32> to vector<2x512xf32>
    %18 = arith.mulf %8, %17 : vector<2x512xf32>
    %19 = arith.truncf %18 : vector<2x512xf32> to vector<2x512xbf16>
    %c0_7 = arith.constant 0 : index
    %c0_8 = arith.constant 0 : index
    %20 = vector.load %arg4[%c0_7, %c0_8] : memref<512x384xbf16, #tpu.memory_space<vmem>>, vector<512x384xbf16>
    %cst_9 = arith.constant dense<0.000000e+00> : vector<2x384xf32>
    %21 = tpu.matmul %19, %20, %cst_9 {dimension_numbers = #tpu.dot_dimension_numbers<[1], [0], [0], [1], [0, 0, 1, 1], [], []>} : vector<2x512xbf16>, vector<512x384xbf16>, vector<2x384xf32> -> vector<2x384xf32>
    %c0_10 = arith.constant 0 : index
    %c0_11 = arith.constant 0 : index
    %22 = vector.load %arg7[%c0_10, %c0_11] : memref<1x384xf32, #tpu.memory_space<vmem>>, vector<1x384xf32>
    %23 = vector.broadcast %22 : vector<1x384xf32> to vector<2x384xf32>
    %24 = arith.addf %21, %23 : vector<2x384xf32>
    %25 = vector.shape_cast %24 : vector<2x384xf32> to vector<2x1x384xf32>
    %c0_12 = arith.constant 0 : index
    %c0_13 = arith.constant 0 : index
    %c0_14 = arith.constant 0 : index
    %26 = vector.load %arg10[%c0_12, %c0_13, %c0_14] : memref<2x1x384xf32, #tpu.memory_space<vmem>>, vector<2x1x384xf32>
    tpu.vector_store %arg10[%c0_12, %c0_13, %c0_14], %25 {strides = array<i32>} : memref<2x1x384xf32, #tpu.memory_space<vmem>>, vector<2x1x384xf32>,
    %c0_15 = arith.constant 0 : index
    %c0_16 = arith.constant 0 : index
    %c0_17 = arith.constant 0 : index
    %27 = vector.load %arg2[%c0_15, %c0_16, %c0_17] : memref<2x16x1024xbf16, #tpu.memory_space<vmem>>, vector<2x16x1024xbf16>
    %cst_18 = arith.constant dense<0xFF80> : vector<2x1024xbf16>
    %28 = vector.multi_reduction <maximumf>, %27, %cst_18 [1] : vector<2x16x1024xbf16> to vector<2x1024xbf16>
    %29 = arith.extf %28 : vector<2x1024xbf16> to vector<2x1024xf32>
    %cst_19 = arith.constant dense<0.000000e+00> : vector<2xf32>
    %30 = vector.multi_reduction <add>, %29, %cst_19 [1] : vector<2x1024xf32> to vector<2xf32>
    %31 = vector.shape_cast %30 : vector<2xf32> to vector<2x1xf32>
    %cst_20 = arith.constant 1.024000e+03 : f32
    %32 = vector.broadcast %cst_20 : f32 to vector<2x1xf32>
    %33 = arith.divf %31, %32 : vector<2x1xf32>
    %34 = vector.broadcast %33 : vector<2x1xf32> to vector<2x1024xf32>
    %35 = arith.subf %29, %34 : vector<2x1024xf32>
    %36 = arith.mulf %35, %35 : vector<2x1024xf32>
    %cst_21 = arith.constant dense<0.000000e+00> : vector<2xf32>
    %37 = vector.multi_reduction <add>, %36, %cst_21 [1] : vector<2x1024xf32> to vector<2xf32>
    %38 = vector.shape_cast %37 : vector<2xf32> to vector<2x1xf32>
    %cst_22 = arith.constant 1.024000e+03 : f32
    %39 = vector.broadcast %cst_22 : f32 to vector<2x1xf32>
    %40 = arith.divf %38, %39 : vector<2x1xf32>
    %cst_23 = arith.constant 9.99999974E-6 : f32
    %41 = vector.broadcast %cst_23 : f32 to vector<2x1xf32>
    %42 = arith.addf %40, %41 : vector<2x1xf32>
    %43 = math.rsqrt %42 : vector<2x1xf32>
    %44 = vector.broadcast %43 : vector<2x1xf32> to vector<2x1024xf32>
    %45 = arith.mulf %35, %44 : vector<2x1024xf32>
    %46 = arith.truncf %45 : vector<2x1024xf32> to vector<2x1024xbf16>
    %c0_24 = arith.constant 0 : index
    %c0_25 = arith.constant 0 : index
    %47 = vector.load %arg5[%c0_24, %c0_25] : memref<1024x1024xbf16, #tpu.memory_space<vmem>>, vector<1024x1024xbf16>
    %cst_26 = arith.constant dense<0.000000e+00> : vector<2x1024xf32>
    %48 = tpu.matmul %46, %47, %cst_26 {dimension_numbers = #tpu.dot_dimension_numbers<[1], [0], [0], [1], [0, 0, 1, 1], [], []>} : vector<2x1024xbf16>, vector<1024x1024xbf16>, vector<2x1024xf32> -> vector<2x1024xf32>
    %c0_27 = arith.constant 0 : index
    %c0_28 = arith.constant 0 : index
    %49 = vector.load %arg8[%c0_27, %c0_28] : memref<1x1024xf32, #tpu.memory_space<vmem>>, vector<1x1024xf32>
    %50 = vector.broadcast %49 : vector<1x1024xf32> to vector<2x1024xf32>
    %51 = arith.addf %48, %50 : vector<2x1024xf32>
    %52 = vector.shape_cast %51 : vector<2x1024xf32> to vector<2x1x1024xf32>
    %c0_29 = arith.constant 0 : index
    %c0_30 = arith.constant 0 : index
    %c0_31 = arith.constant 0 : index
    %53 = vector.load %arg11[%c0_29, %c0_30, %c0_31] : memref<2x1x1024xf32, #tpu.memory_space<vmem>>, vector<2x1x1024xf32>
    tpu.vector_store %arg11[%c0_29, %c0_30, %c0_31], %52 {strides = array<i32>} : memref<2x1x1024xf32, #tpu.memory_space<vmem>>, vector<2x1x1024xf32>,
    %c0_32 = arith.constant 0 : index
    %c0_33 = arith.constant 0 : index
    %c0_34 = arith.constant 0 : index
    %54 = vector.load %arg3[%c0_32, %c0_33, %c0_34] : memref<2x4x2048xbf16, #tpu.memory_space<vmem>>, vector<2x4x2048xbf16>
    %cst_35 = arith.constant dense<0xFF80> : vector<2x2048xbf16>
    %55 = vector.multi_reduction <maximumf>, %54, %cst_35 [1] : vector<2x4x2048xbf16> to vector<2x2048xbf16>
    %56 = arith.extf %55 : vector<2x2048xbf16> to vector<2x2048xf32>
    %cst_36 = arith.constant dense<0.000000e+00> : vector<2xf32>
    %57 = vector.multi_reduction <add>, %56, %cst_36 [1] : vector<2x2048xf32> to vector<2xf32>
    %58 = vector.shape_cast %57 : vector<2xf32> to vector<2x1xf32>
    %cst_37 = arith.constant 2.048000e+03 : f32
    %59 = vector.broadcast %cst_37 : f32 to vector<2x1xf32>
    %60 = arith.divf %58, %59 : vector<2x1xf32>
    %61 = vector.broadcast %60 : vector<2x1xf32> to vector<2x2048xf32>
    %62 = arith.subf %56, %61 : vector<2x2048xf32>
    %63 = arith.mulf %62, %62 : vector<2x2048xf32>
    %cst_38 = arith.constant dense<0.000000e+00> : vector<2xf32>
    %64 = vector.multi_reduction <add>, %63, %cst_38 [1] : vector<2x2048xf32> to vector<2xf32>
    %65 = vector.shape_cast %64 : vector<2xf32> to vector<2x1xf32>
    %cst_39 = arith.constant 2.048000e+03 : f32
    %66 = vector.broadcast %cst_39 : f32 to vector<2x1xf32>
    %67 = arith.divf %65, %66 : vector<2x1xf32>
    %cst_40 = arith.constant 9.99999974E-6 : f32
    %68 = vector.broadcast %cst_40 : f32 to vector<2x1xf32>
    %69 = arith.addf %67, %68 : vector<2x1xf32>
    %70 = math.rsqrt %69 : vector<2x1xf32>
    %71 = vector.broadcast %70 : vector<2x1xf32> to vector<2x2048xf32>
    %72 = arith.mulf %62, %71 : vector<2x2048xf32>
    %73 = arith.truncf %72 : vector<2x2048xf32> to vector<2x2048xbf16>
    %c0_41 = arith.constant 0 : index
    %c0_42 = arith.constant 0 : index
    %74 = vector.load %arg6[%c0_41, %c0_42] : memref<2048x1024xbf16, #tpu.memory_space<vmem>>, vector<2048x1024xbf16>
    %cst_43 = arith.constant dense<0.000000e+00> : vector<2x1024xf32>
    %75 = tpu.matmul %73, %74, %cst_43 {dimension_numbers = #tpu.dot_dimension_numbers<[1], [0], [0], [1], [0, 0, 1, 1], [], []>} : vector<2x2048xbf16>, vector<2048x1024xbf16>, vector<2x1024xf32> -> vector<2x1024xf32>
    %c0_44 = arith.constant 0 : index
    %c0_45 = arith.constant 0 : index
    %76 = vector.load %arg9[%c0_44, %c0_45] : memref<1x1024xf32, #tpu.memory_space<vmem>>, vector<1x1024xf32>
    %77 = vector.broadcast %76 : vector<1x1024xf32> to vector<2x1024xf32>
    %78 = arith.addf %75, %77 : vector<2x1024xf32>
    %79 = vector.shape_cast %78 : vector<2x1024xf32> to vector<2x1x1024xf32>
    %c0_46 = arith.constant 0 : index
    %c0_47 = arith.constant 0 : index
    %c0_48 = arith.constant 0 : index
    %80 = vector.load %arg12[%c0_46, %c0_47, %c0_48] : memref<2x1x1024xf32, #tpu.memory_space<vmem>>, vector<2x1x1024xf32>
    tpu.vector_store %arg12[%c0_46, %c0_47, %c0_48], %79 {strides = array<i32>} : memref<2x1x1024xf32, #tpu.memory_space<vmem>>, vector<2x1x1024xf32>,
    return
  }
  func.func @transform_0(%arg0: i32) -> (i32, i32, i32) {
    %c0_i32 = arith.constant 0 : i32
    %c0_i32_0 = arith.constant 0 : i32
    %c0_i32_1 = arith.constant 0 : i32
    return %arg0, %c0_i32, %c0_i32_0 : i32, i32, i32
  }
  func.func @transform_1(%arg0: i32) -> (i32, i32, i32) {
    %c0_i32 = arith.constant 0 : i32
    %c0_i32_0 = arith.constant 0 : i32
    %c0_i32_1 = arith.constant 0 : i32
    return %arg0, %c0_i32, %c0_i32_0 : i32, i32, i32
  }
  func.func @transform_2(%arg0: i32) -> (i32, i32, i32) {
    %c0_i32 = arith.constant 0 : i32
    %c0_i32_0 = arith.constant 0 : i32
    %c0_i32_1 = arith.constant 0 : i32
    return %arg0, %c0_i32, %c0_i32_0 : i32, i32, i32
  }
  func.func @transform_3(%arg0: i32) -> (i32, i32) {
    %c0_i32 = arith.constant 0 : i32
    %c0_i32_0 = arith.constant 0 : i32
    %c0_i32_1 = arith.constant 0 : i32
    return %c0_i32, %c0_i32_0 : i32, i32
  }
  func.func @transform_4(%arg0: i32) -> (i32, i32) {
    %c0_i32 = arith.constant 0 : i32
    %c0_i32_0 = arith.constant 0 : i32
    %c0_i32_1 = arith.constant 0 : i32
    return %c0_i32, %c0_i32_0 : i32, i32
  }
  func.func @transform_5(%arg0: i32) -> (i32, i32) {
    %c0_i32 = arith.constant 0 : i32
    %c0_i32_0 = arith.constant 0 : i32
    %c0_i32_1 = arith.constant 0 : i32
    return %c0_i32, %c0_i32_0 : i32, i32
  }
  func.func @transform_6(%arg0: i32) -> (i32, i32) {
    %c0_i32 = arith.constant 0 : i32
    %c0_i32_0 = arith.constant 0 : i32
    %c0_i32_1 = arith.constant 0 : i32
    return %c0_i32, %c0_i32_0 : i32, i32
  }
  func.func @transform_7(%arg0: i32) -> (i32, i32) {
    %c0_i32 = arith.constant 0 : i32
    %c0_i32_0 = arith.constant 0 : i32
    %c0_i32_1 = arith.constant 0 : i32
    return %c0_i32, %c0_i32_0 : i32, i32
  }
  func.func @transform_8(%arg0: i32) -> (i32, i32) {
    %c0_i32 = arith.constant 0 : i32
    %c0_i32_0 = arith.constant 0 : i32
    %c0_i32_1 = arith.constant 0 : i32
    return %c0_i32, %c0_i32_0 : i32, i32
  }
  func.func @transform_9(%arg0: i32) -> (i32, i32, i32) {
    %c0_i32 = arith.constant 0 : i32
    %c0_i32_0 = arith.constant 0 : i32
    %c0_i32_1 = arith.constant 0 : i32
    return %arg0, %c0_i32, %c0_i32_0 : i32, i32, i32
  }
  func.func @transform_10(%arg0: i32) -> (i32, i32, i32) {
    %c0_i32 = arith.constant 0 : i32
    %c0_i32_0 = arith.constant 0 : i32
    %c0_i32_1 = arith.constant 0 : i32
    return %arg0, %c0_i32, %c0_i32_0 : i32, i32, i32
  }
  func.func @transform_11(%arg0: i32) -> (i32, i32, i32) {
    %c0_i32 = arith.constant 0 : i32
    %c0_i32_0 = arith.constant 0 : i32
    %c0_i32_1 = arith.constant 0 : i32
    return %arg0, %c0_i32, %c0_i32_0 : i32, i32, i32
  }
}

</mosaic_0001>

<bundles_post_ra>
// kernel: tpu_custom_call.1
= control target key start
LH: loop header
LB: loop body
LE: loop exit
PB: predicated region body
PF: predicated region fallthrough
CT: control target
= control target key end

     0   :  { %17 = vsyncpa [#allocation3], 0  ;;  %s19310_s0 = inlined_call_operand.hbm [shape: bf16[2,64,512], index: 0, kind: input, shape index: {}]   ;;  %s19311_s1 = inlined_call_operand.hbm [shape: bf16[2,16,1024], index: 1, kind: input, shape index: {}]   ;;  %s19312_s2 = inlined_call_operand.hbm [shape: bf16[2,4,2048], index: 2, kind: input, shape index: {}]   ;;  %s19313_s3 = inlined_call_operand.hbm [shape: bf16[512,384], index: 3, kind: input, shape index: {}]   ;;  %s19314_s4 = inlined_call_operand.hbm [shape: bf16[1024,1024], index: 4, kind: input, shape index: {}]   ;;  %s19315_s5 = inlined_call_operand.hbm [shape: bf16[2048,1024], index: 5, kind: input, shape index: {}]   ;;  %s19316_s6 = inlined_call_operand.hbm [shape: f32[1,384], index: 6, kind: input, shape index: {}]   ;;  %s19317_s7 = inlined_call_operand.hbm [shape: f32[1,1024], index: 7, kind: input, shape index: {}]   ;;  %s19318_s8 = inlined_call_operand.hbm [shape: f32[1,1024], index: 8, kind: input, shape index: {}]   ;;  %s19319_s9 = inlined_call_operand.hbm [shape: f32[2,1,384], index: 9, kind: output, shape index: {0}]   ;;  %s19320_s10 = inlined_call_operand.hbm [shape: f32[2,1,1024], index: 10, kind: output, shape index: {1}]   ;;  %s19321_s11 = inlined_call_operand.hbm [shape: f32[2,1,1024], index: 11, kind: output, shape index: {2}]  }
   0x1   :  { %18 = vsyncpa [#allocation6], 0 }
   0x2   :  { %19 = vsyncpa [#allocation9], 0 }
   0x3   :  { %20 = vsyncpa [#allocation12], 0 }
   0x4   :  { %21 = vsyncpa [#allocation15], 0 }
   0x5   :  { %22 = vsyncpa [#allocation4], 0 }
   0x6   :  { %23 = vsyncpa [#allocation19], 0  ;;  %s16928_s17 = smov [#allocation5]   ;;  %s16650_s21 = scalar_lea.hbm %s19311_s1, 2048 }
   0x7   :  { %s41_s18 = sshll.u32 %s16928_s17, 4  ;;  %p16651_p0 = scmp.ne.s32.totalorder %s19311_s1, %s16650_s21  ;;  %s42_s18 = int_to_ptr.vmem [resolvable:$true] %s41_s18 }
   0x8   :  { %p16654_p1 = scmp.lt.u32.totalorder %s16650_s21, %s19311_s1 }
   0xa   :  { %p16656_p2 = pnand %p16654_p1, %p16651_p0 }
   0xc   :  { %16659 = shalt.err (!%p16656_p2)
}
   0xd   :  { %s16660_s26 = scalar_lea.vmem %s42_s18, 2048  ;;  %p16665_p4 = scmp.lt.s32.totalorder %s42_s18, %s42_s18 }
   0xe   :  { %p16661_p3 = scmp.ne.s32.totalorder %s42_s18, %s16660_s26  ;;  %p16666_p5 = scmp.lt.s32.totalorder %s16660_s26, %s16660_s26 }
  0x10   :  { %p16667_p6 = por %p16666_p5, %p16665_p4 }
  0x12   :  { %p16668_p7 = pnand %p16667_p6, %p16661_p3 }
  0x14   :  { %16671 = shalt.err (!%p16668_p7)
}
  0x15   :  { %s16929_s27 = smov 512   ;;  %s16930_s28 = smov 32  }
  0x16   :  { %47 = dma.hbm_to_vmem [thread:$0]  %s19311_s1, 2048, %s42_s18, [#allocation6], %s16929_s27, %s16929_s27, %s16930_s28  }
  0x17   :  { %s16931_s12 = smov [#allocation8]   ;;  %s16672_s16 = scalar_lea.hbm %s19313_s3, 12288 }
  0x18   :  { %s65_s13 = sshll.u32 %s16931_s12, 4  ;;  %p16673_p8 = scmp.ne.s32.totalorder %s19313_s3, %s16672_s16  ;;  %s66_s13 = int_to_ptr.vmem [resolvable:$true] %s65_s13 }
  0x19   :  { %p16676_p9 = scmp.lt.u32.totalorder %s16672_s16, %s19313_s3 }
  0x1b   :  { %p16678_p10 = pnand %p16676_p9, %p16673_p8 }
  0x1d   :  { %16681 = shalt.err (!%p16678_p10)
}
  0x1e   :  { %s16682_s22 = scalar_lea.vmem %s66_s13, 12288  ;;  %p16687_p12 = scmp.lt.s32.totalorder %s66_s13, %s66_s13 }
  0x1f   :  { %p16683_p11 = scmp.ne.s32.totalorder %s66_s13, %s16682_s22  ;;  %p16688_p13 = scmp.lt.s32.totalorder %s16682_s22, %s16682_s22 }
  0x21   :  { %p16689_p0 = por %p16688_p13, %p16687_p12 }
  0x23   :  { %p16690_p1 = pnand %p16689_p0, %p16683_p11 }
  0x25   :  { %16693 = shalt.err (!%p16690_p1)
}
  0x26   :  { %s16932_s1 = smov 192   ;;  %s16933_s18 = smov 12  }
  0x27   :  { %71 = dma.hbm_to_vmem [thread:$0]  %s19313_s3, 12288, %s66_s13, [#allocation9], %s16932_s1, %s16932_s1, %s16933_s18  }
  0x28   :  { %s16934_s25 = smov [#allocation11]   ;;  %s16935_s29 = smov [#allocation14]  }
  0x29   :  { %s89_s26 = sshll.u32 %s16934_s25, 4  ;;  %s112_s30 = sshll.u32 %s16935_s29, 4  ;;  %s90_s26 = int_to_ptr.vmem [resolvable:$true] %s89_s26  ;;  %s113_s30 = int_to_ptr.vmem [resolvable:$true] %s112_s30 }
  0x2a   :  { %s16694_s15 = scalar_lea.hbm %s19315_s5, 131072 }
  0x2b   :  { %p16695_p2 = scmp.ne.s32.totalorder %s19315_s5, %s16694_s15  ;;  %p16698_p3 = scmp.lt.u32.totalorder %s16694_s15, %s19315_s5 }
  0x2d   :  { %p16700_p4 = pnand %p16698_p3, %p16695_p2 }
  0x2f   :  { %16703 = shalt.err (!%p16700_p4)
}
  0x30   :  { %s16704_s3 = scalar_lea.vmem %s90_s26, 131072  ;;  %p16709_p6 = scmp.lt.s32.totalorder %s90_s26, %s90_s26 }
  0x31   :  { %p16705_p5 = scmp.ne.s32.totalorder %s90_s26, %s16704_s3  ;;  %p16710_p7 = scmp.lt.s32.totalorder %s16704_s3, %s16704_s3 }
  0x33   :  { %p16711_p8 = por %p16710_p7, %p16709_p6 }
  0x35   :  { %p16712_p9 = pnand %p16711_p8, %p16705_p5 }
  0x37   :  { %16715 = shalt.err (!%p16712_p9)
}
  0x38   :  { %95 = dma.hbm_to_vmem [thread:$0]  %s19315_s5, 131072, %s90_s26, [#allocation12], %s16929_s27, %s16929_s27, %s16930_s28  }
  0x39   :  { %s16716_s18 = scalar_lea.hbm %s19317_s7, 128 }
  0x3a   :  { %p16717_p10 = scmp.ne.s32.totalorder %s19317_s7, %s16716_s18  ;;  %p16720_p11 = scmp.lt.u32.totalorder %s16716_s18, %s19317_s7 }
  0x3c   :  { %p16722_p12 = pnand %p16720_p11, %p16717_p10 }
  0x3e   :  { %16725 = shalt.err (!%p16722_p12)
}
  0x3f   :  { %s16726_s12 = scalar_lea.vmem %s113_s30, 128  ;;  %p16731_p0 = scmp.lt.s32.totalorder %s113_s30, %s113_s30 }
  0x40   :  { %p16727_p13 = scmp.ne.s32.totalorder %s113_s30, %s16726_s12  ;;  %p16732_p1 = scmp.lt.s32.totalorder %s16726_s12, %s16726_s12 }
  0x42   :  { %p16733_p2 = por %p16732_p1, %p16731_p0 }
  0x44   :  { %p16734_p3 = pnand %p16733_p2, %p16727_p13 }
  0x46   :  { %16737 = shalt.err (!%p16734_p3)
}
  0x47   :  { %115 = dma.hbm_to_vmem [thread:$0]  %s19317_s7, 128, %s113_s30, [#allocation15]  }
  0x48   :  { %s16936_s14 = smov [#allocation2]   ;;  %s16738_s19 = scalar_lea.hbm %s19310_s0, 4096 }
  0x49   :  { %s29_s15 = sshll.u32 %s16936_s14, 4  ;;  %p16739_p4 = scmp.ne.s32.totalorder %s19310_s0, %s16738_s19  ;;  %s30_s15 = int_to_ptr.vmem [resolvable:$true] %s29_s15 }
  0x4a   :  { %p16742_p5 = scmp.lt.u32.totalorder %s16738_s19, %s19310_s0 }
  0x4c   :  { %p16744_p6 = pnand %p16742_p5, %p16739_p4 }
  0x4e   :  { %16747 = shalt.err (!%p16744_p6)
}
  0x4f   :  { %s16748_s22 = scalar_lea.vmem %s30_s15, 4096  ;;  %p16753_p8 = scmp.lt.s32.totalorder %s30_s15, %s30_s15 }
  0x50   :  { %p16749_p7 = scmp.ne.s32.totalorder %s30_s15, %s16748_s22  ;;  %p16754_p9 = scmp.lt.s32.totalorder %s16748_s22, %s16748_s22 }
  0x52   :  { %p16755_p10 = por %p16754_p9, %p16753_p8 }
  0x54   :  { %p16756_p11 = pnand %p16755_p10, %p16749_p7 }
  0x56   :  { %16759 = shalt.err (!%p16756_p11)
}
  0x57   :  { %s16937_s7 = smov 256   ;;  %s16938_s30 = smov 16  }
  0x58   :  { %35 = dma.hbm_to_vmem [thread:$0]  %s19310_s0, 4096, %s30_s15, [#allocation3], %s16937_s7, %s16937_s7, %s16938_s30  }
  0x59   :  { %s16939_s23 = smov [#allocation7]   ;;  %s16940_s25 = smov [#allocation10]  }
  0x5a   :  { %s53_s24 = sshll.u32 %s16939_s23, 4  ;;  %s77_s29 = sshll.u32 %s16940_s25, 4  ;;  %s54_s24 = int_to_ptr.vmem [resolvable:$true] %s53_s24  ;;  %s78_s29 = int_to_ptr.vmem [resolvable:$true] %s77_s29 }
  0x5b   :  { %s16760_s26 = scalar_lea.hbm %s19312_s2, 1024 }
  0x5c   :  { %p16761_p12 = scmp.ne.s32.totalorder %s19312_s2, %s16760_s26  ;;  %p16764_p13 = scmp.lt.u32.totalorder %s16760_s26, %s19312_s2 }
  0x5e   :  { %p16766_p0 = pnand %p16764_p13, %p16761_p12 }
  0x60   :  { %16769 = shalt.err (!%p16766_p0)
}
  0x61   :  { %s16770_s0 = scalar_lea.vmem %s54_s24, 1024  ;;  %p16775_p2 = scmp.lt.s32.totalorder %s54_s24, %s54_s24 }
  0x62   :  { %p16771_p1 = scmp.ne.s32.totalorder %s54_s24, %s16770_s0  ;;  %p16776_p3 = scmp.lt.s32.totalorder %s16770_s0, %s16770_s0 }
  0x64   :  { %p16777_p4 = por %p16776_p3, %p16775_p2 }
  0x66   :  { %p16778_p5 = pnand %p16777_p4, %p16771_p1 }
  0x68   :  { %16781 = shalt.err (!%p16778_p5)
}
  0x69   :  { %59 = dma.hbm_to_vmem [thread:$0]  %s19312_s2, 1024, %s54_s24, [#allocation6], %s16929_s27, %s16929_s27, %s16930_s28  }
  0x6a   :  { %s16782_s21 = scalar_lea.hbm %s19314_s4, 65536 }
  0x6b   :  { %p16783_p6 = scmp.ne.s32.totalorder %s19314_s4, %s16782_s21  ;;  %p16786_p7 = scmp.lt.u32.totalorder %s16782_s21, %s19314_s4 }
  0x6d   :  { %p16788_p8 = pnand %p16786_p7, %p16783_p6 }
  0x6f   :  { %16791 = shalt.err (!%p16788_p8)
}
  0x70   :  { %s16792_s18 = scalar_lea.vmem %s78_s29, 65536  ;;  %p16797_p10 = scmp.lt.s32.totalorder %s78_s29, %s78_s29 }
  0x71   :  { %p16793_p9 = scmp.ne.s32.totalorder %s78_s29, %s16792_s18  ;;  %p16798_p11 = scmp.lt.s32.totalorder %s16792_s18, %s16792_s18 }
  0x73   :  { %p16799_p12 = por %p16798_p11, %p16797_p10 }
  0x75   :  { %p16800_p13 = pnand %p16799_p12, %p16793_p9 }
  0x77   :  { %16803 = shalt.err (!%p16800_p13)
}
  0x78   :  { %83 = dma.hbm_to_vmem [thread:$0]  %s19314_s4, 65536, %s78_s29, [#allocation9], %s16929_s27, %s16929_s27, %s16930_s28  }
  0x79   :  { %s16941_s24 = smov [#allocation13]   ;;  %s16942_s12 = smov [#allocation16]  }
  0x7a   :  { %s102_s25 = sshll.u32 %s16941_s24, 4  ;;  %s122_s5 = sshll.u32 %s16942_s12, 4  ;;  %s103_s25 = int_to_ptr.vmem [resolvable:$true] %s102_s25  ;;  %s123_s5 = int_to_ptr.vmem [resolvable:$true] %s122_s5 }
  0x7b   :  { %s16804_s16 = scalar_lea.hbm %s19316_s6, 48 }
  0x7c   :  { %p16805_p0 = scmp.ne.s32.totalorder %s19316_s6, %s16804_s16  ;;  %p16808_p1 = scmp.lt.u32.totalorder %s16804_s16, %s19316_s6 }
  0x7e   :  { %p16810_p2 = pnand %p16808_p1, %p16805_p0 }
  0x80   :  { %16813 = shalt.err (!%p16810_p2)
}
  0x81   :  { %s16814_s4 = scalar_lea.vmem %s103_s25, 48  ;;  %s16818_s27 = scalar_lea.vmem %s103_s25, 64 }
  0x82   :  { %p16815_p3 = scmp.ne.s32.totalorder %s103_s25, %s16814_s4  ;;  %p16819_p4 = scmp.lt.s32.totalorder %s103_s25, %s103_s25 }
  0x83   :  { %p16820_p5 = scmp.lt.s32.totalorder %s16818_s27, %s16814_s4 }
  0x85   :  { %p16821_p6 = por %p16820_p5, %p16819_p4 }
  0x87   :  { %p16822_p7 = pnand %p16821_p6, %p16815_p3 }
  0x89   :  { %16825 = shalt.err (!%p16822_p7)
}
  0x8a   :  { %105 = dma.hbm_to_vmem [thread:$0]  %s19316_s6, 48, %s103_s25, [#allocation12]  }
  0x8b   :  { %s16826_s13 = scalar_lea.hbm %s19318_s8, 128 }
  0x8c   :  { %p16827_p8 = scmp.ne.s32.totalorder %s19318_s8, %s16826_s13  ;;  %p16830_p9 = scmp.lt.u32.totalorder %s16826_s13, %s19318_s8 }
  0x8e   :  { %p16832_p10 = pnand %p16830_p9, %p16827_p8 }
  0x90   :  { %16835 = shalt.err (!%p16832_p10)
}
  0x91   :  { %s16836_s1 = scalar_lea.vmem %s123_s5, 128  ;;  %p16841_p12 = scmp.lt.s32.totalorder %s123_s5, %s123_s5 }
  0x92   :  { %p16837_p11 = scmp.ne.s32.totalorder %s123_s5, %s16836_s1  ;;  %p16842_p13 = scmp.lt.s32.totalorder %s16836_s1, %s16836_s1 }
  0x94   :  { %p16843_p0 = por %p16842_p13, %p16841_p12 }
  0x96   :  { %p16844_p1 = pnand %p16843_p0, %p16837_p11 }
  0x98   :  { %16847 = shalt.err (!%p16844_p1)
}
  0x99   :  { %125 = dma.hbm_to_vmem [thread:$0]  %s19318_s8, 128, %s123_s5, [#allocation15]  }
  0x9a   :  { %16914 = dma.done.wait [#allocation3], 4096  }
  0x9b   :  { %16915 = vsyncadd [#allocation3], 4294963200 }
  0x9c   :  { %16916 = dma.done.wait [#allocation6], 3072  }
  0x9d   :  { %16917 = vsyncadd [#allocation6], 4294964224 }
  0x9e   :  { %16918 = dma.done.wait [#allocation9], 77824  }
  0x9f   :  { %16919 = vsyncadd [#allocation9], 4294889472 }
  0xa0   :  { %16920 = dma.done.wait [#allocation12], 131120  }
  0xa1   :  { %16921 = vsyncadd [#allocation12], 4294836176 }
  0xa2   :  { %16922 = dma.done.wait [#allocation15], 256  }
  0xa3   :  { %16923 = vsyncadd [#allocation15], 4294967040  ;;  %v16458_v0 = vld [vmem:[#allocation2] ss:$16 sps:$4 sm:$0xff]   ;;  %v16460_v1 = vld [vmem:[#allocation2 + $0x4] ss:$16 sps:$4 sm:$0xff]  }
  0xa4   :  { %v16461_v2 = vld [vmem:[#allocation2 + $0x8] ss:$16 sps:$4 sm:$0xff]   ;;  %v16463_v3 = vld [vmem:[#allocation2 + $0xc] ss:$16 sps:$4 sm:$0xff]   ;;  %v16464_v4 = vld [vmem:[#allocation2 + $0x20] ss:$16 sps:$4 sm:$0xff]  }
  0xa5   :  { %v16466_v5 = vld [vmem:[#allocation2 + $0x24] ss:$16 sps:$4 sm:$0xff]   ;;  %v16467_v6 = vld [vmem:[#allocation2 + $0x28] ss:$16 sps:$4 sm:$0xff]   ;;  %v16469_v7 = vld [vmem:[#allocation2 + $0x2c] ss:$16 sps:$4 sm:$0xff]   ;;  %v347_v13 = vmax.bf16 %v16464_v4, %v16458_v0 }
  0xa6   :  { %v16470_v8 = vld [vmem:[#allocation2 + $0x40] ss:$16 sps:$4 sm:$0xff]   ;;  %v16472_v9 = vld [vmem:[#allocation2 + $0x44] ss:$16 sps:$4 sm:$0xff]   ;;  %v16473_v10 = vld [vmem:[#allocation2 + $0x48] ss:$16 sps:$4 sm:$0xff]   ;;  %v360_v14 = vmax.bf16 %v16466_v5, %v16460_v1  ;;  %v373_v15 = vmax.bf16 %v16467_v6, %v16461_v2  ;;  %v386_v19 = vmax.bf16 %v16469_v7, %v16463_v3 }
  0xa7   :  { %v16475_v11 = vld [vmem:[#allocation2 + $0x4c] ss:$16 sps:$4 sm:$0xff]   ;;  %v16476_v12 = vld [vmem:[#allocation2 + $0x60] ss:$16 sps:$4 sm:$0xff]   ;;  %v16478_v16 = vld [vmem:[#allocation2 + $0x64] ss:$16 sps:$4 sm:$0xff]   ;;  %v348_v22 = vmax.bf16 %v16470_v8, %v347_v13 }
  0xa8   :  { %v16479_v17 = vld [vmem:[#allocation2 + $0x68] ss:$16 sps:$4 sm:$0xff]   ;;  %v16481_v18 = vld [vmem:[#allocation2 + $0x6c] ss:$16 sps:$4 sm:$0xff]   ;;  %v16482_v20 = vld [vmem:[#allocation2 + $0x80] ss:$16 sps:$4 sm:$0xff]   ;;  %v361_v23 = vmax.bf16 %v16472_v9, %v360_v14  ;;  %v374_v24 = vmax.bf16 %v16473_v10, %v373_v15  ;;  %v387_v27 = vmax.bf16 %v16475_v11, %v386_v19 }
  0xa9   :  { %v16484_v21 = vld [vmem:[#allocation2 + $0x84] ss:$16 sps:$4 sm:$0xff]   ;;  %v16488_v25 = vld [vmem:[#allocation2 + $0xa0] ss:$16 sps:$4 sm:$0xff]   ;;  %v16485_v28 = vld [vmem:[#allocation2 + $0x88] ss:$16 sps:$4 sm:$0xff]   ;;  %v349_v31 = vmax.bf16 %v16476_v12, %v348_v22 }
  0xaa   :  { %v16490_v26 = vld [vmem:[#allocation2 + $0xa4] ss:$16 sps:$4 sm:$0xff]   ;;  %v16487_v29 = vld [vmem:[#allocation2 + $0x8c] ss:$16 sps:$4 sm:$0xff]   ;;  %v16494_v30 = vld [vmem:[#allocation2 + $0xc0] ss:$16 sps:$4 sm:$0xff]   ;;  %v362_v32 = vmax.bf16 %v16478_v16, %v361_v23  ;;  %v375_v33 = vmax.bf16 %v16479_v17, %v374_v24  ;;  %v388_v37 = vmax.bf16 %v16481_v18, %v387_v27  ;;  %v399_v38 = vmax.bf16 %v16488_v25, %v16482_v20 }
  0xab   :  { %v16491_v34 = vld [vmem:[#allocation2 + $0xa8] ss:$16 sps:$4 sm:$0xff]   ;;  %v16493_v35 = vld [vmem:[#allocation2 + $0xac] ss:$16 sps:$4 sm:$0xff]   ;;  %v16496_v36 = vld [vmem:[#allocation2 + $0xc4] ss:$16 sps:$4 sm:$0xff]   ;;  %v412_v39 = vmax.bf16 %v16490_v26, %v16484_v21  ;;  %v350_v42 = vunpack.i.l.bf16 %v349_v31  ;;  %v351_v43 = vunpack.i.h.bf16 %v349_v31 }
  0xac   :  { %v16500_v40 = vld [vmem:[#allocation2 + $0xe0] ss:$16 sps:$4 sm:$0xff]   ;;  %v16502_v41 = vld [vmem:[#allocation2 + $0xe4] ss:$16 sps:$4 sm:$0xff]   ;;  %v363_v44 = vunpack.i.l.bf16 %v362_v32  ;;  %v364_v45 = vunpack.i.h.bf16 %v362_v32  ;;  %v16497_v46 = vld [vmem:[#allocation2 + $0xc8] ss:$16 sps:$4 sm:$0xff]   ;;  %v376_v48 = vunpack.i.l.bf16 %v375_v33  ;;  %v377_v49 = vunpack.i.h.bf16 %v375_v33 }
  0xad   :  { %v16499_v47 = vld [vmem:[#allocation2 + $0xcc] ss:$16 sps:$4 sm:$0xff]   ;;  %v389_v50 = vunpack.i.l.bf16 %v388_v37  ;;  %v390_v51 = vunpack.i.h.bf16 %v388_v37  ;;  %v352_v52 = vmax.f32 %v350_v42, %v351_v43  ;;  %v400_v54 = vmax.bf16 %v16494_v30, %v399_v38  ;;  %v16503_v60 = vld [vmem:[#allocation2 + $0xe8] ss:$16 sps:$4 sm:$0xff]   ;;  %s16945_s8 = smov [#allocation18]  }
  0xae   :  { %v365_v53 = vmax.f32 %v363_v44, %v364_v45  ;;  %v413_v55 = vmax.bf16 %v16496_v36, %v412_v39  ;;  %v378_v56 = vmax.f32 %v376_v48, %v377_v49  ;;  %v425_v58 = vmax.bf16 %v16491_v34, %v16485_v28  ;;  %v16505_v1 = vld [vmem:[#allocation2 + $0xec] ss:$16 sps:$4 sm:$0xff]   ;;  %s14493_s2 = sshll.u32 %s16945_s8, 4  ;;  %s14494_s2 = int_to_ptr.vmem [resolvable:$true] %s14493_s2 }
  0xaf   :  { %v391_v57 = vmax.f32 %v389_v50, %v390_v51  ;;  %v438_v59 = vmax.bf16 %v16493_v35, %v16487_v29  ;;  %v353_v61 = vrot.slane %v352_v52, 4  ;;  %v401_v63 = vmax.bf16 %v16500_v40, %v400_v54  ;;  %v1453_v50 = vld [vmem:[#allocation5] sm:$0xff]  ;;  %s16848_s23 = scalar_lea.vmem %s14494_s2, 256  ;;  %p16853_p3 = scmp.lt.s32.totalorder %s14494_s2, %s14494_s2 }
  0xb0   :  { %v366_v62 = vrot.slane %v365_v53, 4  ;;  %v414_v0 = vmax.bf16 %v16502_v41, %v413_v55  ;;  %v379_v2 = vrot.slane %v378_v56, 4  ;;  %v426_v4 = vmax.bf16 %v16497_v46, %v425_v58  ;;  %v1457_v51 = vld [vmem:[#allocation5 + $0x20] sm:$0xff]  ;;  %p16849_p2 = scmp.ne.s32.totalorder %s14494_s2, %s16848_s23  ;;  %p16854_p4 = scmp.lt.s32.totalorder %s16848_s23, %s16848_s23 }
  0xb1   :  { %v392_v3 = vrot.slane %v391_v57, 4  ;;  %v439_v5 = vmax.bf16 %v16499_v47, %v438_v59  ;;  %v354_v6 = vmax.f32 %v352_v52, %v353_v61  ;;  %v402_v8 = vunpack.i.l.bf16 %v401_v63  ;;  %v1459_v61 = vld [vmem:[#allocation5 + $0x30] sm:$0xff] }
  0xb2   :  { %v367_v7 = vmax.f32 %v365_v53, %v366_v62  ;;  %v403_v9 = vunpack.i.h.bf16 %v401_v63  ;;  %v380_v10 = vmax.f32 %v378_v56, %v379_v2  ;;  %v415_v12 = vunpack.i.l.bf16 %v414_v0  ;;  %v1454_v56 = vld [vmem:[#allocation5 + $0x8] sm:$0xff]  ;;  %v1460_v2 = vld [vmem:[#allocation5 + $0x38] sm:$0xff]  ;;  %p16855_p5 = por %p16854_p4, %p16853_p3 }
  0xb3   :  { %v393_v11 = vmax.f32 %v391_v57, %v392_v3  ;;  %v416_v13 = vunpack.i.h.bf16 %v414_v0  ;;  %v355_v14 = vrot.slane %v354_v6, 2  ;;  %v427_v17 = vmax.bf16 %v16503_v60, %v426_v4  ;;  %v1458_v57 = vld [vmem:[#allocation5 + $0x28] sm:$0xff]  ;;  %v1455_v60 = vld [vmem:[#allocation5 + $0x10] sm:$0xff] }
  0xb4   :  { %v368_v15 = vrot.slane %v367_v7, 2  ;;  %v404_v16 = vmax.f32 %v402_v8, %v403_v9  ;;  %v381_v18 = vrot.slane %v380_v10, 2  ;;  %v440_v21 = vmax.bf16 %v16505_v1, %v439_v5  ;;  %v1456_v1 = vld [vmem:[#allocation5 + $0x18] sm:$0xff]  ;;  %v1465_v8 = vld [vmem:[#allocation5 + $0x60] sm:$0xff]  ;;  %p16856_p6 = pnand %p16855_p5, %p16849_p2 }
  0xb5   :  { %v394_v19 = vrot.slane %v393_v11, 2  ;;  %v417_v20 = vmax.f32 %v415_v12, %v416_v13  ;;  %v356_v22 = vmax.f32 %v354_v6, %v355_v14  ;;  %v428_v25 = vunpack.i.l.bf16 %v427_v17  ;;  %v1462_v12 = vld [vmem:[#allocation5 + $0x48] sm:$0xff] }
  0xb6   :  { %v369_v23 = vmax.f32 %v367_v7, %v368_v15  ;;  %v405_v24 = vrot.slane %v404_v16, 4  ;;  %v382_v26 = vmax.f32 %v380_v10, %v381_v18  ;;  %v429_v29 = vunpack.i.h.bf16 %v427_v17  ;;  %v1461_v7 = vld [vmem:[#allocation5 + $0x40] sm:$0xff]  ;;  %v1466_v13 = vld [vmem:[#allocation5 + $0x68] sm:$0xff] }
  0xb7   :  { %v395_v27 = vmax.f32 %v393_v11, %v394_v19  ;;  %v418_v28 = vrot.slane %v417_v20, 4  ;;  %v357_v30 = vrot.slane %v356_v22, 1  ;;  %v441_v33 = vunpack.i.l.bf16 %v440_v21 }
  0xb8   :  { %v370_v31 = vrot.slane %v369_v23, 1  ;;  %v406_v32 = vmax.f32 %v404_v16, %v405_v24  ;;  %v383_v34 = vrot.slane %v382_v26, 1  ;;  %v430_v37 = vmax.f32 %v428_v25, %v429_v29 }
  0xb9   :  { %v396_v35 = vrot.slane %v395_v27, 1  ;;  %v419_v36 = vmax.f32 %v417_v20, %v418_v28  ;;  %v358_v38 = vmax.f32 %v356_v22, %v357_v30  ;;  %v442_v41 = vunpack.i.h.bf16 %v440_v21  ;;  %v17140_v21 = vld [vmem:[#allocation5 + $0x50] sm:$0xff] }
  0xba   :  { %v371_v39 = vmax.f32 %v369_v23, %v370_v31  ;;  %v407_v40 = vrot.slane %v406_v32, 2  ;;  %v384_v42 = vmax.f32 %v382_v26, %v383_v34  ;;  %v431_v45 = vrot.slane %v430_v37, 4  ;;  %v17142_v22 = vld [vmem:[#allocation5 + $0x70] sm:$0xff] }
  0xbb   :  { %v397_v43 = vmax.f32 %v395_v27, %v396_v35  ;;  %v420_v44 = vrot.slane %v419_v36, 2  ;;  %v359_v46 = vpack.i.bf16 %v358_v38, %v358_v38  ;;  %v443_v49 = vmax.f32 %v441_v33, %v442_v41 }
  0xbc   :  { %v372_v47 = vpack.i.bf16 %v371_v39, %v371_v39  ;;  %v408_v48 = vmax.f32 %v406_v32, %v407_v40  ;;  %v385_v52 = vpack.i.bf16 %v384_v42, %v384_v42  ;;  %v432_v55 = vmax.f32 %v430_v37, %v431_v45 }
  0xbd   :  { %v398_v53 = vpack.i.bf16 %v397_v43, %v397_v43  ;;  %v421_v54 = vmax.f32 %v419_v36, %v420_v44  ;;  %vm467_vm0 = vcmask 1041409   ;;  %v444_v59 = vrot.slane %v443_v49, 4 }
  0xbe   :  { %v409_v58 = vrot.slane %v408_v48, 1  ;;  %vm476_vm1 = vcmask 1041408   ;;  %v433_v63 = vrot.slane %v432_v55, 2  ;;  %v17132_v0 = vunpack.c.l.bf16 %v359_v46 }
  0xbf   :  { %v422_v62 = vrot.slane %v421_v54, 1  ;;  %v445_v4 = vmax.f32 %v443_v49, %v444_v59  ;;  %v17134_v5 = vunpack.c.l.bf16 %v372_v47  ;;  %v17136_v6 = vunpack.c.l.bf16 %v385_v52 }
  0xc0   :  { %v410_v3 = vmax.f32 %v408_v48, %v409_v58  ;;  %v434_v10 = vmax.f32 %v432_v55, %v433_v63  ;;  %v17138_v11 = vunpack.c.l.bf16 %v398_v53  ;;  %v14656_v14 = vcombine.low %v1453_v50, %v1457_v51 }
  0xc1   :  { %v423_v9 = vmax.f32 %v421_v54, %v422_v62  ;;  %v446_v16 = vrot.slane %v445_v4, 2  ;;  %v14657_v17 = vcombine.high %v1453_v50, %v1457_v51  ;;  %v14658_v18 = vcombine.low %v1454_v56, %v1458_v57 }
  0xc2   :  { %v411_v15 = vpack.i.bf16 %v410_v3, %v410_v3  ;;  %v435_v20 = vrot.slane %v434_v10, 1  ;;  %v14659_v23 = vcombine.high %v1454_v56, %v1458_v57  ;;  %v14660_v24 = vcombine.low %v1455_v60, %v1459_v61 }
  0xc3   :  { %v424_v19 = vpack.i.bf16 %v423_v9, %v423_v9  ;;  %v447_v25 = vmax.f32 %v445_v4, %v446_v16  ;;  %v14661_v27 = vcombine.high %v1455_v60, %v1459_v61  ;;  %v17146_v28 = vcombine.low %v1456_v1, %v1460_v2 }
  0xc4   :  { %v17144_v26 = vunpack.c.l.bf16 %v411_v15  ;;  %v436_v29 = vmax.f32 %v434_v10, %v435_v20  ;;  %v17150_v31 = vcombine.high %v1456_v1, %v1460_v2  ;;  %v17152_v32 = vcombine.low %v1461_v7, %v1465_v8 }
  0xc5   :  { %v17148_v30 = vunpack.c.l.bf16 %v424_v19  ;;  %v448_v33 = vrot.slane %v447_v25, 1  ;;  %v17157_v35 = vcombine.high %v1461_v7, %v1465_v8  ;;  %v17159_v36 = vcombine.low %v1462_v12, %v1466_v13 }
  0xc6   :  { %v468_v34 = vsel %vm467_vm0, %v17144_v26, %v17132_v0  ;;  %v437_v37 = vpack.i.bf16 %v436_v29, %v436_v29  ;;  %v17165_v40 = vcombine.high %v1462_v12, %v1466_v13  ;;  %v17170_v43 = vcombine.low %v17140_v21, %v17142_v22 }
  0xc7   :  { %v469_v38 = vsel %vm467_vm0, %v17148_v30, %v17134_v5  ;;  %v477_v39 = vsel %vm476_vm1, %v468_v34, 0.0  ;;  %v449_v41 = vmax.f32 %v447_v25, %v448_v33  ;;  %v1549_v44 = vunpack.i.l.bf16 %v14656_v14 }
  0xc8   :  { %v478_v42 = vsel %vm476_vm1, %v469_v38, 0.0  ;;  %v17172_v45 = vunpack.c.l.bf16 %v437_v37  ;;  %v1550_v47 = vunpack.i.h.bf16 %v14656_v14  ;;  %v1559_v48 = vunpack.i.l.bf16 %v14657_v17 }
  0xc9   :  { %v479_v46 = vadd.f32 %v478_v42, %v477_v39  ;;  %v450_v49 = vpack.i.bf16 %v449_v41, %v449_v41  ;;  %v1560_v50 = vunpack.i.h.bf16 %v14657_v17  ;;  %v1569_v51 = vunpack.i.l.bf16 %v14658_v18  ;;  %v1464_v39 = vld [vmem:[#allocation5 + $0x58] sm:$0xff] }
  0xca   :  { %v1570_v52 = vunpack.i.h.bf16 %v14658_v18  ;;  %v470_v53 = vsel %vm467_vm0, %v17172_v45, %v17136_v6  ;;  %v1551_v54 = vmax.f32 %v1549_v44, %v1550_v47  ;;  %v1579_v55 = vunpack.i.l.bf16 %v14659_v23  ;;  %v1468_v41 = vld [vmem:[#allocation5 + $0x78] sm:$0xff] }
  0xcb   :  { %v1580_v56 = vunpack.i.h.bf16 %v14659_v23  ;;  %v17177_v57 = vunpack.c.l.bf16 %v450_v49  ;;  %v480_v58 = vsel %vm476_vm1, %v470_v53, 0.0  ;;  %v1561_v59 = vmax.f32 %v1559_v48, %v1560_v50 }
  0xcc   :  { %v1571_v60 = vmax.f32 %v1569_v51, %v1570_v52  ;;  %v481_v61 = vadd.f32 %v480_v58, %v479_v46  ;;  %v1552_v62 = vrot.slane %v1551_v54, 4  ;;  %v1589_v1 = vunpack.i.l.bf16 %v14660_v24 }
  0xcd   :  { %v1581_v63 = vmax.f32 %v1579_v55, %v1580_v56  ;;  %v471_v2 = vsel %vm467_vm0, %v17177_v57, %v17138_v11  ;;  %v1562_v3 = vrot.slane %v1561_v59, 4  ;;  %v1590_v7 = vunpack.i.h.bf16 %v14660_v24 }
  0xce   :  { %v1572_v4 = vrot.slane %v1571_v60, 4  ;;  %v482_v8 = vsel %vm476_vm1, %v471_v2, 0.0  ;;  %v1553_v9 = vmax.f32 %v1551_v54, %v1552_v62  ;;  %v1599_v12 = vunpack.i.l.bf16 %v14661_v27 }
  0xcf   :  { %v1582_v10 = vrot.slane %v1581_v63, 4  ;;  %v483_v13 = vadd.f32 %v482_v8, %v481_v61  ;;  %v1563_v14 = vmax.f32 %v1561_v59, %v1562_v3  ;;  %v1591_v16 = vmax.f32 %v1589_v1, %v1590_v7 }
  0xd0   :  { %v1573_v15 = vmax.f32 %v1571_v60, %v1572_v4  ;;  %v1554_v17 = vrot.slane %v1553_v9, 2  ;;  %v1600_v19 = vunpack.i.h.bf16 %v14661_v27  ;;  %v1609_v20 = vunpack.i.l.bf16 %v17146_v28 }
  0xd1   :  { %v1583_v18 = vmax.f32 %v1581_v63, %v1582_v10  ;;  %484 = vadd.xlane.f32.xlu0 %v483_v13  ;;  %v1564_v23 = vrot.slane %v1563_v14, 2  ;;  %v1592_v29 = vrot.slane %v1591_v16, 4  ;;  %v1610_v24 = vunpack.i.h.bf16 %v17146_v28 }
  0xd2   :  { %v1574_v25 = vrot.slane %v1573_v15, 2  ;;  %v1555_v33 = vmax.f32 %v1553_v9, %v1554_v17  ;;  %v1601_v37 = vmax.f32 %v1599_v12, %v1600_v19  ;;  %v1619_v38 = vunpack.i.l.bf16 %v17150_v31 }
  0xd3   :  { %v1584_v34 = vrot.slane %v1583_v18, 2  ;;  %v1565_v42 = vmax.f32 %v1563_v14, %v1564_v23  ;;  %v1593_v46 = vmax.f32 %v1591_v16, %v1592_v29  ;;  %v1611_v47 = vmax.f32 %v1609_v20, %v1610_v24 }
  0xd4   :  { %v1575_v44 = vmax.f32 %v1573_v15, %v1574_v25  ;;  %v1556_v27 = vrot.slane %v1555_v33, 1  ;;  %v1602_v49 = vrot.slane %v1601_v37, 4  ;;  %v1620_v50 = vunpack.i.h.bf16 %v17150_v31 }
  0xd5   :  { %v1585_v48 = vmax.f32 %v1583_v18, %v1584_v34  ;;  %v1566_v51 = vrot.slane %v1565_v42, 1  ;;  %v1594_v53 = vrot.slane %v1593_v46, 2  ;;  %v1612_v28 = vrot.slane %v1611_v47, 4 }
  0xd6   :  { %v1576_v52 = vrot.slane %v1575_v44, 1  ;;  %v17188_v54 = vmax.f32 %v1555_v33, %v1556_v27  ;;  %v1603_v56 = vmax.f32 %v1601_v37, %v1602_v49  ;;  %v1621_v58 = vmax.f32 %v1619_v38, %v1620_v50 }
  0xd7   :  { %v1586_v55 = vrot.slane %v1585_v48, 1  ;;  %v14669_v59 = vcombine.high %v17140_v21, %v17142_v22  ;;  %v17192_v60 = vmax.f32 %v1565_v42, %v1566_v51  ;;  %v1595_v61 = vmax.f32 %v1593_v46, %v1594_v53 }
  0xd8   :  { %v1613_v62 = vmax.f32 %v1611_v47, %v1612_v28  ;;  %v17194_v63 = vcombine.low %v1464_v39, %v1468_v41  ;;  %v17196_v1 = vcombine.high %v1464_v39, %v1468_v41  ;;  %v1604_v31 = vrot.slane %v1603_v56, 2 }
  0xd9   :  { %v1622_v2 = vrot.slane %v1621_v58, 4  ;;  %v1558_v3 = vpack.i.bf16 %v17188_v54, %v17188_v54  ;;  %v17200_v4 = vmax.f32 %v1575_v44, %v1576_v52  ;;  %v1596_v7 = vrot.slane %v1595_v61, 1 }
  0xda   :  { %v1614_v8 = vrot.slane %v1613_v62, 2  ;;  %v17202_v9 = vmax.f32 %v1585_v48, %v1586_v55  ;;  %v1605_v21 = vmax.f32 %v1603_v56, %v1604_v31  ;;  %v1629_v10 = vunpack.i.l.bf16 %v17152_v32 }
  0xdb   :  { %v1623_v22 = vmax.f32 %v1621_v58, %v1622_v2  ;;  %v1568_v12 = vpack.i.bf16 %v17192_v60, %v17192_v60  ;;  %v1630_v14 = vunpack.i.h.bf16 %v17152_v32  ;;  %v1639_v15 = vunpack.i.l.bf16 %v17157_v35 }
  0xdc   :  { %v1615_v13 = vmax.f32 %v1613_v62, %v1614_v8  ;;  %v17209_v16 = vmax.f32 %v1595_v61, %v1596_v7  ;;  %v1640_v18 = vunpack.i.h.bf16 %v17157_v35  ;;  %v1649_v19 = vunpack.i.l.bf16 %v17159_v36 }
  0xdd   :  { %v1624_v17 = vrot.slane %v1623_v22, 2  ;;  %v1578_v20 = vpack.i.bf16 %v17200_v4, %v17200_v4  ;;  %v1606_v23 = vrot.slane %v1605_v21, 1  ;;  %v1631_v25 = vmax.f32 %v1629_v10, %v1630_v14 }
  0xde   :  { %v1650_v29 = vunpack.i.h.bf16 %v17159_v36  ;;  %v1616_v24 = vrot.slane %v1615_v13, 1  ;;  %v1641_v34 = vmax.f32 %v1639_v15, %v1640_v18  ;;  %v1659_v32 = vunpack.i.l.bf16 %v17165_v40 }
  0xdf   :  { %v1625_v33 = vmax.f32 %v1623_v22, %v1624_v17  ;;  %v1588_v37 = vpack.i.bf16 %v17202_v9, %v17202_v9  ;;  %v1632_v38 = vrot.slane %v1631_v25, 4  ;;  %v1660_v35 = vunpack.i.h.bf16 %v17165_v40 }
  0xe0   :  { %v1651_v39 = vmax.f32 %v1649_v19, %v1650_v29  ;;  %v1598_v41 = vpack.i.bf16 %v17209_v16, %v17209_v16  ;;  %v1642_v44 = vrot.slane %v1641_v34, 4  ;;  %v1669_v46 = vunpack.i.l.bf16 %v17170_v43 }
  0xe1   :  { %v1626_v42 = vrot.slane %v1625_v33, 1  ;;  %v17223_v36 = vmax.f32 %v1605_v21, %v1606_v23  ;;  %v1633_v47 = vmax.f32 %v1631_v25, %v1632_v38  ;;  %v1661_v48 = vmax.f32 %v1659_v32, %v1660_v35 }
  0xe2   :  { %v1652_v27 = vrot.slane %v1651_v39, 4  ;;  %v17225_v49 = vmax.f32 %v1615_v13, %v1616_v24  ;;  %v1643_v50 = vmax.f32 %v1641_v34, %v1642_v44  ;;  %v1670_v51 = vunpack.i.h.bf16 %v17170_v43 }
  0xe3   :  { %v1679_v52 = vunpack.i.l.bf16 %v14669_v59  ;;  %v1634_v53 = vrot.slane %v1633_v47, 2  ;;  %v1662_v28 = vrot.slane %v1661_v48, 4  ;;  %v1680_v55 = vunpack.i.h.bf16 %v14669_v59 }
  0xe4   :  { %v1653_v40 = vmax.f32 %v1651_v39, %v1652_v27  ;;  %v17228_v56 = vmax.f32 %v1625_v33, %v1626_v42  ;;  %v1644_v58 = vrot.slane %v1643_v50, 2  ;;  %v1671_v61 = vmax.f32 %v1669_v46, %v1670_v51 }
  0xe5   :  { %v1689_v62 = vunpack.i.l.bf16 %v17194_v63  ;;  %v1635_v31 = vmax.f32 %v1633_v47, %v1634_v53  ;;  %v1663_v7 = vmax.f32 %v1661_v48, %v1662_v28  ;;  %v1681_v8 = vmax.f32 %v1679_v52, %v1680_v55 }
  0xe6   :  { %v1654_v2 = vrot.slane %v1653_v40, 2  ;;  %v1645_v21 = vmax.f32 %v1643_v50, %v1644_v58  ;;  %v1672_v22 = vrot.slane %v1671_v61, 4  ;;  %v1690_v10 = vunpack.i.h.bf16 %v17194_v63 }
  0xe7   :  { %v1699_v43 = vunpack.i.l.bf16 %v17196_v1  ;;  %v1636_v13 = vrot.slane %v1635_v31, 1  ;;  %v1664_v15 = vrot.slane %v1663_v7, 2  ;;  %v1682_v59 = vrot.slane %v1681_v8, 4 }
  0xe8   :  { %v1655_v14 = vmax.f32 %v1653_v40, %v1654_v2  ;;  %v1646_v17 = vrot.slane %v1645_v21, 1  ;;  %v1673_v18 = vmax.f32 %v1671_v61, %v1672_v22  ;;  %v1691_v19 = vmax.f32 %v1689_v62, %v1690_v10 }
  0xe9   :  { %v1700_v23 = vunpack.i.h.bf16 %v17196_v1  ;;  %v1637_v25 = vmax.f32 %v1635_v31, %v1636_v13  ;;  %v1665_v24 = vmax.f32 %v1663_v7, %v1664_v15  ;;  %v1683_v33 = vmax.f32 %v1681_v8, %v1682_v59 }
  0xea   :  { %v1656_v29 = vrot.slane %v1655_v14, 1  ;;  %v1647_v34 = vmax.f32 %v1645_v21, %v1646_v17  ;;  %v1674_v32 = vrot.slane %v1673_v18, 2  ;;  %v1692_v38 = vrot.slane %v1691_v19, 4 }
  0xeb   :  { %v1701_v39 = vmax.f32 %v1699_v43, %v1700_v23  ;;  %v1608_v63 = vpack.i.bf16 %v17223_v36, %v17223_v36  ;;  %v1666_v42 = vrot.slane %v1665_v24, 1  ;;  %v1684_v44 = vrot.slane %v1683_v33, 2 }
  0xec   :  { %v1657_v35 = vmax.f32 %v1655_v14, %v1656_v29  ;;  %v1618_v46 = vpack.i.bf16 %v17225_v49, %v17225_v49  ;;  %v1675_v47 = vmax.f32 %v1673_v18, %v1674_v32  ;;  %v1693_v27 = vmax.f32 %v1691_v19, %v1692_v38 }
  0xed   :  { %v1702_v1 = vrot.slane %v1701_v39, 4  ;;  %v1628_v48 = vpack.i.bf16 %v17228_v56, %v17228_v56  ;;  %v1638_v50 = vpack.i.bf16 %v1637_v25, %v1637_v25  ;;  %v1667_v51 = vmax.f32 %v1665_v24, %v1666_v42 }
  0xee   :  { %v1685_v52 = vmax.f32 %v1683_v33, %v1684_v44  ;;  %v1648_v53 = vpack.i.bf16 %v1647_v34, %v1647_v34  ;;  %v1676_v40 = vrot.slane %v1675_v47, 1  ;;  %v1694_v28 = vrot.slane %v1693_v27, 2 }
  0xef   :  { %v1703_v55 = vmax.f32 %v1701_v39, %v1702_v1  ;;  %v1658_v36 = vpack.i.bf16 %v1657_v35, %v1657_v35  ;;  %v1668_v58 = vpack.i.bf16 %v1667_v51, %v1667_v51  ;;  %v17243_v49 = vunpack.c.l.bf16 %v1558_v3 }
  0xf0   :  { %v1686_v61 = vrot.slane %v1685_v52, 1  ;;  %v1677_v62 = vmax.f32 %v1675_v47, %v1676_v40  ;;  %v1695_v31 = vmax.f32 %v1693_v27, %v1694_v28  ;;  %v17248_v56 = vunpack.c.l.bf16 %v1568_v12 }
  0xf1   :  { %v1704_v2 = vrot.slane %v1703_v55, 2  ;;  %v17253_v8 = vunpack.c.l.bf16 %v1578_v20  ;;  %v17258_v54 = vunpack.c.l.bf16 %v1588_v37  ;;  %v17263_v3 = vunpack.c.l.bf16 %v1598_v41 }
  0xf2   :  { %v1687_v7 = vmax.f32 %v1685_v52, %v1686_v61  ;;  %v1678_v21 = vpack.i.bf16 %v1677_v62, %v1677_v62  ;;  %v1696_v60 = vrot.slane %v1695_v31, 1  ;;  %v17265_v22 = vunpack.c.l.bf16 %v1638_v50  ;;  %v16511_v61 = vld [vmem:[#allocation8 + $0x18] ss:$12 sps:$4 sm:$0xff]   ;;  %v16512_v62 = vld [vmem:[#allocation8 + $0x34] ss:$12 sps:$4 sm:$0xff]  }
  0xf3   :  { %v1705_v12 = vmax.f32 %v1703_v55, %v1704_v2  ;;  %v17267_v43 = vunpack.c.l.bf16 %v1648_v53  ;;  %v17269_v4 = vunpack.c.l.bf16 %v1658_v36  ;;  %v17271_v20 = vunpack.c.l.bf16 %v1668_v58  ;;  %v16506_v55 = vld [vmem:[#allocation8 + $0x4] ss:$12 sps:$4 sm:$0xff]   ;;  %v16508_v36 = vld [vmem:[#allocation8] ss:$12 sps:$4 sm:$0xff]   ;;  %v16509_v58 = vld [vmem:[#allocation8 + $0x1c] ss:$12 sps:$4 sm:$0xff]  }
  0xf4   :  { %v1688_v10 = vpack.i.bf16 %v1687_v7, %v1687_v7  ;;  %v1697_v9 = vmax.f32 %v1695_v31, %v1696_v60  ;;  %v17273_v13 = vunpack.c.l.bf16 %v1678_v21  ;;  %v1741_v16 = vsel %vm467_vm0, %v17265_v22, %v17243_v49  ;;  %1249 = vmatprep.subr.bf16.mxu0 %v16506_v55  ;;  %v16532_v31 = vld [vmem:[#allocation8 + $0xc8] ss:$12 sps:$4 sm:$0xff]   ;;  %v16514_v7 = vld [vmem:[#allocation8 + $0x30] ss:$12 sps:$4 sm:$0xff]   ;;  %v16515_v21 = vld [vmem:[#allocation8 + $0x4c] ss:$12 sps:$4 sm:$0xff]  }
  0xf5   :  { %v1706_v37 = vrot.slane %v1705_v12, 1  ;;  %v17278_v41 = vunpack.c.l.bf16 %v1608_v63  ;;  %v1742_v15 = vsel %vm467_vm0, %v17267_v43, %v17248_v56  ;;  %v1743_v59 = vsel %vm467_vm0, %v17269_v4, %v17253_v8  ;;  %1250 = vmatpush1.bf16.msra.mxu0 %v16508_v36  ;;  %v16534_v2 = vld [vmem:[#allocation8 + $0x8] ss:$12 sps:$4 sm:$0xff]   ;;  %16208 = vmatprep.subr.bf16.mxu1 %v16532_v31 }
  0xf6   :  { %v17280_v14 = vunpack.c.l.bf16 %v1688_v10  ;;  %v1698_v17 = vpack.i.bf16 %v1697_v9, %v1697_v9  ;;  %v1744_v19 = vsel %vm467_vm0, %v17271_v20, %v17258_v54  ;;  %v1757_v23 = vsel %vm476_vm1, %v1741_v16, 0.0  ;;  %1251 = vmatprep.subr.bf16.mxu0 %v16509_v58  ;;  %16209 = vmatpush3.bf16.msra.mxu1 %v16534_v2  ;;  %v16517_v60 = vld [vmem:[#allocation8 + $0x48] ss:$12 sps:$4 sm:$0xff]   ;;  %v16520_v10 = vld [vmem:[#allocation8 + $0x60] ss:$12 sps:$4 sm:$0xff]  }
  0xf7   :  { %v1707_v18 = vmax.f32 %v1705_v12, %v1706_v37  ;;  %v17292_v25 = vunpack.c.l.bf16 %v1618_v46  ;;  %v1758_v29 = vsel %vm476_vm1, %v1742_v15, 0.0  ;;  %v1760_v24 = vsel %vm476_vm1, %v1743_v59, 0.0  ;;  %v16518_v12 = vld [vmem:[#allocation8 + $0x64] ss:$12 sps:$4 sm:$0xff]   ;;  %v16521_v9 = vld [vmem:[#allocation8 + $0x7c] ss:$12 sps:$4 sm:$0xff]  }
  0xf8   :  { %v17296_v34 = vunpack.c.l.bf16 %v1698_v17  ;;  %v1745_v32 = vsel %vm467_vm0, %v17273_v13, %v17263_v3  ;;  %v1759_v38 = vadd.f32 %v1758_v29, %v1757_v23  ;;  %v1762_v39 = vsel %vm476_vm1, %v1744_v19, 0.0  ;;  %v16523_v37 = vld [vmem:[#allocation8 + $0x78] ss:$12 sps:$4 sm:$0xff]   ;;  %v16524_v16 = vld [vmem:[#allocation8 + $0x94] ss:$12 sps:$4 sm:$0xff]  }
  0xf9   :  { %v1708_v33 = vpack.i.bf16 %v1707_v18, %v1707_v18  ;;  %v17302_v63 = vunpack.c.l.bf16 %v1628_v48  ;;  %v1746_v42 = vsel %vm467_vm0, %v17280_v14, %v17278_v41  ;;  %v1764_v46 = vsel %vm476_vm1, %v1745_v32, 0.0  ;;  %1252 = vmatpush1.bf16.msra.mxu0 %v16511_v61  ;;  %v16526_v15 = vld [vmem:[#allocation8 + $0x90] ss:$12 sps:$4 sm:$0xff]   ;;  %v16527_v59 = vld [vmem:[#allocation8 + $0xac] ss:$12 sps:$4 sm:$0xff]  }
  0xfa   :  { %v1761_v44 = vadd.f32 %v1760_v24, %v1759_v38  ;;  %v1747_v47 = vsel %vm467_vm0, %v17296_v34, %v17292_v25  ;;  %v1766_v1 = vsel %vm476_vm1, %v1746_v42, 0.0  ;;  %1253 = vmatprep.subr.bf16.mxu0 %v16512_v62  ;;  %v16529_v17 = vld [vmem:[#allocation8 + $0xa8] ss:$12 sps:$4 sm:$0xff]   ;;  %v16530_v18 = vld [vmem:[#allocation8 + $0xc4] ss:$12 sps:$4 sm:$0xff]  }
  0xfb   :  { %v17304_v35 = vunpack.c.l.bf16 %v1708_v33  ;;  %v1768_v51 = vsel %vm476_vm1, %v1747_v47, 0.0  ;;  %v16533_v19 = vld [vmem:[#allocation8 + $0xc0] ss:$12 sps:$4 sm:$0xff]   ;;  %v16535_v2 = vld [vmem:[#allocation8 + $0xdc] ss:$12 sps:$4 sm:$0xff]  }
  0xfc   :  { %v1763_v27 = vadd.f32 %v1762_v39, %v1761_v44 }
  0xfd   :  { %v1748_v48 = vsel %vm467_vm0, %v17304_v35, %v17302_v63  ;;  %1254 = vmatpush1.bf16.msra.mxu0 %v16514_v7  ;;  %v16537_v7 = vld [vmem:[#allocation8 + $0xe0] ss:$12 sps:$4 sm:$0xff]  }
  0xfe   :  { %v1765_v50 = vadd.f32 %v1764_v46, %v1763_v27  ;;  %v1770_v53 = vsel %vm476_vm1, %v1748_v48, 0.0  ;;  %1255 = vmatprep.subr.bf16.mxu0 %v16515_v21  ;;  %v16538_v21 = vld [vmem:[#allocation8 + $0xd8] ss:$12 sps:$4 sm:$0xff]   ;;  %16210 = vmatprep.subr.bf16.mxu1 %v16537_v7 }
 0x100   :  { %v1767_v52 = vadd.f32 %v1766_v1, %v1765_v50 }
 0x101   :  { %1256 = vmatpush1.bf16.msra.mxu0 %v16517_v60  ;;  %v16539_v60 = vld [vmem:[#allocation8 + $0x20] ss:$12 sps:$4 sm:$0xff]  }
 0x102   :  { %v1769_v40 = vadd.f32 %v1768_v51, %v1767_v52  ;;  %1257 = vmatprep.subr.bf16.mxu0 %v16518_v12  ;;  %v16540_v12 = vld [vmem:[#allocation8 + $0xf4] ss:$12 sps:$4 sm:$0xff]   ;;  %16211 = vmatpush3.bf16.msra.mxu1 %v16539_v60 }
 0x104   :  { %v1771_v28 = vadd.f32 %v1770_v53, %v1769_v40 }
 0x105   :  { %1258 = vmatpush1.bf16.msra.mxu0 %v16520_v10  ;;  %v16542_v10 = vld [vmem:[#allocation8 + $0xf8] ss:$12 sps:$4 sm:$0xff]  }
 0x106   :  { %1772 = vadd.xlane.f32.xlu1 %v1771_v28  ;;  %1259 = vmatprep.subr.bf16.mxu0 %v16521_v9  ;;  %v16543_v9 = vld [vmem:[#allocation8 + $0xf0] ss:$12 sps:$4 sm:$0xff]  }
 0x107   :  { %16212 = vmatprep.subr.bf16.mxu1 %v16542_v10 }
 0x109   :  { %1260 = vmatpush1.bf16.msra.mxu0 %v16523_v37  ;;  %v16544_v37 = vld [vmem:[#allocation8 + $0x38] ss:$12 sps:$4 sm:$0xff]  }
 0x10a   :  { %1261 = vmatprep.subr.bf16.mxu0 %v16524_v16  ;;  %v16545_v16 = vld [vmem:[#allocation8 + $0x10c] ss:$12 sps:$4 sm:$0xff]   ;;  %16213 = vmatpush3.bf16.msra.mxu1 %v16544_v37 }
 0x10d   :  { %1262 = vmatpush1.bf16.msra.mxu0 %v16526_v15  ;;  %v16547_v15 = vld [vmem:[#allocation8 + $0x110] ss:$12 sps:$4 sm:$0xff]  }
 0x10e   :  { %1263 = vmatprep.subr.bf16.mxu0 %v16527_v59  ;;  %16214 = vmatprep.subr.bf16.mxu1 %v16547_v15 }
 0x111   :  { %1264 = vmatpush1.bf16.msra.mxu0 %v16529_v17 }
 0x112   :  { %1265 = vmatprep.subr.bf16.mxu0 %v16530_v18 }
 0x115   :  { %1266 = vmatpush1.bf16.msra.mxu0 %v16533_v19 }
 0x116   :  { %1267 = vmatprep.subr.bf16.mxu0 %v16535_v2 }
 0x119   :  { %1268 = vmatpush1.bf16.msra.mxu0 %v16538_v21 }
 0x11a   :  { %1269 = vmatprep.subr.bf16.mxu0 %v16540_v12 }
 0x11d   :  { %1270 = vmatpush1.bf16.msra.mxu0 %v16543_v9 }
 0x11e   :  { %1271 = vmatprep.subr.bf16.mxu0 %v16545_v16 }
 0x15e   :  { %v485_v23 = vpop.xlane.xlu0 %484 }
 0x15f   :  { %v487_v29 = vmul.f32 0.001953125, %v485_v23 }
 0x161   :  { %v489_v24 = vrot.slane %v487_v29, 1  ;;  %v17320_v33 = vsub.f32 %v17132_v0, %v487_v29  ;;  %v17323_v32 = vsub.f32 %v17134_v5, %v487_v29  ;;  %v17326_v38 = vsub.f32 %v17136_v6, %v487_v29 }
 0x162   :  { %v17341_v0 = vsub.f32 %v17138_v11, %v487_v29 }
 0x163   :  { %v17329_v39 = vsub.f32 %v17144_v26, %v489_v24  ;;  %v17332_v42 = vsub.f32 %v17148_v30, %v489_v24  ;;  %v17335_v44 = vsub.f32 %v17172_v45, %v489_v24  ;;  %v17338_v46 = vsub.f32 %v17177_v57, %v489_v24 }
 0x164   :  { %v500_v45 = vmul.f32 %v17320_v33, %v17320_v33  ;;  %v501_v57 = vmul.f32 %v17323_v32, %v17323_v32  ;;  %v502_v11 = vmul.f32 %v17326_v38, %v17326_v38  ;;  %v503_v50 = vmul.f32 %v17341_v0, %v17341_v0 }
 0x165   :  { %v504_v5 = vmul.f32 %v17329_v39, %v17329_v39  ;;  %v505_v6 = vmul.f32 %v17332_v42, %v17332_v42  ;;  %v506_v26 = vmul.f32 %v17335_v44, %v17335_v44  ;;  %v507_v30 = vmul.f32 %v17338_v46, %v17338_v46 }
 0x167   :  { %v516_v47 = vrot.slane %v504_v5, 7  ;;  %v518_v27 = vrot.slane %v505_v6, 7  ;;  %v520_v1 = vrot.slane %v506_v26, 7  ;;  %v522_v48 = vrot.slane %v507_v30, 7 }
 0x169   :  { %v517_v51 = vsel %vm467_vm0, %v516_v47, %v500_v45  ;;  %v519_v52 = vsel %vm467_vm0, %v518_v27, %v501_v57  ;;  %v521_v53 = vsel %vm467_vm0, %v520_v1, %v502_v11  ;;  %v523_v55 = vsel %vm467_vm0, %v522_v48, %v503_v50 }
 0x16a   :  { %v528_v40 = vsel %vm476_vm1, %v517_v51, 0.0  ;;  %v529_v28 = vsel %vm476_vm1, %v519_v52, 0.0  ;;  %v531_v58 = vsel %vm476_vm1, %v521_v53, 0.0  ;;  %v533_v62 = vsel %vm476_vm1, %v523_v55, 0.0 }
 0x16b   :  { %v530_v36 = vadd.f32 %v529_v28, %v528_v40 }
 0x16d   :  { %v532_v61 = vadd.f32 %v531_v58, %v530_v36 }
 0x16f   :  { %v534_v31 = vadd.f32 %v533_v62, %v532_v61 }
 0x171   :  { %535 = vadd.xlane.f32.xlu0 %v534_v31 }
 0x193   :  { %v1773_v59 = vpop.xlane.xlu1 %1772 }
 0x194   :  { %v1775_v17 = vmul.f32 0.0009765625, %v1773_v59 }
 0x196   :  { %v1777_v18 = vrot.slane %v1775_v17, 1  ;;  %v17368_v19 = vsub.f32 %v17243_v49, %v1775_v17  ;;  %v17371_v23 = vsub.f32 %v17248_v56, %v1775_v17  ;;  %v17374_v29 = vsub.f32 %v17253_v8, %v1775_v17 }
 0x197   :  { %v17386_v26 = vsub.f32 %v17258_v54, %v1775_v17  ;;  %v17430_v11 = vsub.f32 %v17292_v25, %v1775_v17  ;;  %v17437_v53 = vsub.f32 %v17302_v63, %v1775_v17 }
 0x198   :  { %19451 = vst [vmem:[#allocation28_spill] sm:$0xff] %v17368_v19  ;;  %19452 = vst [vmem:[#allocation29_spill] sm:$0xff] %v17374_v29  ;;  %v17377_v24 = vsub.f32 %v17265_v22, %v1777_v18  ;;  %v17380_v5 = vsub.f32 %v17267_v43, %v1777_v18  ;;  %v17383_v6 = vsub.f32 %v17269_v4, %v1777_v18 }
 0x199   :  { %19455 = vst [vmem:[#allocation32_spill] sm:$0xff] %v17386_v26  ;;  %v17389_v49 = vsub.f32 %v17271_v20, %v1777_v18  ;;  %v17392_v56 = vsub.f32 %v17273_v13, %v1777_v18  ;;  %v17395_v8 = vsub.f32 %v17280_v14, %v1777_v18  ;;  %v17398_v22 = vsub.f32 %v17263_v3, %v1775_v17 }
 0x19a   :  { %19453 = vst [vmem:[#allocation30_spill] sm:$0xff] %v17377_v24  ;;  %19454 = vst [vmem:[#allocation31_spill] sm:$0xff] %v17383_v6  ;;  %v17401_v43 = vsub.f32 %v17278_v41, %v1775_v17  ;;  %v17404_v4 = vsub.f32 %v17296_v34, %v1777_v18  ;;  %v17407_v54 = vsub.f32 %v17304_v35, %v1777_v18 }
 0x19b   :  { %19456 = vst [vmem:[#allocation33_spill] sm:$0xff] %v17389_v49  ;;  %19457 = vst [vmem:[#allocation34_spill] sm:$0xff] %v17392_v56  ;;  %v1796_v20 = vmul.f32 %v17368_v19, %v17368_v19  ;;  %v1797_v13 = vmul.f32 %v17371_v23, %v17371_v23  ;;  %v1798_v14 = vmul.f32 %v17374_v29, %v17374_v29  ;;  %v17608_v29 = vld [vmem:[#allocation10 + $0x340] sm:$0xff] }
 0x19c   :  { %19458 = vst [vmem:[#allocation35_spill] sm:$0xff] %v17395_v8  ;;  %19459 = vst [vmem:[#allocation36_spill] sm:$0xff] %v17398_v22  ;;  %v1804_v3 = vmul.f32 %v17377_v24, %v17377_v24  ;;  %v1805_v41 = vmul.f32 %v17380_v5, %v17380_v5  ;;  %v1806_v34 = vmul.f32 %v17383_v6, %v17383_v6 }
 0x19d   :  { %19460 = vst [vmem:[#allocation37_spill] sm:$0xff] %v17401_v43  ;;  %19461 = vst [vmem:[#allocation38_spill] sm:$0xff] %v17404_v4  ;;  %v1799_v35 = vmul.f32 %v17386_v26, %v17386_v26  ;;  %v1807_v30 = vmul.f32 %v17389_v49, %v17389_v49  ;;  %v1808_v45 = vmul.f32 %v17392_v56, %v17392_v56  ;;  %v5822_v56 = vld [vmem:[#allocation7 + $0x10] sm:$0xff]  ;;  %v17617_v49 = vld [vmem:[#allocation10 + $0x148] sm:$0xff] }
 0x19e   :  { %19462 = vst [vmem:[#allocation39_spill] sm:$0xff] %v17407_v54  ;;  %v1809_v57 = vmul.f32 %v17395_v8, %v17395_v8  ;;  %19463 = vst [vmem:[#allocation40_spill] sm:$0xff] %v17430_v11  ;;  %v1828_v47 = vrot.slane %v1804_v3, 7  ;;  %v1830_v27 = vrot.slane %v1805_v41, 7  ;;  %v1832_v1 = vrot.slane %v1806_v34, 7  ;;  %v17610_v8 = vld [vmem:[#allocation10 + $0x360] sm:$0xff] }
 0x19f   :  { %v1800_v48 = vmul.f32 %v17398_v22, %v17398_v22  ;;  %v1810_v50 = vmul.f32 %v17404_v4, %v17404_v4  ;;  %v1834_v51 = vrot.slane %v1807_v30, 7  ;;  %v1836_v52 = vrot.slane %v1808_v45, 7  ;;  %19464 = vst [vmem:[#allocation41_spill] sm:$0xff] %v17437_v53  ;;  %v16548_v30 = vld [vmem:[#allocation8 + $0x108] ss:$12 sps:$4 sm:$0xff]   ;;  %v17581_v4 = vld [vmem:[#allocation10 + $0x320] sm:$0xff] }
 0x1a0   :  { %v1829_v40 = vsel %vm467_vm0, %v1828_v47, %v1796_v20  ;;  %v1831_v28 = vsel %vm467_vm0, %v1830_v27, %v1797_v13  ;;  %v1833_v25 = vsel %vm467_vm0, %v1832_v1, %v1798_v14  ;;  %v1801_v55 = vmul.f32 %v17401_v43, %v17401_v43  ;;  %v16549_v45 = vld [vmem:[#allocation8 + $0x50] ss:$12 sps:$4 sm:$0xff]   ;;  %1272 = vmatpush1.bf16.msra.mxu0 %v16548_v30  ;;  %v16552_v47 = vld [vmem:[#allocation8 + $0x128] ss:$12 sps:$4 sm:$0xff]   ;;  %v16553_v27 = vld [vmem:[#allocation8 + $0x120] ss:$12 sps:$4 sm:$0xff]  }
 0x1a1   :  { %v1811_v36 = vmul.f32 %v17407_v54, %v17407_v54  ;;  %v1835_v58 = vsel %vm467_vm0, %v1834_v51, %v1799_v35  ;;  %v1838_v61 = vrot.slane %v1809_v57, 7  ;;  %v1852_v62 = vsel %vm476_vm1, %v1829_v40, 0.0  ;;  %16215 = vmatpush3.bf16.msra.mxu1 %v16549_v45  ;;  %v16550_v57 = vld [vmem:[#allocation8 + $0x124] ss:$12 sps:$4 sm:$0xff]   ;;  %v16554_v1 = vld [vmem:[#allocation8 + $0x68] ss:$12 sps:$4 sm:$0xff]  }
 0x1a2   :  { %v1853_v63 = vsel %vm476_vm1, %v1831_v28, 0.0  ;;  %v1855_v31 = vsel %vm476_vm1, %v1833_v25, 0.0  ;;  %v1802_v2 = vmul.f32 %v17430_v11, %v17430_v11  ;;  %v1837_v7 = vsel %vm467_vm0, %v1836_v52, %v1800_v48  ;;  %1273 = vmatprep.subr.bf16.mxu0 %v16550_v57  ;;  %16216 = vmatprep.subr.bf16.mxu1 %v16552_v47  ;;  %v16555_v48 = vld [vmem:[#allocation8 + $0x13c] ss:$12 sps:$4 sm:$0xff]   ;;  %v16558_v51 = vld [vmem:[#allocation8 + $0x138] ss:$12 sps:$4 sm:$0xff]  }
 0x1a3   :  { %v1840_v21 = vrot.slane %v1810_v50, 7  ;;  %v1854_v60 = vadd.f32 %v1853_v63, %v1852_v62  ;;  %v1857_v12 = vsel %vm476_vm1, %v1835_v58, 0.0  ;;  %v1803_v10 = vmul.f32 %v17437_v53, %v17437_v53  ;;  %v16557_v50 = vld [vmem:[#allocation8 + $0x140] ss:$12 sps:$4 sm:$0xff]   ;;  %v16562_v28 = vld [vmem:[#allocation8 + $0x158] ss:$12 sps:$4 sm:$0xff]  }
 0x1a4   :  { %v1839_v9 = vsel %vm467_vm0, %v1838_v61, %v1801_v55  ;;  %v1842_v37 = vrot.slane %v1811_v36, 7  ;;  %v1859_v15 = vsel %vm476_vm1, %v1837_v7, 0.0  ;;  %1274 = vmatpush1.bf16.msra.mxu0 %v16553_v27  ;;  %v16559_v52 = vld [vmem:[#allocation8 + $0x80] ss:$12 sps:$4 sm:$0xff]   ;;  %v16563_v25 = vld [vmem:[#allocation8 + $0x150] ss:$12 sps:$4 sm:$0xff]   ;;  %v5870_v19 = vcombine.high %v5822_v56, %v5822_v56 }
 0x1a5   :  { %v1856_v16 = vadd.f32 %v1855_v31, %v1854_v60  ;;  %v1841_v59 = vsel %vm467_vm0, %v1840_v21, %v1802_v2  ;;  %v1861_v18 = vsel %vm476_vm1, %v1839_v9, 0.0  ;;  %16217 = vmatpush3.bf16.msra.mxu1 %v16554_v1  ;;  %v16560_v40 = vld [vmem:[#allocation8 + $0x154] ss:$12 sps:$4 sm:$0xff]   ;;  %1275 = vmatprep.subr.bf16.mxu0 %v16555_v48  ;;  %v16564_v55 = vld [vmem:[#allocation8 + $0x98] ss:$12 sps:$4 sm:$0xff]   ;;  %v17555_v48 = vld [vmem:[#allocation10 + $0x88] sm:$0xff] }
 0x1a6   :  { %v1843_v20 = vsel %vm467_vm0, %v1842_v37, %v1803_v10  ;;  %v1863_v14 = vsel %vm476_vm1, %v1841_v59, 0.0  ;;  %16218 = vmatprep.subr.bf16.mxu1 %v16557_v50  ;;  %v16565_v36 = vld [vmem:[#allocation8 + $0x16c] ss:$12 sps:$4 sm:$0xff]   ;;  %v16567_v58 = vld [vmem:[#allocation8 + $0x170] ss:$12 sps:$4 sm:$0xff]   ;;  %v17463_v2 = vld [vmem:[#allocation10] sm:$0xff] }
 0x1a7   :  { %v1858_v17 = vadd.f32 %v1857_v12, %v1856_v16  ;;  %v1865_v41 = vsel %vm476_vm1, %v1843_v20, 0.0  ;;  %v16568_v61 = vld [vmem:[#allocation8 + $0x168] ss:$12 sps:$4 sm:$0xff]   ;;  %v16569_v62 = vld [vmem:[#allocation8 + $0xb0] ss:$12 sps:$4 sm:$0xff]   ;;  %v17465_v7 = vld [vmem:[#allocation10 + $0x20] sm:$0xff] }
 0x1a8   :  { %1276 = vmatpush1.bf16.msra.mxu0 %v16558_v51  ;;  %v16572_v63 = vld [vmem:[#allocation8 + $0x184] ss:$12 sps:$4 sm:$0xff]   ;;  %v16573_v31 = vld [vmem:[#allocation8 + $0x248] ss:$12 sps:$4 sm:$0xff]   ;;  %19479 = vst [vmem:[#allocation56_spill] sm:$0xff] %v17555_v48  ;;  %19486 = vst [vmem:[#allocation63_spill] sm:$0xff] %v17581_v4 }
 0x1a9   :  { %v1860_v13 = vadd.f32 %v1859_v15, %v1858_v17  ;;  %16219 = vmatpush3.bf16.msra.mxu1 %v16559_v52  ;;  %1277 = vmatprep.subr.bf16.mxu0 %v16560_v40  ;;  %v17467_v21 = vld [vmem:[#allocation10 + $0x40] sm:$0xff]  ;;  %v19322_v15 = vlaneseq  ;;  %v17514_v51 = vld [vmem:[#allocation10 + $0x8] sm:$0xff]  ;;  %19489 = vst [vmem:[#allocation66_spill] sm:$0xff] %v17608_v29  ;;  %19490 = vst [vmem:[#allocation67_spill] sm:$0xff] %v17610_v8 }
 0x1aa   :  { %16220 = vmatprep.subr.bf16.mxu1 %v16562_v28  ;;  %v17469_v60 = vld [vmem:[#allocation10 + $0x60] sm:$0xff]  ;;  %19471 = vst [vmem:[#allocation48_spill] sm:$0xff] %v17514_v51  ;;  %v17516_v52 = vld [vmem:[#allocation10 + $0x28] sm:$0xff]  ;;  %19491 = vst [vmem:[#allocation68_spill] sm:$0xff] %v17617_v49 }
 0x1ab   :  { %v1862_v3 = vadd.f32 %v1861_v18, %v1860_v13  ;;  %v17471_v12 = vld [vmem:[#allocation10 + $0x80] sm:$0xff]  ;;  %19472 = vst [vmem:[#allocation49_spill] sm:$0xff] %v17516_v52  ;;  %v17557_v50 = vld [vmem:[#allocation10 + $0xa8] sm:$0xff] }
 0x1ac   :  { %1278 = vmatpush1.bf16.msra.mxu0 %v16563_v25  ;;  %v17473_v10 = vld [vmem:[#allocation10 + $0xa0] sm:$0xff]  ;;  %19480 = vst [vmem:[#allocation57_spill] sm:$0xff] %v17557_v50  ;;  %v17592_v22 = vld [vmem:[#allocation10 + $0x108] sm:$0xff] }
 0x1ad   :  { %v1864_v34 = vadd.f32 %v1863_v14, %v1862_v3  ;;  %16221 = vmatpush3.bf16.msra.mxu1 %v16564_v55  ;;  %1279 = vmatprep.subr.bf16.mxu0 %v16565_v36  ;;  %v17475_v9 = vld [vmem:[#allocation10 + $0xc0] sm:$0xff]  ;;  %v17494_v3 = vshrl.u32 %v19322_v15, 7  ;;  %19487 = vst [vmem:[#allocation64_spill] sm:$0xff] %v17592_v22  ;;  %v5821_v54 = vld [vmem:[#allocation7 + $0x8] sm:$0xff] }
 0x1ae   :  { %16222 = vmatprep.subr.bf16.mxu1 %v16567_v58  ;;  %v17477_v37 = vld [vmem:[#allocation10 + $0xe0] sm:$0xff]  ;;  %v5853_v6 = vcombine.high %v5821_v54, %v5821_v54  ;;  %v17619_v11 = vld [vmem:[#allocation10 + $0x168] sm:$0xff] }
 0x1af   :  { %v1866_v35 = vadd.f32 %v1865_v41, %v1864_v34  ;;  %v17479_v16 = vld [vmem:[#allocation10 + $0x100] sm:$0xff]  ;;  %19467 = vst [vmem:[#allocation44_spill] sm:$0xff] %v17494_v3  ;;  %v16943_v41 = vmov 1983009808   ;;  %19492 = vst [vmem:[#allocation69_spill] sm:$0xff] %v17619_v11 }
 0x1b0   :  { %1280 = vmatpush1.bf16.msra.mxu0 %v16568_v61  ;;  %v17481_v59 = vld [vmem:[#allocation10 + $0x120] sm:$0xff]  ;;  %v5838_v34 = vunpack.c.l.s4 %v16943_v41  ;;  %v17569_v41 = vld [vmem:[#allocation10 + $0xc8] sm:$0xff] }
 0x1b1   :  { %1867 = vadd.xlane.f32.xlu1 %v1866_v35  ;;  %16223 = vmatpush3.bf16.msra.mxu1 %v16569_v62  ;;  %v17483_v17 = vld [vmem:[#allocation10 + $0x140] sm:$0xff]  ;;  %v17530_v62 = vld [vmem:[#allocation10 + $0x48] sm:$0xff]  ;;  %19483 = vst [vmem:[#allocation60_spill] sm:$0xff] %v17569_v41 }
 0x1b2   :  { %1290 = vmatprep.subr.bf16.mxu0 %v16572_v63  ;;  %16230 = vmatprep.subr.bf16.mxu1 %v16573_v31  ;;  %v17485_v18 = vld [vmem:[#allocation10 + $0x160] sm:$0xff]  ;;  %v5839_v28 = vunpack.c.0.s8 %v5838_v34  ;;  %19475 = vst [vmem:[#allocation52_spill] sm:$0xff] %v17530_v62  ;;  %v17532_v63 = vld [vmem:[#allocation10 + $0x68] sm:$0xff] }
 0x1b3   :  { %v17487_v20 = vld [vmem:[#allocation10 + $0x180] sm:$0xff]  ;;  %19476 = vst [vmem:[#allocation53_spill] sm:$0xff] %v17532_v63  ;;  %v17571_v34 = vld [vmem:[#allocation10 + $0xe8] sm:$0xff] }
 0x1b4   :  { %v17489_v13 = vld [vmem:[#allocation10 + $0x1a0] sm:$0xff]  ;;  %v17545_v25 = vsub.s32 %v5839_v28, %v17494_v3  ;;  %19484 = vst [vmem:[#allocation61_spill] sm:$0xff] %v17571_v34  ;;  %v17594_v28 = vld [vmem:[#allocation10 + $0x128] sm:$0xff] }
 0x1b5   :  { %19465 = vst [vmem:[#allocation42_spill] sm:$0xff] %v17489_v13  ;;  %v17491_v14 = vld [vmem:[#allocation10 + $0x1c0] sm:$0xff]  ;;  %19488 = vst [vmem:[#allocation65_spill] sm:$0xff] %v17594_v28 }
 0x1b6   :  { %19466 = vst [vmem:[#allocation43_spill] sm:$0xff] %v17491_v14  ;;  %v17502_v57 = vld [vmem:[#allocation10 + $0x1e0] sm:$0xff]  ;;  %v5860_v24 = vrot.slane %v5821_v54, %v17545_v25  ;;  %v17623_v34 = vrot.slane %v5822_v56, %v17545_v25 }
 0x1b7   :  { %19468 = vst [vmem:[#allocation45_spill] sm:$0xff] %v17502_v57  ;;  %v17504_v47 = vld [vmem:[#allocation10 + $0x200] sm:$0xff] }
 0x1b8   :  { %19469 = vst [vmem:[#allocation46_spill] sm:$0xff] %v17504_v47  ;;  %v17506_v27 = vld [vmem:[#allocation10 + $0x220] sm:$0xff]  ;;  %v5868_v53 = vcombine.high %v5860_v24, %v5860_v24 }
 0x1b9   :  { %19470 = vst [vmem:[#allocation47_spill] sm:$0xff] %v17506_v27  ;;  %v17518_v40 = vld [vmem:[#allocation10 + $0x240] sm:$0xff] }
 0x1ba   :  { %19473 = vst [vmem:[#allocation50_spill] sm:$0xff] %v17518_v40  ;;  %v17528_v61 = vld [vmem:[#allocation10 + $0x260] sm:$0xff] }
 0x1bb   :  { %19474 = vst [vmem:[#allocation51_spill] sm:$0xff] %v17528_v61  ;;  %v17540_v15 = vld [vmem:[#allocation10 + $0x280] sm:$0xff] }
 0x1bc   :  { %19477 = vst [vmem:[#allocation54_spill] sm:$0xff] %v17540_v15  ;;  %v17542_v36 = vld [vmem:[#allocation10 + $0x2a0] sm:$0xff] }
 0x1bd   :  { %19478 = vst [vmem:[#allocation55_spill] sm:$0xff] %v17542_v36  ;;  %v5820_v58 = vld [vmem:[#allocation7] sm:$0xff] }
 0x1be   :  { %v17559_v45 = vld [vmem:[#allocation10 + $0x2c0] sm:$0xff]  ;;  %v5836_v35 = vcombine.high %v5820_v58, %v5820_v58  ;;  %v5843_v31 = vrot.slane %v5820_v58, %v17545_v25  ;;  %v5823_v58 = vld [vmem:[#allocation7 + $0x18] sm:$0xff] }
 0x1bf   :  { %19481 = vst [vmem:[#allocation58_spill] sm:$0xff] %v17559_v45  ;;  %v17567_v1 = vld [vmem:[#allocation10 + $0x2e0] sm:$0xff]  ;;  %v17639_v45 = vrot.slane %v5853_v6, %v17545_v25 }
 0x1c0   :  { %19482 = vst [vmem:[#allocation59_spill] sm:$0xff] %v17567_v1  ;;  %v17579_v55 = vld [vmem:[#allocation10 + $0x300] sm:$0xff]  ;;  %v5850_v3 = vrot.slane %v5836_v35, %v17545_v25  ;;  %v5851_v43 = vcombine.high %v5843_v31, %v5843_v31  ;;  %v5887_v35 = vcombine.high %v5823_v58, %v5823_v58  ;;  %v5974_v30 = vsel %vm476_vm1, %v5843_v31, 4286644096 }
 0x1c1   :  { %19485 = vst [vmem:[#allocation62_spill] sm:$0xff] %v17579_v55  ;;  %v5824_v26 = vld [vmem:[#allocation7 + $0x20] sm:$0xff]  ;;  %v17632_v55 = vrot.slane %v5823_v58, %v17545_v25  ;;  %v17647_v58 = vrot.slane %v5870_v19, %v17545_v25  ;;  %v5976_v11 = vunpack.i.l.bf16 %v5974_v30  ;;  %v5977_v49 = vunpack.i.h.bf16 %v5974_v30 }
 0x1c2   :  { %v5904_v41 = vcombine.high %v5824_v26, %v5824_v26  ;;  %v5852_v1 = vcombine.high %v5850_v3, %v5850_v3  ;;  %v17642_v28 = vrot.slane %v5824_v26, %v17545_v25  ;;  %v5987_v4 = vsel %vm476_vm1, %v5851_v43, 4286644096 }
 0x1c3   :  { %v17652_v56 = vrot.slane %v5887_v35, %v17545_v25  ;;  %v5989_v31 = vunpack.i.l.bf16 %v5987_v4  ;;  %v5990_v19 = vunpack.i.h.bf16 %v5987_v4  ;;  %v6000_v8 = vsel %vm476_vm1, %v5850_v3, 4286644096 }
 0x1c4   :  { %v17655_v6 = vrot.slane %v5904_v41, %v17545_v25  ;;  %v6013_v54 = vsel %vm476_vm1, %v5852_v1, 4286644096  ;;  %v5978_v29 = vmax.f32 %v5976_v11, %v5977_v49  ;;  %v6002_v35 = vunpack.i.l.bf16 %v6000_v8  ;;  %v5825_v49 = vld [vmem:[#allocation7 + $0x28] sm:$0xff] }
 0x1c5   :  { %v6003_v22 = vunpack.i.h.bf16 %v6000_v8  ;;  %v6015_v50 = vunpack.i.l.bf16 %v6013_v54  ;;  %v5991_v48 = vmax.f32 %v5989_v31, %v5990_v19  ;;  %v6016_v36 = vunpack.i.h.bf16 %v6013_v54 }
 0x1c6   :  { %v6026_v26 = vsel %vm476_vm1, %v5860_v24, 4286644096  ;;  %v6039_v30 = vsel %vm476_vm1, %v5868_v53, 4286644096  ;;  %v5979_v63 = vrot.slane %v5978_v29, 4  ;;  %v5921_v51 = vcombine.high %v5825_v49, %v5825_v49  ;;  %v5826_v24 = vld [vmem:[#allocation7 + $0x30] sm:$0xff] }
 0x1c7   :  { %v6004_v62 = vmax.f32 %v6002_v35, %v6003_v22  ;;  %v6028_v43 = vunpack.i.l.bf16 %v6026_v26  ;;  %v5992_v4 = vrot.slane %v5991_v48, 4  ;;  %v6017_v61 = vmax.f32 %v6015_v50, %v6016_v36  ;;  %v5827_v22 = vld [vmem:[#allocation7 + $0x38] sm:$0xff] }
 0x1c8   :  { %v6029_v3 = vunpack.i.h.bf16 %v6026_v26  ;;  %v6041_v40 = vunpack.i.l.bf16 %v6039_v30  ;;  %v5980_v11 = vmax.f32 %v5978_v29, %v5979_v63  ;;  %v6042_v52 = vunpack.i.h.bf16 %v6039_v30 }
 0x1c9   :  { %v6005_v8 = vrot.slane %v6004_v62, 4  ;;  %v5993_v31 = vmax.f32 %v5991_v48, %v5992_v4  ;;  %v6018_v54 = vrot.slane %v6017_v61, 4  ;;  %v5938_v35 = vcombine.high %v5826_v24, %v5826_v24 }
 0x1ca   :  { %v6030_v19 = vmax.f32 %v6028_v43, %v6029_v3  ;;  %v5981_v53 = vrot.slane %v5980_v11, 2  ;;  %v6043_v27 = vmax.f32 %v6041_v40, %v6042_v52  ;;  %v5955_v36 = vcombine.high %v5827_v22, %v5827_v22 }
 0x1cb   :  { %v5994_v47 = vrot.slane %v5993_v31, 2  ;;  %v6019_v50 = vmax.f32 %v6017_v61, %v6018_v54  ;;  %v17672_v43 = vrot.slane %v5825_v49, %v17545_v25  ;;  %v17675_v52 = vrot.slane %v5921_v51, %v17545_v25 }
 0x1cc   :  { %v5982_v63 = vmax.f32 %v5980_v11, %v5981_v53  ;;  %v6031_v48 = vrot.slane %v6030_v19, 4  ;;  %v17678_v61 = vrot.slane %v5826_v24, %v17545_v25  ;;  %v17681_v3 = vrot.slane %v5938_v35, %v17545_v25 }
 0x1cd   :  { %v5995_v11 = vmax.f32 %v5993_v31, %v5994_v47  ;;  %v17689_v51 = vrot.slane %v5955_v36, %v17545_v25 }
 0x1ce   :  { %v5983_v54 = vrot.slane %v5982_v63, 1  ;;  %v6032_v24 = vmax.f32 %v6030_v19, %v6031_v48 }
 0x1cf   :  { %19493 = vst [vmem:[#allocation70_spill] sm:$0xff] %v17689_v51 }
 0x1d0   :  { %v6033_v31 = vrot.slane %v6032_v24, 2 }
 0x1fe   :  { %v536_v41 = vpop.xlane.xlu0 %535 }
 0x1ff   :  { %v537_v15 = vmul.f32 0.001953125, %v536_v41  ;;  %v6006_v41 = vmax.f32 %v6004_v62, %v6005_v8  ;;  %v6044_v62 = vrot.slane %v6043_v27, 4  ;;  %v6020_v8 = vrot.slane %v6019_v50, 2 }
 0x201   :  { %v538_v1 = vadd.f32 1e-05, %v537_v15  ;;  %v6052_v15 = vsel %vm476_vm1, %v17639_v45, 4286644096  ;;  %v6007_v40 = vrot.slane %v6006_v41, 2  ;;  %v6045_v36 = vmax.f32 %v6043_v27, %v6044_v62 }
 0x202   :  { %v6054_v30 = vunpack.i.l.bf16 %v6052_v15  ;;  %v6055_v4 = vunpack.i.h.bf16 %v6052_v15 }
 0x203   :  { %16642 = vrsqrt.f32 %v538_v1  ;;  %v17684_v1 = vrot.slane %v5827_v22, %v17545_v25  ;;  %v6008_v15 = vmax.f32 %v6006_v41, %v6007_v40  ;;  %v19494_v22 = vcombine.high %v17639_v45, %v17639_v45 }
 0x204   :  { %v6056_v19 = vmax.f32 %v6054_v30, %v6055_v4  ;;  %v5996_v41 = vrot.slane %v5995_v11, 1  ;;  %v6021_v40 = vmax.f32 %v6019_v50, %v6020_v8  ;;  %v6046_v48 = vrot.slane %v6045_v36, 2 }
 0x205   :  { %v6065_v47 = vsel %vm476_vm1, %v19494_v22, 4286644096  ;;  %v17709_v22 = vmax.f32 %v5982_v63, %v5983_v54  ;;  %v6009_v30 = vrot.slane %v6008_v15, 1 }
 0x206   :  { %v6067_v29 = vunpack.i.l.bf16 %v6065_v47  ;;  %v6057_v35 = vrot.slane %v6056_v19, 4  ;;  %v6068_v25 = vunpack.i.h.bf16 %v6065_v47  ;;  %v17716_v45 = vmax.f32 %v5995_v11, %v5996_v41 }
 0x207   :  { %v6022_v63 = vrot.slane %v6021_v40, 1  ;;  %v17723_v51 = vmax.f32 %v6008_v15, %v6009_v30 }
 0x208   :  { %v6069_v13 = vmax.f32 %v6067_v29, %v6068_v25 }
 0x20d   :  { %v16643_v26 = vpop.eup %16642 }
 0x20e   :  { %v541_v53 = vrot.slane %v16643_v26, 1  ;;  %v545_v27 = vmul.f32 %v16643_v26, %v17323_v32  ;;  %v544_v62 = vmul.f32 %v16643_v26, %v17320_v33  ;;  %v547_v4 = vmul.f32 %v16643_v26, %v17341_v0 }
 0x20f   :  { %v17719_v32 = vmax.f32 %v6032_v24, %v6033_v31 }
 0x210   :  { %v549_v50 = vmul.f32 %v541_v53, %v17332_v42  ;;  %v548_v8 = vmul.f32 %v541_v53, %v17329_v39  ;;  %v553_v54 = vpack.c.bf16 %v545_v27, %v545_v27  ;;  %v552_v49 = vpack.c.bf16 %v544_v62, %v544_v62 }
 0x211   :  { %v551_v57 = vmul.f32 %v541_v53, %v17338_v46  ;;  %v555_v47 = vpack.c.bf16 %v547_v4, %v547_v4  ;;  %v6078_v39 = vsel %vm476_vm1, %v17623_v34, 4286644096  ;;  %v17727_v27 = vmax.f32 %v6045_v36, %v6046_v48 }
 0x212   :  { %v557_v33 = vpack.c.bf16 %v549_v50, %v549_v50  ;;  %v556_v14 = vpack.c.bf16 %v548_v8, %v548_v8  ;;  %v17729_v46 = vmax.f32 %v6056_v19, %v6057_v35  ;;  %v714_v24 = vunpack.c.l.b16 %v553_v54  ;;  %v16570_v54 = vld [vmem:[#allocation8 + $0x180] ss:$12 sps:$4 sm:$0xff]  }
 0x213   :  { %v559_v42 = vpack.c.bf16 %v551_v57, %v551_v57  ;;  %v713_v31 = vunpack.c.l.b16 %v552_v49  ;;  %v6080_v4 = vunpack.i.l.bf16 %v6078_v39  ;;  %v6081_v57 = vunpack.i.h.bf16 %v6078_v39 }
 0x214   :  { %v718_v11 = vunpack.c.l.b16 %v557_v33  ;;  %v717_v41 = vunpack.c.l.b16 %v556_v14  ;;  %v716_v29 = vunpack.c.l.b16 %v555_v47  ;;  %v17733_v8 = vmax.f32 %v6021_v40, %v6022_v63  ;;  %v16577_v63 = vld [vmem:[#allocation8 + $0x19c] ss:$12 sps:$4 sm:$0xff]  }
 0x215   :  { %v720_v62 = vunpack.c.l.b16 %v559_v42  ;;  %v6070_v33 = vrot.slane %v6069_v13, 4  ;;  %v6082_v36 = vmax.f32 %v6080_v4, %v6081_v57  ;;  %v19496_v49 = vcombine.high %v17623_v34, %v17623_v34 }
 0x216   :  { %v723_v15 = vrot.slane %v718_v11, 7  ;;  %v721_v30 = vrot.slane %v717_v41, 7  ;;  %19495 = vst [vmem:[#allocation71_spill] sm:$0xff] %v17733_v8  ;;  %v16574_v11 = vld [vmem:[#allocation8 + $0x188] ss:$12 sps:$4 sm:$0xff]   ;;  %v550_v40 = vmul.f32 %v541_v53, %v17335_v44  ;;  %v17744_v39 = vmul.f32 %v16643_v26, %v17326_v38 }
 0x217   :  { %v727_v25 = vrot.slane %v720_v62, 7  ;;  %v6091_v19 = vsel %vm476_vm1, %v19496_v49, 4286644096  ;;  %v6048_v34 = vrot.slane %v17727_v27, 1  ;;  %v6083_v62 = vrot.slane %v6082_v36, 4 }
 0x218   :  { %v724_v14 = vsel %vm467_vm0, %v723_v15, %v714_v24  ;;  %v722_v35 = vsel %vm467_vm0, %v721_v30, %v713_v31  ;;  %v6035_v24 = vrot.slane %v17719_v32, 1  ;;  %v16578_v31 = vld [vmem:[#allocation8 + $0x260] ss:$12 sps:$4 sm:$0xff]   ;;  %v6093_v15 = vunpack.i.l.bf16 %v6091_v19  ;;  %v16575_v26 = vld [vmem:[#allocation8 + $0x198] ss:$12 sps:$4 sm:$0xff]  }
 0x219   :  { %v730_v48 = vpack.c.b16 %v724_v14, %v724_v14  ;;  %v729_v42 = vpack.c.b16 %v722_v35, %v722_v35  ;;  %v728_v47 = vsel %vm467_vm0, %v727_v25, %v716_v29  ;;  %v6094_v30 = vunpack.i.h.bf16 %v6091_v19  ;;  %v16579_v29 = vld [vmem:[#allocation8 + $0x1a0] ss:$12 sps:$4 sm:$0xff]   ;;  %v16595_v8 = vld [vmem:[#allocation8 + $0x1f8] ss:$12 sps:$4 sm:$0xff]  }
 0x21a   :  { %v6104_v44 = vsel %vm476_vm1, %v17647_v58, 4286644096  ;;  %v732_v38 = vpack.c.b16 %v728_v47, %v728_v47  ;;  %v6071_v53 = vmax.f32 %v6069_v13, %v6070_v33  ;;  %v558_v25 = vpack.c.bf16 %v550_v40, %v550_v40 }
 0x21b   :  { %1281 = vmatprep.mubr.bf16.mxu0 %v730_v48  ;;  %1363 = vmatprep.mubr.bf16.mxu1 %v730_v48  ;;  %v6106_v4 = vunpack.i.l.bf16 %v6104_v44  ;;  %v6107_v57 = vunpack.i.h.bf16 %v6104_v44  ;;  %v6095_v14 = vmax.f32 %v6093_v15, %v6094_v30  ;;  %v19497_v35 = vcombine.high %v17647_v58, %v17647_v58  ;;  %v16582_v48 = vld [vmem:[#allocation8 + $0x1b4] ss:$12 sps:$4 sm:$0xff]  }
 0x21c   :  { %1282 = vmatmul.mubr.bf16.vlgmr.msra.gmra.mrb[0].mxu0 %v729_v42  ;;  %1364 = vmatmul.mubr.bf16.vlgmr.msra.gmra.mrb[0].mxu1 %v729_v42  ;;  %v6130_v19 = vsel %vm476_vm1, %v17632_v55, 4286644096  ;;  %v16583_v42 = vld [vmem:[#allocation8 + $0x278] ss:$12 sps:$4 sm:$0xff]   ;;  %v6084_v13 = vmax.f32 %v6082_v36, %v6083_v62  ;;  %v6072_v30 = vrot.slane %v6071_v53, 2  ;;  %v19498_v41 = vcombine.high %v17632_v55, %v17632_v55 }
 0x21d   :  { %1291 = vmatpush1.bf16.msra.mxu0 %v16570_v54  ;;  %16231 = vmatpush3.bf16.msra.mxu1 %v16574_v11  ;;  %v6117_v49 = vsel %vm476_vm1, %v19497_v35, 4286644096  ;;  %v6108_v33 = vmax.f32 %v6106_v4, %v6107_v57  ;;  %v6059_v11 = vrot.slane %v17729_v46, 2  ;;  %v6096_v40 = vrot.slane %v6095_v14, 4  ;;  %v16580_v36 = vld [vmem:[#allocation8 + $0x1b0] ss:$12 sps:$4 sm:$0xff]  }
 0x21e   :  { %1322 = vmatprep.mubr.bf16.mxu0 %v732_v38  ;;  %1403 = vmatprep.mubr.bf16.mxu1 %v732_v38  ;;  %v6119_v47 = vunpack.i.l.bf16 %v6117_v49  ;;  %v6120_v54 = vunpack.i.h.bf16 %v6117_v49  ;;  %v6132_v15 = vunpack.i.l.bf16 %v6130_v19  ;;  %v6133_v58 = vunpack.i.h.bf16 %v6130_v19  ;;  %v16584_v62 = vld [vmem:[#allocation8 + $0x1b8] ss:$12 sps:$4 sm:$0xff]   ;;  %v16588_v19 = vld [vmem:[#allocation8 + $0x290] ss:$12 sps:$4 sm:$0xff]  }
 0x21f   :  { %1292 = vmatprep.subr.bf16.mxu0 %v16577_v63  ;;  %16232 = vmatprep.subr.bf16.mxu1 %v16578_v31  ;;  %v6109_v44 = vrot.slane %v6108_v33, 4  ;;  %v6143_v38 = vsel %vm476_vm1, %v19498_v41, 4286644096  ;;  %v719_v4 = vunpack.c.l.b16 %v558_v25  ;;  %v6097_v63 = vmax.f32 %v6095_v14, %v6096_v40  ;;  %v16587_v49 = vld [vmem:[#allocation8 + $0x1cc] ss:$12 sps:$4 sm:$0xff]  }
 0x220   :  { %v6121_v35 = vmax.f32 %v6119_v47, %v6120_v54  ;;  %v6134_v31 = vmax.f32 %v6132_v15, %v6133_v58  ;;  %v6145_v57 = vunpack.i.l.bf16 %v6143_v38  ;;  %v554_v47 = vpack.c.bf16 %v17744_v39, %v17744_v39  ;;  %v16589_v39 = vld [vmem:[#allocation8 + $0x1d0] ss:$12 sps:$4 sm:$0xff]  }
 0x221   :  { %1293 = vmatpush1.bf16.msra.mxu0 %v16575_v26  ;;  %16233 = vmatpush3.bf16.msra.mxu1 %v16579_v29  ;;  %v6085_v54 = vrot.slane %v6084_v13, 2  ;;  %v6146_v41 = vunpack.i.h.bf16 %v6143_v38  ;;  %v17768_v26 = vmax.f32 %v17719_v32, %v6035_v24  ;;  %v6110_v29 = vmax.f32 %v6108_v33, %v6109_v44  ;;  %v16592_v32 = vld [vmem:[#allocation8 + $0x1e4] ss:$12 sps:$4 sm:$0xff]   ;;  %v16593_v24 = vld [vmem:[#allocation8 + $0x2a8] ss:$12 sps:$4 sm:$0xff]  }
 0x222   :  { %1294 = vmatprep.subr.bf16.mxu0 %v16582_v48  ;;  %16234 = vmatprep.subr.bf16.mxu1 %v16583_v42  ;;  %v6122_v25 = vrot.slane %v6121_v35, 4  ;;  %v6156_v14 = vsel %vm476_vm1, %v17652_v56, 4286644096  ;;  %v16585_v48 = vld [vmem:[#allocation8 + $0x1c8] ss:$12 sps:$4 sm:$0xff]   ;;  %v6060_v42 = vmax.f32 %v17729_v46, %v6059_v11  ;;  %v6073_v40 = vmax.f32 %v6071_v53, %v6072_v30 }
 0x223   :  { %19499 = vst [vmem:[#allocation72_spill] sm:$0xff] %v17768_v26  ;;  %v6147_v15 = vmax.f32 %v6145_v57, %v6146_v41  ;;  %v6158_v58 = vunpack.i.l.bf16 %v6156_v14  ;;  %v725_v55 = vrot.slane %v719_v4, 7  ;;  %v6098_v50 = vrot.slane %v6097_v63, 2 }
 0x224   :  { %v6135_v38 = vrot.slane %v6134_v31, 4  ;;  %v6159_v0 = vunpack.i.h.bf16 %v6156_v14  ;;  %v715_v33 = vunpack.c.l.b16 %v554_v47  ;;  %v17776_v44 = vmax.f32 %v17727_v27, %v6048_v34  ;;  %v16590_v27 = vld [vmem:[#allocation8 + $0x1e0] ss:$12 sps:$4 sm:$0xff]   ;;  %v16594_v34 = vld [vmem:[#allocation8 + $0x1e8] ss:$12 sps:$4 sm:$0xff]  }
 0x225   :  { %1295 = vmatpush1.bf16.msra.mxu0 %v16580_v36  ;;  %16235 = vmatpush3.bf16.msra.mxu1 %v16584_v62  ;;  %v6086_v46 = vmax.f32 %v6084_v13, %v6085_v54  ;;  %v19500_v53 = vcombine.high %v17652_v56, %v17652_v56  ;;  %v6111_v30 = vrot.slane %v6110_v29, 2  ;;  %v6123_v36 = vmax.f32 %v6121_v35, %v6122_v25  ;;  %v16597_v13 = vld [vmem:[#allocation8 + $0x1fc] ss:$12 sps:$4 sm:$0xff]   ;;  %v16598_v35 = vld [vmem:[#allocation8 + $0x2c0] ss:$12 sps:$4 sm:$0xff]  }
 0x226   :  { %1296 = vmatprep.subr.bf16.mxu0 %v16587_v49  ;;  %16236 = vmatprep.subr.bf16.mxu1 %v16588_v19  ;;  %v6148_v62 = vrot.slane %v6147_v15, 4  ;;  %v6160_v4 = vmax.f32 %v6158_v58, %v6159_v0  ;;  %v6061_v49 = vrot.slane %v6060_v42, 1  ;;  %v6074_v19 = vrot.slane %v6073_v40, 1 }
 0x227   :  { %v6169_v11 = vsel %vm476_vm1, %v19500_v53, 4286644096  ;;  %v726_v54 = vsel %vm467_vm0, %v725_v55, %v715_v33  ;;  %v6099_v56 = vmax.f32 %v6097_v63, %v6098_v50  ;;  %v6136_v41 = vmax.f32 %v6134_v31, %v6135_v38  ;;  %v16599_v55 = vld [vmem:[#allocation8 + $0x200] ss:$12 sps:$4 sm:$0xff]  }
 0x228   :  { %v6171_v47 = vunpack.i.l.bf16 %v6169_v11  ;;  %v6172_v14 = vunpack.i.h.bf16 %v6169_v11  ;;  %v6087_v25 = vrot.slane %v6086_v46, 1  ;;  %v6161_v58 = vrot.slane %v6160_v4, 4 }
 0x229   :  { %1297 = vmatpush1.bf16.msra.mxu0 %v16585_v48  ;;  %16237 = vmatpush3.bf16.msra.mxu1 %v16589_v39  ;;  %v6182_v48 = vsel %vm476_vm1, %v17642_v28, 4286644096  ;;  %v6112_v39 = vmax.f32 %v6110_v29, %v6111_v30  ;;  %v6124_v53 = vrot.slane %v6123_v36, 2  ;;  %v6149_v57 = vmax.f32 %v6147_v15, %v6148_v62  ;;  %v16603_v29 = vld [vmem:[#allocation8 + $0x2d8] ss:$12 sps:$4 sm:$0xff]  }
 0x22a   :  { %1298 = vmatprep.subr.bf16.mxu0 %v16592_v32  ;;  %16238 = vmatprep.subr.bf16.mxu1 %v16593_v24  ;;  %v6173_v26 = vmax.f32 %v6171_v47, %v6172_v14  ;;  %v17789_v50 = vpack.c.b16 %v726_v54, %v726_v54  ;;  %v17791_v63 = vmax.f32 %v6060_v42, %v6061_v49  ;;  %v6184_v38 = vunpack.i.l.bf16 %v6182_v48  ;;  %v16602_v32 = vld [vmem:[#allocation8 + $0x214] ss:$12 sps:$4 sm:$0xff]   ;;  %v16604_v54 = vld [vmem:[#allocation8 + $0x218] ss:$12 sps:$4 sm:$0xff]  }
 0x22b   :  { %v17793_v31 = vmax.f32 %v6073_v40, %v6074_v19  ;;  %v6100_v24 = vrot.slane %v6099_v56, 1  ;;  %v6137_v33 = vrot.slane %v6136_v41, 2  ;;  %v6185_v0 = vunpack.i.h.bf16 %v6182_v48 }
 0x22c   :  { %v6174_v11 = vrot.slane %v6173_v26, 4  ;;  %v17795_v15 = vmax.f32 %v6086_v46, %v6087_v25  ;;  %v6162_v30 = vmax.f32 %v6160_v4, %v6161_v58  ;;  %v19501_v42 = vcombine.high %v17642_v28, %v17642_v28  ;;  %v16607_v4 = vld [vmem:[#allocation8 + $0x22c] ss:$12 sps:$4 sm:$0xff]   ;;  %v16608_v25 = vld [vmem:[#allocation8 + $0x2f0] ss:$12 sps:$4 sm:$0xff]  }
 0x22d   :  { %1299 = vmatpush1.bf16.msra.mxu0 %v16590_v27  ;;  %16239 = vmatpush3.bf16.msra.mxu1 %v16594_v34  ;;  %v6208_v62 = vsel %vm476_vm1, %v17655_v6, 4286644096  ;;  %v6113_v49 = vrot.slane %v6112_v39, 1  ;;  %v6125_v19 = vmax.f32 %v6123_v36, %v6124_v53  ;;  %v6150_v47 = vrot.slane %v6149_v57, 2  ;;  %v16600_v34 = vld [vmem:[#allocation8 + $0x210] ss:$12 sps:$4 sm:$0xff]  }
 0x22e   :  { %1300 = vmatprep.subr.bf16.mxu0 %v16597_v13  ;;  %16240 = vmatprep.subr.bf16.mxu1 %v16598_v35  ;;  %v6195_v40 = vsel %vm476_vm1, %v19501_v42, 4286644096  ;;  %v6186_v27 = vmax.f32 %v6184_v38, %v6185_v0  ;;  %v6175_v13 = vmax.f32 %v6173_v26, %v6174_v11  ;;  %v6210_v46 = vunpack.i.l.bf16 %v6208_v62 }
 0x22f   :  { %v6197_v14 = vunpack.i.l.bf16 %v6195_v40  ;;  %v6198_v35 = vunpack.i.h.bf16 %v6195_v40  ;;  %v17803_v28 = vmax.f32 %v6099_v56, %v6100_v24  ;;  %v6138_v58 = vmax.f32 %v6136_v41, %v6137_v33  ;;  %v16605_v41 = vld [vmem:[#allocation8 + $0x228] ss:$12 sps:$4 sm:$0xff]   ;;  %v16609_v40 = vld [vmem:[#allocation8 + $0x230] ss:$12 sps:$4 sm:$0xff]  }
 0x230   :  { %v6187_v48 = vrot.slane %v6186_v27, 4  ;;  %v6211_v42 = vunpack.i.h.bf16 %v6208_v62  ;;  %v6163_v36 = vrot.slane %v6162_v30, 2  ;;  %v19502_v0 = vcombine.high %v17655_v6, %v17655_v6 }
 0x231   :  { %1301 = vmatpush1.bf16.msra.mxu0 %v16595_v8  ;;  %16241 = vmatpush3.bf16.msra.mxu1 %v16599_v55  ;;  %v6199_v53 = vmax.f32 %v6197_v14, %v6198_v35  ;;  %v6234_v8 = vsel %vm476_vm1, %v17672_v43, 4286644096  ;;  %v17811_v55 = vmax.f32 %v6112_v39, %v6113_v49  ;;  %v6151_v38 = vmax.f32 %v6149_v57, %v6150_v47 }
 0x232   :  { %1302 = vmatprep.subr.bf16.mxu0 %v16602_v32  ;;  %16242 = vmatprep.subr.bf16.mxu1 %v16603_v29  ;;  %v6221_v26 = vsel %vm476_vm1, %v19502_v0, 4286644096  ;;  %v6188_v56 = vmax.f32 %v6186_v27, %v6187_v48  ;;  %v6212_v24 = vmax.f32 %v6210_v46, %v6211_v42  ;;  %v6176_v33 = vrot.slane %v6175_v13, 2  ;;  %v16612_v0 = vld [vmem:[#allocation8 + $0x244] ss:$12 sps:$4 sm:$0xff]  }
 0x233   :  { %v6200_v11 = vrot.slane %v6199_v53, 4  ;;  %v6223_v32 = vunpack.i.l.bf16 %v6221_v26  ;;  %v6224_v29 = vunpack.i.h.bf16 %v6221_v26  ;;  %v6126_v62 = vrot.slane %v6125_v19, 1 }
 0x234   :  { %v6189_v6 = vrot.slane %v6188_v56, 2  ;;  %v6213_v14 = vrot.slane %v6212_v24, 4  ;;  %v6236_v35 = vunpack.i.l.bf16 %v6234_v8  ;;  %v6164_v39 = vmax.f32 %v6162_v30, %v6163_v36  ;;  %v16610_v30 = vld [vmem:[#allocation8 + $0x240] ss:$12 sps:$4 sm:$0xff]  }
 0x235   :  { %1303 = vmatpush1.bf16.msra.mxu0 %v16600_v34  ;;  %16243 = vmatpush3.bf16.msra.mxu1 %v16604_v54  ;;  %v6201_v49 = vmax.f32 %v6199_v53, %v6200_v11  ;;  %v6225_v57 = vmax.f32 %v6223_v32, %v6224_v29  ;;  %v6237_v47 = vunpack.i.h.bf16 %v6234_v8  ;;  %v6063_v27 = vpack.i.bf16 %v17791_v63, %v17791_v63 }
 0x236   :  { %1304 = vmatprep.subr.bf16.mxu0 %v16607_v4  ;;  %16244 = vmatprep.subr.bf16.mxu1 %v16608_v25  ;;  %v6076_v46 = vpack.i.bf16 %v17793_v31, %v17793_v31  ;;  %v6139_v34 = vrot.slane %v6138_v58, 1  ;;  %v6152_v54 = vrot.slane %v6151_v38, 1  ;;  %v6177_v48 = vmax.f32 %v6175_v13, %v6176_v33 }
 0x237   :  { %v6190_v42 = vmax.f32 %v6188_v56, %v6189_v6  ;;  %v6214_v26 = vmax.f32 %v6212_v24, %v6213_v14  ;;  %v19503_v4 = vcombine.high %v17672_v43, %v17672_v43  ;;  %v17823_v53 = vmax.f32 %v6125_v19, %v6126_v62  ;;  %v16615_v56 = vld [vmem:[#allocation8 + $0x25c] ss:$12 sps:$4 sm:$0xff]  }
 0x238   :  { %v6226_v8 = vrot.slane %v6225_v57, 4  ;;  %v6238_v11 = vmax.f32 %v6236_v35, %v6237_v47  ;;  %v19504_v13 = vcombine.high %v17463_v2, %v17465_v7  ;;  %v6202_v33 = vrot.slane %v6201_v49, 2  ;;  %v16613_v47 = vld [vmem:[#allocation8 + $0x258] ss:$12 sps:$4 sm:$0xff]  }
 0x239   :  { %v6247_v25 = vsel %vm476_vm1, %v19503_v4, 4286644096  ;;  %1305 = vmatpush1.bf16.msra.mxu0 %v16605_v41  ;;  %16245 = vmatpush3.bf16.msra.mxu1 %v16609_v40  ;;  %v6165_v41 = vrot.slane %v6164_v39, 1  ;;  %v17832_v32 = vmax.f32 %v6138_v58, %v6139_v34  ;;  %v6260_v40 = vsel %vm476_vm1, %v17675_v52, 4286644096 }
 0x23a   :  { %1306 = vmatprep.subr.bf16.mxu0 %v16612_v0  ;;  %5086 = vmatprep.subr.bf16.mxu1 %v19504_v13  ;;  %v6249_v19 = vunpack.i.l.bf16 %v6247_v25  ;;  %v6250_v29 = vunpack.i.h.bf16 %v6247_v25  ;;  %v17837_v62 = vmax.f32 %v6151_v38, %v6152_v54  ;;  %v6178_v6 = vrot.slane %v6177_v48, 1  ;;  %v16618_v13 = vld [vmem:[#allocation8 + $0x274] ss:$12 sps:$4 sm:$0xff]  }
 0x23b   :  { %v6191_v14 = vrot.slane %v6190_v42, 1  ;;  %v6215_v35 = vrot.slane %v6214_v26, 2  ;;  %v19505_v0 = vcombine.low %v17463_v2, %v17465_v7  ;;  %v6227_v34 = vmax.f32 %v6225_v57, %v6226_v8 }
 0x23c   :  { %1404 = vmatmul.mubr.bf16.vlgmr.msra.gmra.mrb[4].mxu1 %v17789_v50  ;;  %v6239_v4 = vrot.slane %v6238_v11, 4  ;;  %v19506_v25 = vcombine.high %v17675_v52, %v17675_v52  ;;  %v17851_v2 = vmax.f32 %v6164_v39, %v6165_v41  ;;  %v6203_v7 = vmax.f32 %v6201_v49, %v6202_v33  ;;  %v16616_v49 = vld [vmem:[#allocation8 + $0x270] ss:$12 sps:$4 sm:$0xff]  }
 0x23d   :  { %1307 = vmatpush1.bf16.msra.mxu0 %v16610_v30  ;;  %5087 = vmatpush1.bf16.msra.mxu1 %v19505_v0  ;;  %v19507_v30 = vcombine.high %v17467_v21, %v17469_v60  ;;  %v6262_v0 = vunpack.i.l.bf16 %v6260_v40  ;;  %v6263_v24 = vunpack.i.h.bf16 %v6260_v40  ;;  %v6251_v8 = vmax.f32 %v6249_v19, %v6250_v29 }
 0x23e   :  { %v6273_v38 = vsel %vm476_vm1, %v19506_v25, 4286644096  ;;  %v1868_v54 = vpop.xlane.xlu1 %1867  ;;  %1308 = vmatprep.subr.bf16.mxu0 %v16615_v56  ;;  %v17857_v56 = vmax.f32 %v6177_v48, %v6178_v6  ;;  %v17859_v43 = vmax.f32 %v6190_v42, %v6191_v14  ;;  %v19508_v39 = vcombine.low %v17467_v21, %v17469_v60  ;;  %v16621_v48 = vld [vmem:[#allocation8 + $0x28c] ss:$12 sps:$4 sm:$0xff]  }
 0x23f   :  { %5088 = vmatprep.subr.bf16.mxu1 %v19507_v30  ;;  %v1869_v58 = vmul.f32 0.0009765625, %v1868_v54  ;;  %v6275_v52 = vunpack.i.l.bf16 %v6273_v38  ;;  %v6216_v30 = vmax.f32 %v6214_v26, %v6215_v35  ;;  %v6228_v41 = vrot.slane %v6227_v34, 2 }
 0x240   :  { %v6240_v33 = vmax.f32 %v6238_v11, %v6239_v4  ;;  %v6276_v40 = vunpack.i.h.bf16 %v6273_v38  ;;  %v19509_v19 = vcombine.high %v17471_v12, %v17473_v10  ;;  %v6204_v26 = vrot.slane %v6203_v7, 1  ;;  %v16619_v11 = vld [vmem:[#allocation8 + $0x288] ss:$12 sps:$4 sm:$0xff]  }
 0x241   :  { %v1870_v36 = vadd.f32 1e-05, %v1869_v58  ;;  %1309 = vmatpush1.bf16.msra.mxu0 %v16613_v47  ;;  %5089 = vmatpush1.bf16.msra.mxu1 %v19508_v39  ;;  %v6264_v29 = vmax.f32 %v6262_v0, %v6263_v24  ;;  %v6286_v6 = vsel %vm476_vm1, %v17678_v61, 4286644096  ;;  %v6252_v21 = vrot.slane %v6251_v8, 4 }
 0x242   :  { %1310 = vmatprep.subr.bf16.mxu0 %v16618_v13  ;;  %5090 = vmatprep.subr.bf16.mxu1 %v19509_v19  ;;  %v6277_v60 = vmax.f32 %v6275_v52, %v6276_v40  ;;  %v6288_v14 = vunpack.i.l.bf16 %v6286_v6  ;;  %v6193_v47 = vpack.i.bf16 %v17859_v43, %v17859_v43  ;;  %v6217_v58 = vrot.slane %v6216_v30, 1  ;;  %v16624_v39 = vld [vmem:[#allocation8 + $0x2a4] ss:$12 sps:$4 sm:$0xff]  }
 0x243   :  { %16644 = vrsqrt.f32 %v1870_v36  ;;  %v6289_v4 = vunpack.i.h.bf16 %v6286_v6  ;;  %v19510_v24 = vcombine.low %v17471_v12, %v17473_v10  ;;  %v6229_v38 = vmax.f32 %v6227_v34, %v6228_v41 }
 0x244   :  { %v6241_v54 = vrot.slane %v6240_v33, 2  ;;  %v19511_v36 = vcombine.high %v17678_v61, %v17678_v61  ;;  %v6312_v0 = vsel %vm476_vm1, %v17681_v3, 4286644096  ;;  %v19512_v52 = vcombine.high %v17475_v9, %v17477_v37 }
 0x245   :  { %1311 = vmatpush1.bf16.msra.mxu0 %v16616_v49  ;;  %5091 = vmatpush1.bf16.msra.mxu1 %v19510_v24  ;;  %v17887_v49 = vmax.f32 %v6203_v7, %v6204_v26  ;;  %v6265_v12 = vrot.slane %v6264_v29, 4  ;;  %v6290_v10 = vmax.f32 %v6288_v14, %v6289_v4  ;;  %v6253_v41 = vmax.f32 %v6251_v8, %v6252_v21  ;;  %v16622_v26 = vld [vmem:[#allocation8 + $0x2a0] ss:$12 sps:$4 sm:$0xff]  }
 0x246   :  { %v6299_v13 = vsel %vm476_vm1, %v19511_v36, 4286644096  ;;  %1312 = vmatprep.subr.bf16.mxu0 %v16621_v48  ;;  %5092 = vmatprep.subr.bf16.mxu1 %v19512_v52  ;;  %v6278_v40 = vrot.slane %v6277_v60, 4  ;;  %v6314_v61 = vunpack.i.l.bf16 %v6312_v0  ;;  %v17889_v6 = vmax.f32 %v6216_v30, %v6217_v58  ;;  %v16627_v58 = vld [vmem:[#allocation8 + $0x2bc] ss:$12 sps:$4 sm:$0xff]  }
 0x247   :  { %v6301_v34 = vunpack.i.l.bf16 %v6299_v13  ;;  %v6302_v19 = vunpack.i.h.bf16 %v6299_v13  ;;  %v6291_v24 = vrot.slane %v6290_v10, 4  ;;  %v6315_v36 = vunpack.i.h.bf16 %v6312_v0 }
 0x248   :  { %v19513_v48 = vcombine.high %v17681_v3, %v17681_v3  ;;  %v19514_v7 = vcombine.low %v17475_v9, %v17477_v37  ;;  %v6230_v14 = vrot.slane %v6229_v38, 1  ;;  %v17898_v8 = vmax.f32 %v6240_v33, %v6241_v54 }
 0x249   :  { %1313 = vmatpush1.bf16.msra.mxu0 %v16619_v11  ;;  %v6303_v21 = vmax.f32 %v6301_v34, %v6302_v19  ;;  %v19515_v30 = vcombine.high %v17479_v16, %v17481_v59  ;;  %v6266_v3 = vmax.f32 %v6264_v29, %v6265_v12  ;;  %v6316_v13 = vmax.f32 %v6314_v61, %v6315_v36  ;;  %v16625_v29 = vld [vmem:[#allocation8 + $0x2b8] ss:$12 sps:$4 sm:$0xff]  }
 0x24a   :  { %v6325_v35 = vsel %vm476_vm1, %v19513_v48, 4286644096  ;;  %5093 = vmatpush1.bf16.msra.mxu1 %v19514_v7  ;;  %1314 = vmatprep.subr.bf16.mxu0 %v16624_v39  ;;  %v6338_v11 = vsel %vm476_vm1, %v17684_v1, 4286644096  ;;  %v6254_v9 = vrot.slane %v6253_v41, 2  ;;  %v6279_v37 = vmax.f32 %v6277_v60, %v6278_v40 }
 0x24b   :  { %v6327_v4 = vunpack.i.l.bf16 %v6325_v35  ;;  %5094 = vmatprep.subr.bf16.mxu1 %v19515_v30  ;;  %v6328_v0 = vunpack.i.h.bf16 %v6325_v35  ;;  %v6304_v52 = vrot.slane %v6303_v21, 4  ;;  %v6340_v48 = vunpack.i.l.bf16 %v6338_v11 }
 0x24c   :  { %v6292_v33 = vmax.f32 %v6290_v10, %v6291_v24  ;;  %v6317_v54 = vrot.slane %v6316_v13, 4  ;;  %v6341_v19 = vunpack.i.h.bf16 %v6338_v11  ;;  %v19516_v7 = vcombine.low %v17479_v16, %v17481_v59  ;;  %v16630_v16 = vld [vmem:[#allocation8 + $0x2d4] ss:$12 sps:$4 sm:$0xff]   ;;  %v16628_v11 = vld [vmem:[#allocation8 + $0x2d0] ss:$12 sps:$4 sm:$0xff]  }
 0x24d   :  { %v6329_v34 = vmax.f32 %v6327_v4, %v6328_v0  ;;  %v17905_v39 = vpop.eup %16644  ;;  %1315 = vmatpush1.bf16.msra.mxu0 %v16622_v26  ;;  %v6206_v35 = vpack.i.bf16 %v17887_v49, %v17887_v49  ;;  %v17912_v12 = vmax.f32 %v6229_v38, %v6230_v14  ;;  %v6305_v60 = vmax.f32 %v6303_v21, %v6304_v52 }
 0x24e   :  { %5095 = vmatpush1.bf16.msra.mxu1 %v19516_v7  ;;  %v17915_v40 = vrot.slane %v17905_v39, 1  ;;  %v1877_v10 = vmul.f32 %v17905_v39, %v17371_v23  ;;  %1316 = vmatprep.subr.bf16.mxu0 %v16627_v58  ;;  %v19517_v61 = vcombine.high %v17483_v17, %v17485_v18  ;;  %v6267_v59 = vrot.slane %v6266_v3, 2 }
 0x24f   :  { %v6318_v24 = vmax.f32 %v6316_v13, %v6317_v54  ;;  %v6243_v36 = vrot.slane %v17898_v8, 1  ;;  %v6280_v26 = vrot.slane %v6279_v37, 2  ;;  %v6330_v38 = vrot.slane %v6329_v34, 4 }
 0x250   :  { %5096 = vmatprep.subr.bf16.mxu1 %v19517_v61  ;;  %v6342_v14 = vmax.f32 %v6340_v48, %v6341_v19  ;;  %v1885_v21 = vmul.f32 %v17915_v40, %v17380_v5  ;;  %v6255_v4 = vmax.f32 %v6253_v41, %v6254_v9  ;;  %v6293_v30 = vrot.slane %v6292_v33, 2  ;;  %v19520_v5 = vld [vmem:[#allocation42_spill] sm:$0xff] }
 0x251   :  { %v19518_v23 = vcombine.high %v17684_v1, %v17684_v1  ;;  %v1893_v0 = vpack.c.bf16 %v1877_v10, %v1877_v10  ;;  %1317 = vmatpush1.bf16.msra.mxu0 %v16625_v29  ;;  %v19519_v13 = vcombine.low %v17483_v17, %v17485_v18  ;;  %v6306_v52 = vrot.slane %v6305_v60, 2  ;;  %v16633_v9 = vld [vmem:[#allocation8 + $0x2ec] ss:$12 sps:$4 sm:$0xff]  }
 0x252   :  { %v6331_v54 = vmax.f32 %v6329_v34, %v6330_v38  ;;  %v6343_v48 = vrot.slane %v6342_v14, 4  ;;  %v1901_v19 = vpack.c.bf16 %v1885_v21, %v1885_v21  ;;  %1318 = vmatprep.subr.bf16.mxu0 %v16630_v16  ;;  %v19521_v41 = vcombine.high %v17487_v20, %v19520_v5  ;;  %v19522_v61 = vld [vmem:[#allocation70_spill] sm:$0xff] }
 0x253   :  { %v6351_v58 = vsel %vm476_vm1, %v19518_v23, 4286644096  ;;  %5097 = vmatpush1.bf16.msra.mxu1 %v19519_v13  ;;  %v6268_v1 = vmax.f32 %v6266_v3, %v6267_v59  ;;  %v6319_v7 = vrot.slane %v6318_v24, 2  ;;  %v6364_v29 = vsel %vm476_vm1, %v19522_v61, 4286644096 }
 0x254   :  { %5098 = vmatprep.subr.bf16.mxu1 %v19521_v41  ;;  %v6281_v10 = vmax.f32 %v6279_v37, %v6280_v26  ;;  %v6332_v23 = vrot.slane %v6331_v54, 2  ;;  %v6344_v17 = vmax.f32 %v6342_v14, %v6343_v48  ;;  %v6353_v18 = vunpack.i.l.bf16 %v6351_v58  ;;  %v16631_v41 = vld [vmem:[#allocation8 + $0x2e8] ss:$12 sps:$4 sm:$0xff]  }
 0x255   :  { %v2487_v13 = vunpack.c.l.b16 %v1901_v19  ;;  %v6256_v42 = vrot.slane %v6255_v4, 1  ;;  %v6294_v34 = vmax.f32 %v6292_v33, %v6293_v30  ;;  %v6354_v38 = vunpack.i.h.bf16 %v6351_v58  ;;  %1319 = vmatpush1.bf16.msra.mxu0 %v16628_v11  ;;  %v19524_v37 = vld [vmem:[#allocation43_spill] sm:$0xff]  ;;  %v19525_v26 = vld [vmem:[#allocation45_spill] sm:$0xff] }
 0x256   :  { %v2479_v21 = vunpack.c.l.b16 %v1893_v0  ;;  %v19523_v16 = vcombine.low %v17487_v20, %v19520_v5  ;;  %v6307_v3 = vmax.f32 %v6305_v60, %v6306_v52  ;;  %v6345_v59 = vrot.slane %v6344_v17, 2  ;;  %1320 = vmatprep.subr.bf16.mxu0 %v16633_v9 }
 0x257   :  { %v6366_v25 = vunpack.i.l.bf16 %v6364_v29  ;;  %v2496_v57 = vrot.slane %v2487_v13, 7  ;;  %v19526_v14 = vcombine.high %v19524_v37, %v19525_v26  ;;  %v6320_v48 = vmax.f32 %v6318_v24, %v6319_v7 }
 0x258   :  { %5099 = vmatpush1.bf16.msra.mxu1 %v19523_v16  ;;  %v6355_v19 = vmax.f32 %v6353_v18, %v6354_v38  ;;  %v6367_v33 = vunpack.i.h.bf16 %v6364_v29  ;;  %v6269_v30 = vrot.slane %v6268_v1, 1  ;;  %v6282_v58 = vrot.slane %v6281_v10, 1  ;;  %v19531_v18 = vld [vmem:[#allocation47_spill] sm:$0xff]  ;;  %v19533_v38 = vld [vmem:[#allocation48_spill] sm:$0xff]  ;;  %v19534_v16 = vld [vmem:[#allocation49_spill] sm:$0xff] }
 0x259   :  { %5100 = vmatprep.subr.bf16.mxu1 %v19526_v14  ;;  %v6333_v0 = vmax.f32 %v6331_v54, %v6332_v23  ;;  %v19527_v20 = vcombine.high %v19522_v61, %v19522_v61  ;;  %v2497_v60 = vsel %vm467_vm0, %v2496_v57, %v2479_v21  ;;  %v6346_v52 = vmax.f32 %v6344_v17, %v6345_v59  ;;  %v19530_v23 = vld [vmem:[#allocation46_spill] sm:$0xff] }
 0x25a   :  { %v6356_v5 = vrot.slane %v6355_v19, 4  ;;  %v6368_v9 = vmax.f32 %v6366_v25, %v6367_v33  ;;  %v17948_v13 = vpack.c.b16 %v2497_v60, %v2497_v60  ;;  %1321 = vmatpush1.bf16.msra.mxu0 %v16631_v41  ;;  %v19529_v24 = vcombine.low %v19524_v37, %v19525_v26 }
 0x25b   :  { %v6377_v11 = vsel %vm476_vm1, %v19527_v20, 4286644096  ;;  %v6295_v7 = vrot.slane %v6294_v34, 1  ;;  %v6308_v29 = vrot.slane %v6307_v3, 1  ;;  %v19532_v61 = vcombine.high %v19530_v23, %v19531_v18 }
 0x25c   :  { %19528 = vst [vmem:[#allocation42_spill] sm:$0xff] %v17948_v13  ;;  %5101 = vmatpush1.bf16.msra.mxu1 %v19529_v24  ;;  %v6379_v54 = vunpack.i.l.bf16 %v6377_v11  ;;  %v19535_v57 = vcombine.high %v19533_v38, %v19534_v16  ;;  %v6321_v17 = vrot.slane %v6320_v48, 1  ;;  %v6357_v25 = vmax.f32 %v6355_v19, %v6356_v5  ;;  %5118 = vmatprep.mubr.bf16.mxu1 %v17948_v13 }
 0x25d   :  { %5102 = vmatprep.subr.bf16.mxu1 %v19532_v61  ;;  %v6369_v21 = vrot.slane %v6368_v9, 4  ;;  %v6380_v59 = vunpack.i.h.bf16 %v6377_v11  ;;  %v17963_v41 = vmax.f32 %v17898_v8, %v6243_v36  ;;  %v17965_v37 = vmax.f32 %v6255_v4, %v6256_v42  ;;  %1323 = vmatmul.mubr.bf16.vlgmr.msra.gmra.mrb[0].mxu0 %v17789_v50  ;;  %v19538_v50 = vld [vmem:[#allocation50_spill] sm:$0xff]  ;;  %v19539_v4 = vld [vmem:[#allocation51_spill] sm:$0xff] }
 0x25e   :  { %5250 = vmatprep.subr.bf16.mxu0 %v19535_v57  ;;  %v17967_v26 = vmax.f32 %v6268_v1, %v6269_v30  ;;  %v6334_v14 = vrot.slane %v6333_v0, 1  ;;  %v6347_v33 = vrot.slane %v6346_v52, 1  ;;  %v6358_v20 = vrot.slane %v6357_v25, 2  ;;  %5282 = vmatprep.mubr.bf16.mxu0 %v17948_v13 }
 0x25f   :  { %v6370_v60 = vmax.f32 %v6368_v9, %v6369_v21  ;;  %v6381_v19 = vmax.f32 %v6379_v54, %v6380_v59  ;;  %v19536_v11 = vcombine.low %v19530_v23, %v19531_v18  ;;  %v19537_v5 = vcombine.low %v19533_v38, %v19534_v16  ;;  %v19541_v23 = vld [vmem:[#allocation52_spill] sm:$0xff]  ;;  %v19550_v59 = vld [vmem:[#allocation57_spill] sm:$0xff] }
 0x260   :  { %v17976_v8 = vmax.f32 %v6281_v10, %v6282_v58  ;;  %v17978_v42 = vmax.f32 %v6294_v34, %v6295_v7  ;;  %v17980_v36 = vmax.f32 %v6307_v3, %v6308_v29  ;;  %v19540_v1 = vcombine.high %v19538_v50, %v19539_v4  ;;  %v19542_v10 = vld [vmem:[#allocation53_spill] sm:$0xff]  ;;  %v19549_v21 = vld [vmem:[#allocation56_spill] sm:$0xff] }
 0x261   :  { %5103 = vmatpush1.bf16.msra.mxu1 %v19536_v11  ;;  %5251 = vmatpush1.bf16.msra.mxu0 %v19537_v5  ;;  %v6219_v30 = vpack.i.bf16 %v17889_v6, %v17889_v6  ;;  %v17988_v9 = vmax.f32 %v6320_v48, %v6321_v17  ;;  %v6371_v24 = vrot.slane %v6370_v60, 2  ;;  %v6382_v54 = vrot.slane %v6381_v19, 4  ;;  %v19547_v17 = vld [vmem:[#allocation55_spill] sm:$0xff] }
 0x262   :  { %5104 = vmatprep.subr.bf16.mxu1 %v19540_v1  ;;  %v19543_v58 = vcombine.high %v19541_v23, %v19542_v10  ;;  %v6232_v34 = vpack.i.bf16 %v17912_v12, %v17912_v12  ;;  %v6245_v3 = vpack.i.bf16 %v17963_v41, %v17963_v41  ;;  %v6258_v7 = vpack.i.bf16 %v17965_v37, %v17965_v37 }
 0x263   :  { %v6359_v29 = vmax.f32 %v6357_v25, %v6358_v20  ;;  %v6271_v6 = vpack.i.bf16 %v17967_v26, %v17967_v26  ;;  %v18001_v48 = vmax.f32 %v6333_v0, %v6334_v14  ;;  %v18003_v18 = vmax.f32 %v6346_v52, %v6347_v33  ;;  %v19546_v52 = vld [vmem:[#allocation54_spill] sm:$0xff] }
 0x264   :  { %5252 = vmatprep.subr.bf16.mxu0 %v19543_v58  ;;  %v6383_v61 = vmax.f32 %v6381_v19, %v6382_v54  ;;  %v19544_v38 = vcombine.low %v19538_v50, %v19539_v4  ;;  %v19545_v12 = vcombine.low %v19541_v23, %v19542_v10  ;;  %v6284_v16 = vpack.i.bf16 %v17976_v8, %v17976_v8  ;;  %v19555_v50 = vld [vmem:[#allocation71_spill] sm:$0xff]  ;;  %v19559_v4 = vld [vmem:[#allocation72_spill] sm:$0xff]  ;;  %v19562_v10 = vld [vmem:[#allocation58_spill] sm:$0xff] }
 0x265   :  { %v6297_v57 = vpack.i.bf16 %v17978_v42, %v17978_v42  ;;  %v6310_v0 = vpack.i.bf16 %v17980_v36, %v17980_v36  ;;  %v19548_v25 = vcombine.high %v19546_v52, %v19547_v17  ;;  %v19551_v41 = vcombine.high %v19549_v21, %v19550_v59  ;;  %v19563_v58 = vld [vmem:[#allocation59_spill] sm:$0xff] }
 0x266   :  { %5105 = vmatpush1.bf16.msra.mxu1 %v19544_v38  ;;  %5253 = vmatpush1.bf16.msra.mxu0 %v19545_v12  ;;  %v6323_v37 = vpack.i.bf16 %v17988_v9, %v17988_v9  ;;  %v6372_v26 = vmax.f32 %v6370_v60, %v6371_v24  ;;  %v19552_v14 = vpack.i.bf16 %v17709_v22, %v17709_v22  ;;  %v6360_v11 = vrot.slane %v6359_v29, 1  ;;  %v19566_v38 = vld [vmem:[#allocation61_spill] sm:$0xff] }
 0x267   :  { %5106 = vmatprep.subr.bf16.mxu1 %v19548_v25  ;;  %5254 = vmatprep.subr.bf16.mxu0 %v19551_v41  ;;  %v19553_v20 = vpack.i.bf16 %v17716_v45, %v17716_v45  ;;  %v6384_v5 = vrot.slane %v6383_v61, 2  ;;  %v18038_v8 = vunpack.c.l.bf16 %v6193_v47  ;;  %v18043_v60 = vunpack.c.l.bf16 %v6206_v35 }
 0x268   :  { %v18028_v33 = vunpack.c.l.bf16 %v19552_v14  ;;  %v6336_v22 = vpack.i.bf16 %v18001_v48, %v18001_v48  ;;  %v6349_v45 = vpack.i.bf16 %v18003_v18, %v18003_v18  ;;  %v19554_v42 = vpack.i.bf16 %v17723_v51, %v17723_v51  ;;  %v19565_v18 = vld [vmem:[#allocation60_spill] sm:$0xff] }
 0x269   :  { %v18033_v19 = vunpack.c.l.bf16 %v19553_v20  ;;  %v19556_v43 = vpack.i.bf16 %v19555_v50, %v19555_v50  ;;  %v19557_v49 = vcombine.low %v19546_v52, %v19547_v17  ;;  %v19558_v35 = vcombine.low %v19549_v21, %v19550_v59  ;;  %v19577_v50 = vld [vmem:[#allocation63_spill] sm:$0xff] }
 0x26a   :  { %v18052_v36 = vunpack.c.l.bf16 %v19554_v42  ;;  %v19560_v1 = vpack.i.bf16 %v19559_v4, %v19559_v4  ;;  %v19561_v51 = vpack.i.bf16 %v17776_v44, %v17776_v44  ;;  %v18078_v54 = vunpack.c.l.bf16 %v6063_v27  ;;  %v19576_v42 = vld [vmem:[#allocation62_spill] sm:$0xff] }
 0x26b   :  { %v18057_v47 = vunpack.c.l.bf16 %v19556_v43  ;;  %5107 = vmatpush1.bf16.msra.mxu1 %v19557_v49  ;;  %5255 = vmatpush1.bf16.msra.mxu0 %v19558_v35  ;;  %v18080_v23 = vunpack.c.l.bf16 %v6219_v30  ;;  %v19564_v48 = vcombine.high %v19562_v10, %v19563_v58  ;;  %v19567_v12 = vcombine.high %v19565_v18, %v19566_v38  ;;  %v19579_v49 = vld [vmem:[#allocation64_spill] sm:$0xff]  ;;  %v19580_v35 = vld [vmem:[#allocation65_spill] sm:$0xff] }
 0x26c   :  { %v18068_v9 = vunpack.c.l.bf16 %v19560_v1  ;;  %v18073_v24 = vunpack.c.l.bf16 %v19561_v51  ;;  %v6373_v52 = vrot.slane %v6372_v26, 1  ;;  %v18091_v44 = vunpack.c.l.bf16 %v6076_v46 }
 0x26d   :  { %5108 = vmatprep.subr.bf16.mxu1 %v19564_v48  ;;  %5256 = vmatprep.subr.bf16.mxu0 %v19567_v12  ;;  %v19568_v63 = vpack.i.bf16 %v17795_v15, %v17795_v15  ;;  %v18098_v30 = vunpack.c.l.bf16 %v6232_v34  ;;  %v6361_v17 = vmax.f32 %v6359_v29, %v6360_v11  ;;  %v6385_v25 = vmax.f32 %v6383_v61, %v6384_v5 }
 0x26e   :  { %v6453_v21 = vsel %vm467_vm0, %v18038_v8, %v18028_v33  ;;  %v6454_v59 = vsel %vm467_vm0, %v18043_v60, %v18033_v19  ;;  %v19569_v31 = vpack.i.bf16 %v17803_v28, %v17803_v28  ;;  %v19570_v15 = vpack.i.bf16 %v17811_v55, %v17811_v55 }
 0x26f   :  { %v18096_v27 = vunpack.c.l.bf16 %v19568_v63  ;;  %v19571_v29 = vpack.i.bf16 %v17823_v53, %v17823_v53  ;;  %v18121_v41 = vunpack.c.l.bf16 %v6245_v3  ;;  %v19572_v14 = vcombine.low %v19562_v10, %v19563_v58 }
 0x270   :  { %v18109_v46 = vunpack.c.l.bf16 %v19569_v31  ;;  %v18114_v34 = vunpack.c.l.bf16 %v19570_v15  ;;  %v19573_v28 = vcombine.low %v19565_v18, %v19566_v38  ;;  %v19574_v55 = vpack.i.bf16 %v17832_v32, %v17832_v32  ;;  %v19590_v31 = vld [vmem:[#allocation66_spill] sm:$0xff]  ;;  %v19591_v15 = vld [vmem:[#allocation67_spill] sm:$0xff] }
 0x271   :  { %v18119_v61 = vunpack.c.l.bf16 %v19571_v29  ;;  %5109 = vmatpush1.bf16.msra.mxu1 %v19572_v14  ;;  %v19575_v53 = vpack.i.bf16 %v17837_v62, %v17837_v62  ;;  %v6455_v3 = vsel %vm467_vm0, %v18080_v23, %v18052_v36  ;;  %v6485_v5 = vsel %vm476_vm1, %v6453_v21, 0.0  ;;  %v19593_v14 = vld [vmem:[#allocation68_spill] sm:$0xff] }
 0x272   :  { %5257 = vmatpush1.bf16.msra.mxu0 %v19573_v28  ;;  %v18132_v20 = vunpack.c.l.bf16 %v19574_v55  ;;  %v19578_v43 = vcombine.high %v19576_v42, %v19577_v50  ;;  %v19581_v32 = vcombine.high %v19579_v49, %v19580_v35  ;;  %v18149_v4 = vmax.f32 %v6372_v26, %v6373_v52  ;;  %v19594_v28 = vld [vmem:[#allocation69_spill] sm:$0xff] }
 0x273   :  { %v18137_v11 = vunpack.c.l.bf16 %v19575_v53  ;;  %v18151_v1 = vunpack.c.l.bf16 %v6258_v7  ;;  %v6456_v62 = vsel %vm467_vm0, %v18098_v30, %v18057_v47  ;;  %v6486_v51 = vsel %vm476_vm1, %v6454_v59, 0.0  ;;  %v2020_v59 = vld [vmem:[#allocation10 + $0x380] sm:$0xff] }
 0x274   :  { %5110 = vmatprep.subr.bf16.mxu1 %v19578_v43  ;;  %5258 = vmatprep.subr.bf16.mxu0 %v19581_v32  ;;  %v6362_v10 = vpack.i.bf16 %v6361_v17, %v6361_v17  ;;  %v6386_v58 = vrot.slane %v6385_v25, 1  ;;  %v18157_v48 = vunpack.c.l.bf16 %v6271_v6  ;;  %v18159_v18 = vunpack.c.l.bf16 %v6284_v16  ;;  %v2028_v32 = vld [vmem:[#allocation10 + $0x3c0] sm:$0xff] }
 0x275   :  { %v18161_v38 = vunpack.c.l.bf16 %v6297_v57  ;;  %v6457_v26 = vsel %vm467_vm0, %v18121_v41, %v18068_v9  ;;  %v6487_v7 = vadd.f32 %v6486_v51, %v6485_v5  ;;  %v6488_v12 = vsel %vm476_vm1, %v6455_v3, 0.0  ;;  %v2024_v3 = vld [vmem:[#allocation10 + $0x3a0] sm:$0xff]  ;;  %v1957_v5 = vld [vmem:[#allocation10 + $0x188] sm:$0xff] }
 0x276   :  { %19582 = vst [vmem:[#allocation70_spill] sm:$0xff] %v18159_v18  ;;  %v19584_v52 = vcombine.low %v19576_v42, %v19577_v50  ;;  %v19585_v63 = vcombine.low %v19579_v49, %v19580_v35  ;;  %v19586_v6 = vpack.i.bf16 %v17851_v2, %v17851_v2  ;;  %v18178_v57 = vunpack.c.l.bf16 %v6310_v0  ;;  %v1961_v42 = vld [vmem:[#allocation10 + $0x1a8] sm:$0xff] }
 0x277   :  { %19583 = vst [vmem:[#allocation43_spill] sm:$0xff] %v18161_v38  ;;  %v18180_v17 = vunpack.c.l.bf16 %v6323_v37  ;;  %v6490_v21 = vsel %vm476_vm1, %v6456_v62, 0.0  ;;  %v19592_v29 = vcombine.high %v19590_v31, %v19591_v15  ;;  %v19595_v55 = vcombine.high %v19593_v14, %v19594_v28  ;;  %v1965_v51 = vld [vmem:[#allocation10 + $0x1c8] sm:$0xff] }
 0x278   :  { %5111 = vmatpush1.bf16.msra.mxu1 %v19584_v52  ;;  %5259 = vmatpush1.bf16.msra.mxu0 %v19585_v63  ;;  %v18176_v16 = vunpack.c.l.bf16 %v19586_v6  ;;  %19588 = vst [vmem:[#allocation46_spill] sm:$0xff] %v18178_v57  ;;  %v6375_v2 = vpack.i.bf16 %v18149_v4, %v18149_v4  ;;  %v18191_v53 = vunpack.c.l.bf16 %v6336_v22  ;;  %v6458_v0 = vsel %vm467_vm0, %v18151_v1, %v18073_v24  ;;  %v2032_v4 = vld [vmem:[#allocation10 + $0x3e0] sm:$0xff] }
 0x279   :  { %19589 = vst [vmem:[#allocation47_spill] sm:$0xff] %v18180_v17  ;;  %5112 = vmatprep.subr.bf16.mxu1 %v19592_v29  ;;  %5260 = vmatprep.subr.bf16.mxu0 %v19595_v55  ;;  %v6489_v37 = vadd.f32 %v6488_v12, %v6487_v7  ;;  %v18196_v50 = vmax.f32 %v6385_v25, %v6386_v58  ;;  %v18198_v43 = vunpack.c.l.bf16 %v6349_v45  ;;  %v18200_v49 = vunpack.c.l.bf16 %v6362_v10  ;;  %v1969_v10 = vld [vmem:[#allocation10 + $0x1e8] sm:$0xff]  ;;  %v18219_v6 = vld [vmem:[#allocation10 + $0x400] sm:$0xff] }
 0x27a   :  { %19587 = vst [vmem:[#allocation45_spill] sm:$0xff] %v18176_v16  ;;  %19596 = vst [vmem:[#allocation48_spill] sm:$0xff] %v18191_v53  ;;  %v6492_v35 = vsel %vm476_vm1, %v6457_v26, 0.0  ;;  %v6459_v22 = vsel %vm467_vm0, %v18157_v48, %v18078_v54  ;;  %v6460_v62 = vsel %vm467_vm0, %v18159_v18, %v18091_v44  ;;  %v6461_v25 = vsel %vm467_vm0, %v18161_v38, %v18096_v27  ;;  %v18221_v29 = vld [vmem:[#allocation10 + $0x420] sm:$0xff] }
 0x27b   :  { %19597 = vst [vmem:[#allocation49_spill] sm:$0xff] %v18198_v43  ;;  %19598 = vst [vmem:[#allocation50_spill] sm:$0xff] %v18200_v49  ;;  %v6491_v45 = vadd.f32 %v6490_v21, %v6489_v37  ;;  %v19599_v58 = vcombine.low %v19590_v31, %v19591_v15  ;;  %v19600_v26 = vcombine.low %v19593_v14, %v19594_v28  ;;  %v6494_v7 = vsel %vm476_vm1, %v6458_v0, 0.0  ;;  %v1973_v37 = vld [vmem:[#allocation10 + $0x208] sm:$0xff]  ;;  %v19601_v0 = vld [vmem:[#allocation28_spill] sm:$0xff] }
 0x27c   :  { %v14784_v12 = vcombine.low %v2020_v59, %v2024_v3  ;;  %v14785_v52 = vcombine.high %v2020_v59, %v2024_v3  ;;  %v14722_v63 = vcombine.low %v1957_v5, %v1961_v42  ;;  %v6462_v21 = vsel %vm467_vm0, %v18178_v57, %v18109_v46  ;;  %v19602_v3 = vld [vmem:[#allocation30_spill] sm:$0xff] }
 0x27d   :  { %5113 = vmatpush1.bf16.msra.mxu1 %v19599_v58  ;;  %5261 = vmatpush1.bf16.msra.mxu0 %v19600_v26  ;;  %v6493_v55 = vadd.f32 %v6492_v35, %v6491_v45  ;;  %v14723_v31 = vcombine.high %v1957_v5, %v1961_v42  ;;  %v14793_v15 = vcombine.high %v2028_v32, %v2032_v4  ;;  %v1977_v58 = vld [vmem:[#allocation10 + $0x228] sm:$0xff]  ;;  %v6496_v14 = vsel %vm476_vm1, %v6459_v22, 0.0  ;;  %v18486_v57 = vld [vmem:[#allocation10 + $0x50] sm:$0xff] }
 0x27e   :  { %5114 = vmatprep.subr.bf16.mxu1 %v14785_v52  ;;  %v14731_v28 = vcombine.high %v1965_v51, %v1969_v10  ;;  %v1876_v59 = vmul.f32 %v17905_v39, %v19601_v0  ;;  %v1884_v26 = vmul.f32 %v17915_v40, %v19602_v3  ;;  %v14792_v38 = vcombine.low %v2028_v32, %v2032_v4  ;;  %v19604_v3 = vld [vmem:[#allocation32_spill] sm:$0xff]  ;;  %v19605_v32 = vld [vmem:[#allocation33_spill] sm:$0xff] }
 0x27f   :  { %v6495_v13 = vadd.f32 %v6494_v7, %v6493_v55  ;;  %5262 = vmatprep.subr.bf16.mxu0 %v14723_v31  ;;  %v14730_v18 = vcombine.low %v1965_v51, %v1969_v10  ;;  %v14801_v5 = vcombine.high %v18219_v6, %v18221_v29  ;;  %v6498_v42 = vsel %vm476_vm1, %v6460_v62, 0.0 }
 0x280   :  { %v1892_v35 = vpack.c.bf16 %v1876_v59, %v1876_v59  ;;  %v1900_v22 = vpack.c.bf16 %v1884_v26, %v1884_v26  ;;  %v14739_v45 = vcombine.high %v1973_v37, %v1977_v58  ;;  %v18234_v52 = vunpack.c.l.bf16 %v6375_v2 }
 0x281   :  { %5115 = vmatpush1.bf16.msra.mxu1 %v14784_v12  ;;  %5263 = vmatpush1.bf16.msra.mxu0 %v14722_v63  ;;  %v6497_v0 = vadd.f32 %v6496_v14, %v6495_v13  ;;  %v1879_v7 = vmul.f32 %v17905_v39, %v19604_v3  ;;  %v1887_v4 = vmul.f32 %v17915_v40, %v19605_v32  ;;  %v6500_v10 = vsel %vm476_vm1, %v6461_v25, 0.0  ;;  %v1981_v12 = vld [vmem:[#allocation10 + $0x248] sm:$0xff]  ;;  %v2044_v14 = vld [vmem:[#allocation10 + $0x440] sm:$0xff] }
 0x282   :  { %19603 = vst [vmem:[#allocation51_spill] sm:$0xff] %v18234_v52  ;;  %5116 = vmatprep.subr.bf16.mxu1 %v14793_v15  ;;  %5264 = vmatprep.subr.bf16.mxu0 %v14731_v28  ;;  %v6388_v51 = vpack.i.bf16 %v18196_v50, %v18196_v50  ;;  %v6463_v62 = vsel %vm467_vm0, %v18180_v17, %v18114_v34  ;;  %v2486_v2 = vunpack.c.l.b16 %v1900_v22  ;;  %v1985_v13 = vld [vmem:[#allocation10 + $0x268] sm:$0xff]  ;;  %v2048_v28 = vld [vmem:[#allocation10 + $0x460] sm:$0xff]  ;;  %v6502_v50 = vsel %vm476_vm1, %v6462_v21, 0.0 }
 0x283   :  { %v6464_v63 = vsel %vm467_vm0, %v18191_v53, %v18119_v61  ;;  %v6499_v55 = vadd.f32 %v6498_v42, %v6497_v0  ;;  %v1895_v31 = vpack.c.bf16 %v1879_v7, %v1879_v7  ;;  %v1903_v15 = vpack.c.bf16 %v1887_v4, %v1887_v4  ;;  %v1989_v21 = vld [vmem:[#allocation10 + $0x288] sm:$0xff]  ;;  %v18444_v53 = vld [vmem:[#allocation10 + $0xfe0] sm:$0xff] }
 0x284   :  { %v2478_v59 = vunpack.c.l.b16 %v1892_v35  ;;  %v2494_v26 = vrot.slane %v2486_v2, 7  ;;  %v14738_v3 = vcombine.low %v1973_v37, %v1977_v58  ;;  %v6465_v25 = vsel %vm467_vm0, %v18198_v43, %v18132_v20  ;;  %v1993_v35 = vld [vmem:[#allocation10 + $0x2a8] sm:$0xff]  ;;  %v18442_v43 = vld [vmem:[#allocation10 + $0xfc0] sm:$0xff] }
 0x285   :  { %5117 = vmatpush1.bf16.msra.mxu1 %v14792_v38  ;;  %5265 = vmatpush1.bf16.msra.mxu0 %v14730_v18  ;;  %v6501_v22 = vadd.f32 %v6500_v10, %v6499_v55  ;;  %v2489_v32 = vunpack.c.l.b16 %v1903_v15  ;;  %v14747_v42 = vcombine.high %v1981_v12, %v1985_v13  ;;  %v6504_v0 = vsel %vm476_vm1, %v6463_v62, 0.0  ;;  %v2056_v55 = vld [vmem:[#allocation10 + $0x4a0] sm:$0xff]  ;;  %v18458_v17 = vld [vmem:[#allocation10 + $0xe08] sm:$0xff] }
 0x286   :  { %5127 = vmatprep.subr.bf16.mxu1 %v14801_v5  ;;  %5266 = vmatprep.subr.bf16.mxu0 %v14739_v45  ;;  %v2495_v7 = vsel %vm467_vm0, %v2494_v26, %v2478_v59  ;;  %v14800_v38 = vcombine.low %v18219_v6, %v18221_v29  ;;  %v14809_v18 = vcombine.high %v2044_v14, %v2048_v28  ;;  %v2481_v4 = vunpack.c.l.b16 %v1895_v31  ;;  %v2052_v29 = vld [vmem:[#allocation10 + $0x480] sm:$0xff] }
 0x287   :  { %v6503_v37 = vadd.f32 %v6502_v50, %v6501_v22  ;;  %v18257_v58 = vpack.c.b16 %v2495_v7, %v2495_v7  ;;  %v2500_v2 = vrot.slane %v2489_v32, 7  ;;  %v19607_v5 = vpack.i.bf16 %v17857_v56, %v17857_v56 }
 0x288   :  { %v6466_v62 = vsel %vm467_vm0, %v18200_v49, %v18137_v11  ;;  %v6506_v10 = vsel %vm476_vm1, %v6464_v63, 0.0  ;;  %v14746_v6 = vcombine.low %v1981_v12, %v1985_v13  ;;  %v18268_v15 = vunpack.c.l.bf16 %v6388_v51  ;;  %v1997_v63 = vld [vmem:[#allocation10 + $0x2c8] sm:$0xff] }
 0x289   :  { %19606 = vst [vmem:[#allocation52_spill] sm:$0xff] %v18257_v58  ;;  %v18262_v45 = vunpack.c.l.bf16 %v19607_v5  ;;  %5267 = vmatpush1.bf16.msra.mxu0 %v14738_v3  ;;  %v6505_v50 = vadd.f32 %v6504_v0, %v6503_v37  ;;  %5119 = vmatmul.mubr.bf16.vlgmr.msra.gmra.mrb[8].mxu1 %v18257_v58  ;;  %v2501_v31 = vsel %vm467_vm0, %v2500_v2, %v2481_v4  ;;  %v6508_v59 = vsel %vm476_vm1, %v6465_v25, 0.0  ;;  %v2001_v3 = vld [vmem:[#allocation10 + $0x2e8] sm:$0xff]  ;;  %v2060_v25 = vld [vmem:[#allocation10 + $0x4c0] sm:$0xff] }
 0x28a   :  { %19609 = vst [vmem:[#allocation54_spill] sm:$0xff] %v18268_v15  ;;  %5268 = vmatprep.subr.bf16.mxu0 %v14747_v42  ;;  %v14755_v56 = vcombine.high %v1989_v21, %v1993_v35  ;;  %5128 = vmatpush1.bf16.msra.mxu1 %v14800_v38  ;;  %v18273_v26 = vpack.c.b16 %v2501_v31, %v2501_v31  ;;  %v6510_v32 = vsel %vm476_vm1, %v6466_v62, 0.0  ;;  %v2064_v0 = vld [vmem:[#allocation10 + $0x4e0] sm:$0xff]  ;;  %v2005_v37 = vld [vmem:[#allocation10 + $0x308] sm:$0xff] }
 0x28b   :  { %19608 = vst [vmem:[#allocation53_spill] sm:$0xff] %v18262_v45  ;;  %v14808_v22 = vcombine.low %v2044_v14, %v2048_v28  ;;  %v6467_v51 = vsel %vm467_vm0, %v18234_v52, %v18176_v16  ;;  %v6507_v12 = vadd.f32 %v6506_v10, %v6505_v50  ;;  %5129 = vmatprep.subr.bf16.mxu1 %v14809_v18  ;;  %v2009_v4 = vld [vmem:[#allocation10 + $0x328] sm:$0xff]  ;;  %v2068_v62 = vld [vmem:[#allocation10 + $0x500] sm:$0xff] }
 0x28c   :  { %19610 = vst [vmem:[#allocation55_spill] sm:$0xff] %v18273_v26  ;;  %v14817_v13 = vcombine.high %v2052_v29, %v2056_v55  ;;  %5159 = vmatprep.mubr.bf16.mxu1 %v18273_v26  ;;  %v14754_v42 = vcombine.low %v1989_v21, %v1993_v35  ;;  %v6468_v14 = vsel %vm467_vm0, %v18268_v15, %v18262_v45  ;;  %v6512_v38 = vsel %vm476_vm1, %v6467_v51, 0.0  ;;  %v2072_v10 = vld [vmem:[#allocation10 + $0x520] sm:$0xff]  ;;  %v2293_v45 = vld [vmem:[#allocation10 + $0xc08] sm:$0xff] }
 0x28d   :  { %5269 = vmatpush1.bf16.msra.mxu0 %v14746_v6  ;;  %v6509_v28 = vadd.f32 %v6508_v59, %v6507_v12  ;;  %v14763_v7 = vcombine.high %v1997_v63, %v2001_v3  ;;  %v14816_v18 = vcombine.low %v2052_v29, %v2056_v55  ;;  %v14825_v5 = vcombine.high %v2060_v25, %v2064_v0  ;;  %v2017_v59 = vld [vmem:[#allocation10 + $0x368] sm:$0xff]  ;;  %v2076_v51 = vld [vmem:[#allocation10 + $0x540] sm:$0xff] }
 0x28e   :  { %5270 = vmatprep.subr.bf16.mxu0 %v14755_v56  ;;  %5130 = vmatpush1.bf16.msra.mxu1 %v14808_v22  ;;  %v6514_v21 = vsel %vm476_vm1, %v6468_v14, 0.0  ;;  %v14762_v35 = vcombine.low %v1997_v63, %v2001_v3  ;;  %v14771_v50 = vcombine.high %v2005_v37, %v2009_v4  ;;  %v14824_v31 = vcombine.low %v2060_v25, %v2064_v0  ;;  %v2013_v56 = vld [vmem:[#allocation10 + $0x348] sm:$0xff]  ;;  %v2080_v12 = vld [vmem:[#allocation10 + $0x560] sm:$0xff] }
 0x28f   :  { %v6511_v2 = vadd.f32 %v6510_v32, %v6509_v28  ;;  %5131 = vmatprep.subr.bf16.mxu1 %v14817_v13  ;;  %v14833_v29 = vcombine.high %v2068_v62, %v2072_v10  ;;  %v14770_v55 = vcombine.low %v2005_v37, %v2009_v4  ;;  %v14779_v13 = vcombine.high %v2013_v56, %v2017_v59  ;;  %v2021_v3 = vld [vmem:[#allocation10 + $0x388] sm:$0xff]  ;;  %v2084_v0 = vld [vmem:[#allocation10 + $0x580] sm:$0xff] }
 0x290   :  { %v14832_v63 = vcombine.low %v2068_v62, %v2072_v10  ;;  %v2025_v32 = vld [vmem:[#allocation10 + $0x3a8] sm:$0xff]  ;;  %v14778_v25 = vcombine.low %v2013_v56, %v2017_v59  ;;  %v2088_v14 = vld [vmem:[#allocation10 + $0x5a0] sm:$0xff] }
 0x291   :  { %5271 = vmatpush1.bf16.msra.mxu0 %v14754_v42  ;;  %v6513_v6 = vadd.f32 %v6512_v38, %v6511_v2  ;;  %v14841_v42 = vcombine.high %v2076_v51, %v2080_v12  ;;  %v14787_v28 = vcombine.high %v2021_v3, %v2025_v32  ;;  %v2029_v38 = vld [vmem:[#allocation10 + $0x3c8] sm:$0xff]  ;;  %v14849_v37 = vcombine.high %v2084_v0, %v2088_v14  ;;  %v2092_v2 = vld [vmem:[#allocation10 + $0x5c0] sm:$0xff] }
 0x292   :  { %5272 = vmatprep.subr.bf16.mxu0 %v14763_v7  ;;  %5132 = vmatpush1.bf16.msra.mxu1 %v14816_v18  ;;  %v14840_v7 = vcombine.low %v2076_v51, %v2080_v12  ;;  %v2033_v18 = vld [vmem:[#allocation10 + $0x3e8] sm:$0xff]  ;;  %v14786_v4 = vcombine.low %v2021_v3, %v2025_v32  ;;  %v2104_v56 = vld [vmem:[#allocation10 + $0x620] sm:$0xff] }
 0x293   :  { %v6515_v22 = vadd.f32 %v6514_v21, %v6513_v6  ;;  %5133 = vmatprep.subr.bf16.mxu1 %v14825_v5  ;;  %v2096_v5 = vld [vmem:[#allocation10 + $0x5e0] sm:$0xff]  ;;  %v14795_v21 = vcombine.high %v2029_v38, %v2033_v18  ;;  %v2037_v62 = vld [vmem:[#allocation10 + $0x408] sm:$0xff] }
 0x294   :  { %v2041_v10 = vld [vmem:[#allocation10 + $0x428] sm:$0xff]  ;;  %v14857_v6 = vcombine.high %v2092_v2, %v2096_v5 }
 0x295   :  { %5273 = vmatpush1.bf16.msra.mxu0 %v14762_v35  ;;  %6516 = vadd.xlane.f32.xlu0 %v6515_v22  ;;  %v14848_v35 = vcombine.low %v2084_v0, %v2088_v14  ;;  %v14803_v59 = vcombine.high %v2037_v62, %v2041_v10  ;;  %v14856_v22 = vcombine.low %v2092_v2, %v2096_v5  ;;  %v18440_v49 = vld [vmem:[#allocation10 + $0xda8] sm:$0xff] }
 0x296   :  { %5274 = vmatprep.subr.bf16.mxu0 %v14771_v50  ;;  %5134 = vmatpush1.bf16.msra.mxu1 %v14824_v31  ;;  %v14794_v50 = vcombine.low %v2029_v38, %v2033_v18  ;;  %v2100_v31 = vld [vmem:[#allocation10 + $0x600] sm:$0xff]  ;;  %v14802_v12 = vcombine.low %v2037_v62, %v2041_v10  ;;  %19633 = vst [vmem:[#allocation65_spill] sm:$0xff] %v18440_v49  ;;  %v18454_v52 = vld [vmem:[#allocation10 + $0xdc8] sm:$0xff] }
 0x297   :  { %5135 = vmatprep.subr.bf16.mxu1 %v14833_v29  ;;  %v2045_v29 = vld [vmem:[#allocation10 + $0x448] sm:$0xff]  ;;  %v14865_v51 = vcombine.high %v2100_v31, %v2104_v56  ;;  %v14864_v32 = vcombine.low %v2100_v31, %v2104_v56 }
 0x298   :  { %v18505_v49 = vld [vmem:[#allocation10 + $0xea8] sm:$0xff] }
 0x299   :  { %5275 = vmatpush1.bf16.msra.mxu0 %v14770_v55  ;;  %v2049_v55 = vld [vmem:[#allocation10 + $0x468] sm:$0xff] }
 0x29a   :  { %5276 = vmatprep.subr.bf16.mxu0 %v14779_v13  ;;  %5136 = vmatpush1.bf16.msra.mxu1 %v14832_v63  ;;  %v2108_v13 = vld [vmem:[#allocation10 + $0x640] sm:$0xff]  ;;  %v14811_v3 = vcombine.high %v2045_v29, %v2049_v55  ;;  %v14810_v14 = vcombine.low %v2045_v29, %v2049_v55 }
 0x29b   :  { %5137 = vmatprep.subr.bf16.mxu1 %v14841_v42  ;;  %v2112_v63 = vld [vmem:[#allocation10 + $0x660] sm:$0xff]  ;;  %v2053_v42 = vld [vmem:[#allocation10 + $0x488] sm:$0xff] }
 0x29c   :  { %v14873_v0 = vcombine.high %v2108_v13, %v2112_v63  ;;  %v14872_v18 = vcombine.low %v2108_v13, %v2112_v63 }
 0x29d   :  { %5277 = vmatpush1.bf16.msra.mxu0 %v14778_v25  ;;  %v2057_v25 = vld [vmem:[#allocation10 + $0x4a8] sm:$0xff] }
 0x29e   :  { %5278 = vmatprep.subr.bf16.mxu0 %v14787_v28  ;;  %5138 = vmatpush1.bf16.msra.mxu1 %v14840_v7  ;;  %v2116_v28 = vld [vmem:[#allocation10 + $0x680] sm:$0xff]  ;;  %v14819_v38 = vcombine.high %v2053_v42, %v2057_v25  ;;  %v14818_v5 = vcombine.low %v2053_v42, %v2057_v25  ;;  %v19611_v42 = vld [vmem:[#allocation31_spill] sm:$0xff] }
 0x29f   :  { %5139 = vmatprep.subr.bf16.mxu1 %v14849_v37  ;;  %v2120_v7 = vld [vmem:[#allocation10 + $0x6a0] sm:$0xff]  ;;  %v2061_v37 = vld [vmem:[#allocation10 + $0x4c8] sm:$0xff]  ;;  %v1886_v25 = vmul.f32 %v17915_v40, %v19611_v42 }
 0x2a0   :  { %v14881_v2 = vcombine.high %v2116_v28, %v2120_v7  ;;  %v14880_v10 = vcombine.low %v2116_v28, %v2120_v7 }
 0x2a1   :  { %5279 = vmatpush1.bf16.msra.mxu0 %v14786_v4  ;;  %v2065_v4 = vld [vmem:[#allocation10 + $0x4e8] sm:$0xff] }
 0x2a2   :  { %5280 = vmatprep.subr.bf16.mxu0 %v14795_v21  ;;  %5140 = vmatpush1.bf16.msra.mxu1 %v14848_v35  ;;  %v2124_v21 = vld [vmem:[#allocation10 + $0x6c0] sm:$0xff]  ;;  %v14827_v62 = vcombine.high %v2061_v37, %v2065_v4  ;;  %v14826_v56 = vcombine.low %v2061_v37, %v2065_v4 }
 0x2a3   :  { %5141 = vmatprep.subr.bf16.mxu1 %v14857_v6  ;;  %v2128_v35 = vld [vmem:[#allocation10 + $0x6e0] sm:$0xff]  ;;  %v2069_v6 = vld [vmem:[#allocation10 + $0x508] sm:$0xff] }
 0x2a4   :  { %v14889_v31 = vcombine.high %v2124_v21, %v2128_v35  ;;  %v14888_v55 = vcombine.low %v2124_v21, %v2128_v35  ;;  %v1902_v21 = vpack.c.bf16 %v1886_v25, %v1886_v25  ;;  %v2101_v25 = vld [vmem:[#allocation10 + $0x608] sm:$0xff] }
 0x2a5   :  { %5281 = vmatpush1.bf16.msra.mxu0 %v14794_v50  ;;  %v2073_v50 = vld [vmem:[#allocation10 + $0x528] sm:$0xff] }
 0x2a6   :  { %5291 = vmatprep.subr.bf16.mxu0 %v14803_v59  ;;  %5142 = vmatpush1.bf16.msra.mxu1 %v14856_v22  ;;  %v2132_v59 = vld [vmem:[#allocation10 + $0x700] sm:$0xff]  ;;  %v14835_v29 = vcombine.high %v2069_v6, %v2073_v50  ;;  %v14834_v63 = vcombine.low %v2069_v6, %v2073_v50  ;;  %v2093_v6 = vld [vmem:[#allocation10 + $0x5c8] sm:$0xff] }
 0x2a7   :  { %5143 = vmatprep.subr.bf16.mxu1 %v14865_v51  ;;  %v2136_v22 = vld [vmem:[#allocation10 + $0x720] sm:$0xff]  ;;  %v2077_v51 = vld [vmem:[#allocation10 + $0x548] sm:$0xff] }
 0x2a8   :  { %5283 = vmatmul.mubr.bf16.vlgmr.msra.gmra.mrb[4].mxu0 %v18257_v58  ;;  %v14897_v13 = vcombine.high %v2132_v59, %v2136_v22  ;;  %v14896_v7 = vcombine.low %v2132_v59, %v2136_v22  ;;  %v2097_v50 = vld [vmem:[#allocation10 + $0x5e8] sm:$0xff] }
 0x2a9   :  { %5292 = vmatpush1.bf16.msra.mxu0 %v14802_v12  ;;  %5323 = vmatprep.mubr.bf16.mxu0 %v18273_v26  ;;  %v2081_v12 = vld [vmem:[#allocation10 + $0x568] sm:$0xff] }
 0x2aa   :  { %5293 = vmatprep.subr.bf16.mxu0 %v14811_v3  ;;  %5144 = vmatpush1.bf16.msra.mxu1 %v14864_v32  ;;  %v2140_v3 = vld [vmem:[#allocation10 + $0x740] sm:$0xff]  ;;  %v14842_v4 = vcombine.low %v2077_v51, %v2081_v12 }
 0x2ab   :  { %5145 = vmatprep.subr.bf16.mxu1 %v14873_v0  ;;  %v2144_v32 = vld [vmem:[#allocation10 + $0x760] sm:$0xff]  ;;  %v14843_v0 = vcombine.high %v2077_v51, %v2081_v12 }
 0x2ac   :  { %v14905_v37 = vcombine.high %v2140_v3, %v2144_v32  ;;  %v19614_v22 = vld [vmem:[#allocation37_spill] sm:$0xff] }
 0x2ad   :  { %5294 = vmatpush1.bf16.msra.mxu0 %v14810_v14  ;;  %v19612_v14 = vld [vmem:[#allocation35_spill] sm:$0xff]  ;;  %v2156_v51 = vld [vmem:[#allocation10 + $0x7c0] sm:$0xff] }
 0x2ae   :  { %5295 = vmatprep.subr.bf16.mxu0 %v14819_v38  ;;  %5146 = vmatpush1.bf16.msra.mxu1 %v14872_v18  ;;  %v1889_v28 = vmul.f32 %v17915_v40, %v19612_v14  ;;  %v2085_v38 = vld [vmem:[#allocation10 + $0x588] sm:$0xff]  ;;  %v2160_v12 = vld [vmem:[#allocation10 + $0x7e0] sm:$0xff] }
 0x2af   :  { %5147 = vmatprep.subr.bf16.mxu1 %v14881_v2  ;;  %v2089_v18 = vld [vmem:[#allocation10 + $0x5a8] sm:$0xff]  ;;  %v2148_v2 = vld [vmem:[#allocation10 + $0x780] sm:$0xff]  ;;  %v14921_v14 = vcombine.high %v2156_v51, %v2160_v12 }
 0x2b0   :  { %v14851_v35 = vcombine.high %v2085_v38, %v2089_v18 }
 0x2b1   :  { %5296 = vmatpush1.bf16.msra.mxu0 %v14818_v5  ;;  %v2152_v5 = vld [vmem:[#allocation10 + $0x7a0] sm:$0xff] }
 0x2b2   :  { %5297 = vmatprep.subr.bf16.mxu0 %v14827_v62  ;;  %5148 = vmatpush1.bf16.msra.mxu1 %v14880_v10  ;;  %v1905_v62 = vpack.c.bf16 %v1889_v28, %v1889_v28  ;;  %v14904_v10 = vcombine.low %v2140_v3, %v2144_v32  ;;  %v14913_v59 = vcombine.high %v2148_v2, %v2152_v5 }
 0x2b3   :  { %5149 = vmatprep.subr.bf16.mxu1 %v14889_v31  ;;  %v19613_v31 = vld [vmem:[#allocation29_spill] sm:$0xff]  ;;  %v14912_v3 = vcombine.low %v2148_v2, %v2152_v5 }
 0x2b4   :  { %v2491_v42 = vunpack.c.l.b16 %v1905_v62  ;;  %v2109_v62 = vld [vmem:[#allocation10 + $0x648] sm:$0xff] }
 0x2b5   :  { %5298 = vmatpush1.bf16.msra.mxu0 %v14826_v56  ;;  %v1878_v56 = vmul.f32 %v17905_v39, %v19613_v31  ;;  %v2164_v31 = vld [vmem:[#allocation10 + $0x800] sm:$0xff] }
 0x2b6   :  { %5299 = vmatprep.subr.bf16.mxu0 %v14835_v29  ;;  %5150 = vmatpush1.bf16.msra.mxu1 %v14888_v55  ;;  %v1881_v29 = vmul.f32 %v17905_v39, %v19614_v22  ;;  %v14850_v55 = vcombine.low %v2085_v38, %v2089_v18  ;;  %v2504_v18 = vrot.slane %v2491_v42, 7  ;;  %v2172_v22 = vld [vmem:[#allocation10 + $0x840] sm:$0xff] }
 0x2b7   :  { %5151 = vmatprep.subr.bf16.mxu1 %v14897_v13  ;;  %v2488_v13 = vunpack.c.l.b16 %v1902_v21  ;;  %v1894_v32 = vpack.c.bf16 %v1878_v56, %v1878_v56  ;;  %v14920_v21 = vcombine.low %v2156_v51, %v2160_v12  ;;  %v2121_v51 = vld [vmem:[#allocation10 + $0x6a8] sm:$0xff] }
 0x2b8   :  { %v1897_v28 = vpack.c.bf16 %v1881_v29, %v1881_v29 }
 0x2b9   :  { %5300 = vmatpush1.bf16.msra.mxu0 %v14834_v63  ;;  %v14859_v63 = vcombine.high %v2093_v6, %v2097_v50 }
 0x2ba   :  { %5301 = vmatprep.subr.bf16.mxu0 %v14843_v0  ;;  %5152 = vmatpush1.bf16.msra.mxu1 %v14896_v7  ;;  %v2105_v0 = vld [vmem:[#allocation10 + $0x628] sm:$0xff]  ;;  %v14858_v7 = vcombine.low %v2093_v6, %v2097_v50  ;;  %v2483_v5 = vunpack.c.l.b16 %v1897_v28  ;;  %v2176_v6 = vld [vmem:[#allocation10 + $0x860] sm:$0xff] }
 0x2bb   :  { %5153 = vmatprep.subr.bf16.mxu1 %v14905_v37  ;;  %v2498_v37 = vrot.slane %v2488_v13, 7  ;;  %v14867_v38 = vcombine.high %v2101_v25, %v2105_v0  ;;  %v2117_v13 = vld [vmem:[#allocation10 + $0x688] sm:$0xff] }
 0x2bc   :  { %v2505_v50 = vsel %vm467_vm0, %v2504_v18, %v2483_v5  ;;  %v2125_v28 = vld [vmem:[#allocation10 + $0x6c8] sm:$0xff]  ;;  %v2196_v5 = vld [vmem:[#allocation10 + $0x900] sm:$0xff] }
 0x2bd   :  { %5302 = vmatpush1.bf16.msra.mxu0 %v14842_v4  ;;  %v2168_v4 = vld [vmem:[#allocation10 + $0x820] sm:$0xff]  ;;  %v18299_v42 = vpack.c.b16 %v2505_v50, %v2505_v50  ;;  %v2145_v50 = vld [vmem:[#allocation10 + $0x768] sm:$0xff] }
 0x2be   :  { %5303 = vmatprep.subr.bf16.mxu0 %v14851_v35  ;;  %5154 = vmatpush1.bf16.msra.mxu1 %v14904_v10  ;;  %v2480_v35 = vunpack.c.l.b16 %v1894_v32  ;;  %v2113_v10 = vld [vmem:[#allocation10 + $0x668] sm:$0xff]  ;;  %v14929_v2 = vcombine.high %v2164_v31, %v2168_v4  ;;  %v2180_v32 = vld [vmem:[#allocation10 + $0x880] sm:$0xff] }
 0x2bf   :  { %5155 = vmatprep.subr.bf16.mxu1 %v14913_v59  ;;  %v14866_v59 = vcombine.low %v2101_v25, %v2105_v0  ;;  %v14875_v29 = vcombine.high %v2109_v62, %v2113_v10  ;;  %19616 = vst [vmem:[#allocation57_spill] sm:$0xff] %v18299_v42  ;;  %v2184_v25 = vld [vmem:[#allocation10 + $0x8a0] sm:$0xff]  ;;  %v14883_v0 = vcombine.high %v2117_v13, %v2121_v51 }
 0x2c0   :  { %v2499_v56 = vsel %vm467_vm0, %v2498_v37, %v2480_v35  ;;  %v14945_v37 = vcombine.high %v2180_v32, %v2184_v25  ;;  %v2133_v35 = vld [vmem:[#allocation10 + $0x708] sm:$0xff] }
 0x2c1   :  { %5304 = vmatpush1.bf16.msra.mxu0 %v14850_v55  ;;  %v14928_v55 = vcombine.low %v2164_v31, %v2168_v4  ;;  %v18297_v12 = vpack.c.b16 %v2499_v56, %v2499_v56  ;;  %v14882_v31 = vcombine.low %v2117_v13, %v2121_v51  ;;  %v2188_v4 = vld [vmem:[#allocation10 + $0x8c0] sm:$0xff] }
 0x2c2   :  { %5305 = vmatprep.subr.bf16.mxu0 %v14859_v63  ;;  %5156 = vmatpush1.bf16.msra.mxu1 %v14912_v3  ;;  %v14937_v63 = vcombine.high %v2172_v22, %v2176_v6  ;;  %v14874_v3 = vcombine.low %v2109_v62, %v2113_v10  ;;  %v2137_v62 = vld [vmem:[#allocation10 + $0x728] sm:$0xff]  ;;  %v2200_v56 = vld [vmem:[#allocation10 + $0x920] sm:$0xff] }
 0x2c3   :  { %5157 = vmatprep.subr.bf16.mxu1 %v14921_v14  ;;  %19615 = vst [vmem:[#allocation56_spill] sm:$0xff] %v18297_v12  ;;  %v14936_v14 = vcombine.low %v2172_v22, %v2176_v6  ;;  %v2141_v6 = vld [vmem:[#allocation10 + $0x748] sm:$0xff]  ;;  %v2204_v13 = vld [vmem:[#allocation10 + $0x940] sm:$0xff] }
 0x2c4   :  { %v2208_v51 = vld [vmem:[#allocation10 + $0x960] sm:$0xff] }
 0x2c5   :  { %5306 = vmatpush1.bf16.msra.mxu0 %v14858_v7  ;;  %v2129_v7 = vld [vmem:[#allocation10 + $0x6e8] sm:$0xff] }
 0x2c6   :  { %5307 = vmatprep.subr.bf16.mxu0 %v14867_v38  ;;  %5158 = vmatpush1.bf16.msra.mxu1 %v14920_v21  ;;  %v2192_v38 = vld [vmem:[#allocation10 + $0x8e0] sm:$0xff]  ;;  %v14891_v18 = vcombine.high %v2125_v28, %v2129_v7  ;;  %v14944_v21 = vcombine.low %v2180_v32, %v2184_v25  ;;  %v2149_v32 = vld [vmem:[#allocation10 + $0x788] sm:$0xff] }
 0x2c7   :  { %5168 = vmatprep.subr.bf16.mxu1 %v14929_v2  ;;  %v14953_v10 = vcombine.high %v2188_v4, %v2192_v38  ;;  %v14890_v2 = vcombine.low %v2125_v28, %v2129_v7  ;;  %v14952_v22 = vcombine.low %v2188_v4, %v2192_v38  ;;  %v2153_v25 = vld [vmem:[#allocation10 + $0x7a8] sm:$0xff]  ;;  %v2212_v28 = vld [vmem:[#allocation10 + $0x980] sm:$0xff] }
 0x2c8   :  { %v2216_v7 = vld [vmem:[#allocation10 + $0x9a0] sm:$0xff]  ;;  %v2157_v4 = vld [vmem:[#allocation10 + $0x7c8] sm:$0xff] }
 0x2c9   :  { %5308 = vmatpush1.bf16.msra.mxu0 %v14866_v59  ;;  %5160 = vmatmul.mubr.bf16.vlgmr.msra.gmra.mrb[8].mxu1 %v18297_v12  ;;  %v14899_v59 = vcombine.high %v2133_v35, %v2137_v62  ;;  %v2161_v38 = vld [vmem:[#allocation10 + $0x7e8] sm:$0xff] }
 0x2ca   :  { %5309 = vmatprep.subr.bf16.mxu0 %v14875_v29  ;;  %5169 = vmatpush1.bf16.msra.mxu1 %v14928_v55  ;;  %v14961_v29 = vcombine.high %v2196_v5, %v2200_v56  ;;  %v14898_v55 = vcombine.low %v2133_v35, %v2137_v62  ;;  %v2220_v35 = vld [vmem:[#allocation10 + $0x9c0] sm:$0xff] }
 0x2cb   :  { %5200 = vmatprep.mubr.bf16.mxu1 %v18299_v42  ;;  %5170 = vmatprep.subr.bf16.mxu1 %v14937_v63  ;;  %v14907_v63 = vcombine.high %v2141_v6, %v2145_v50  ;;  %v2224_v62 = vld [vmem:[#allocation10 + $0x9e0] sm:$0xff] }
 0x2cd   :  { %5310 = vmatpush1.bf16.msra.mxu0 %v14874_v3  ;;  %v14960_v3 = vcombine.low %v2196_v5, %v2200_v56  ;;  %v2165_v5 = vld [vmem:[#allocation10 + $0x808] sm:$0xff] }
 0x2ce   :  { %5311 = vmatprep.subr.bf16.mxu0 %v14883_v0  ;;  %5171 = vmatpush1.bf16.msra.mxu1 %v14936_v14  ;;  %v14969_v0 = vcombine.high %v2204_v13, %v2208_v51  ;;  %v14906_v14 = vcombine.low %v2141_v6, %v2145_v50  ;;  %v2169_v56 = vld [vmem:[#allocation10 + $0x828] sm:$0xff]  ;;  %v2228_v6 = vld [vmem:[#allocation10 + $0xa00] sm:$0xff] }
 0x2cf   :  { %5172 = vmatprep.subr.bf16.mxu1 %v14945_v37  ;;  %v14915_v37 = vcombine.high %v2149_v32, %v2153_v25  ;;  %v2232_v50 = vld [vmem:[#allocation10 + $0xa20] sm:$0xff] }
 0x2d1   :  { %5312 = vmatpush1.bf16.msra.mxu0 %v14882_v31  ;;  %v14968_v31 = vcombine.low %v2204_v13, %v2208_v51  ;;  %v2173_v13 = vld [vmem:[#allocation10 + $0x848] sm:$0xff] }
 0x2d2   :  { %5313 = vmatprep.subr.bf16.mxu0 %v14891_v18  ;;  %5173 = vmatpush1.bf16.msra.mxu1 %v14944_v21  ;;  %v14977_v18 = vcombine.high %v2212_v28, %v2216_v7  ;;  %v14914_v21 = vcombine.low %v2149_v32, %v2153_v25  ;;  %v2177_v51 = vld [vmem:[#allocation10 + $0x868] sm:$0xff]  ;;  %v2236_v32 = vld [vmem:[#allocation10 + $0xa40] sm:$0xff] }
 0x2d3   :  { %5174 = vmatprep.subr.bf16.mxu1 %v14953_v10  ;;  %v14923_v10 = vcombine.high %v2157_v4, %v2161_v38  ;;  %v2240_v25 = vld [vmem:[#allocation10 + $0xa60] sm:$0xff] }
 0x2d5   :  { %5314 = vmatpush1.bf16.msra.mxu0 %v14890_v2  ;;  %v14976_v2 = vcombine.low %v2212_v28, %v2216_v7  ;;  %v2181_v28 = vld [vmem:[#allocation10 + $0x888] sm:$0xff] }
 0x2d6   :  { %5315 = vmatprep.subr.bf16.mxu0 %v14899_v59  ;;  %5175 = vmatpush1.bf16.msra.mxu1 %v14952_v22  ;;  %v14985_v59 = vcombine.high %v2220_v35, %v2224_v62  ;;  %v14922_v22 = vcombine.low %v2157_v4, %v2161_v38  ;;  %v2185_v7 = vld [vmem:[#allocation10 + $0x8a8] sm:$0xff]  ;;  %v2244_v4 = vld [vmem:[#allocation10 + $0xa80] sm:$0xff] }
 0x2d7   :  { %5176 = vmatprep.subr.bf16.mxu1 %v14961_v29  ;;  %v14931_v29 = vcombine.high %v2165_v5, %v2169_v56  ;;  %v2248_v38 = vld [vmem:[#allocation10 + $0xaa0] sm:$0xff] }
 0x2d9   :  { %5316 = vmatpush1.bf16.msra.mxu0 %v14898_v55  ;;  %v14984_v55 = vcombine.low %v2220_v35, %v2224_v62  ;;  %v2189_v35 = vld [vmem:[#allocation10 + $0x8c8] sm:$0xff] }
 0x2da   :  { %5317 = vmatprep.subr.bf16.mxu0 %v14907_v63  ;;  %5177 = vmatpush1.bf16.msra.mxu1 %v14960_v3  ;;  %v14993_v63 = vcombine.high %v2228_v6, %v2232_v50  ;;  %v14930_v3 = vcombine.low %v2165_v5, %v2169_v56  ;;  %v2193_v62 = vld [vmem:[#allocation10 + $0x8e8] sm:$0xff]  ;;  %v2252_v5 = vld [vmem:[#allocation10 + $0xac0] sm:$0xff] }
 0x2db   :  { %5178 = vmatprep.subr.bf16.mxu1 %v14969_v0  ;;  %v14939_v0 = vcombine.high %v2173_v13, %v2177_v51  ;;  %v2256_v56 = vld [vmem:[#allocation10 + $0xae0] sm:$0xff] }
 0x2dd   :  { %5318 = vmatpush1.bf16.msra.mxu0 %v14906_v14  ;;  %v14992_v14 = vcombine.low %v2228_v6, %v2232_v50  ;;  %v2197_v6 = vld [vmem:[#allocation10 + $0x908] sm:$0xff] }
 0x2de   :  { %5319 = vmatprep.subr.bf16.mxu0 %v14915_v37  ;;  %5179 = vmatpush1.bf16.msra.mxu1 %v14968_v31  ;;  %v15001_v37 = vcombine.high %v2236_v32, %v2240_v25  ;;  %v14938_v31 = vcombine.low %v2173_v13, %v2177_v51  ;;  %v2201_v50 = vld [vmem:[#allocation10 + $0x928] sm:$0xff]  ;;  %v2260_v13 = vld [vmem:[#allocation10 + $0xb00] sm:$0xff] }
 0x2df   :  { %5180 = vmatprep.subr.bf16.mxu1 %v14977_v18  ;;  %v14947_v18 = vcombine.high %v2181_v28, %v2185_v7  ;;  %v2264_v51 = vld [vmem:[#allocation10 + $0xb20] sm:$0xff] }
 0x2e1   :  { %5320 = vmatpush1.bf16.msra.mxu0 %v14914_v21  ;;  %v15000_v21 = vcombine.low %v2236_v32, %v2240_v25  ;;  %v2205_v32 = vld [vmem:[#allocation10 + $0x948] sm:$0xff] }
 0x2e2   :  { %5321 = vmatprep.subr.bf16.mxu0 %v14923_v10  ;;  %5181 = vmatpush1.bf16.msra.mxu1 %v14976_v2  ;;  %v15009_v10 = vcombine.high %v2244_v4, %v2248_v38  ;;  %v14946_v2 = vcombine.low %v2181_v28, %v2185_v7  ;;  %v2209_v25 = vld [vmem:[#allocation10 + $0x968] sm:$0xff]  ;;  %v2268_v28 = vld [vmem:[#allocation10 + $0xb40] sm:$0xff] }
 0x2e3   :  { %5182 = vmatprep.subr.bf16.mxu1 %v14985_v59  ;;  %v14955_v59 = vcombine.high %v2189_v35, %v2193_v62  ;;  %v2272_v7 = vld [vmem:[#allocation10 + $0xb60] sm:$0xff] }
 0x2e5   :  { %5322 = vmatpush1.bf16.msra.mxu0 %v14922_v22  ;;  %v15008_v22 = vcombine.low %v2244_v4, %v2248_v38  ;;  %v14971_v4 = vcombine.high %v2205_v32, %v2209_v25  ;;  %v19618_v38 = vld [vmem:[#allocation39_spill] sm:$0xff] }
 0x2e6   :  { %5332 = vmatprep.subr.bf16.mxu0 %v14931_v29  ;;  %5183 = vmatpush1.bf16.msra.mxu1 %v14984_v55  ;;  %v15017_v29 = vcombine.high %v2252_v5, %v2256_v56  ;;  %v14954_v55 = vcombine.low %v2189_v35, %v2193_v62  ;;  %v2213_v35 = vld [vmem:[#allocation10 + $0x988] sm:$0xff] }
 0x2e7   :  { %5184 = vmatprep.subr.bf16.mxu1 %v14993_v63  ;;  %v14963_v63 = vcombine.high %v2197_v6, %v2201_v50  ;;  %v2217_v62 = vld [vmem:[#allocation10 + $0x9a8] sm:$0xff] }
 0x2e8   :  { %5324 = vmatmul.mubr.bf16.vlgmr.msra.gmra.mrb[4].mxu0 %v18297_v12  ;;  %v2233_v12 = vld [vmem:[#allocation10 + $0xa28] sm:$0xff] }
 0x2e9   :  { %5333 = vmatpush1.bf16.msra.mxu0 %v14930_v3  ;;  %5364 = vmatprep.mubr.bf16.mxu0 %v18299_v42  ;;  %v15016_v3 = vcombine.low %v2252_v5, %v2256_v56  ;;  %v2276_v5 = vld [vmem:[#allocation10 + $0xb80] sm:$0xff]  ;;  %v2229_v42 = vld [vmem:[#allocation10 + $0xa08] sm:$0xff] }
 0x2ea   :  { %5334 = vmatprep.subr.bf16.mxu0 %v14939_v0  ;;  %5185 = vmatpush1.bf16.msra.mxu1 %v14992_v14  ;;  %v15025_v0 = vcombine.high %v2260_v13, %v2264_v51  ;;  %v14962_v14 = vcombine.low %v2197_v6, %v2201_v50  ;;  %v2280_v56 = vld [vmem:[#allocation10 + $0xba0] sm:$0xff] }
 0x2eb   :  { %5186 = vmatprep.subr.bf16.mxu1 %v15001_v37  ;;  %v19617_v37 = vld [vmem:[#allocation34_spill] sm:$0xff] }
 0x2ed   :  { %5335 = vmatpush1.bf16.msra.mxu0 %v14938_v31  ;;  %v1888_v31 = vmul.f32 %v17915_v40, %v19617_v37  ;;  %v19619_v37 = vld [vmem:[#allocation36_spill] sm:$0xff] }
 0x2ee   :  { %5336 = vmatprep.subr.bf16.mxu0 %v14947_v18  ;;  %5187 = vmatpush1.bf16.msra.mxu1 %v15000_v21  ;;  %v1891_v18 = vmul.f32 %v17915_v40, %v19618_v38  ;;  %v15024_v21 = vcombine.low %v2260_v13, %v2264_v51  ;;  %v1880_v13 = vmul.f32 %v17905_v39, %v19619_v37  ;;  %v2288_v38 = vld [vmem:[#allocation10 + $0xbe0] sm:$0xff] }
 0x2ef   :  { %5188 = vmatprep.subr.bf16.mxu1 %v15009_v10  ;;  %v15033_v10 = vcombine.high %v2268_v28, %v2272_v7  ;;  %v16224_v50 = vpop.f32.mrb[0].mxu1  ;;  %v15040_v37 = vcombine.low %v2276_v5, %v2280_v56 }
 0x2f0   :  { %v1907_v6 = vpack.c.bf16 %v1891_v18, %v1891_v18  ;;  %v16225_v51 = vpop.f32.mrb[1].mxu1 }
 0x2f1   :  { %5337 = vmatpush1.bf16.msra.mxu0 %v14946_v2  ;;  %v14970_v2 = vcombine.low %v2205_v32, %v2209_v25  ;;  %v18313_v25 = vadd.f32 %v16225_v51, %v16224_v50  ;;  %v2292_v51 = vld [vmem:[#allocation10 + $0xc00] sm:$0xff] }
 0x2f2   :  { %5338 = vmatprep.subr.bf16.mxu0 %v14955_v59  ;;  %5189 = vmatpush1.bf16.msra.mxu1 %v15008_v22  ;;  %v1904_v59 = vpack.c.bf16 %v1888_v31, %v1888_v31  ;;  %v14979_v22 = vcombine.high %v2213_v35, %v2217_v62  ;;  %v14978_v31 = vcombine.low %v2213_v35, %v2217_v62  ;;  %v2296_v35 = vld [vmem:[#allocation10 + $0xc20] sm:$0xff] }
 0x2f3   :  { %5190 = vmatprep.subr.bf16.mxu1 %v15017_v29  ;;  %v15032_v29 = vcombine.low %v2268_v28, %v2272_v7  ;;  %v14995_v62 = vcombine.high %v2229_v42, %v2233_v12 }
 0x2f4   :  { %v2490_v18 = vunpack.c.l.b16 %v1904_v59 }
 0x2f5   :  { %5339 = vmatpush1.bf16.msra.mxu0 %v14954_v55  ;;  %v2221_v55 = vld [vmem:[#allocation10 + $0x9c8] sm:$0xff] }
 0x2f6   :  { %5340 = vmatprep.subr.bf16.mxu0 %v14963_v63  ;;  %5191 = vmatpush1.bf16.msra.mxu1 %v15016_v3  ;;  %v2225_v63 = vld [vmem:[#allocation10 + $0x9e8] sm:$0xff]  ;;  %v15041_v3 = vcombine.high %v2276_v5, %v2280_v56  ;;  %v15057_v5 = vcombine.high %v2292_v51, %v2296_v35 }
 0x2f7   :  { %5192 = vmatprep.subr.bf16.mxu1 %v15025_v0  ;;  %v19620_v0 = vld [vmem:[#allocation41_spill] sm:$0xff]  ;;  %v14987_v7 = vcombine.high %v2221_v55, %v2225_v63  ;;  %v14986_v50 = vcombine.low %v2221_v55, %v2225_v63 }
 0x2f8   :  { %v1883_v32 = vmul.f32 %v17905_v39, %v19620_v0  ;;  %v2304_v55 = vld [vmem:[#allocation10 + $0xc60] sm:$0xff] }
 0x2f9   :  { %5341 = vmatpush1.bf16.msra.mxu0 %v14962_v14  ;;  %v16227_v14 = vpop.f32.mrb[2].mxu1 }
 0x2fa   :  { %5342 = vmatprep.subr.bf16.mxu0 %v14971_v4  ;;  %5193 = vmatpush1.bf16.msra.mxu1 %v15024_v21  ;;  %v2284_v4 = vld [vmem:[#allocation10 + $0xbc0] sm:$0xff]  ;;  %v16228_v28 = vpop.f32.mrb[3].mxu1  ;;  %v2493_v21 = vunpack.c.l.b16 %v1907_v6  ;;  %v1899_v0 = vpack.c.bf16 %v1883_v32, %v1883_v32  ;;  %v2237_v6 = vld [vmem:[#allocation10 + $0xa48] sm:$0xff] }
 0x2fb   :  { %5194 = vmatprep.subr.bf16.mxu1 %v15033_v10  ;;  %v1896_v10 = vpack.c.bf16 %v1880_v13, %v1880_v13  ;;  %v15049_v26 = vcombine.high %v2284_v4, %v2288_v38  ;;  %v2300_v32 = vld [vmem:[#allocation10 + $0xc40] sm:$0xff]  ;;  %v2245_v28 = vld [vmem:[#allocation10 + $0xa88] sm:$0xff] }
 0x2fc   :  { %v2508_v59 = vrot.slane %v2493_v21, 7  ;;  %v2485_v56 = vunpack.c.l.b16 %v1899_v0  ;;  %v2253_v0 = vld [vmem:[#allocation10 + $0xac8] sm:$0xff] }
 0x2fd   :  { %5343 = vmatpush1.bf16.msra.mxu0 %v14970_v2  ;;  %v2502_v2 = vrot.slane %v2490_v18, 7  ;;  %v2482_v14 = vunpack.c.l.b16 %v1896_v10  ;;  %v15056_v18 = vcombine.low %v2292_v51, %v2296_v35  ;;  %v15064_v10 = vcombine.low %v2300_v32, %v2304_v55  ;;  %v2316_v35 = vld [vmem:[#allocation10 + $0xcc0] sm:$0xff] }
 0x2fe   :  { %5344 = vmatprep.subr.bf16.mxu0 %v14979_v22  ;;  %5195 = vmatpush1.bf16.msra.mxu1 %v15032_v29  ;;  %v15048_v22 = vcombine.low %v2284_v4, %v2288_v38  ;;  %v2241_v29 = vld [vmem:[#allocation10 + $0xa68] sm:$0xff]  ;;  %v2509_v63 = vsel %vm467_vm0, %v2508_v59, %v2485_v56  ;;  %v2324_v56 = vld [vmem:[#allocation10 + $0xd00] sm:$0xff] }
 0x2ff   :  { %5196 = vmatprep.subr.bf16.mxu1 %v15041_v3  ;;  %v2503_v13 = vsel %vm467_vm0, %v2502_v2, %v2482_v14  ;;  %v14994_v3 = vcombine.low %v2229_v42, %v2233_v12  ;;  %v2249_v4 = vld [vmem:[#allocation10 + $0xaa8] sm:$0xff]  ;;  %v15002_v21 = vcombine.low %v2237_v6, %v2241_v29  ;;  %v2312_v12 = vld [vmem:[#allocation10 + $0xca0] sm:$0xff] }
 0x300   :  { %v18317_v38 = vpack.c.b16 %v2503_v13, %v2503_v13  ;;  %v15011_v42 = vcombine.high %v2245_v28, %v2249_v4  ;;  %v15010_v51 = vcombine.low %v2245_v28, %v2249_v4  ;;  %v2261_v14 = vld [vmem:[#allocation10 + $0xb08] sm:$0xff]  ;;  %v2328_v13 = vld [vmem:[#allocation10 + $0xd20] sm:$0xff] }
 0x301   :  { %5345 = vmatpush1.bf16.msra.mxu0 %v14978_v31  ;;  %v15003_v31 = vcombine.high %v2237_v6, %v2241_v29  ;;  %v2265_v6 = vld [vmem:[#allocation10 + $0xb28] sm:$0xff] }
 0x302   :  { %5346 = vmatprep.subr.bf16.mxu0 %v14987_v7  ;;  %5197 = vmatpush1.bf16.msra.mxu1 %v15040_v37  ;;  %19621 = vst [vmem:[#allocation71_spill] sm:$0xff] %v18317_v38  ;;  %v18319_v7 = vpack.c.b16 %v2509_v63, %v2509_v63  ;;  %v2308_v37 = vld [vmem:[#allocation10 + $0xc80] sm:$0xff]  ;;  %v2273_v63 = vld [vmem:[#allocation10 + $0xb68] sm:$0xff]  ;;  %v15026_v4 = vcombine.low %v2261_v14, %v2265_v6 }
 0x303   :  { %5198 = vmatprep.subr.bf16.mxu1 %v15049_v26  ;;  %v15065_v26 = vcombine.high %v2300_v32, %v2304_v55  ;;  %v15073_v2 = vcombine.high %v2308_v37, %v2312_v12  ;;  %v2269_v55 = vld [vmem:[#allocation10 + $0xb48] sm:$0xff] }
 0x304   :  { %19622 = vst [vmem:[#allocation72_spill] sm:$0xff] %v18319_v7 }
 0x305   :  { %5347 = vmatpush1.bf16.msra.mxu0 %v14986_v50  ;;  %v2257_v50 = vld [vmem:[#allocation10 + $0xae8] sm:$0xff] }
 0x306   :  { %5348 = vmatprep.subr.bf16.mxu0 %v14995_v62  ;;  %5199 = vmatpush1.bf16.msra.mxu1 %v15048_v22  ;;  %v2320_v62 = vld [vmem:[#allocation10 + $0xce0] sm:$0xff]  ;;  %v15019_v59 = vcombine.high %v2253_v0, %v2257_v50  ;;  %v15072_v22 = vcombine.low %v2308_v37, %v2312_v12  ;;  %v15035_v12 = vcombine.high %v2269_v55, %v2273_v63 }
 0x307   :  { %5209 = vmatprep.subr.bf16.mxu1 %v15057_v5  ;;  %v15081_v29 = vcombine.high %v2316_v35, %v2320_v62  ;;  %v15018_v5 = vcombine.low %v2253_v0, %v2257_v50  ;;  %v15080_v32 = vcombine.low %v2316_v35, %v2320_v62  ;;  %v18326_v37 = vld [vmem:[#allocation13] sm:$0x7]  ;;  %v2281_v0 = vld [vmem:[#allocation10 + $0xba8] sm:$0xff]  ;;  %v15034_v62 = vcombine.low %v2269_v55, %v2273_v63 }
 0x308   :  { %19625 = vst [vmem:[#allocation59_spill] sm:$0xff] %v18326_v37  ;;  %v19626_v50 = vld [vmem:[#allocation38_spill] sm:$0xff]  ;;  %v2348_v55 = vld [vmem:[#allocation10 + $0xdc0] sm:$0xff] }
 0x309   :  { %5349 = vmatpush1.bf16.msra.mxu0 %v14994_v3  ;;  %5201 = vmatmul.mubr.bf16.vlgmr.msra.gmra.mrb[8].mxu1 %v18317_v38  ;;  %v15027_v3 = vcombine.high %v2261_v14, %v2265_v6  ;;  %v2352_v63 = vld [vmem:[#allocation10 + $0xde0] sm:$0xff] }
 0x30a   :  { %5350 = vmatprep.subr.bf16.mxu0 %v15003_v31  ;;  %5210 = vmatpush1.bf16.msra.mxu1 %v15056_v18  ;;  %v15089_v31 = vcombine.high %v2324_v56, %v2328_v13  ;;  %v19623_v18 = vld [vmem:[#allocation44_spill] sm:$0xff] }
 0x30b   :  { %5241 = vmatprep.mubr.bf16.mxu1 %v18319_v7  ;;  %5211 = vmatprep.subr.bf16.mxu1 %v15065_v26  ;;  %v18324_v28 = vsub.s32 2, %v19623_v18  ;;  %v2332_v26 = vld [vmem:[#allocation10 + $0xd40] sm:$0xff] }
 0x30d   :  { %5351 = vmatpush1.bf16.msra.mxu0 %v15002_v21  ;;  %19624 = vst [vmem:[#allocation58_spill] sm:$0xff] %v18324_v28  ;;  %v2336_v21 = vld [vmem:[#allocation10 + $0xd60] sm:$0xff]  ;;  %v701_v35 = vrot.slane %v18326_v37, %v18324_v28  ;;  %v18484_v37 = vld [vmem:[#allocation10 + $0xe68] sm:$0xff] }
 0x30e   :  { %5352 = vmatprep.subr.bf16.mxu0 %v15011_v42  ;;  %5212 = vmatpush1.bf16.msra.mxu1 %v15064_v10  ;;  %v15088_v42 = vcombine.low %v2324_v56, %v2328_v13  ;;  %v2277_v10 = vld [vmem:[#allocation10 + $0xb88] sm:$0xff]  ;;  %v19627_v28 = vld [vmem:[#allocation40_spill] sm:$0xff] }
 0x30f   :  { %5213 = vmatprep.subr.bf16.mxu1 %v15073_v2  ;;  %v1890_v2 = vmul.f32 %v17915_v40, %v19626_v50  ;;  %v15043_v14 = vcombine.high %v2277_v10, %v2281_v0  ;;  %v16246_v6 = vpop.f32.mrb[4].mxu1  ;;  %v2289_v56 = vld [vmem:[#allocation10 + $0xbe8] sm:$0xff] }
 0x311   :  { %5353 = vmatpush1.bf16.msra.mxu0 %v15010_v51  ;;  %v15097_v51 = vcombine.high %v2332_v26, %v2336_v21  ;;  %v1906_v13 = vpack.c.bf16 %v1890_v2, %v1890_v2 }
 0x312   :  { %5354 = vmatprep.subr.bf16.mxu0 %v15019_v59  ;;  %5214 = vmatpush1.bf16.msra.mxu1 %v15072_v22  ;;  %v2340_v59 = vld [vmem:[#allocation10 + $0xd80] sm:$0xff] }
 0x313   :  { %5215 = vmatprep.subr.bf16.mxu1 %v15081_v29  ;;  %v2344_v22 = vld [vmem:[#allocation10 + $0xda0] sm:$0xff]  ;;  %v15096_v29 = vcombine.low %v2332_v26, %v2336_v21 }
 0x314   :  { %v15105_v40 = vcombine.high %v2340_v59, %v2344_v22 }
 0x315   :  { %5355 = vmatpush1.bf16.msra.mxu0 %v15018_v5  ;;  %v2285_v5 = vld [vmem:[#allocation10 + $0xbc8] sm:$0xff] }
 0x316   :  { %5356 = vmatprep.subr.bf16.mxu0 %v15027_v3  ;;  %5216 = vmatpush1.bf16.msra.mxu1 %v15080_v32  ;;  %v16247_v3 = vpop.f32.mrb[5].mxu1  ;;  %v1366_v32 = vadd.f32 %v18313_v25, %v701_v35  ;;  %v15051_v21 = vcombine.high %v2285_v5, %v2289_v56  ;;  %v2297_v25 = vld [vmem:[#allocation10 + $0xc28] sm:$0xff]  ;;  %v2492_v35 = vunpack.c.l.b16 %v1906_v13 }
 0x317   :  { %5217 = vmatprep.subr.bf16.mxu1 %v15089_v31  ;;  %v16248_v31 = vadd.f32 %v16247_v3, %v16246_v6  ;;  %v16249_v50 = vpop.f32.mrb[6].mxu1  ;;  %v18339_v6 = vld [vmem:[#allocation10 + $0xe20] sm:$0xff]  ;;  %v18347_v13 = vld [vmem:[#allocation10 + $0xc68] sm:$0xff] }
 0x318   :  { %v16250_v26 = vpop.f32.mrb[7].mxu1  ;;  %v18341_v3 = vld [vmem:[#allocation10 + $0xe40] sm:$0xff]  ;;  %v18355_v50 = vld [vmem:[#allocation10 + $0xc88] sm:$0xff] }
 0x319   :  { %5357 = vmatpush1.bf16.msra.mxu0 %v15026_v4  ;;  %v15042_v4 = vcombine.low %v2277_v10, %v2281_v0  ;;  %v18335_v2 = vadd.f32 %v16248_v31, %v1366_v32  ;;  %v15050_v10 = vcombine.low %v2285_v5, %v2289_v56  ;;  %v18337_v0 = vld [vmem:[#allocation10 + $0xe00] sm:$0xff] }
 0x31a   :  { %5358 = vmatprep.subr.bf16.mxu0 %v15035_v12  ;;  %5218 = vmatpush1.bf16.msra.mxu1 %v15088_v42  ;;  %v1882_v12 = vmul.f32 %v17905_v39, %v19627_v28  ;;  %v16944_v42 = vmov 1966171168   ;;  %v15121_v56 = vcombine.high %v18337_v0, %v18339_v6  ;;  %v18351_v32 = vld [vmem:[#allocation10 + $0xe80] sm:$0xff] }
 0x31b   :  { %5219 = vmatprep.subr.bf16.mxu1 %v15097_v51  ;;  %v1416_v58 = vunpack.c.l.s4 %v16944_v42  ;;  %v15104_v51 = vcombine.low %v2340_v59, %v2344_v22  ;;  %v18343_v59 = vld [vmem:[#allocation10 + $0xe60] sm:$0xff]  ;;  %v18345_v22 = vld [vmem:[#allocation10 + $0xc48] sm:$0xff] }
 0x31c   :  { %v1898_v39 = vpack.c.bf16 %v1882_v12, %v1882_v12  ;;  %v18353_v31 = vld [vmem:[#allocation10 + $0xea0] sm:$0xff]  ;;  %v15120_v12 = vcombine.low %v18337_v0, %v18339_v6 }
 0x31d   :  { %5359 = vmatpush1.bf16.msra.mxu0 %v15034_v62  ;;  %v15113_v62 = vcombine.high %v2348_v55, %v2352_v63  ;;  %v1417_v28 = vunpack.c.0.s8 %v1416_v58  ;;  %v15058_v58 = vcombine.low %v2293_v45, %v2297_v25  ;;  %v18368_v26 = vld [vmem:[#allocation10 + $0xec0] sm:$0xff] }
 0x31e   :  { %5360 = vmatprep.subr.bf16.mxu0 %v15043_v14  ;;  %5220 = vmatpush1.bf16.msra.mxu1 %v15096_v29  ;;  %v15059_v14 = vcombine.high %v2293_v45, %v2297_v25  ;;  %v15112_v29 = vcombine.low %v2348_v55, %v2352_v63  ;;  %v2484_v55 = vunpack.c.l.b16 %v1898_v39  ;;  %v15067_v45 = vcombine.high %v18345_v22, %v18347_v13  ;;  %v18382_v0 = vld [vmem:[#allocation10 + $0xf00] sm:$0xff] }
 0x31f   :  { %5221 = vmatprep.subr.bf16.mxu1 %v15105_v40  ;;  %v2506_v40 = vrot.slane %v2492_v35, 7  ;;  %v18360_v63 = vsub.s32 %v1417_v28, %v19623_v18  ;;  %v15129_v35 = vcombine.high %v18341_v3, %v18343_v59  ;;  %v18384_v6 = vld [vmem:[#allocation10 + $0xf20] sm:$0xff]  ;;  %v18427_v28 = vld [vmem:[#allocation10 + $0xd88] sm:$0xff] }
 0x320   :  { %v18411_v42 = vld [vmem:[#allocation10 + $0xf60] sm:$0xff] }
 0x321   :  { %5361 = vmatpush1.bf16.msra.mxu0 %v15042_v4  ;;  %v18357_v4 = vld [vmem:[#allocation10 + $0xca8] sm:$0xff]  ;;  %v2507_v39 = vsel %vm467_vm0, %v2506_v40, %v2484_v55  ;;  %v18402_v40 = vld [vmem:[#allocation10 + $0xf40] sm:$0xff] }
 0x322   :  { %5362 = vmatprep.subr.bf16.mxu0 %v15051_v21  ;;  %5222 = vmatpush1.bf16.msra.mxu1 %v15104_v51  ;;  %v6517_v5 = vpop.xlane.xlu0 %6516  ;;  %v18370_v21 = vld [vmem:[#allocation10 + $0xee0] sm:$0xff]  ;;  %v18372_v51 = vld [vmem:[#allocation10 + $0xcc8] sm:$0xff]  ;;  %v15075_v55 = vcombine.high %v18355_v50, %v18357_v4  ;;  %v18429_v15 = vpack.c.b16 %v2507_v39, %v2507_v39 }
 0x323   :  { %5223 = vmatprep.subr.bf16.mxu1 %v15113_v62  ;;  %v18374_v25 = vmul.f32 0.00048828125, %v6517_v5  ;;  %v15066_v62 = vcombine.low %v18345_v22, %v18347_v13  ;;  %v18394_v22 = vld [vmem:[#allocation10 + $0xd28] sm:$0xff]  ;;  %v18397_v13 = vsub.s32 0, %v19623_v18  ;;  %v18400_v5 = vsub.s32 1, %v19623_v18 }
 0x324   :  { %v18415_v18 = vld [vmem:[#allocation10 + $0xd68] sm:$0xff]  ;;  %19632 = vst [vmem:[#allocation64_spill] sm:$0xff] %v18429_v15 }
 0x325   :  { %5363 = vmatpush1.bf16.msra.mxu0 %v15050_v10  ;;  %v18380_v10 = vld [vmem:[#allocation10 + $0xce8] sm:$0xff]  ;;  %19628 = vst [vmem:[#allocation60_spill] sm:$0xff] %v18397_v13  ;;  %19629 = vst [vmem:[#allocation61_spill] sm:$0xff] %v18400_v5  ;;  %v18470_v5 = vld [vmem:[#allocation10 + $0x10] sm:$0xff]  ;;  %v18584_v39 = vsub.f32 %v18073_v24, %v18374_v25  ;;  %v19646_v24 = vcombine.low %v18368_v26, %v18370_v21 }
 0x326   :  { %5373 = vmatprep.subr.bf16.mxu0 %v15059_v14  ;;  %5224 = vmatpush1.bf16.msra.mxu1 %v15112_v29  ;;  %v15137_v14 = vcombine.high %v18351_v32, %v18353_v31  ;;  %v18392_v29 = vld [vmem:[#allocation10 + $0xd08] sm:$0xff]  ;;  %v15083_v16 = vcombine.high %v18372_v51, %v18380_v10  ;;  %v18472_v13 = vld [vmem:[#allocation10 + $0x30] sm:$0xff] }
 0x327   :  { %5225 = vmatprep.subr.bf16.mxu1 %v15121_v56  ;;  %v15074_v56 = vcombine.low %v18355_v50, %v18357_v4  ;;  %v18423_v50 = vld [vmem:[#allocation10 + $0xf80] sm:$0xff]  ;;  %v18456_v15 = vld [vmem:[#allocation10 + $0xde8] sm:$0xff]  ;;  %19642 = vst [vmem:[#allocation28_spill] sm:$0xff] %v18584_v39 }
 0x328   :  { %5365 = vmatmul.mubr.bf16.vlgmr.msra.gmra.mrb[4].mxu0 %v18317_v38  ;;  %v18413_v38 = vld [vmem:[#allocation10 + $0xd48] sm:$0xff]  ;;  %19630 = vst [vmem:[#allocation62_spill] sm:$0xff] %v18423_v50  ;;  %v18425_v4 = vld [vmem:[#allocation10 + $0xfa0] sm:$0xff] }
 0x329   :  { %5374 = vmatpush1.bf16.msra.mxu0 %v15058_v58  ;;  %5405 = vmatprep.mubr.bf16.mxu0 %v18319_v7  ;;  %19631 = vst [vmem:[#allocation63_spill] sm:$0xff] %v18425_v4  ;;  %v18468_v7 = vld [vmem:[#allocation10 + $0xe28] sm:$0xff]  ;;  %v18501_v4 = vld [vmem:[#allocation10 + $0x70] sm:$0xff] }
 0x32a   :  { %5375 = vmatprep.subr.bf16.mxu0 %v15067_v45  ;;  %5226 = vmatpush1.bf16.msra.mxu1 %v15120_v12  ;;  %v18432_v45 = vrot.slane %v18374_v25, 1  ;;  %v18482_v58 = vld [vmem:[#allocation10 + $0xe48] sm:$0xff]  ;;  %v19652_v12 = vcombine.high %v18413_v38, %v18415_v18 }
 0x32b   :  { %5227 = vmatprep.subr.bf16.mxu1 %v15129_v35  ;;  %v18503_v50 = vld [vmem:[#allocation10 + $0xe88] sm:$0xff] }
 0x32d   :  { %5376 = vmatpush1.bf16.msra.mxu0 %v15066_v62  ;;  %v18493_v62 = vsub.f32 %v18038_v8, %v18432_v45  ;;  %v18509_v8 = vsub.f32 %v18043_v60, %v18432_v45  ;;  %v19636_v60 = vcombine.low %v18351_v32, %v18353_v31  ;;  %v18557_v32 = vsub.f32 %v18052_v36, %v18374_v25 }
 0x32e   :  { %5377 = vmatprep.subr.bf16.mxu0 %v15075_v55  ;;  %v19634_v55 = vcombine.low %v18341_v3, %v18343_v59  ;;  %v18513_v3 = vsub.f32 %v18080_v23, %v18432_v45  ;;  %v18529_v59 = vsub.f32 %v18098_v30, %v18432_v45  ;;  %v18546_v30 = vsub.f32 %v18033_v19, %v18374_v25 }
 0x32f   :  { %19635 = vst [vmem:[#allocation66_spill] sm:$0xff] %v18509_v8  ;;  %v6573_v19 = vmul.f32 %v18509_v8, %v18509_v8  ;;  %v18576_v36 = vsub.f32 %v18057_v47, %v18374_v25  ;;  %v18596_v47 = vsub.f32 %v18151_v1, %v18432_v45  ;;  %v6558_v23 = vmul.f32 %v18557_v32, %v18557_v32 }
 0x330   :  { %5228 = vmatpush1.bf16.msra.mxu1 %v19634_v55  ;;  %19637 = vst [vmem:[#allocation67_spill] sm:$0xff] %v18546_v30  ;;  %v6574_v31 = vmul.f32 %v18513_v3, %v18513_v3  ;;  %v6557_v1 = vmul.f32 %v18546_v30, %v18546_v30  ;;  %v1324_v30 = vpop.f32.mrb[0].mxu0 }
 0x331   :  { %5229 = vmatprep.subr.bf16.mxu1 %v15137_v14  ;;  %5378 = vmatpush1.bf16.msra.mxu0 %v15074_v56  ;;  %v6572_v56 = vmul.f32 %v18493_v62, %v18493_v62  ;;  %v19638_v14 = vcombine.high %v18368_v26, %v18370_v21  ;;  %19644 = vst [vmem:[#allocation32_spill] sm:$0xff] %v18596_v47  ;;  %v6622_v55 = vrot.slane %v6573_v19, 7 }
 0x332   :  { %5379 = vmatprep.subr.bf16.mxu0 %v15083_v16  ;;  %v18542_v16 = vsub.f32 %v18028_v33, %v18374_v25  ;;  %v18561_v33 = vsub.f32 %v18121_v41, %v18432_v45  ;;  %v18580_v41 = vsub.f32 %v18068_v9, %v18374_v25  ;;  %v6575_v9 = vmul.f32 %v18529_v59, %v18529_v59 }
 0x333   :  { %v6624_v26 = vrot.slane %v6574_v31, 7  ;;  %v19648_v21 = vcombine.high %v18382_v0, %v18384_v6  ;;  %v18635_v19 = vsub.f32 %v18119_v61, %v18374_v25  ;;  %v19649_v31 = vcombine.low %v18392_v29, %v18394_v22 }
 0x334   :  { %5230 = vmatpush1.bf16.msra.mxu1 %v19636_v60  ;;  %19639 = vst [vmem:[#allocation68_spill] sm:$0xff] %v18561_v33  ;;  %v18569_v60 = vrot.slane %v18335_v2, %v18360_v63  ;;  %19641 = vst [vmem:[#allocation69_spill] sm:$0xff] %v18580_v41  ;;  %v18588_v2 = vsub.f32 %v18078_v54, %v18374_v25  ;;  %v18608_v54 = vsub.f32 %v18157_v48, %v18432_v45 }
 0x335   :  { %5231 = vmatprep.subr.bf16.mxu1 %v19638_v14  ;;  %v19640_v14 = vcombine.low %v18372_v51, %v18380_v10  ;;  %v18592_v51 = vsub.f32 %v18091_v44, %v18374_v25  ;;  %v19645_v10 = vcombine.high %v18392_v29, %v18394_v22  ;;  %v6556_v44 = vmul.f32 %v18542_v16, %v18542_v16  ;;  %v19653_v29 = vld [vmem:[#allocation43_spill] sm:$0xff] }
 0x336   :  { %19643 = vst [vmem:[#allocation30_spill] sm:$0xff] %v18588_v2  ;;  %19647 = vst [vmem:[#allocation33_spill] sm:$0xff] %v18608_v54  ;;  %v18623_v48 = vsub.f32 %v18096_v27, %v18374_v25  ;;  %v6577_v35 = vmul.f32 %v18596_v47, %v18596_v47  ;;  %v18653_v61 = vsub.f32 %v18132_v20, %v18374_v25 }
 0x337   :  { %5380 = vmatpush1.bf16.msra.mxu0 %v19640_v14  ;;  %v6620_v14 = vrot.slane %v6572_v56, 7  ;;  %v18631_v56 = vsub.f32 %v18114_v34, %v18374_v25  ;;  %v6626_v34 = vrot.slane %v6575_v9, 7  ;;  %v18657_v22 = vsub.f32 %v19653_v29, %v18432_v45  ;;  %v1326_v29 = vpop.f32.mrb[1].mxu0 }
 0x338   :  { %5381 = vmatprep.subr.bf16.mxu0 %v19645_v10  ;;  %5232 = vmatpush1.bf16.msra.mxu1 %v19646_v24  ;;  %v6576_v10 = vmul.f32 %v18561_v33, %v18561_v33  ;;  %v18627_v24 = vsub.f32 %v18109_v46, %v18374_v25  ;;  %v6559_v46 = vmul.f32 %v18576_v36, %v18576_v36 }
 0x339   :  { %5233 = vmatprep.subr.bf16.mxu1 %v19648_v21  ;;  %v19650_v21 = vld [vmem:[#allocation70_spill] sm:$0xff]  ;;  %19654 = vst [vmem:[#allocation35_spill] sm:$0xff] %v18657_v22  ;;  %v19655_v9 = vcombine.low %v18382_v0, %v18384_v6  ;;  %v6623_v20 = vsel %vm467_vm0, %v6622_v55, %v6557_v1  ;;  %v6625_v8 = vsel %vm467_vm0, %v6624_v26, %v6558_v23  ;;  %v1328_v23 = vpop.f32.mrb[2].mxu0 }
 0x33a   :  { %v18642_v27 = vsub.f32 %v19650_v21, %v18432_v45  ;;  %v6621_v21 = vsel %vm467_vm0, %v6620_v14, %v6556_v44  ;;  %v6628_v33 = vrot.slane %v6576_v10, 7  ;;  %v19656_v47 = vcombine.high %v18402_v40, %v18411_v42  ;;  %v19657_v0 = vld [vmem:[#allocation46_spill] sm:$0xff]  ;;  %v19659_v14 = vld [vmem:[#allocation47_spill] sm:$0xff] }
 0x33b   :  { %5382 = vmatpush1.bf16.msra.mxu0 %v19649_v31  ;;  %v6560_v31 = vmul.f32 %v18580_v41, %v18580_v41  ;;  %v18674_v44 = vsub.f32 %v18137_v11, %v18374_v25  ;;  %v18678_v6 = vsub.f32 %v19657_v0, %v18432_v45  ;;  %v6561_v55 = vmul.f32 %v18584_v39, %v18584_v39  ;;  %v1329_v0 = vpop.f32.mrb[3].mxu0  ;;  %v19663_v41 = vld [vmem:[#allocation48_spill] sm:$0xff] }
 0x33c   :  { %19651 = vst [vmem:[#allocation31_spill] sm:$0xff] %v18642_v27  ;;  %5383 = vmatprep.subr.bf16.mxu0 %v19652_v12  ;;  %5234 = vmatpush1.bf16.msra.mxu1 %v19655_v9  ;;  %v6578_v12 = vmul.f32 %v18608_v54, %v18608_v54  ;;  %v18682_v9 = vsub.f32 %v19659_v14, %v18432_v45  ;;  %v6630_v10 = vrot.slane %v6577_v35, 7  ;;  %v6668_v26 = vsel %vm476_vm1, %v6621_v21, 0.0  ;;  %v19661_v14 = vld [vmem:[#allocation65_spill] sm:$0xff]  ;;  %v19666_v0 = vld [vmem:[#allocation63_spill] sm:$0xff] }
 0x33d   :  { %5235 = vmatprep.subr.bf16.mxu1 %v19656_v47  ;;  %19658 = vst [vmem:[#allocation29_spill] sm:$0xff] %v18678_v6  ;;  %v19660_v1 = vcombine.low %v18413_v38, %v18415_v18  ;;  %v6579_v11 = vmul.f32 %v18642_v27, %v18642_v27  ;;  %v6627_v47 = vsel %vm467_vm0, %v6626_v34, %v6559_v46  ;;  %v6669_v18 = vsel %vm476_vm1, %v6623_v20, 0.0 }
 0x33e   :  { %v19662_v54 = vcombine.high %v18427_v28, %v19661_v14  ;;  %v18698_v23 = vsub.f32 %v19663_v41, %v18432_v45  ;;  %v6562_v38 = vmul.f32 %v18588_v2, %v18588_v2  ;;  %v19664_v35 = vcombine.low %v18402_v40, %v18411_v42  ;;  %v19665_v41 = vld [vmem:[#allocation62_spill] sm:$0xff]  ;;  %v19668_v2 = vld [vmem:[#allocation49_spill] sm:$0xff] }
 0x33f   :  { %5384 = vmatpush1.bf16.msra.mxu0 %v19660_v1  ;;  %v6671_v1 = vsel %vm476_vm1, %v6625_v8, 0.0  ;;  %v6580_v46 = vmul.f32 %v18657_v22, %v18657_v22  ;;  %v6632_v34 = vrot.slane %v6578_v12, 7  ;;  %v6670_v21 = vadd.f32 %v6669_v18, %v6668_v26  ;;  %v19669_v8 = vld [vmem:[#allocation50_spill] sm:$0xff] }
 0x340   :  { %5385 = vmatprep.subr.bf16.mxu0 %v19662_v54  ;;  %5236 = vmatpush1.bf16.msra.mxu1 %v19664_v35  ;;  %v6629_v54 = vsel %vm467_vm0, %v6628_v33, %v6560_v31  ;;  %v19667_v27 = vcombine.high %v19665_v41, %v19666_v0  ;;  %v18715_v20 = vsub.f32 %v19668_v2, %v18432_v45  ;;  %v6673_v40 = vsel %vm476_vm1, %v6627_v47, 0.0  ;;  %v19672_v35 = vld [vmem:[#allocation59_spill] sm:$0xff] }
 0x341   :  { %v18719_v39 = vsub.f32 %v19669_v8, %v18432_v45  ;;  %v6563_v42 = vmul.f32 %v18592_v51, %v18592_v51  ;;  %v19670_v33 = vcombine.low %v18427_v28, %v19661_v14  ;;  %v6631_v31 = vsel %vm467_vm0, %v6630_v10, %v6561_v55  ;;  %v19673_v8 = vld [vmem:[#allocation60_spill] sm:$0xff] }
 0x342   :  { %5237 = vmatprep.subr.bf16.mxu1 %v19667_v27  ;;  %v6581_v27 = vmul.f32 %v18678_v6, %v18678_v6  ;;  %v6634_v2 = vrot.slane %v6579_v11, 7  ;;  %v6672_v12 = vadd.f32 %v6671_v1, %v6670_v21  ;;  %v19671_v26 = vcombine.high %v18454_v52, %v18456_v15 }
 0x343   :  { %5386 = vmatpush1.bf16.msra.mxu0 %v19670_v33  ;;  %v6564_v18 = vmul.f32 %v18623_v48, %v18623_v48  ;;  %v6675_v47 = vsel %vm476_vm1, %v6629_v54, 0.0  ;;  %v19674_v28 = vrot.slane %v19672_v35, %v19673_v8  ;;  %v19675_v33 = vld [vmem:[#allocation61_spill] sm:$0xff]  ;;  %v19677_v55 = vcombine.low %v19665_v41, %v19666_v0 }
 0x344   :  { %5387 = vmatprep.subr.bf16.mxu0 %v19671_v26  ;;  %v19676_v22 = vrot.slane %v19672_v35, %v19675_v33  ;;  %v6582_v11 = vmul.f32 %v18682_v9, %v18682_v9  ;;  %v6633_v10 = vsel %vm467_vm0, %v6632_v34, %v6562_v38  ;;  %v6636_v1 = vrot.slane %v6580_v46, 7  ;;  %v19682_v35 = vld [vmem:[#allocation54_spill] sm:$0xff] }
 0x345   :  { %v16252_v14 = vadd.f32 %v1324_v30, %v19674_v28  ;;  %5238 = vmatpush1.bf16.msra.mxu1 %v19677_v55  ;;  %v6674_v21 = vadd.f32 %v6673_v40, %v6672_v12  ;;  %v19678_v54 = vcombine.high %v18442_v43, %v18444_v53  ;;  %v19679_v30 = vld [vmem:[#allocation51_spill] sm:$0xff]  ;;  %v19680_v0 = vcombine.low %v18454_v52, %v18456_v15 }
 0x346   :  { %v16253_v6 = vadd.f32 %v1326_v29, %v19676_v22  ;;  %v18753_v26 = vsub.f32 %v19679_v30, %v18432_v45  ;;  %v6565_v22 = vmul.f32 %v18627_v24, %v18627_v24  ;;  %v6677_v29 = vsel %vm476_vm1, %v6631_v31, 0.0  ;;  %v1930_v55 = vld [vmem:[#allocation10 + $0xb0] sm:$0xff] }
 0x347   :  { %5239 = vmatprep.subr.bf16.mxu1 %v19678_v54  ;;  %5388 = vmatpush1.bf16.msra.mxu0 %v19680_v0  ;;  %v6583_v38 = vmul.f32 %v18698_v23, %v18698_v23  ;;  %v6635_v46 = vsel %vm467_vm0, %v6634_v2, %v6563_v42  ;;  %v6638_v34 = vrot.slane %v6581_v27, 7  ;;  %v6676_v40 = vadd.f32 %v6675_v47, %v6674_v21  ;;  %v2381_v0 = vld [vmem:[#allocation10 + $0xec8] sm:$0xff] }
 0x348   :  { %v1414_v41 = vcombine.low %v16252_v14, %v16253_v6  ;;  %v19681_v12 = vcombine.high %v18458_v17, %v18468_v7  ;;  %v18769_v28 = vsub.f32 %v19682_v35, %v18432_v45  ;;  %v6566_v6 = vmul.f32 %v18631_v56, %v18631_v56  ;;  %v1926_v14 = vld [vmem:[#allocation10 + $0x90] sm:$0xff] }
 0x349   :  { %v6679_v52 = vsel %vm476_vm1, %v6633_v10, 0.0  ;;  %v19683_v42 = vcombine.low %v18442_v43, %v18444_v53  ;;  %v6584_v27 = vmul.f32 %v18715_v20, %v18715_v20  ;;  %v6637_v31 = vsel %vm467_vm0, %v6636_v1, %v6564_v18 }
 0x34a   :  { %5389 = vmatprep.subr.bf16.mxu0 %v19681_v12  ;;  %v18775_v15 = vrot.slane %v1414_v41, %v18360_v63  ;;  %v6640_v2 = vrot.slane %v6582_v11, 7  ;;  %v6678_v45 = vadd.f32 %v6677_v29, %v6676_v40  ;;  %v19684_v47 = vcombine.high %v18470_v5, %v18472_v13  ;;  %v19686_v29 = vld [vmem:[#allocation64_spill] sm:$0xff]  ;;  %v19688_v40 = vld [vmem:[#allocation45_spill] sm:$0xff] }
 0x34b   :  { %5240 = vmatpush1.bf16.msra.mxu1 %v19683_v42  ;;  %v6567_v10 = vmul.f32 %v18635_v19, %v18635_v19  ;;  %v6681_v21 = vsel %vm476_vm1, %v6635_v46, 0.0  ;;  %v19685_v18 = vcombine.low %v18458_v17, %v18468_v7  ;;  %v6585_v11 = vmul.f32 %v18719_v39, %v18719_v39  ;;  %v2385_v46 = vld [vmem:[#allocation10 + $0xee8] sm:$0xff] }
 0x34c   :  { %5414 = vmatprep.subr.bf16.mxu1 %v19684_v47  ;;  %v1429_v53 = vcombine.low %v18775_v15, %v18569_v60  ;;  %v6639_v1 = vsel %vm467_vm0, %v6638_v34, %v6565_v22  ;;  %v6642_v54 = vrot.slane %v6583_v38, 7  ;;  %v6680_v30 = vadd.f32 %v6679_v52, %v6678_v45  ;;  %v19690_v38 = vld [vmem:[#allocation42_spill] sm:$0xff] }
 0x34d   :  { %5390 = vmatpush1.bf16.msra.mxu0 %v19685_v18  ;;  %v19687_v41 = vcombine.high %v18482_v58, %v18484_v37  ;;  %v18805_v12 = vsub.f32 %v19688_v40, %v18374_v25  ;;  %v6568_v17 = vmul.f32 %v18653_v61, %v18653_v61  ;;  %v6683_v7 = vsel %vm476_vm1, %v6637_v31, 0.0  ;;  %v1934_v18 = vld [vmem:[#allocation10 + $0xd0] sm:$0xff] }
 0x34e   :  { %5242 = vmatmul.mubr.bf16.vlgmr.msra.gmra.mrb[8].mxu1 %v19686_v29  ;;  %v19689_v22 = vcombine.low %v18470_v5, %v18472_v13  ;;  %v14693_v34 = vcombine.high %v1926_v14, %v1930_v55  ;;  %v6586_v35 = vmul.f32 %v18753_v26, %v18753_v26  ;;  %v6641_v52 = vsel %vm467_vm0, %v6640_v2, %v6566_v6  ;;  %v1938_v31 = vld [vmem:[#allocation10 + $0xf0] sm:$0xff] }
 0x34f   :  { %5391 = vmatprep.subr.bf16.mxu0 %v19687_v41  ;;  %5446 = vmatprep.mubr.bf16.mxu1 %v19690_v38  ;;  %v6644_v42 = vrot.slane %v6584_v27, 7  ;;  %v6682_v45 = vadd.f32 %v6681_v21, %v6680_v30  ;;  %v19691_v47 = vcombine.high %v18486_v57, %v18501_v4  ;;  %v19692_v41 = vld [vmem:[#allocation53_spill] sm:$0xff]  ;;  %v6569_v5 = vmul.f32 %v18674_v44, %v18674_v44 }
 0x350   :  { %5415 = vmatpush1.bf16.msra.mxu1 %v19689_v22  ;;  %v18822_v13 = vsub.f32 %v19692_v41, %v18374_v25  ;;  %v6685_v40 = vsel %vm476_vm1, %v6639_v1, 0.0  ;;  %v19693_v6 = vcombine.low %v18482_v58, %v18484_v37  ;;  %v15147_v27 = vcombine.high %v2381_v0, %v2385_v46  ;;  %v2393_v41 = vld [vmem:[#allocation10 + $0xf28] sm:$0xff] }
 0x351   :  { %5416 = vmatprep.subr.bf16.mxu1 %v19691_v47  ;;  %v6587_v2 = vmul.f32 %v18769_v28, %v18769_v28  ;;  %v6643_v21 = vsel %vm467_vm0, %v6642_v54, %v6567_v10  ;;  %v6646_v30 = vrot.slane %v6585_v11, 7  ;;  %v6684_v22 = vadd.f32 %v6683_v7, %v6682_v45  ;;  %v2389_v47 = vld [vmem:[#allocation10 + $0xf08] sm:$0xff] }
 0x352   :  { %5392 = vmatpush1.bf16.msra.mxu0 %v19693_v6  ;;  %v19694_v25 = vcombine.high %v18503_v50, %v18505_v49  ;;  %v6687_v1 = vsel %vm476_vm1, %v6641_v52, 0.0  ;;  %v19695_v37 = vcombine.low %v18486_v57, %v18501_v4  ;;  %v14692_v58 = vcombine.low %v1926_v14, %v1930_v55  ;;  %v1942_v57 = vld [vmem:[#allocation10 + $0x110] sm:$0xff] }
 0x353   :  { %v14701_v6 = vcombine.high %v1934_v18, %v1938_v31  ;;  %v6570_v43 = vmul.f32 %v18805_v12, %v18805_v12  ;;  %v6645_v10 = vsel %vm467_vm0, %v6644_v42, %v6568_v17  ;;  %v6648_v11 = vrot.slane %v6586_v35, 7  ;;  %v1946_v4 = vld [vmem:[#allocation10 + $0x130] sm:$0xff]  ;;  %v2397_v42 = vld [vmem:[#allocation10 + $0xf48] sm:$0xff] }
 0x354   :  { %5393 = vmatprep.subr.bf16.mxu0 %v19694_v25  ;;  %5417 = vmatpush1.bf16.msra.mxu1 %v19695_v37  ;;  %v6686_v54 = vadd.f32 %v6685_v40, %v6684_v22  ;;  %v6689_v7 = vsel %vm476_vm1, %v6643_v21, 0.0  ;;  %v19696_v45 = vcombine.low %v18503_v50, %v18505_v49  ;;  %v15146_v52 = vcombine.low %v2381_v0, %v2385_v46  ;;  %v2401_v40 = vld [vmem:[#allocation10 + $0xf68] sm:$0xff]  ;;  %v1950_v22 = vld [vmem:[#allocation10 + $0x150] sm:$0xff] }
 0x355   :  { %5418 = vmatprep.subr.bf16.mxu1 %v14693_v34  ;;  %v15155_v25 = vcombine.high %v2389_v47, %v2393_v41  ;;  %v6571_v14 = vmul.f32 %v18822_v13, %v18822_v13  ;;  %v6647_v55 = vsel %vm467_vm0, %v6646_v30, %v6569_v5  ;;  %v6650_v37 = vrot.slane %v6587_v2, 7  ;;  %v1954_v5 = vld [vmem:[#allocation10 + $0x170] sm:$0xff] }
 0x356   :  { %5394 = vmatpush1.bf16.msra.mxu0 %v19696_v45  ;;  %v6688_v17 = vadd.f32 %v6687_v1, %v6686_v54  ;;  %v6691_v34 = vsel %vm476_vm1, %v6645_v10, 0.0  ;;  %v14700_v35 = vcombine.low %v1934_v18, %v1938_v31  ;;  %v6649_v49 = vsel %vm467_vm0, %v6648_v11, %v6570_v43  ;;  %v2405_v1 = vld [vmem:[#allocation10 + $0xf88] sm:$0xff]  ;;  %v1962_v11 = vld [vmem:[#allocation10 + $0x1b0] sm:$0xff] }
 0x357   :  { %5395 = vmatprep.subr.bf16.mxu0 %v15147_v27  ;;  %v14709_v0 = vcombine.high %v1942_v57, %v1946_v4  ;;  %v6693_v46 = vsel %vm476_vm1, %v6647_v55, 0.0  ;;  %v15154_v21 = vcombine.low %v2389_v47, %v2393_v41  ;;  %v6651_v2 = vsel %vm467_vm0, %v6650_v37, %v6571_v14  ;;  %v2409_v43 = vld [vmem:[#allocation10 + $0xfa8] sm:$0xff]  ;;  %v1958_v41 = vld [vmem:[#allocation10 + $0x190] sm:$0xff] }
 0x358   :  { %5419 = vmatpush1.bf16.msra.mxu1 %v14692_v58  ;;  %v6690_v50 = vadd.f32 %v6689_v7, %v6688_v17  ;;  %v15163_v30 = vcombine.high %v2397_v42, %v2401_v40  ;;  %v6695_v18 = vsel %vm476_vm1, %v6649_v49, 0.0  ;;  %v14708_v31 = vcombine.low %v1942_v57, %v1946_v4  ;;  %v2413_v4 = vld [vmem:[#allocation10 + $0xfc8] sm:$0xff] }
 0x359   :  { %5420 = vmatprep.subr.bf16.mxu1 %v14701_v6  ;;  %v14717_v6 = vcombine.high %v1950_v22, %v1954_v5  ;;  %v6697_v10 = vsel %vm476_vm1, %v6651_v2, 0.0  ;;  %v15162_v47 = vcombine.low %v2397_v42, %v2401_v40  ;;  %v15171_v7 = vcombine.high %v2405_v1, %v2409_v43  ;;  %v2417_v14 = vld [vmem:[#allocation10 + $0xfe8] sm:$0xff]  ;;  %v1923_v2 = vld [vmem:[#allocation10 + $0x78] sm:$0xff] }
 0x35a   :  { %5396 = vmatpush1.bf16.msra.mxu0 %v15146_v52  ;;  %v6692_v27 = vadd.f32 %v6691_v34, %v6690_v50  ;;  %v1437_v45 = vrot.slane %v1429_v53, %v18360_v63  ;;  %v19697_v52 = vcombine.high %v18775_v15, %v18569_v60  ;;  %v14716_v57 = vcombine.low %v1950_v22, %v1954_v5  ;;  %v1966_v34 = vld [vmem:[#allocation10 + $0x1d0] sm:$0xff]  ;;  %v1911_v60 = vld [vmem:[#allocation10 + $0x18] sm:$0xff] }
 0x35b   :  { %5397 = vmatprep.subr.bf16.mxu0 %v15155_v25  ;;  %v14725_v37 = vcombine.high %v1958_v41, %v1962_v11  ;;  %v15170_v17 = vcombine.low %v2405_v1, %v2409_v43  ;;  %v15179_v42 = vcombine.high %v2413_v4, %v2417_v14  ;;  %v19698_v53 = vlaneseq  ;;  %v1915_v15 = vld [vmem:[#allocation10 + $0x38] sm:$0xff] }
 0x35c   :  { %5421 = vmatpush1.bf16.msra.mxu1 %v14700_v35  ;;  %v6694_v58 = vadd.f32 %v6693_v46, %v6692_v27  ;;  %v1444_v25 = vrot.slane %v19697_v52, %v18360_v63  ;;  %v1970_v35 = vld [vmem:[#allocation10 + $0x1f0] sm:$0xff]  ;;  %v14724_v40 = vcombine.low %v1958_v41, %v1962_v11  ;;  %v15178_v50 = vcombine.low %v2413_v4, %v2417_v14  ;;  %v1919_v5 = vld [vmem:[#allocation10 + $0x58] sm:$0xff] }
 0x35d   :  { %5422 = vmatprep.subr.bf16.mxu1 %v14709_v0  ;;  %vm1449_vm2 = vcmp.lt.s32.totalorder %v19698_v53, 384  ;;  %v14733_v49 = vcombine.high %v1966_v34, %v1970_v35  ;;  %v1974_v0 = vld [vmem:[#allocation10 + $0x210] sm:$0xff]  ;;  %v14732_v22 = vcombine.low %v1966_v34, %v1970_v35  ;;  %v14687_v1 = vcombine.high %v1919_v5, %v1923_v2  ;;  %v1939_v52 = vld [vmem:[#allocation10 + $0xf8] sm:$0xff] }
 0x35e   :  { %5398 = vmatpush1.bf16.msra.mxu0 %v15154_v21  ;;  %v6696_v54 = vadd.f32 %v6695_v18, %v6694_v58  ;;  %1451 = vst.msk [vmem:[#allocation17] sm:$0x7] %vm1449_vm2, %v1437_v45  ;;  %1452 = vst.msk [vmem:[#allocation17 + $0x3] sm:$0x7] %vm1449_vm2, %v1444_v25  ;;  %v1978_v46 = vld [vmem:[#allocation10 + $0x230] sm:$0xff]  ;;  %v14679_v21 = vcombine.high %v1911_v60, %v1915_v15  ;;  %v1927_v58 = vld [vmem:[#allocation10 + $0x98] sm:$0xff] }
 0x35f   :  { %5399 = vmatprep.subr.bf16.mxu0 %v15163_v30  ;;  %v14741_v27 = vcombine.high %v1974_v0, %v1978_v46  ;;  %v14678_v30 = vcombine.low %v1911_v60, %v1915_v15  ;;  %v1982_v18 = vld [vmem:[#allocation10 + $0x250] sm:$0xff]  ;;  %v14740_v43 = vcombine.low %v1974_v0, %v1978_v46  ;;  %v1935_v45 = vld [vmem:[#allocation10 + $0xd8] sm:$0xff] }
 0x360   :  { %5423 = vmatpush1.bf16.msra.mxu1 %v14708_v31  ;;  %v6698_v55 = vadd.f32 %v6697_v10, %v6696_v54  ;;  %v1986_v31 = vld [vmem:[#allocation10 + $0x270] sm:$0xff]  ;;  %v14702_v35 = vcombine.low %v1935_v45, %v1939_v52  ;;  %v1951_v15 = vld [vmem:[#allocation10 + $0x158] sm:$0xff] }
 0x361   :  { %5424 = vmatprep.subr.bf16.mxu1 %v14717_v6  ;;  %v1931_v6 = vld [vmem:[#allocation10 + $0xb8] sm:$0xff]  ;;  %v14749_v10 = vcombine.high %v1982_v18, %v1986_v31  ;;  %v1990_v41 = vld [vmem:[#allocation10 + $0x290] sm:$0xff] }
 0x362   :  { %5400 = vmatpush1.bf16.msra.mxu0 %v15162_v47  ;;  %6699 = vadd.xlane.f32.xlu1 %v6698_v55  ;;  %v14686_v47 = vcombine.low %v1919_v5, %v1923_v2  ;;  %v1994_v11 = vld [vmem:[#allocation10 + $0x2b0] sm:$0xff]  ;;  %v14695_v54 = vcombine.high %v1927_v58, %v1931_v6  ;;  %v14703_v55 = vcombine.high %v1935_v45, %v1939_v52  ;;  %v1959_v2 = vld [vmem:[#allocation10 + $0x198] sm:$0xff] }
 0x363   :  { %5401 = vmatprep.subr.bf16.mxu0 %v15171_v7  ;;  %v14748_v7 = vcombine.low %v1982_v18, %v1986_v31  ;;  %v14757_v25 = vcombine.high %v1990_v41, %v1994_v11  ;;  %v1998_v4 = vld [vmem:[#allocation10 + $0x2d0] sm:$0xff]  ;;  %v1975_v52 = vld [vmem:[#allocation10 + $0x218] sm:$0xff] }
 0x364   :  { %5425 = vmatpush1.bf16.msra.mxu1 %v14716_v57  ;;  %v14694_v57 = vcombine.low %v1927_v58, %v1931_v6  ;;  %v2002_v14 = vld [vmem:[#allocation10 + $0x2f0] sm:$0xff]  ;;  %v1967_v6 = vld [vmem:[#allocation10 + $0x1d8] sm:$0xff] }
 0x365   :  { %5426 = vmatprep.subr.bf16.mxu1 %v14725_v37  ;;  %v14756_v37 = vcombine.low %v1990_v41, %v1994_v11  ;;  %v14765_v34 = vcombine.high %v1998_v4, %v2002_v14  ;;  %v2010_v53 = vld [vmem:[#allocation10 + $0x330] sm:$0xff]  ;;  %v14764_v60 = vcombine.low %v1998_v4, %v2002_v14 }
 0x366   :  { %5402 = vmatpush1.bf16.msra.mxu0 %v15170_v17  ;;  %v1947_v17 = vld [vmem:[#allocation10 + $0x138] sm:$0xff]  ;;  %v2014_v46 = vld [vmem:[#allocation10 + $0x350] sm:$0xff] }
 0x367   :  { %5403 = vmatprep.subr.bf16.mxu0 %v15179_v42  ;;  %v2006_v42 = vld [vmem:[#allocation10 + $0x310] sm:$0xff] }
 0x368   :  { %5427 = vmatpush1.bf16.msra.mxu1 %v14724_v40  ;;  %v14772_v5 = vcombine.low %v2006_v42, %v2010_v53  ;;  %v2022_v31 = vld [vmem:[#allocation10 + $0x390] sm:$0xff] }
 0x369   :  { %5428 = vmatprep.subr.bf16.mxu1 %v14733_v49  ;;  %v1955_v49 = vld [vmem:[#allocation10 + $0x178] sm:$0xff]  ;;  %v2030_v11 = vld [vmem:[#allocation10 + $0x3d0] sm:$0xff] }
 0x36a   :  { %5404 = vmatpush1.bf16.msra.mxu0 %v15178_v50  ;;  %v14773_v50 = vcombine.high %v2006_v42, %v2010_v53  ;;  %v14718_v18 = vcombine.low %v1951_v15, %v1955_v49  ;;  %v2038_v14 = vld [vmem:[#allocation10 + $0x410] sm:$0xff] }
 0x36b   :  { %5578 = vmatprep.subr.bf16.mxu0 %v14679_v21  ;;  %v2018_v21 = vld [vmem:[#allocation10 + $0x370] sm:$0xff] }
 0x36c   :  { %5429 = vmatpush1.bf16.msra.mxu1 %v14732_v22  ;;  %v14719_v22 = vcombine.high %v1951_v15, %v1955_v49  ;;  %v14780_v58 = vcombine.low %v2014_v46, %v2018_v21  ;;  %v2046_v53 = vld [vmem:[#allocation10 + $0x450] sm:$0xff]  ;;  %v1991_v49 = vld [vmem:[#allocation10 + $0x298] sm:$0xff] }
 0x36d   :  { %5406 = vmatmul.mubr.bf16.vlgmr.msra.gmra.mrb[4].mxu0 %v19686_v29  ;;  %5430 = vmatprep.subr.bf16.mxu1 %v14741_v27  ;;  %v1963_v27 = vld [vmem:[#allocation10 + $0x1b8] sm:$0xff] }
 0x36e   :  { %5579 = vmatpush1.bf16.msra.mxu0 %v14678_v30  ;;  %5610 = vmatprep.mubr.bf16.mxu0 %v19690_v38  ;;  %v1943_v38 = vld [vmem:[#allocation10 + $0x118] sm:$0xff]  ;;  %v14781_v30 = vcombine.high %v2014_v46, %v2018_v21  ;;  %v14726_v41 = vcombine.low %v1959_v2, %v1963_v27  ;;  %v2054_v21 = vld [vmem:[#allocation10 + $0x490] sm:$0xff] }
 0x36f   :  { %5580 = vmatprep.subr.bf16.mxu0 %v14687_v1  ;;  %v14711_v40 = vcombine.high %v1943_v38, %v1947_v17  ;;  %v14710_v0 = vcombine.low %v1943_v38, %v1947_v17  ;;  %v2026_v1 = vld [vmem:[#allocation10 + $0x3b0] sm:$0xff]  ;;  %v1983_v17 = vld [vmem:[#allocation10 + $0x258] sm:$0xff] }
 0x370   :  { %5431 = vmatpush1.bf16.msra.mxu1 %v14740_v43  ;;  %v14727_v43 = vcombine.high %v1959_v2, %v1963_v27  ;;  %v14788_v45 = vcombine.low %v2022_v31, %v2026_v1  ;;  %v19700_v27 = vld [vmem:[#allocation55_spill] sm:$0xff] }
 0x371   :  { %5432 = vmatprep.subr.bf16.mxu1 %v14749_v10  ;;  %v1971_v10 = vld [vmem:[#allocation10 + $0x1f8] sm:$0xff] }
 0x372   :  { %5581 = vmatpush1.bf16.msra.mxu0 %v14686_v47  ;;  %v14789_v47 = vcombine.high %v2022_v31, %v2026_v1  ;;  %v14734_v4 = vcombine.low %v1967_v6, %v1971_v10  ;;  %v2003_v31 = vld [vmem:[#allocation10 + $0x2f8] sm:$0xff] }
 0x373   :  { %5582 = vmatprep.subr.bf16.mxu0 %v14695_v54  ;;  %v2034_v54 = vld [vmem:[#allocation10 + $0x3f0] sm:$0xff] }
 0x374   :  { %5433 = vmatpush1.bf16.msra.mxu1 %v14748_v7  ;;  %v14735_v7 = vcombine.high %v1967_v6, %v1971_v10  ;;  %v14796_v38 = vcombine.low %v2030_v11, %v2034_v54  ;;  %v2066_v6 = vld [vmem:[#allocation10 + $0x4f0] sm:$0xff] }
 0x375   :  { %5434 = vmatprep.subr.bf16.mxu1 %v14757_v25  ;;  %v1979_v25 = vld [vmem:[#allocation10 + $0x238] sm:$0xff] }
 0x376   :  { %5583 = vmatpush1.bf16.msra.mxu0 %v14694_v57  ;;  %v14797_v57 = vcombine.high %v2030_v11, %v2034_v54  ;;  %v14742_v42 = vcombine.low %v1975_v52, %v1979_v25  ;;  %v2011_v11 = vld [vmem:[#allocation10 + $0x338] sm:$0xff] }
 0x377   :  { %5584 = vmatprep.subr.bf16.mxu0 %v14703_v55  ;;  %v2042_v55 = vld [vmem:[#allocation10 + $0x430] sm:$0xff] }
 0x378   :  { %5435 = vmatpush1.bf16.msra.mxu1 %v14756_v37  ;;  %v14743_v37 = vcombine.high %v1975_v52, %v1979_v25  ;;  %v14804_v15 = vcombine.low %v2038_v14, %v2042_v55  ;;  %v2074_v52 = vld [vmem:[#allocation10 + $0x530] sm:$0xff] }
 0x379   :  { %5436 = vmatprep.subr.bf16.mxu1 %v14765_v34  ;;  %v1987_v34 = vld [vmem:[#allocation10 + $0x278] sm:$0xff] }
 0x37a   :  { %5585 = vmatpush1.bf16.msra.mxu0 %v14702_v35  ;;  %v14805_v35 = vcombine.high %v2038_v14, %v2042_v55  ;;  %v14750_v46 = vcombine.low %v1983_v17, %v1987_v34  ;;  %v2019_v14 = vld [vmem:[#allocation10 + $0x378] sm:$0xff] }
 0x37b   :  { %5586 = vmatprep.subr.bf16.mxu0 %v14711_v40  ;;  %v2050_v40 = vld [vmem:[#allocation10 + $0x470] sm:$0xff] }
 0x37c   :  { %5437 = vmatpush1.bf16.msra.mxu1 %v14764_v60  ;;  %v14751_v60 = vcombine.high %v1983_v17, %v1987_v34  ;;  %v2082_v17 = vld [vmem:[#allocation10 + $0x570] sm:$0xff] }
 0x37d   :  { %5438 = vmatprep.subr.bf16.mxu1 %v14773_v50  ;;  %v1995_v50 = vld [vmem:[#allocation10 + $0x2b8] sm:$0xff] }
 0x37e   :  { %5587 = vmatpush1.bf16.msra.mxu0 %v14710_v0  ;;  %v14813_v0 = vcombine.high %v2046_v53, %v2050_v40  ;;  %v14759_v2 = vcombine.high %v1991_v49, %v1995_v50 }
 0x37f   :  { %5588 = vmatprep.subr.bf16.mxu0 %v14719_v22  ;;  %v2058_v22 = vld [vmem:[#allocation10 + $0x4b0] sm:$0xff] }
 0x380   :  { %5439 = vmatpush1.bf16.msra.mxu1 %v14772_v5  ;;  %v19699_v5 = vld [vmem:[#allocation52_spill] sm:$0xff]  ;;  %v14821_v1 = vcombine.high %v2054_v21, %v2058_v22 }
 0x381   :  { %5440 = vmatprep.subr.bf16.mxu1 %v14781_v30  ;;  %v14812_v30 = vcombine.low %v2046_v53, %v2050_v40  ;;  %v2027_v53 = vld [vmem:[#allocation10 + $0x3b8] sm:$0xff] }
 0x382   :  { %5589 = vmatpush1.bf16.msra.mxu0 %v14718_v18  ;;  %v1999_v18 = vld [vmem:[#allocation10 + $0x2d8] sm:$0xff] }
 0x383   :  { %5590 = vmatprep.subr.bf16.mxu0 %v14727_v43  ;;  %v14758_v43 = vcombine.low %v1991_v49, %v1995_v50  ;;  %v14767_v10 = vcombine.high %v1999_v18, %v2003_v31  ;;  %v2090_v49 = vld [vmem:[#allocation10 + $0x5b0] sm:$0xff] }
 0x384   :  { %5441 = vmatpush1.bf16.msra.mxu1 %v14780_v58  ;;  %v2062_v58 = vld [vmem:[#allocation10 + $0x4d0] sm:$0xff] }
 0x385   :  { %5442 = vmatprep.subr.bf16.mxu1 %v14789_v47  ;;  %v14820_v47 = vcombine.low %v2054_v21, %v2058_v22  ;;  %v14829_v54 = vcombine.high %v2062_v58, %v2066_v6  ;;  %v2035_v21 = vld [vmem:[#allocation10 + $0x3f8] sm:$0xff] }
 0x386   :  { %5591 = vmatpush1.bf16.msra.mxu0 %v14726_v41  ;;  %v2007_v41 = vld [vmem:[#allocation10 + $0x318] sm:$0xff] }
 0x387   :  { %5592 = vmatprep.subr.bf16.mxu0 %v14735_v7  ;;  %v14766_v7 = vcombine.low %v1999_v18, %v2003_v31  ;;  %v14775_v25 = vcombine.high %v2007_v41, %v2011_v11  ;;  %v2098_v18 = vld [vmem:[#allocation10 + $0x5f0] sm:$0xff] }
 0x388   :  { %5443 = vmatpush1.bf16.msra.mxu1 %v14788_v45  ;;  %v2070_v45 = vld [vmem:[#allocation10 + $0x510] sm:$0xff] }
 0x389   :  { %5444 = vmatprep.subr.bf16.mxu1 %v14797_v57  ;;  %v14828_v57 = vcombine.low %v2062_v58, %v2066_v6  ;;  %v14837_v55 = vcombine.high %v2070_v45, %v2074_v52  ;;  %v2043_v58 = vld [vmem:[#allocation10 + $0x438] sm:$0xff] }
 0x38a   :  { %5593 = vmatpush1.bf16.msra.mxu0 %v14734_v4  ;;  %v2015_v4 = vld [vmem:[#allocation10 + $0x358] sm:$0xff] }
 0x38b   :  { %5594 = vmatprep.subr.bf16.mxu0 %v14743_v37  ;;  %v14774_v37 = vcombine.low %v2007_v41, %v2011_v11  ;;  %v14783_v34 = vcombine.high %v2015_v4, %v2019_v14  ;;  %v2106_v41 = vld [vmem:[#allocation10 + $0x630] sm:$0xff] }
 0x38c   :  { %5445 = vmatpush1.bf16.msra.mxu1 %v14796_v38  ;;  %v2078_v38 = vld [vmem:[#allocation10 + $0x550] sm:$0xff] }
 0x38d   :  { %5455 = vmatprep.subr.bf16.mxu1 %v14805_v35  ;;  %v14836_v35 = vcombine.low %v2070_v45, %v2074_v52  ;;  %v14845_v40 = vcombine.high %v2078_v38, %v2082_v17  ;;  %v2051_v45 = vld [vmem:[#allocation10 + $0x478] sm:$0xff] }
 0x38e   :  { %5595 = vmatpush1.bf16.msra.mxu0 %v14742_v42  ;;  %v2023_v42 = vld [vmem:[#allocation10 + $0x398] sm:$0xff] }
 0x38f   :  { %5447 = vmatmul.mubr.bf16.vlgmr.msra.gmra.mrb[12].mxu1 %v19699_v5  ;;  %5596 = vmatprep.subr.bf16.mxu0 %v14751_v60  ;;  %v14782_v60 = vcombine.low %v2015_v4, %v2019_v14  ;;  %v14791_v50 = vcombine.high %v2023_v42, %v2027_v53  ;;  %v2114_v4 = vld [vmem:[#allocation10 + $0x670] sm:$0xff] }
 0x390   :  { %5456 = vmatpush1.bf16.msra.mxu1 %v14804_v15  ;;  %5487 = vmatprep.mubr.bf16.mxu1 %v19700_v27  ;;  %v2086_v15 = vld [vmem:[#allocation10 + $0x590] sm:$0xff] }
 0x391   :  { %5457 = vmatprep.subr.bf16.mxu1 %v14813_v0  ;;  %v14844_v0 = vcombine.low %v2078_v38, %v2082_v17  ;;  %v14853_v22 = vcombine.high %v2086_v15, %v2090_v49  ;;  %v2059_v38 = vld [vmem:[#allocation10 + $0x4b8] sm:$0xff] }
 0x392   :  { %5597 = vmatpush1.bf16.msra.mxu0 %v14750_v46  ;;  %v2031_v46 = vld [vmem:[#allocation10 + $0x3d8] sm:$0xff] }
 0x393   :  { %5598 = vmatprep.subr.bf16.mxu0 %v14759_v2  ;;  %v14790_v2 = vcombine.low %v2023_v42, %v2027_v53  ;;  %v14799_v31 = vcombine.high %v2031_v46, %v2035_v21  ;;  %v2122_v42 = vld [vmem:[#allocation10 + $0x6b0] sm:$0xff] }
 0x394   :  { %5458 = vmatpush1.bf16.msra.mxu1 %v14812_v30  ;;  %v2094_v30 = vld [vmem:[#allocation10 + $0x5d0] sm:$0xff] }
 0x395   :  { %5459 = vmatprep.subr.bf16.mxu1 %v14821_v1  ;;  %v14852_v1 = vcombine.low %v2086_v15, %v2090_v49  ;;  %v14861_v6 = vcombine.high %v2094_v30, %v2098_v18  ;;  %v2067_v15 = vld [vmem:[#allocation10 + $0x4f8] sm:$0xff] }
 0x396   :  { %5599 = vmatpush1.bf16.msra.mxu0 %v14758_v43  ;;  %v2039_v43 = vld [vmem:[#allocation10 + $0x418] sm:$0xff] }
 0x397   :  { %5600 = vmatprep.subr.bf16.mxu0 %v14767_v10  ;;  %v14798_v10 = vcombine.low %v2031_v46, %v2035_v21  ;;  %v14807_v11 = vcombine.high %v2039_v43, %v2043_v58  ;;  %v2130_v46 = vld [vmem:[#allocation10 + $0x6f0] sm:$0xff] }
 0x398   :  { %5460 = vmatpush1.bf16.msra.mxu1 %v14820_v47  ;;  %v2102_v47 = vld [vmem:[#allocation10 + $0x610] sm:$0xff] }
 0x399   :  { %5461 = vmatprep.subr.bf16.mxu1 %v14829_v54  ;;  %v14860_v54 = vcombine.low %v2094_v30, %v2098_v18  ;;  %v14869_v52 = vcombine.high %v2102_v47, %v2106_v41  ;;  %v2134_v18 = vld [vmem:[#allocation10 + $0x710] sm:$0xff] }
 0x39a   :  { %5601 = vmatpush1.bf16.msra.mxu0 %v14766_v7  ;;  %v2047_v7 = vld [vmem:[#allocation10 + $0x458] sm:$0xff] }
 0x39b   :  { %5602 = vmatprep.subr.bf16.mxu0 %v14775_v25  ;;  %v14806_v25 = vcombine.low %v2039_v43, %v2043_v58  ;;  %v14815_v14 = vcombine.high %v2047_v7, %v2051_v45  ;;  %v2079_v58 = vld [vmem:[#allocation10 + $0x558] sm:$0xff] }
 0x39c   :  { %5462 = vmatpush1.bf16.msra.mxu1 %v14828_v57  ;;  %v2110_v57 = vld [vmem:[#allocation10 + $0x650] sm:$0xff] }
 0x39d   :  { %5463 = vmatprep.subr.bf16.mxu1 %v14837_v55  ;;  %v14868_v55 = vcombine.low %v2102_v47, %v2106_v41  ;;  %v14877_v17 = vcombine.high %v2110_v57, %v2114_v4  ;;  %v2142_v41 = vld [vmem:[#allocation10 + $0x750] sm:$0xff] }
 0x39e   :  { %5603 = vmatpush1.bf16.msra.mxu0 %v14774_v37  ;;  %v2055_v37 = vld [vmem:[#allocation10 + $0x498] sm:$0xff] }
 0x39f   :  { %5604 = vmatprep.subr.bf16.mxu0 %v14783_v34  ;;  %v14814_v34 = vcombine.low %v2047_v7, %v2051_v45  ;;  %v14823_v53 = vcombine.high %v2055_v37, %v2059_v38  ;;  %v2087_v45 = vld [vmem:[#allocation10 + $0x598] sm:$0xff] }
 0x3a0   :  { %5464 = vmatpush1.bf16.msra.mxu1 %v14836_v35  ;;  %v2118_v35 = vld [vmem:[#allocation10 + $0x690] sm:$0xff] }
 0x3a1   :  { %5465 = vmatprep.subr.bf16.mxu1 %v14845_v40  ;;  %v14876_v40 = vcombine.low %v2110_v57, %v2114_v4  ;;  %v14885_v49 = vcombine.high %v2118_v35, %v2122_v42  ;;  %v14884_v21 = vcombine.low %v2118_v35, %v2122_v42  ;;  %v2150_v4 = vld [vmem:[#allocation10 + $0x790] sm:$0xff] }
 0x3a2   :  { %5605 = vmatpush1.bf16.msra.mxu0 %v14782_v60  ;;  %v2063_v60 = vld [vmem:[#allocation10 + $0x4d8] sm:$0xff]  ;;  %v2158_v42 = vld [vmem:[#allocation10 + $0x7d0] sm:$0xff] }
 0x3a3   :  { %5606 = vmatprep.subr.bf16.mxu0 %v14791_v50  ;;  %v14822_v50 = vcombine.low %v2055_v37, %v2059_v38  ;;  %v14830_v30 = vcombine.low %v2063_v60, %v2067_v15  ;;  %v2095_v38 = vld [vmem:[#allocation10 + $0x5d8] sm:$0xff] }
 0x3a4   :  { %5466 = vmatpush1.bf16.msra.mxu1 %v14844_v0  ;;  %v2126_v0 = vld [vmem:[#allocation10 + $0x6d0] sm:$0xff] }
 0x3a5   :  { %5467 = vmatprep.subr.bf16.mxu1 %v14853_v22  ;;  %v2075_v22 = vld [vmem:[#allocation10 + $0x538] sm:$0xff]  ;;  %v14892_v43 = vcombine.low %v2126_v0, %v2130_v46 }
 0x3a6   :  { %5607 = vmatpush1.bf16.msra.mxu0 %v14790_v2  ;;  %v14893_v2 = vcombine.high %v2126_v0, %v2130_v46  ;;  %v2166_v46 = vld [vmem:[#allocation10 + $0x810] sm:$0xff] }
 0x3a7   :  { %5608 = vmatprep.subr.bf16.mxu0 %v14799_v31  ;;  %v2138_v31 = vld [vmem:[#allocation10 + $0x730] sm:$0xff] }
 0x3a8   :  { %5468 = vmatpush1.bf16.msra.mxu1 %v14852_v1  ;;  %v14900_v7 = vcombine.low %v2134_v18, %v2138_v31 }
 0x3a9   :  { %5469 = vmatprep.subr.bf16.mxu1 %v14861_v6  ;;  %v2083_v6 = vld [vmem:[#allocation10 + $0x578] sm:$0xff] }
 0x3aa   :  { %5609 = vmatpush1.bf16.msra.mxu0 %v14798_v10  ;;  %v14901_v10 = vcombine.high %v2134_v18, %v2138_v31  ;;  %v14846_v57 = vcombine.low %v2079_v58, %v2083_v6  ;;  %v2174_v31 = vld [vmem:[#allocation10 + $0x850] sm:$0xff] }
 0x3ab   :  { %5619 = vmatprep.subr.bf16.mxu0 %v14807_v11  ;;  %v2146_v11 = vld [vmem:[#allocation10 + $0x770] sm:$0xff] }
 0x3ac   :  { %5470 = vmatpush1.bf16.msra.mxu1 %v14860_v54  ;;  %v14847_v54 = vcombine.high %v2079_v58, %v2083_v6  ;;  %v14908_v37 = vcombine.low %v2142_v41, %v2146_v11  ;;  %v2119_v6 = vld [vmem:[#allocation10 + $0x698] sm:$0xff] }
 0x3ad   :  { %5471 = vmatprep.subr.bf16.mxu1 %v14869_v52  ;;  %5611 = vmatmul.mubr.bf16.vlgmr.msra.gmra.mrb[8].mxu0 %v19699_v5  ;;  %v14831_v5 = vcombine.high %v2063_v60, %v2067_v15  ;;  %v2091_v52 = vld [vmem:[#allocation10 + $0x5b8] sm:$0xff] }
 0x3ae   :  { %5620 = vmatpush1.bf16.msra.mxu0 %v14806_v25  ;;  %5651 = vmatprep.mubr.bf16.mxu0 %v19700_v27  ;;  %v2071_v27 = vld [vmem:[#allocation10 + $0x518] sm:$0xff]  ;;  %v14909_v25 = vcombine.high %v2142_v41, %v2146_v11  ;;  %v14854_v35 = vcombine.low %v2087_v45, %v2091_v52  ;;  %v2182_v11 = vld [vmem:[#allocation10 + $0x890] sm:$0xff] }
 0x3af   :  { %5621 = vmatprep.subr.bf16.mxu0 %v14815_v14  ;;  %v14839_v1 = vcombine.high %v2071_v27, %v2075_v22  ;;  %v14838_v47 = vcombine.low %v2071_v27, %v2075_v22  ;;  %v2154_v14 = vld [vmem:[#allocation10 + $0x7b0] sm:$0xff]  ;;  %v2103_v15 = vld [vmem:[#allocation10 + $0x618] sm:$0xff] }
 0x3b0   :  { %5472 = vmatpush1.bf16.msra.mxu1 %v14868_v55  ;;  %v14855_v55 = vcombine.high %v2087_v45, %v2091_v52  ;;  %v14916_v60 = vcombine.low %v2150_v4, %v2154_v14  ;;  %v2111_v22 = vld [vmem:[#allocation10 + $0x658] sm:$0xff]  ;;  %v19702_v52 = vld [vmem:[#allocation57_spill] sm:$0xff] }
 0x3b1   :  { %5473 = vmatprep.subr.bf16.mxu1 %v14877_v17  ;;  %v2099_v17 = vld [vmem:[#allocation10 + $0x5f8] sm:$0xff] }
 0x3b2   :  { %5622 = vmatpush1.bf16.msra.mxu0 %v14814_v34  ;;  %v14917_v34 = vcombine.high %v2150_v4, %v2154_v14  ;;  %v14862_v0 = vcombine.low %v2095_v38, %v2099_v17  ;;  %v2131_v4 = vld [vmem:[#allocation10 + $0x6f8] sm:$0xff] }
 0x3b3   :  { %5623 = vmatprep.subr.bf16.mxu0 %v14823_v53  ;;  %v2162_v53 = vld [vmem:[#allocation10 + $0x7f0] sm:$0xff] }
 0x3b4   :  { %5474 = vmatpush1.bf16.msra.mxu1 %v14876_v40  ;;  %v14863_v40 = vcombine.high %v2095_v38, %v2099_v17  ;;  %v14924_v27 = vcombine.low %v2158_v42, %v2162_v53  ;;  %v2194_v38 = vld [vmem:[#allocation10 + $0x8f0] sm:$0xff] }
 0x3b5   :  { %5475 = vmatprep.subr.bf16.mxu1 %v14885_v49  ;;  %v2107_v49 = vld [vmem:[#allocation10 + $0x638] sm:$0xff] }
 0x3b6   :  { %5624 = vmatpush1.bf16.msra.mxu0 %v14822_v50  ;;  %v14925_v50 = vcombine.high %v2158_v42, %v2162_v53  ;;  %v14870_v18 = vcombine.low %v2103_v15, %v2107_v49  ;;  %v2139_v42 = vld [vmem:[#allocation10 + $0x738] sm:$0xff] }
 0x3b7   :  { %5625 = vmatprep.subr.bf16.mxu0 %v14831_v5  ;;  %v2170_v5 = vld [vmem:[#allocation10 + $0x830] sm:$0xff] }
 0x3b8   :  { %5476 = vmatpush1.bf16.msra.mxu1 %v14884_v21  ;;  %v14871_v21 = vcombine.high %v2103_v15, %v2107_v49  ;;  %v14932_v58 = vcombine.low %v2166_v46, %v2170_v5  ;;  %v2202_v15 = vld [vmem:[#allocation10 + $0x930] sm:$0xff] }
 0x3b9   :  { %5477 = vmatprep.subr.bf16.mxu1 %v14893_v2  ;;  %v2115_v2 = vld [vmem:[#allocation10 + $0x678] sm:$0xff] }
 0x3ba   :  { %5626 = vmatpush1.bf16.msra.mxu0 %v14830_v30  ;;  %v14933_v30 = vcombine.high %v2166_v46, %v2170_v5  ;;  %v14878_v41 = vcombine.low %v2111_v22, %v2115_v2  ;;  %v2147_v46 = vld [vmem:[#allocation10 + $0x778] sm:$0xff] }
 0x3bb   :  { %5627 = vmatprep.subr.bf16.mxu0 %v14839_v1  ;;  %v2178_v1 = vld [vmem:[#allocation10 + $0x870] sm:$0xff] }
 0x3bc   :  { %5478 = vmatpush1.bf16.msra.mxu1 %v14892_v43  ;;  %v14879_v43 = vcombine.high %v2111_v22, %v2115_v2  ;;  %v2210_v22 = vld [vmem:[#allocation10 + $0x970] sm:$0xff] }
 0x3bd   :  { %5479 = vmatprep.subr.bf16.mxu1 %v14901_v10  ;;  %v2123_v10 = vld [vmem:[#allocation10 + $0x6b8] sm:$0xff] }
 0x3be   :  { %5628 = vmatpush1.bf16.msra.mxu0 %v14838_v47  ;;  %v14941_v47 = vcombine.high %v2174_v31, %v2178_v1  ;;  %v14887_v45 = vcombine.high %v2119_v6, %v2123_v10 }
 0x3bf   :  { %5629 = vmatprep.subr.bf16.mxu0 %v14847_v54  ;;  %v2186_v54 = vld [vmem:[#allocation10 + $0x8b0] sm:$0xff] }
 0x3c0   :  { %5480 = vmatpush1.bf16.msra.mxu1 %v14900_v7  ;;  %v19701_v7 = vld [vmem:[#allocation56_spill] sm:$0xff]  ;;  %v14949_v14 = vcombine.high %v2182_v11, %v2186_v54 }
 0x3c1   :  { %5481 = vmatprep.subr.bf16.mxu1 %v14909_v25  ;;  %v14940_v25 = vcombine.low %v2174_v31, %v2178_v1  ;;  %v2155_v31 = vld [vmem:[#allocation10 + $0x7b8] sm:$0xff] }
 0x3c2   :  { %5630 = vmatpush1.bf16.msra.mxu0 %v14846_v57  ;;  %v2127_v57 = vld [vmem:[#allocation10 + $0x6d8] sm:$0xff] }
 0x3c3   :  { %5631 = vmatprep.subr.bf16.mxu0 %v14855_v55  ;;  %v14886_v55 = vcombine.low %v2119_v6, %v2123_v10  ;;  %v14895_v17 = vcombine.high %v2127_v57, %v2131_v4  ;;  %v2218_v6 = vld [vmem:[#allocation10 + $0x9b0] sm:$0xff] }
 0x3c4   :  { %5482 = vmatpush1.bf16.msra.mxu1 %v14908_v37  ;;  %v2190_v37 = vld [vmem:[#allocation10 + $0x8d0] sm:$0xff] }
 0x3c5   :  { %5483 = vmatprep.subr.bf16.mxu1 %v14917_v34  ;;  %v14948_v34 = vcombine.low %v2182_v11, %v2186_v54  ;;  %v14957_v53 = vcombine.high %v2190_v37, %v2194_v38  ;;  %v2163_v11 = vld [vmem:[#allocation10 + $0x7f8] sm:$0xff] }
 0x3c6   :  { %5632 = vmatpush1.bf16.msra.mxu0 %v14854_v35  ;;  %v2135_v35 = vld [vmem:[#allocation10 + $0x718] sm:$0xff] }
 0x3c7   :  { %5633 = vmatprep.subr.bf16.mxu0 %v14863_v40  ;;  %v14894_v40 = vcombine.low %v2127_v57, %v2131_v4  ;;  %v14903_v49 = vcombine.high %v2135_v35, %v2139_v42  ;;  %v2226_v57 = vld [vmem:[#allocation10 + $0x9f0] sm:$0xff] }
 0x3c8   :  { %5484 = vmatpush1.bf16.msra.mxu1 %v14916_v60  ;;  %v2198_v60 = vld [vmem:[#allocation10 + $0x910] sm:$0xff] }
 0x3c9   :  { %5485 = vmatprep.subr.bf16.mxu1 %v14925_v50  ;;  %v14956_v50 = vcombine.low %v2190_v37, %v2194_v38  ;;  %v14965_v5 = vcombine.high %v2198_v60, %v2202_v15  ;;  %v2171_v37 = vld [vmem:[#allocation10 + $0x838] sm:$0xff] }
 0x3ca   :  { %5634 = vmatpush1.bf16.msra.mxu0 %v14862_v0  ;;  %v2143_v0 = vld [vmem:[#allocation10 + $0x758] sm:$0xff] }
 0x3cb   :  { %5635 = vmatprep.subr.bf16.mxu0 %v14871_v21  ;;  %v14902_v21 = vcombine.low %v2135_v35, %v2139_v42  ;;  %v14911_v2 = vcombine.high %v2143_v0, %v2147_v46  ;;  %v2234_v35 = vld [vmem:[#allocation10 + $0xa30] sm:$0xff] }
 0x3cc   :  { %5486 = vmatpush1.bf16.msra.mxu1 %v14924_v27  ;;  %v2206_v27 = vld [vmem:[#allocation10 + $0x950] sm:$0xff] }
 0x3cd   :  { %5496 = vmatprep.subr.bf16.mxu1 %v14933_v30  ;;  %v14964_v30 = vcombine.low %v2198_v60, %v2202_v15  ;;  %v14973_v1 = vcombine.high %v2206_v27, %v2210_v22  ;;  %v2179_v60 = vld [vmem:[#allocation10 + $0x878] sm:$0xff] }
 0x3ce   :  { %5636 = vmatpush1.bf16.msra.mxu0 %v14870_v18  ;;  %v2151_v18 = vld [vmem:[#allocation10 + $0x798] sm:$0xff] }
 0x3cf   :  { %5488 = vmatmul.mubr.bf16.vlgmr.msra.gmra.mrb[12].mxu1 %v19701_v7  ;;  %5637 = vmatprep.subr.bf16.mxu0 %v14879_v43  ;;  %v14910_v43 = vcombine.low %v2143_v0, %v2147_v46  ;;  %v14919_v10 = vcombine.high %v2151_v18, %v2155_v31  ;;  %v2242_v0 = vld [vmem:[#allocation10 + $0xa70] sm:$0xff] }
 0x3d0   :  { %5497 = vmatpush1.bf16.msra.mxu1 %v14932_v58  ;;  %5528 = vmatprep.mubr.bf16.mxu1 %v19702_v52  ;;  %v2214_v58 = vld [vmem:[#allocation10 + $0x990] sm:$0xff] }
 0x3d1   :  { %5498 = vmatprep.subr.bf16.mxu1 %v14941_v47  ;;  %v14972_v47 = vcombine.low %v2206_v27, %v2210_v22  ;;  %v14981_v54 = vcombine.high %v2214_v58, %v2218_v6  ;;  %v2187_v27 = vld [vmem:[#allocation10 + $0x8b8] sm:$0xff] }
 0x3d2   :  { %5638 = vmatpush1.bf16.msra.mxu0 %v14878_v41  ;;  %v2159_v41 = vld [vmem:[#allocation10 + $0x7d8] sm:$0xff] }
 0x3d3   :  { %5639 = vmatprep.subr.bf16.mxu0 %v14887_v45  ;;  %v14918_v45 = vcombine.low %v2151_v18, %v2155_v31  ;;  %v14927_v4 = vcombine.high %v2159_v41, %v2163_v11  ;;  %v2250_v18 = vld [vmem:[#allocation10 + $0xab0] sm:$0xff] }
 0x3d4   :  { %5499 = vmatpush1.bf16.msra.mxu1 %v14940_v25  ;;  %v2222_v25 = vld [vmem:[#allocation10 + $0x9d0] sm:$0xff] }
 0x3d5   :  { %5500 = vmatprep.subr.bf16.mxu1 %v14949_v14  ;;  %v14980_v14 = vcombine.low %v2214_v58, %v2218_v6  ;;  %v14989_v38 = vcombine.high %v2222_v25, %v2226_v57  ;;  %v2191_v58 = vld [vmem:[#allocation10 + $0x8d8] sm:$0xff] }
 0x3d6   :  { %5640 = vmatpush1.bf16.msra.mxu0 %v14886_v55  ;;  %v2167_v55 = vld [vmem:[#allocation10 + $0x818] sm:$0xff] }
 0x3d7   :  { %5641 = vmatprep.subr.bf16.mxu0 %v14895_v17  ;;  %v14926_v17 = vcombine.low %v2159_v41, %v2163_v11  ;;  %v14935_v42 = vcombine.high %v2167_v55, %v2171_v37  ;;  %v2195_v6 = vld [vmem:[#allocation10 + $0x8f8] sm:$0xff]  ;;  %v2258_v11 = vld [vmem:[#allocation10 + $0xaf0] sm:$0xff] }
 0x3d8   :  { %5501 = vmatpush1.bf16.msra.mxu1 %v14948_v34  ;;  %v2230_v34 = vld [vmem:[#allocation10 + $0xa10] sm:$0xff] }
 0x3d9   :  { %5502 = vmatprep.subr.bf16.mxu1 %v14957_v53  ;;  %v14988_v53 = vcombine.low %v2222_v25, %v2226_v57  ;;  %v14997_v15 = vcombine.high %v2230_v34, %v2234_v35  ;;  %v2199_v25 = vld [vmem:[#allocation10 + $0x918] sm:$0xff] }
 0x3da   :  { %5642 = vmatpush1.bf16.msra.mxu0 %v14894_v40  ;;  %v2175_v40 = vld [vmem:[#allocation10 + $0x858] sm:$0xff] }
 0x3db   :  { %5643 = vmatprep.subr.bf16.mxu0 %v14903_v49  ;;  %v14934_v49 = vcombine.low %v2167_v55, %v2171_v37  ;;  %v14943_v46 = vcombine.high %v2175_v40, %v2179_v60  ;;  %v2203_v57 = vld [vmem:[#allocation10 + $0x938] sm:$0xff]  ;;  %v2262_v55 = vld [vmem:[#allocation10 + $0xb10] sm:$0xff] }
 0x3dc   :  { %5503 = vmatpush1.bf16.msra.mxu1 %v14956_v50  ;;  %v2238_v50 = vld [vmem:[#allocation10 + $0xa50] sm:$0xff] }
 0x3dd   :  { %5504 = vmatprep.subr.bf16.mxu1 %v14965_v5  ;;  %v14996_v5 = vcombine.low %v2230_v34, %v2234_v35  ;;  %v15005_v22 = vcombine.high %v2238_v50, %v2242_v0  ;;  %v2266_v37 = vld [vmem:[#allocation10 + $0xb30] sm:$0xff]  ;;  %v2207_v34 = vld [vmem:[#allocation10 + $0x958] sm:$0xff] }
 0x3de   :  { %5644 = vmatpush1.bf16.msra.mxu0 %v14902_v21  ;;  %v2183_v21 = vld [vmem:[#allocation10 + $0x898] sm:$0xff] }
 0x3df   :  { %5645 = vmatprep.subr.bf16.mxu0 %v14911_v2  ;;  %v14942_v2 = vcombine.low %v2175_v40, %v2179_v60  ;;  %v14951_v31 = vcombine.high %v2183_v21, %v2187_v27  ;;  %v14950_v41 = vcombine.low %v2183_v21, %v2187_v27  ;;  %v2211_v35 = vld [vmem:[#allocation10 + $0x978] sm:$0xff]  ;;  %v2270_v40 = vld [vmem:[#allocation10 + $0xb50] sm:$0xff] }
 0x3e0   :  { %5505 = vmatpush1.bf16.msra.mxu1 %v14964_v30  ;;  %v2246_v30 = vld [vmem:[#allocation10 + $0xa90] sm:$0xff] }
 0x3e1   :  { %5506 = vmatprep.subr.bf16.mxu1 %v14973_v1  ;;  %v2274_v60 = vld [vmem:[#allocation10 + $0xb70] sm:$0xff] }
 0x3e2   :  { %5646 = vmatpush1.bf16.msra.mxu0 %v14910_v43  ;;  %v15004_v43 = vcombine.low %v2238_v50, %v2242_v0  ;;  %v2215_v50 = vld [vmem:[#allocation10 + $0x998] sm:$0xff]  ;;  %v2278_v21 = vld [vmem:[#allocation10 + $0xb90] sm:$0xff] }
 0x3e3   :  { %5647 = vmatprep.subr.bf16.mxu0 %v14919_v10  ;;  %v2219_v0 = vld [vmem:[#allocation10 + $0x9b8] sm:$0xff]  ;;  %v2282_v27 = vld [vmem:[#allocation10 + $0xbb0] sm:$0xff] }
 0x3e4   :  { %5507 = vmatpush1.bf16.msra.mxu1 %v14972_v47  ;;  %v15013_v47 = vcombine.high %v2246_v30, %v2250_v18 }
 0x3e5   :  { %5508 = vmatprep.subr.bf16.mxu1 %v14981_v54 }
 0x3e6   :  { %5648 = vmatpush1.bf16.msra.mxu0 %v14918_v45  ;;  %v15012_v45 = vcombine.low %v2246_v30, %v2250_v18  ;;  %v15036_v30 = vcombine.low %v2270_v40, %v2274_v60  ;;  %v2223_v18 = vld [vmem:[#allocation10 + $0x9d8] sm:$0xff] }
 0x3e7   :  { %5649 = vmatprep.subr.bf16.mxu0 %v14927_v4 }
 0x3e8   :  { %5509 = vmatpush1.bf16.msra.mxu1 %v14980_v14  ;;  %v14958_v14 = vcombine.low %v2191_v58, %v2195_v6 }
 0x3e9   :  { %5510 = vmatprep.subr.bf16.mxu1 %v14989_v38  ;;  %v14967_v38 = vcombine.high %v2199_v25, %v2203_v57 }
 0x3ea   :  { %5650 = vmatpush1.bf16.msra.mxu0 %v14926_v17 }
 0x3eb   :  { %5660 = vmatprep.subr.bf16.mxu0 %v14935_v42  ;;  %v15029_v42 = vcombine.high %v2262_v55, %v2266_v37 }
 0x3ec   :  { %5511 = vmatpush1.bf16.msra.mxu1 %v14988_v53  ;;  %v14966_v53 = vcombine.low %v2199_v25, %v2203_v57  ;;  %v2235_v25 = vld [vmem:[#allocation10 + $0xa38] sm:$0xff] }
 0x3ed   :  { %5512 = vmatprep.subr.bf16.mxu1 %v14997_v15  ;;  %5652 = vmatmul.mubr.bf16.vlgmr.msra.gmra.mrb[8].mxu0 %v19701_v7  ;;  %v2254_v7 = vld [vmem:[#allocation10 + $0xad0] sm:$0xff]  ;;  %v14975_v15 = vcombine.high %v2207_v34, %v2211_v35 }
 0x3ee   :  { %5661 = vmatpush1.bf16.msra.mxu0 %v14934_v49  ;;  %5692 = vmatprep.mubr.bf16.mxu0 %v19702_v52  ;;  %v14959_v52 = vcombine.high %v2191_v58, %v2195_v6  ;;  %v15021_v4 = vcombine.high %v2254_v7, %v2258_v11  ;;  %v15020_v17 = vcombine.low %v2254_v7, %v2258_v11  ;;  %v2290_v7 = vld [vmem:[#allocation10 + $0xbf0] sm:$0xff] }
 0x3ef   :  { %5662 = vmatprep.subr.bf16.mxu0 %v14943_v46  ;;  %v6700_v1 = vpop.xlane.xlu1 %6699  ;;  %v15028_v49 = vcombine.low %v2262_v55, %v2266_v37  ;;  %v15037_v46 = vcombine.high %v2270_v40, %v2274_v60  ;;  %v15045_v6 = vcombine.high %v2278_v21, %v2282_v27 }
 0x3f0   :  { %5513 = vmatpush1.bf16.msra.mxu1 %v14996_v5  ;;  %v6701_v10 = vmul.f32 0.00048828125, %v6700_v1  ;;  %v14974_v5 = vcombine.low %v2207_v34, %v2211_v35  ;;  %v19703_v34 = vld [vmem:[#allocation28_spill] sm:$0xff] }
 0x3f1   :  { %5514 = vmatprep.subr.bf16.mxu1 %v15005_v22 }
 0x3f2   :  { %5663 = vmatpush1.bf16.msra.mxu0 %v14942_v2  ;;  %v6702_v54 = vadd.f32 1e-05, %v6701_v10  ;;  %v14983_v2 = vcombine.high %v2215_v50, %v2219_v0 }
 0x3f3   :  { %5664 = vmatprep.subr.bf16.mxu0 %v14951_v31  ;;  %v2227_v31 = vld [vmem:[#allocation10 + $0x9f8] sm:$0xff] }
 0x3f4   :  { %5515 = vmatpush1.bf16.msra.mxu1 %v15004_v43  ;;  %16646 = vrsqrt.f32 %v6702_v54  ;;  %v14991_v11 = vcombine.high %v2223_v18, %v2227_v31  ;;  %v14990_v37 = vcombine.low %v2223_v18, %v2227_v31 }
 0x3f5   :  { %5516 = vmatprep.subr.bf16.mxu1 %v15013_v47  ;;  %v14982_v47 = vcombine.low %v2215_v50, %v2219_v0  ;;  %v19704_v0 = vld [vmem:[#allocation32_spill] sm:$0xff] }
 0x3f6   :  { %5665 = vmatpush1.bf16.msra.mxu0 %v14950_v41  ;;  %v2286_v41 = vld [vmem:[#allocation10 + $0xbd0] sm:$0xff] }
 0x3f7   :  { %5666 = vmatprep.subr.bf16.mxu0 %v14959_v52  ;;  %v15052_v60 = vcombine.low %v2286_v41, %v2290_v7 }
 0x3f8   :  { %5517 = vmatpush1.bf16.msra.mxu1 %v15012_v45  ;;  %v2231_v45 = vld [vmem:[#allocation10 + $0xa18] sm:$0xff] }
 0x3f9   :  { %5518 = vmatprep.subr.bf16.mxu1 %v15021_v4  ;;  %v15053_v4 = vcombine.high %v2286_v41, %v2290_v7  ;;  %v14999_v35 = vcombine.high %v2231_v45, %v2235_v25  ;;  %v14998_v31 = vcombine.low %v2231_v45, %v2235_v25 }
 0x3fa   :  { %5667 = vmatpush1.bf16.msra.mxu0 %v14958_v14 }
 0x3fb   :  { %5668 = vmatprep.subr.bf16.mxu0 %v14967_v38  ;;  %v2294_v38 = vld [vmem:[#allocation10 + $0xc10] sm:$0xff] }
 0x3fc   :  { %5519 = vmatpush1.bf16.msra.mxu1 %v15020_v17 }
 0x3fd   :  { %5520 = vmatprep.subr.bf16.mxu1 %v15029_v42 }
 0x3fe   :  { %5669 = vmatpush1.bf16.msra.mxu0 %v14966_v53  ;;  %v18875_v22 = vpop.eup %16646 }
 0x3ff   :  { %5670 = vmatprep.subr.bf16.mxu0 %v14975_v15  ;;  %v18878_v1 = vrot.slane %v18875_v22, 1  ;;  %v6708_v43 = vmul.f32 %v18875_v22, %v18542_v16  ;;  %v6711_v58 = vmul.f32 %v18875_v22, %v18576_v36  ;;  %v6710_v10 = vmul.f32 %v18875_v22, %v18557_v32  ;;  %v2243_v15 = vld [vmem:[#allocation10 + $0xa78] sm:$0xff] }
 0x400   :  { %5521 = vmatpush1.bf16.msra.mxu1 %v15028_v49  ;;  %v15044_v36 = vcombine.low %v2278_v21, %v2282_v27  ;;  %v2302_v21 = vld [vmem:[#allocation10 + $0xc50] sm:$0xff] }
 0x401   :  { %5522 = vmatprep.subr.bf16.mxu1 %v15037_v46  ;;  %v6724_v54 = vmul.f32 %v18878_v1, %v18493_v62  ;;  %v6740_v52 = vpack.c.bf16 %v6708_v43, %v6708_v43  ;;  %v6727_v16 = vmul.f32 %v18878_v1, %v18529_v59  ;;  %v6743_v57 = vpack.c.bf16 %v6711_v58, %v6711_v58  ;;  %v2298_v62 = vld [vmem:[#allocation10 + $0xc30] sm:$0xff] }
 0x402   :  { %5671 = vmatpush1.bf16.msra.mxu0 %v14974_v5  ;;  %v6726_v32 = vmul.f32 %v18878_v1, %v18513_v3  ;;  %v6742_v55 = vpack.c.bf16 %v6710_v10, %v6710_v10  ;;  %v6713_v59 = vmul.f32 %v18875_v22, %v19703_v34  ;;  %v2239_v3 = vld [vmem:[#allocation10 + $0xa58] sm:$0xff]  ;;  %v6729_v46 = vmul.f32 %v18878_v1, %v19704_v0  ;;  %v2306_v27 = vld [vmem:[#allocation10 + $0xc70] sm:$0xff] }
 0x403   :  { %5672 = vmatprep.subr.bf16.mxu0 %v14983_v2  ;;  %v6756_v14 = vpack.c.bf16 %v6724_v54, %v6724_v54  ;;  %v6759_v17 = vpack.c.bf16 %v6727_v16, %v6727_v16  ;;  %v7870_v42 = vunpack.c.l.b16 %v6740_v52  ;;  %v7873_v49 = vunpack.c.l.b16 %v6743_v57  ;;  %v2247_v10 = vld [vmem:[#allocation10 + $0xa98] sm:$0xff] }
 0x404   :  { %5523 = vmatpush1.bf16.msra.mxu1 %v15036_v30  ;;  %v6758_v40 = vpack.c.bf16 %v6726_v32, %v6726_v32  ;;  %v15061_v5 = vcombine.high %v2294_v38, %v2298_v62  ;;  %v7872_v30 = vunpack.c.l.b16 %v6742_v55  ;;  %v6745_v58 = vpack.c.bf16 %v6713_v59, %v6713_v59  ;;  %v2310_v55 = vld [vmem:[#allocation10 + $0xc90] sm:$0xff]  ;;  %v2259_v0 = vld [vmem:[#allocation10 + $0xaf8] sm:$0xff] }
 0x405   :  { %5524 = vmatprep.subr.bf16.mxu1 %v15045_v6  ;;  %v7886_v53 = vunpack.c.l.b16 %v6756_v14  ;;  %v7889_v50 = vunpack.c.l.b16 %v6759_v17  ;;  %v15007_v6 = vcombine.high %v2239_v3, %v2243_v15  ;;  %v15060_v54 = vcombine.low %v2294_v38, %v2298_v62  ;;  %v19707_v59 = vld [vmem:[#allocation71_spill] sm:$0xff] }
 0x406   :  { %5673 = vmatpush1.bf16.msra.mxu0 %v14982_v47  ;;  %v7888_v18 = vunpack.c.l.b16 %v6758_v40  ;;  %v2251_v47 = vld [vmem:[#allocation10 + $0xab8] sm:$0xff]  ;;  %v15069_v52 = vcombine.high %v2302_v21, %v2306_v27  ;;  %v15006_v25 = vcombine.low %v2239_v3, %v2243_v15  ;;  %v7875_v62 = vunpack.c.l.b16 %v6745_v58 }
 0x407   :  { %5674 = vmatprep.subr.bf16.mxu0 %v14991_v11  ;;  %v7902_v2 = vrot.slane %v7886_v53, 7  ;;  %v7908_v43 = vrot.slane %v7889_v50, 7  ;;  %v6761_v11 = vpack.c.bf16 %v6729_v46, %v6729_v46  ;;  %v15015_v38 = vcombine.high %v2247_v10, %v2251_v47  ;;  %v19708_v53 = vld [vmem:[#allocation31_spill] sm:$0xff]  ;;  %v19710_v15 = vld [vmem:[#allocation72_spill] sm:$0xff]  ;;  %v19711_v46 = vld [vmem:[#allocation33_spill] sm:$0xff] }
 0x408   :  { %5525 = vmatpush1.bf16.msra.mxu1 %v15044_v36  ;;  %v7906_v7 = vrot.slane %v7888_v18, 7  ;;  %v19705_v36 = vld [vmem:[#allocation69_spill] sm:$0xff]  ;;  %v6715_v34 = vmul.f32 %v18875_v22, %v18592_v51  ;;  %v6731_v40 = vmul.f32 %v18878_v1, %v19708_v53  ;;  %v2255_v50 = vld [vmem:[#allocation10 + $0xad8] sm:$0xff]  ;;  %v6730_v51 = vmul.f32 %v18878_v1, %v19711_v46  ;;  %v2318_v18 = vld [vmem:[#allocation10 + $0xcd0] sm:$0xff] }
 0x409   :  { %5526 = vmatprep.subr.bf16.mxu1 %v15053_v4  ;;  %v18897_v41 = vsel %vm467_vm0, %v7902_v2, %v7870_v42  ;;  %v18900_v16 = vsel %vm467_vm0, %v7908_v43, %v7873_v49  ;;  %v6712_v45 = vmul.f32 %v18875_v22, %v19705_v36  ;;  %v7891_v32 = vunpack.c.l.b16 %v6761_v11  ;;  %v19706_v4 = vld [vmem:[#allocation68_spill] sm:$0xff] }
 0x40a   :  { %5675 = vmatpush1.bf16.msra.mxu0 %v14990_v37  ;;  %v18905_v57 = vsel %vm467_vm0, %v7906_v7, %v7872_v30  ;;  %v6728_v14 = vmul.f32 %v18878_v1, %v19706_v4  ;;  %v2314_v37 = vld [vmem:[#allocation10 + $0xcb0] sm:$0xff]  ;;  %v15068_v49 = vcombine.low %v2302_v21, %v2306_v27  ;;  %v6747_v2 = vpack.c.bf16 %v6715_v34, %v6715_v34  ;;  %v2267_v36 = vld [vmem:[#allocation10 + $0xb38] sm:$0xff] }
 0x40b   :  { %5676 = vmatprep.subr.bf16.mxu0 %v14999_v35  ;;  %v6744_v17 = vpack.c.bf16 %v6712_v45, %v6712_v45  ;;  %v7912_v35 = vrot.slane %v7891_v32, 7  ;;  %v15014_v30 = vcombine.low %v2247_v10, %v2251_v47  ;;  %v15076_v7 = vcombine.low %v2310_v55, %v2314_v37  ;;  %v19712_v47 = vld [vmem:[#allocation29_spill] sm:$0xff]  ;;  %v2275_v53 = vld [vmem:[#allocation10 + $0xb78] sm:$0xff] }
 0x40c   :  { %5527 = vmatpush1.bf16.msra.mxu1 %v15052_v60  ;;  %v6760_v42 = vpack.c.bf16 %v6728_v14, %v6728_v14  ;;  %v19709_v60 = vld [vmem:[#allocation30_spill] sm:$0xff]  ;;  %v15023_v21 = vcombine.high %v2255_v50, %v2259_v0  ;;  %v6763_v27 = vpack.c.bf16 %v6731_v40, %v6731_v40  ;;  %v6762_v45 = vpack.c.bf16 %v6730_v51, %v6730_v51 }
 0x40d   :  { %5537 = vmatprep.subr.bf16.mxu1 %v15061_v5  ;;  %v6714_v3 = vmul.f32 %v18875_v22, %v19709_v60  ;;  %v15077_v5 = vcombine.high %v2310_v55, %v2314_v37  ;;  %v18920_v43 = vsel %vm467_vm0, %v7912_v35, %v7875_v62  ;;  %v7874_v58 = vunpack.c.l.b16 %v6744_v17  ;;  %v2330_v62 = vld [vmem:[#allocation10 + $0xd30] sm:$0xff] }
 0x40e   :  { %5677 = vmatpush1.bf16.msra.mxu0 %v14998_v31  ;;  %v2322_v31 = vld [vmem:[#allocation10 + $0xcf0] sm:$0xff]  ;;  %v6717_v10 = vmul.f32 %v18875_v22, %v18627_v24  ;;  %v7877_v14 = vunpack.c.l.b16 %v6747_v2  ;;  %v7893_v55 = vunpack.c.l.b16 %v6763_v27  ;;  %v15022_v37 = vcombine.low %v2255_v50, %v2259_v0  ;;  %v18929_v24 = vld [vmem:[#allocation10 + $0xb58] sm:$0xff] }
 0x40f   :  { %5529 = vmatmul.mubr.bf16.vlgmr.msra.gmra.mrb[12].mxu1 %v19707_v59  ;;  %5678 = vmatprep.subr.bf16.mxu0 %v15007_v6  ;;  %v7890_v6 = vunpack.c.l.b16 %v6760_v42  ;;  %v6746_v11 = vpack.c.bf16 %v6714_v3, %v6714_v3  ;;  %v15084_v32 = vcombine.low %v2318_v18, %v2322_v31  ;;  %v15085_v4 = vcombine.high %v2318_v18, %v2322_v31  ;;  %v19713_v0 = vld [vmem:[#allocation35_spill] sm:$0xff]  ;;  %v18940_v31 = vld [vmem:[#allocation14] sm:$0xff] }
 0x410   :  { %5538 = vmatpush1.bf16.msra.mxu1 %v15060_v54  ;;  %5569 = vmatprep.mubr.bf16.mxu1 %v19710_v15  ;;  %v2263_v54 = vld [vmem:[#allocation10 + $0xb18] sm:$0xff]  ;;  %v7892_v35 = vunpack.c.l.b16 %v6762_v45  ;;  %v7916_v40 = vrot.slane %v7893_v55, 7  ;;  %v6749_v60 = vpack.c.bf16 %v6717_v10, %v6717_v10  ;;  %v6716_v50 = vmul.f32 %v18875_v22, %v18623_v48 }
 0x411   :  { %5539 = vmatprep.subr.bf16.mxu1 %v15069_v52  ;;  %v7910_v52 = vrot.slane %v7890_v6, 7  ;;  %v7876_v34 = vunpack.c.l.b16 %v6746_v11  ;;  %v15031_v42 = vcombine.high %v2263_v54, %v2267_v36  ;;  %v6732_v46 = vmul.f32 %v18878_v1, %v19713_v0  ;;  %v2338_v6 = vld [vmem:[#allocation10 + $0xd70] sm:$0xff]  ;;  %v18948_v45 = vld [vmem:[#allocation10 + $0xbb8] sm:$0xff] }
 0x412   :  { %5679 = vmatpush1.bf16.msra.mxu0 %v15006_v25  ;;  %v6733_v25 = vmul.f32 %v18878_v1, %v19712_v47  ;;  %v6719_v51 = vmul.f32 %v18875_v22, %v18635_v19  ;;  %v18938_v2 = vsel %vm467_vm0, %v7916_v40, %v7877_v14  ;;  %v15030_v18 = vcombine.low %v2263_v54, %v2267_v36 }
 0x413   :  { %5680 = vmatprep.subr.bf16.mxu0 %v15015_v38  ;;  %v2326_v38 = vld [vmem:[#allocation10 + $0xd10] sm:$0xff]  ;;  %v18927_v17 = vsel %vm467_vm0, %v7910_v52, %v7874_v58  ;;  %v15039_v48 = vcombine.high %v18929_v24, %v2275_v53  ;;  %v6748_v27 = vpack.c.bf16 %v6716_v50, %v6716_v50  ;;  %v6764_v11 = vpack.c.bf16 %v6732_v46, %v6732_v46  ;;  %v18946_v52 = vld [vmem:[#allocation10 + $0xb98] sm:$0xff] }
 0x414   :  { %5540 = vmatpush1.bf16.msra.mxu1 %v15068_v49  ;;  %v6765_v3 = vpack.c.bf16 %v6733_v25, %v6733_v25  ;;  %v7914_v49 = vrot.slane %v7892_v35, 7  ;;  %v2334_v58 = vld [vmem:[#allocation10 + $0xd50] sm:$0xff]  ;;  %v6735_v54 = vmul.f32 %v18878_v1, %v18698_v23  ;;  %v6751_v36 = vpack.c.bf16 %v6719_v51, %v6719_v51 }
 0x415   :  { %5541 = vmatprep.subr.bf16.mxu1 %v15077_v5  ;;  %v15093_v5 = vcombine.high %v2326_v38, %v2330_v62  ;;  %v6718_v10 = vmul.f32 %v18875_v22, %v18631_v56  ;;  %v6734_v47 = vmul.f32 %v18878_v1, %v18682_v9  ;;  %v2425_v25 = vrot.slane %v18940_v31, %v19673_v8  ;;  %v2342_v23 = vld [vmem:[#allocation10 + $0xd90] sm:$0xff] }
 0x416   :  { %5681 = vmatpush1.bf16.msra.mxu0 %v15014_v30  ;;  %v15092_v30 = vcombine.low %v2326_v38, %v2330_v62  ;;  %v7895_v19 = vunpack.c.l.b16 %v6765_v3  ;;  %v15038_v55 = vcombine.low %v18929_v24, %v2275_v53  ;;  %v7878_v38 = vunpack.c.l.b16 %v6748_v27  ;;  %v2291_v3 = vld [vmem:[#allocation10 + $0xbf8] sm:$0xff] }
 0x417   :  { %5682 = vmatprep.subr.bf16.mxu0 %v15023_v21  ;;  %v7879_v21 = vunpack.c.l.b16 %v6749_v60  ;;  %v7894_v62 = vunpack.c.l.b16 %v6764_v11  ;;  %v6767_v56 = vpack.c.bf16 %v6735_v54, %v6735_v54  ;;  %v15047_v9 = vcombine.high %v18946_v52, %v18948_v45  ;;  %v2287_v60 = vld [vmem:[#allocation10 + $0xbd8] sm:$0xff] }
 0x418   :  { %5542 = vmatpush1.bf16.msra.mxu1 %v15076_v7  ;;  %v18944_v7 = vsel %vm467_vm0, %v7914_v49, %v7876_v34  ;;  %v7920_v14 = vrot.slane %v7895_v19, 7  ;;  %v6750_v35 = vpack.c.bf16 %v6718_v10, %v6718_v10  ;;  %v15100_v40 = vcombine.low %v2334_v58, %v2338_v6  ;;  %v2299_v10 = vld [vmem:[#allocation10 + $0xc38] sm:$0xff] }
 0x419   :  { %5543 = vmatprep.subr.bf16.mxu1 %v15085_v4  ;;  %v15101_v4 = vcombine.high %v2334_v58, %v2338_v6  ;;  %v7918_v49 = vrot.slane %v7894_v62, 7  ;;  %v7881_v24 = vunpack.c.l.b16 %v6751_v36  ;;  %v7897_v53 = vunpack.c.l.b16 %v6767_v56  ;;  %v2303_v56 = vld [vmem:[#allocation10 + $0xc58] sm:$0xff] }
 0x41a   :  { %5683 = vmatpush1.bf16.msra.mxu0 %v15022_v37  ;;  %v2346_v37 = vld [vmem:[#allocation10 + $0xdb0] sm:$0xff]  ;;  %v18964_v34 = vsel %vm467_vm0, %v7920_v14, %v7879_v21  ;;  %v7880_v0 = vunpack.c.l.b16 %v6750_v35  ;;  %v6721_v51 = vmul.f32 %v18875_v22, %v18674_v44  ;;  %v15055_v27 = vcombine.high %v2287_v60, %v2291_v3 }
 0x41b   :  { %5684 = vmatprep.subr.bf16.mxu0 %v15031_v42  ;;  %v6766_v42 = vpack.c.bf16 %v6734_v47, %v6734_v47  ;;  %v15109_v50 = vcombine.high %v2342_v23, %v2346_v37  ;;  %v18971_v58 = vsel %vm467_vm0, %v7918_v49, %v7878_v38  ;;  %v7924_v6 = vrot.slane %v7897_v53, 7  ;;  %v2362_v38 = vld [vmem:[#allocation10 + $0xe30] sm:$0xff] }
 0x41c   :  { %5544 = vmatpush1.bf16.msra.mxu1 %v15084_v32  ;;  %v2429_v32 = vrot.slane %v18940_v31, %v19675_v33  ;;  %v6737_v44 = vmul.f32 %v18878_v1, %v18719_v39  ;;  %v6739_v53 = vmul.f32 %v18878_v1, %v18769_v28  ;;  %v6738_v28 = vmul.f32 %v18878_v1, %v18753_v26 }
 0x41d   :  { %5545 = vmatprep.subr.bf16.mxu1 %v15093_v5  ;;  %v7896_v46 = vunpack.c.l.b16 %v6766_v42  ;;  %v18980_v47 = vsel %vm467_vm0, %v7924_v6, %v7881_v24  ;;  %v6723_v24 = vmul.f32 %v18875_v22, %v18822_v13 }
 0x41e   :  { %5685 = vmatpush1.bf16.msra.mxu0 %v15030_v18  ;;  %v15046_v18 = vcombine.low %v18946_v52, %v18948_v45  ;;  %v15108_v52 = vcombine.low %v2342_v23, %v2346_v37  ;;  %v2295_v45 = vld [vmem:[#allocation10 + $0xc18] sm:$0xff]  ;;  %v15054_v37 = vcombine.low %v2287_v60, %v2291_v3  ;;  %v6769_v35 = vpack.c.bf16 %v6737_v44, %v6737_v44 }
 0x41f   :  { %5686 = vmatprep.subr.bf16.mxu0 %v15039_v48  ;;  %v2350_v48 = vld [vmem:[#allocation10 + $0xdd0] sm:$0xff]  ;;  %v7922_v11 = vrot.slane %v7896_v46, 7  ;;  %v15063_v62 = vcombine.high %v2295_v45, %v2299_v10  ;;  %v15062_v46 = vcombine.low %v2295_v45, %v2299_v10  ;;  %v6771_v6 = vpack.c.bf16 %v6739_v53, %v6739_v53 }
 0x420   :  { %5546 = vmatpush1.bf16.msra.mxu1 %v15092_v30  ;;  %v2354_v30 = vld [vmem:[#allocation10 + $0xdf0] sm:$0xff]  ;;  %v7899_v3 = vunpack.c.l.b16 %v6769_v35 }
 0x421   :  { %5547 = vmatprep.subr.bf16.mxu1 %v15101_v4  ;;  %v5243_v5 = vpop.f32.mrb[8].mxu1  ;;  %v15117_v14 = vcombine.high %v2350_v48, %v2354_v30  ;;  %v18985_v39 = vsel %vm467_vm0, %v7922_v11, %v7880_v0  ;;  %v6722_v0 = vmul.f32 %v18875_v22, %v18805_v12  ;;  %v2315_v11 = vld [vmem:[#allocation10 + $0xcb8] sm:$0xff]  ;;  %v2374_v10 = vld [vmem:[#allocation10 + $0xe90] sm:$0xff] }
 0x422   :  { %5687 = vmatpush1.bf16.msra.mxu0 %v15038_v55  ;;  %v18973_v21 = vadd.f32 %v5243_v5, %v2425_v25  ;;  %v5245_v19 = vpop.f32.mrb[9].mxu1  ;;  %v6720_v25 = vmul.f32 %v18875_v22, %v18653_v61  ;;  %v2358_v55 = vld [vmem:[#allocation10 + $0xe10] sm:$0xff]  ;;  %v6736_v61 = vmul.f32 %v18878_v1, %v18715_v20 }
 0x423   :  { %5688 = vmatprep.subr.bf16.mxu0 %v15047_v9  ;;  %v18977_v54 = vadd.f32 %v5245_v19, %v2429_v32  ;;  %v5247_v36 = vpop.f32.mrb[10].mxu1  ;;  %v6753_v32 = vpack.c.bf16 %v6721_v51, %v6721_v51  ;;  %v2307_v9 = vld [vmem:[#allocation10 + $0xc78] sm:$0xff]  ;;  %v15125_v49 = vcombine.high %v2358_v55, %v2362_v38  ;;  %v2366_v20 = vld [vmem:[#allocation10 + $0xe50] sm:$0xff]  ;;  %v15124_v19 = vcombine.low %v2358_v55, %v2362_v38 }
 0x424   :  { %5548 = vmatpush1.bf16.msra.mxu1 %v15100_v40  ;;  %v5248_v4 = vpop.f32.mrb[11].mxu1  ;;  %v6752_v42 = vpack.c.bf16 %v6720_v25, %v6720_v25  ;;  %v15116_v40 = vcombine.low %v2350_v48, %v2354_v30  ;;  %v2370_v51 = vld [vmem:[#allocation10 + $0xe70] sm:$0xff]  ;;  %v15071_v5 = vcombine.high %v2303_v56, %v2307_v9  ;;  %v6755_v48 = vpack.c.bf16 %v6723_v24, %v6723_v24 }
 0x425   :  { %5549 = vmatprep.subr.bf16.mxu1 %v15109_v50  ;;  %v5750_v23 = vcombine.low %v18973_v21, %v18977_v54  ;;  %v7883_v60 = vunpack.c.l.b16 %v6753_v32  ;;  %v6768_v50 = vpack.c.bf16 %v6736_v61, %v6736_v61  ;;  %v7928_v30 = vrot.slane %v7899_v3, 7  ;;  %v2378_v25 = vld [vmem:[#allocation10 + $0xeb0] sm:$0xff]  ;;  %v2319_v32 = vld [vmem:[#allocation10 + $0xcd8] sm:$0xff] }
 0x426   :  { %5689 = vmatpush1.bf16.msra.mxu0 %v15046_v18  ;;  %v7882_v18 = vunpack.c.l.b16 %v6752_v42  ;;  %v15133_v12 = vcombine.high %v2366_v20, %v2370_v51  ;;  %v15070_v45 = vcombine.low %v2303_v56, %v2307_v9  ;;  %v7885_v26 = vunpack.c.l.b16 %v6755_v48  ;;  %v2382_v9 = vld [vmem:[#allocation10 + $0xed0] sm:$0xff]  ;;  %v2331_v3 = vld [vmem:[#allocation10 + $0xd38] sm:$0xff] }
 0x427   :  { %5690 = vmatprep.subr.bf16.mxu0 %v15055_v27  ;;  %v7898_v13 = vunpack.c.l.b16 %v6768_v50  ;;  %v2311_v27 = vld [vmem:[#allocation10 + $0xc98] sm:$0xff]  ;;  %v19001_v44 = vsel %vm467_vm0, %v7928_v30, %v7883_v60  ;;  %v7901_v4 = vunpack.c.l.b16 %v6771_v6  ;;  %v15132_v38 = vcombine.low %v2366_v20, %v2370_v51  ;;  %v2386_v42 = vld [vmem:[#allocation10 + $0xef0] sm:$0xff] }
 0x428   :  { %5550 = vmatpush1.bf16.msra.mxu1 %v15108_v52  ;;  %v6754_v52 = vpack.c.bf16 %v6722_v0, %v6722_v0  ;;  %v15141_v35 = vcombine.high %v2374_v10, %v2378_v25  ;;  %v15078_v56 = vcombine.low %v2311_v27, %v2315_v11  ;;  %v15140_v53 = vcombine.low %v2374_v10, %v2378_v25  ;;  %v2327_v60 = vld [vmem:[#allocation10 + $0xd18] sm:$0xff]  ;;  %v2390_v20 = vld [vmem:[#allocation10 + $0xf10] sm:$0xff] }
 0x429   :  { %5551 = vmatprep.subr.bf16.mxu1 %v15117_v14  ;;  %v7926_v36 = vrot.slane %v7898_v13, 7  ;;  %v15079_v14 = vcombine.high %v2311_v27, %v2315_v11  ;;  %v15149_v50 = vcombine.high %v2382_v9, %v2386_v42  ;;  %v2394_v51 = vld [vmem:[#allocation10 + $0xf30] sm:$0xff]  ;;  %v2335_v48 = vld [vmem:[#allocation10 + $0xd58] sm:$0xff]  ;;  %v15094_v6 = vcombine.low %v2327_v60, %v2331_v3 }
 0x42a   :  { %5691 = vmatpush1.bf16.msra.mxu0 %v15054_v37  ;;  %v2323_v37 = vld [vmem:[#allocation10 + $0xcf8] sm:$0xff]  ;;  %v7884_v61 = vunpack.c.l.b16 %v6754_v52  ;;  %v15157_v13 = vcombine.high %v2390_v20, %v2394_v51  ;;  %v2398_v27 = vld [vmem:[#allocation10 + $0xf50] sm:$0xff] }
 0x42b   :  { %5701 = vmatprep.subr.bf16.mxu0 %v15063_v62  ;;  %v19005_v55 = vsel %vm467_vm0, %v7926_v36, %v7882_v18  ;;  %v7932_v62 = vrot.slane %v7901_v4, 7  ;;  %v15148_v18 = vcombine.low %v2382_v9, %v2386_v42  ;;  %v2339_v30 = vld [vmem:[#allocation10 + $0xd78] sm:$0xff]  ;;  %v2402_v11 = vld [vmem:[#allocation10 + $0xf70] sm:$0xff] }
 0x42c   :  { %5552 = vmatpush1.bf16.msra.mxu1 %v15116_v40  ;;  %v19715_v36 = vld [vmem:[#allocation66_spill] sm:$0xff]  ;;  %v2343_v10 = vld [vmem:[#allocation10 + $0xd98] sm:$0xff] }
 0x42d   :  { %5553 = vmatprep.subr.bf16.mxu1 %v15125_v49  ;;  %5693 = vmatmul.mubr.bf16.vlgmr.msra.gmra.mrb[8].mxu0 %v19707_v59  ;;  %v6770_v59 = vpack.c.bf16 %v6738_v28, %v6738_v28  ;;  %v19008_v40 = vsel %vm467_vm0, %v7932_v62, %v7885_v26  ;;  %v15087_v49 = vcombine.high %v2319_v32, %v2323_v37  ;;  %v19714_v28 = vld [vmem:[#allocation44_spill] sm:$0xff]  ;;  %v19716_v26 = vld [vmem:[#allocation58_spill] sm:$0xff] }
 0x42e   :  { %5702 = vmatpush1.bf16.msra.mxu0 %v15062_v46  ;;  %5733 = vmatprep.mubr.bf16.mxu0 %v19710_v15  ;;  %v15086_v46 = vcombine.low %v2319_v32, %v2323_v37  ;;  %v6725_v52 = vmul.f32 %v18878_v1, %v19715_v36  ;;  %v2347_v25 = vld [vmem:[#allocation10 + $0xdb8] sm:$0xff]  ;;  %v2433_v4 = vrot.slane %v18940_v31, %v19716_v26  ;;  %v2406_v32 = vld [vmem:[#allocation10 + $0xf90] sm:$0xff]  ;;  %v6772_v36 = vld [vmem:[#allocation11] sm:$0xff] }
 0x42f   :  { %5703 = vmatprep.subr.bf16.mxu0 %v15071_v5  ;;  %v7900_v15 = vunpack.c.l.b16 %v6770_v59  ;;  %v15095_v5 = vcombine.high %v2327_v60, %v2331_v3  ;;  %v2410_v37 = vld [vmem:[#allocation10 + $0xfb0] sm:$0xff]  ;;  %v15111_v62 = vcombine.high %v2343_v10, %v2347_v25  ;;  %v2351_v9 = vld [vmem:[#allocation10 + $0xdd8] sm:$0xff]  ;;  %v15110_v3 = vcombine.low %v2343_v10, %v2347_v25 }
 0x430   :  { %5554 = vmatpush1.bf16.msra.mxu1 %v15124_v19  ;;  %v2436_v19 = vsub.s32 3, %v19714_v28  ;;  %v19717_v1 = vld [vmem:[#allocation67_spill] sm:$0xff] }
 0x431   :  { %5555 = vmatprep.subr.bf16.mxu1 %v15133_v12  ;;  %v7930_v24 = vrot.slane %v7900_v15, 7  ;;  %v15103_v12 = vcombine.high %v2335_v48, %v2339_v30  ;;  %v2355_v42 = vld [vmem:[#allocation10 + $0xdf8] sm:$0xff] }
 0x432   :  { %5704 = vmatpush1.bf16.msra.mxu0 %v15070_v45  ;;  %v15156_v45 = vcombine.low %v2390_v20, %v2394_v51  ;;  %v2437_v59 = vrot.slane %v18940_v31, %v2436_v19  ;;  %v15119_v51 = vcombine.high %v2351_v9, %v2355_v42  ;;  %v2367_v54 = vld [vmem:[#allocation10 + $0xe58] sm:$0xff] }
 0x433   :  { %5705 = vmatprep.subr.bf16.mxu0 %v15079_v14  ;;  %v19011_v0 = vsel %vm467_vm0, %v7930_v24, %v7884_v61  ;;  %v15165_v14 = vcombine.high %v2398_v27, %v2402_v11  ;;  %v6757_v61 = vpack.c.bf16 %v6725_v52, %v6725_v52  ;;  %v6776_v52 = vld [vmem:[#allocation11 + $0x20] sm:$0xff] }
 0x434   :  { %5556 = vmatpush1.bf16.msra.mxu1 %v15132_v38  ;;  %v15102_v38 = vcombine.low %v2335_v48, %v2339_v30  ;;  %v15172_v48 = vcombine.low %v2406_v32, %v2410_v37  ;;  %v2359_v30 = vld [vmem:[#allocation10 + $0xe18] sm:$0xff] }
 0x435   :  { %5557 = vmatprep.subr.bf16.mxu1 %v15141_v35  ;;  %v6709_v35 = vmul.f32 %v18875_v22, %v19717_v1 }
 0x436   :  { %5706 = vmatpush1.bf16.msra.mxu0 %v15078_v56  ;;  %v15164_v56 = vcombine.low %v2398_v27, %v2402_v11  ;;  %v19027_v27 = vrot.slane %v5750_v23, %v18360_v63  ;;  %v2371_v23 = vld [vmem:[#allocation10 + $0xe78] sm:$0xff] }
 0x437   :  { %5707 = vmatprep.subr.bf16.mxu0 %v15087_v49  ;;  %v6741_v22 = vpack.c.bf16 %v6709_v35, %v6709_v35  ;;  %v15135_v1 = vcombine.high %v2367_v54, %v2371_v23  ;;  %v15184_v35 = vcombine.low %v6772_v36, %v6776_v52 }
 0x438   :  { %5558 = vmatpush1.bf16.msra.mxu1 %v15140_v53  ;;  %v15173_v53 = vcombine.high %v2406_v32, %v2410_v37  ;;  %v6780_v32 = vld [vmem:[#allocation11 + $0x40] sm:$0xff] }
 0x439   :  { %5559 = vmatprep.subr.bf16.mxu1 %v15149_v50  ;;  %v2414_v50 = vld [vmem:[#allocation10 + $0xfd0] sm:$0xff]  ;;  %v7871_v10 = vunpack.c.l.b16 %v6741_v22  ;;  %v6784_v37 = vld [vmem:[#allocation11 + $0x60] sm:$0xff] }
 0x43a   :  { %5708 = vmatpush1.bf16.msra.mxu0 %v15086_v46  ;;  %v2418_v46 = vld [vmem:[#allocation10 + $0xff0] sm:$0xff] }
 0x43b   :  { %5709 = vmatprep.subr.bf16.mxu0 %v15095_v5  ;;  %v7887_v5 = vunpack.c.l.b16 %v6757_v61  ;;  %v15180_v21 = vcombine.low %v2414_v50, %v2418_v46  ;;  %v2375_v61 = vld [vmem:[#allocation10 + $0xe98] sm:$0xff] }
 0x43c   :  { %5560 = vmatpush1.bf16.msra.mxu1 %v15148_v18 }
 0x43d   :  { %5561 = vmatprep.subr.bf16.mxu1 %v15157_v13  ;;  %v2363_v13 = vld [vmem:[#allocation10 + $0xe38] sm:$0xff]  ;;  %v7904_v25 = vrot.slane %v7887_v5, 7 }
 0x43e   :  { %5710 = vmatpush1.bf16.msra.mxu0 %v15094_v6  ;;  %v15181_v6 = vcombine.high %v2414_v50, %v2418_v46 }
 0x43f   :  { %5711 = vmatprep.subr.bf16.mxu0 %v15103_v12  ;;  %v15118_v12 = vcombine.low %v2351_v9, %v2355_v42  ;;  %v15134_v42 = vcombine.low %v2367_v54, %v2371_v23  ;;  %v6812_v54 = vld [vmem:[#allocation11 + $0x140] sm:$0xff] }
 0x440   :  { %5562 = vmatpush1.bf16.msra.mxu1 %v15156_v45  ;;  %v5407_v15 = vpop.f32.mrb[4].mxu0  ;;  %v15127_v45 = vcombine.high %v2359_v30, %v2363_v13  ;;  %v6816_v23 = vld [vmem:[#allocation11 + $0x160] sm:$0xff] }
 0x441   :  { %v16256_v49 = vadd.f32 %v5407_v15, %v2433_v4  ;;  %v5409_v24 = vpop.f32.mrb[5].mxu0  ;;  %5563 = vmatprep.subr.bf16.mxu1 %v15165_v14  ;;  %v2379_v15 = vld [vmem:[#allocation10 + $0xeb8] sm:$0xff] }
 0x442   :  { %v16257_v60 = vadd.f32 %v5409_v24, %v2437_v59  ;;  %v5411_v31 = vpop.f32.mrb[6].mxu0  ;;  %5712 = vmatpush1.bf16.msra.mxu0 %v15102_v38  ;;  %v15185_v59 = vcombine.high %v6772_v36, %v6776_v52  ;;  %v15126_v38 = vcombine.low %v2359_v30, %v2363_v13  ;;  %v6792_v24 = vld [vmem:[#allocation11 + $0xa0] sm:$0xff]  ;;  %v15142_v46 = vcombine.low %v2375_v61, %v2379_v15 }
 0x443   :  { %v5412_v20 = vpop.f32.mrb[7].mxu0  ;;  %5713 = vmatprep.subr.bf16.mxu0 %v15111_v62  ;;  %v7905_v62 = vsel %vm467_vm0, %v7904_v25, %v7871_v10  ;;  %v2383_v31 = vld [vmem:[#allocation10 + $0xed8] sm:$0xff] }
 0x444   :  { %v5751_v18 = vcombine.low %v16256_v49, %v16257_v60  ;;  %5564 = vmatpush1.bf16.msra.mxu1 %v15164_v56  ;;  %v15193_v56 = vcombine.high %v6780_v32, %v6784_v37  ;;  %v19037_v9 = vpack.c.b16 %v7905_v62, %v7905_v62  ;;  %v6788_v49 = vld [vmem:[#allocation11 + $0x80] sm:$0xff]  ;;  %v15192_v60 = vcombine.low %v6780_v32, %v6784_v37  ;;  %v2403_v10 = vld [vmem:[#allocation10 + $0xf78] sm:$0xff] }
 0x445   :  { %5565 = vmatprep.subr.bf16.mxu1 %v15173_v53  ;;  %v15143_v53 = vcombine.high %v2375_v61, %v2379_v15  ;;  %v15201_v50 = vcombine.high %v6788_v49, %v6792_v24  ;;  %v6796_v20 = vld [vmem:[#allocation11 + $0xc0] sm:$0xff]  ;;  %v15200_v5 = vcombine.low %v6788_v49, %v6792_v24  ;;  %v2407_v32 = vld [vmem:[#allocation10 + $0xf98] sm:$0xff]  ;;  %v15225_v62 = vcombine.high %v6812_v54, %v6816_v23 }
 0x446   :  { %v19030_v11 = vrot.slane %v5751_v18, %v18360_v63  ;;  %5714 = vmatpush1.bf16.msra.mxu0 %v15110_v3  ;;  %v2387_v3 = vld [vmem:[#allocation10 + $0xef8] sm:$0xff]  ;;  %v6824_v61 = vld [vmem:[#allocation11 + $0x1a0] sm:$0xff] }
 0x447   :  { %5715 = vmatprep.subr.bf16.mxu0 %v15119_v51  ;;  %v6800_v51 = vld [vmem:[#allocation11 + $0xe0] sm:$0xff]  ;;  %v15151_v22 = vcombine.high %v2383_v31, %v2387_v3  ;;  %v2391_v18 = vld [vmem:[#allocation10 + $0xf18] sm:$0xff]  ;;  %v15150_v13 = vcombine.low %v2383_v31, %v2387_v3 }
 0x448   :  { %v5782_v4 = vcombine.low %v19027_v27, %v19030_v11  ;;  %v5783_v14 = vcombine.high %v19027_v27, %v19030_v11  ;;  %5566 = vmatpush1.bf16.msra.mxu1 %v15172_v48  ;;  %v2395_v48 = vld [vmem:[#allocation10 + $0xf38] sm:$0xff]  ;;  %v15209_v30 = vcombine.high %v6796_v20, %v6800_v51  ;;  %v15208_v52 = vcombine.low %v6796_v20, %v6800_v51  ;;  %v6832_v31 = vld [vmem:[#allocation11 + $0x1e0] sm:$0xff]  ;;  %v6777_v20 = vld [vmem:[#allocation11 + $0x28] sm:$0xff] }
 0x449   :  { %5567 = vmatprep.subr.bf16.mxu1 %v15181_v6  ;;  %v6804_v6 = vld [vmem:[#allocation11 + $0x100] sm:$0xff]  ;;  %v15159_v36 = vcombine.high %v2391_v18, %v2395_v48  ;;  %v2411_v37 = vld [vmem:[#allocation10 + $0xfb8] sm:$0xff] }
 0x44a   :  { %5716 = vmatpush1.bf16.msra.mxu0 %v15118_v12  ;;  %v6808_v12 = vld [vmem:[#allocation11 + $0x120] sm:$0xff]  ;;  %v15175_v15 = vcombine.high %v2407_v32, %v2411_v37  ;;  %v2419_v49 = vld [vmem:[#allocation10 + $0xff8] sm:$0xff] }
 0x44b   :  { %5717 = vmatprep.subr.bf16.mxu0 %v15127_v45  ;;  %v2399_v45 = vld [vmem:[#allocation10 + $0xf58] sm:$0xff]  ;;  %v15217_v25 = vcombine.high %v6804_v6, %v6808_v12 }
 0x44c   :  { %5568 = vmatpush1.bf16.msra.mxu1 %v15180_v21  ;;  %v15158_v21 = vcombine.low %v2391_v18, %v2395_v48  ;;  %v6840_v18 = vld [vmem:[#allocation11 + $0x220] sm:$0xff] }
 0x44d   :  { %13086 = vmatprep.subr.bf16.mxu1 %v15185_v59  ;;  %v15167_v59 = vcombine.high %v2399_v45, %v2403_v10 }
 0x44e   :  { %5718 = vmatpush1.bf16.msra.mxu0 %v15126_v38  ;;  %v15216_v38 = vcombine.low %v6804_v6, %v6808_v12  ;;  %v6785_v6 = vld [vmem:[#allocation11 + $0x68] sm:$0xff] }
 0x44f   :  { %5570 = vmatmul.mubr.bf16.vlgmr.msra.gmra.mrb[12].mxu1 %v19686_v29  ;;  %5719 = vmatprep.subr.bf16.mxu0 %v15135_v1  ;;  %v15166_v1 = vcombine.low %v2399_v45, %v2403_v10  ;;  %v6848_v45 = vld [vmem:[#allocation11 + $0x260] sm:$0xff] }
 0x450   :  { %13087 = vmatpush1.bf16.msra.mxu1 %v15184_v35  ;;  %13118 = vmatprep.mubr.bf16.mxu1 %v19037_v9  ;;  %v6820_v35 = vld [vmem:[#allocation11 + $0x180] sm:$0xff] }
 0x451   :  { %13088 = vmatprep.subr.bf16.mxu1 %v15193_v56  ;;  %v15224_v56 = vcombine.low %v6812_v54, %v6816_v23  ;;  %v15233_v24 = vcombine.high %v6820_v35, %v6824_v61  ;;  %v6793_v54 = vld [vmem:[#allocation11 + $0xa8] sm:$0xff] }
 0x452   :  { %5720 = vmatpush1.bf16.msra.mxu0 %v15134_v42  ;;  %v2415_v42 = vld [vmem:[#allocation10 + $0xfd8] sm:$0xff] }
 0x453   :  { %5721 = vmatprep.subr.bf16.mxu0 %v15143_v53  ;;  %v15174_v53 = vcombine.low %v2407_v32, %v2411_v37  ;;  %v15183_v3 = vcombine.high %v2415_v42, %v2419_v49  ;;  %v6856_v32 = vld [vmem:[#allocation11 + $0x2a0] sm:$0xff] }
 0x454   :  { %13089 = vmatpush1.bf16.msra.mxu1 %v15192_v60  ;;  %v6828_v60 = vld [vmem:[#allocation11 + $0x1c0] sm:$0xff] }
 0x455   :  { %13090 = vmatprep.subr.bf16.mxu1 %v15201_v50  ;;  %v15232_v50 = vcombine.low %v6820_v35, %v6824_v61  ;;  %v15241_v51 = vcombine.high %v6828_v60, %v6832_v31  ;;  %v6801_v35 = vld [vmem:[#allocation11 + $0xe8] sm:$0xff] }
 0x456   :  { %5722 = vmatpush1.bf16.msra.mxu0 %v15142_v46  ;;  %v6773_v46 = vld [vmem:[#allocation11 + $0x8] sm:$0xff] }
 0x457   :  { %5723 = vmatprep.subr.bf16.mxu0 %v15151_v22  ;;  %v15182_v22 = vcombine.low %v2415_v42, %v2419_v49  ;;  %v15187_v48 = vcombine.high %v6773_v46, %v6777_v20 }
 0x458   :  { %13091 = vmatpush1.bf16.msra.mxu1 %v15200_v5  ;;  %v6836_v5 = vld [vmem:[#allocation11 + $0x200] sm:$0xff] }
 0x459   :  { %13092 = vmatprep.subr.bf16.mxu1 %v15209_v30  ;;  %v15240_v30 = vcombine.low %v6828_v60, %v6832_v31  ;;  %v15249_v12 = vcombine.high %v6836_v5, %v6840_v18 }
 0x45a   :  { %5724 = vmatpush1.bf16.msra.mxu0 %v15150_v13  ;;  %v6781_v13 = vld [vmem:[#allocation11 + $0x48] sm:$0xff] }
 0x45b   :  { %5725 = vmatprep.subr.bf16.mxu0 %v15159_v36  ;;  %v15186_v36 = vcombine.low %v6773_v46, %v6777_v20  ;;  %v15195_v10 = vcombine.high %v6781_v13, %v6785_v6 }
 0x45c   :  { %13093 = vmatpush1.bf16.msra.mxu1 %v15208_v52  ;;  %v6844_v52 = vld [vmem:[#allocation11 + $0x240] sm:$0xff] }
 0x45d   :  { %13094 = vmatprep.subr.bf16.mxu1 %v15217_v25  ;;  %v15248_v25 = vcombine.low %v6836_v5, %v6840_v18  ;;  %v15257_v23 = vcombine.high %v6844_v52, %v6848_v45 }
 0x45e   :  { %5726 = vmatpush1.bf16.msra.mxu0 %v15158_v21  ;;  %v6789_v21 = vld [vmem:[#allocation11 + $0x88] sm:$0xff] }
 0x45f   :  { %5727 = vmatprep.subr.bf16.mxu0 %v15167_v59  ;;  %v15194_v59 = vcombine.low %v6781_v13, %v6785_v6  ;;  %v15203_v37 = vcombine.high %v6789_v21, %v6793_v54 }
 0x460   :  { %13095 = vmatpush1.bf16.msra.mxu1 %v15216_v38  ;;  %v6852_v38 = vld [vmem:[#allocation11 + $0x280] sm:$0xff] }
 0x461   :  { %13096 = vmatprep.subr.bf16.mxu1 %v15225_v62  ;;  %v15256_v62 = vcombine.low %v6844_v52, %v6848_v45  ;;  %v15265_v61 = vcombine.high %v6852_v38, %v6856_v32  ;;  %v15264_v49 = vcombine.low %v6852_v38, %v6856_v32 }
 0x462   :  { %5728 = vmatpush1.bf16.msra.mxu0 %v15166_v1  ;;  %v6797_v1 = vld [vmem:[#allocation11 + $0xc8] sm:$0xff] }
 0x463   :  { %5729 = vmatprep.subr.bf16.mxu0 %v15175_v15  ;;  %v15202_v15 = vcombine.low %v6789_v21, %v6793_v54  ;;  %v15211_v42 = vcombine.high %v6797_v1, %v6801_v35  ;;  %v15210_v31 = vcombine.low %v6797_v1, %v6801_v35 }
 0x464   :  { %13097 = vmatpush1.bf16.msra.mxu1 %v15224_v56  ;;  %v6860_v56 = vld [vmem:[#allocation11 + $0x2c0] sm:$0xff] }
 0x465   :  { %13098 = vmatprep.subr.bf16.mxu1 %v15233_v24  ;;  %v6805_v24 = vld [vmem:[#allocation11 + $0x108] sm:$0xff] }
 0x466   :  { %5730 = vmatpush1.bf16.msra.mxu0 %v15174_v53  ;;  %v6809_v53 = vld [vmem:[#allocation11 + $0x128] sm:$0xff] }
 0x467   :  { %5731 = vmatprep.subr.bf16.mxu0 %v15183_v3  ;;  %v6868_v3 = vld [vmem:[#allocation11 + $0x300] sm:$0xff]  ;;  %v15219_v46 = vcombine.high %v6805_v24, %v6809_v53  ;;  %v15218_v18 = vcombine.low %v6805_v24, %v6809_v53 }
 0x468   :  { %13099 = vmatpush1.bf16.msra.mxu1 %v15232_v50  ;;  %v6872_v50 = vld [vmem:[#allocation11 + $0x320] sm:$0xff] }
 0x469   :  { %13100 = vmatprep.subr.bf16.mxu1 %v15241_v51  ;;  %v6813_v51 = vld [vmem:[#allocation11 + $0x148] sm:$0xff]  ;;  %v15281_v5 = vcombine.high %v6868_v3, %v6872_v50  ;;  %v15280_v6 = vcombine.low %v6868_v3, %v6872_v50 }
 0x46a   :  { %5732 = vmatpush1.bf16.msra.mxu0 %v15182_v22  ;;  %v6817_v22 = vld [vmem:[#allocation11 + $0x168] sm:$0xff] }
 0x46b   :  { %13414 = vmatprep.subr.bf16.mxu0 %v15187_v48  ;;  %v6876_v48 = vld [vmem:[#allocation11 + $0x340] sm:$0xff]  ;;  %v15227_v13 = vcombine.high %v6813_v51, %v6817_v22  ;;  %v15226_v45 = vcombine.low %v6813_v51, %v6817_v22 }
 0x46c   :  { %13101 = vmatpush1.bf16.msra.mxu1 %v15240_v30  ;;  %v6880_v30 = vld [vmem:[#allocation11 + $0x360] sm:$0xff] }
 0x46d   :  { %5734 = vmatmul.mubr.bf16.vlgmr.msra.gmra.mrb[8].mxu0 %v19686_v29  ;;  %13102 = vmatprep.subr.bf16.mxu1 %v15249_v12  ;;  %v6864_v29 = vld [vmem:[#allocation11 + $0x2e0] sm:$0xff]  ;;  %v6821_v12 = vld [vmem:[#allocation11 + $0x188] sm:$0xff]  ;;  %v15289_v52 = vcombine.high %v6876_v48, %v6880_v30  ;;  %v15288_v54 = vcombine.low %v6876_v48, %v6880_v30  ;;  %v19045_v48 = vpack.c.b16 %v18897_v41, %v18897_v41 }
 0x46e   :  { %13415 = vmatpush1.bf16.msra.mxu0 %v15186_v36  ;;  %13446 = vmatprep.mubr.bf16.mxu0 %v19037_v9  ;;  %v15273_v60 = vcombine.high %v6860_v56, %v6864_v29  ;;  %v15272_v20 = vcombine.low %v6860_v56, %v6864_v29  ;;  %v6825_v36 = vld [vmem:[#allocation11 + $0x1a8] sm:$0xff] }
 0x46f   :  { %13416 = vmatprep.subr.bf16.mxu0 %v15195_v10  ;;  %v6884_v10 = vld [vmem:[#allocation11 + $0x380] sm:$0xff]  ;;  %v15235_v21 = vcombine.high %v6821_v12, %v6825_v36  ;;  %v15234_v32 = vcombine.low %v6821_v12, %v6825_v36  ;;  %v6861_v41 = vld [vmem:[#allocation11 + $0x2c8] sm:$0xff] }
 0x470   :  { %13103 = vmatpush1.bf16.msra.mxu1 %v15248_v25  ;;  %v6888_v25 = vld [vmem:[#allocation11 + $0x3a0] sm:$0xff] }
 0x471   :  { %13104 = vmatprep.subr.bf16.mxu1 %v15257_v23  ;;  %v6829_v23 = vld [vmem:[#allocation11 + $0x1c8] sm:$0xff]  ;;  %v15297_v38 = vcombine.high %v6884_v10, %v6888_v25  ;;  %v15296_v35 = vcombine.low %v6884_v10, %v6888_v25  ;;  %v6916_v12 = vld [vmem:[#allocation11 + $0x480] sm:$0xff] }
 0x472   :  { %13417 = vmatpush1.bf16.msra.mxu0 %v15194_v59  ;;  %v6833_v59 = vld [vmem:[#allocation11 + $0x1e8] sm:$0xff]  ;;  %v6920_v36 = vld [vmem:[#allocation11 + $0x4a0] sm:$0xff] }
 0x473   :  { %13418 = vmatprep.subr.bf16.mxu0 %v15203_v37  ;;  %v6892_v37 = vld [vmem:[#allocation11 + $0x3c0] sm:$0xff]  ;;  %v15243_v1 = vcombine.high %v6829_v23, %v6833_v59  ;;  %v15242_v29 = vcombine.low %v6829_v23, %v6833_v59  ;;  %v6865_v10 = vld [vmem:[#allocation11 + $0x2e8] sm:$0xff]  ;;  %v15329_v25 = vcombine.high %v6916_v12, %v6920_v36  ;;  %v15328_v59 = vcombine.low %v6916_v12, %v6920_v36 }
 0x474   :  { %13105 = vmatpush1.bf16.msra.mxu1 %v15256_v62  ;;  %v6896_v62 = vld [vmem:[#allocation11 + $0x3e0] sm:$0xff]  ;;  %v15275_v23 = vcombine.high %v6861_v41, %v6865_v10 }
 0x475   :  { %13106 = vmatprep.subr.bf16.mxu1 %v15265_v61  ;;  %v6837_v61 = vld [vmem:[#allocation11 + $0x208] sm:$0xff]  ;;  %v15305_v56 = vcombine.high %v6892_v37, %v6896_v62  ;;  %v15304_v53 = vcombine.low %v6892_v37, %v6896_v62  ;;  %v15274_v62 = vcombine.low %v6861_v41, %v6865_v10 }
 0x476   :  { %13419 = vmatpush1.bf16.msra.mxu0 %v15202_v15  ;;  %v6841_v15 = vld [vmem:[#allocation11 + $0x228] sm:$0xff] }
 0x477   :  { %13420 = vmatprep.subr.bf16.mxu0 %v15211_v42  ;;  %v6900_v42 = vld [vmem:[#allocation11 + $0x400] sm:$0xff]  ;;  %v15251_v24 = vcombine.high %v6837_v61, %v6841_v15  ;;  %v15250_v50 = vcombine.low %v6837_v61, %v6841_v15 }
 0x478   :  { %13107 = vmatpush1.bf16.msra.mxu1 %v15264_v49  ;;  %v6904_v49 = vld [vmem:[#allocation11 + $0x420] sm:$0xff] }
 0x479   :  { %13108 = vmatprep.subr.bf16.mxu1 %v15273_v60  ;;  %v6845_v60 = vld [vmem:[#allocation11 + $0x248] sm:$0xff]  ;;  %v15313_v3 = vcombine.high %v6900_v42, %v6904_v49  ;;  %v15312_v22 = vcombine.low %v6900_v42, %v6904_v49 }
 0x47a   :  { %13421 = vmatpush1.bf16.msra.mxu0 %v15210_v31  ;;  %v6849_v31 = vld [vmem:[#allocation11 + $0x268] sm:$0xff] }
 0x47b   :  { %13422 = vmatprep.subr.bf16.mxu0 %v15219_v46  ;;  %v6908_v46 = vld [vmem:[#allocation11 + $0x440] sm:$0xff]  ;;  %v15259_v51 = vcombine.high %v6845_v60, %v6849_v31 }
 0x47c   :  { %13109 = vmatpush1.bf16.msra.mxu1 %v15272_v20  ;;  %v6912_v20 = vld [vmem:[#allocation11 + $0x460] sm:$0xff] }
 0x47d   :  { %13110 = vmatprep.subr.bf16.mxu1 %v15281_v5  ;;  %v6853_v5 = vld [vmem:[#allocation11 + $0x288] sm:$0xff]  ;;  %v15321_v30 = vcombine.high %v6908_v46, %v6912_v20 }
 0x47e   :  { %13423 = vmatpush1.bf16.msra.mxu0 %v15218_v18  ;;  %v6857_v18 = vld [vmem:[#allocation11 + $0x2a8] sm:$0xff] }
 0x47f   :  { %13424 = vmatprep.subr.bf16.mxu0 %v15227_v13  ;;  %v19049_v13 = vpack.c.b16 %v18900_v16, %v18900_v16  ;;  %v6924_v16 = vld [vmem:[#allocation11 + $0x4c0] sm:$0xff] }
 0x480   :  { %13111 = vmatpush1.bf16.msra.mxu1 %v15280_v6  ;;  %v15258_v6 = vcombine.low %v6845_v60, %v6849_v31 }
 0x481   :  { %13112 = vmatprep.subr.bf16.mxu1 %v15289_v52  ;;  %v15267_v52 = vcombine.high %v6853_v5, %v6857_v18 }
 0x482   :  { %13425 = vmatpush1.bf16.msra.mxu0 %v15226_v45  ;;  %v15320_v45 = vcombine.low %v6908_v46, %v6912_v20 }
 0x483   :  { %13426 = vmatprep.subr.bf16.mxu0 %v15235_v21  ;;  %v15266_v21 = vcombine.low %v6853_v5, %v6857_v18 }
 0x484   :  { %13113 = vmatpush1.bf16.msra.mxu1 %v15288_v54  ;;  %v6928_v54 = vld [vmem:[#allocation11 + $0x4e0] sm:$0xff] }
 0x485   :  { %13114 = vmatprep.subr.bf16.mxu1 %v15297_v38  ;;  %v6869_v38 = vld [vmem:[#allocation11 + $0x308] sm:$0xff]  ;;  %v15337_v37 = vcombine.high %v6924_v16, %v6928_v54  ;;  %v15336_v15 = vcombine.low %v6924_v16, %v6928_v54 }
 0x486   :  { %13427 = vmatpush1.bf16.msra.mxu0 %v15234_v32  ;;  %v6873_v32 = vld [vmem:[#allocation11 + $0x328] sm:$0xff] }
 0x487   :  { %13428 = vmatprep.subr.bf16.mxu0 %v15243_v1  ;;  %v6932_v1 = vld [vmem:[#allocation11 + $0x500] sm:$0xff]  ;;  %v15283_v61 = vcombine.high %v6869_v38, %v6873_v32  ;;  %v15282_v49 = vcombine.low %v6869_v38, %v6873_v32 }
 0x488   :  { %13115 = vmatpush1.bf16.msra.mxu1 %v15296_v35  ;;  %v6936_v35 = vld [vmem:[#allocation11 + $0x520] sm:$0xff] }
 0x489   :  { %13116 = vmatprep.subr.bf16.mxu1 %v15305_v56  ;;  %v6877_v56 = vld [vmem:[#allocation11 + $0x348] sm:$0xff]  ;;  %v15345_v42 = vcombine.high %v6932_v1, %v6936_v35  ;;  %v15344_v31 = vcombine.low %v6932_v1, %v6936_v35 }
 0x48a   :  { %13429 = vmatpush1.bf16.msra.mxu0 %v15242_v29  ;;  %v6881_v29 = vld [vmem:[#allocation11 + $0x368] sm:$0xff] }
 0x48b   :  { %13430 = vmatprep.subr.bf16.mxu0 %v15251_v24  ;;  %v6940_v24 = vld [vmem:[#allocation11 + $0x540] sm:$0xff]  ;;  %v15291_v60 = vcombine.high %v6877_v56, %v6881_v29  ;;  %v15290_v20 = vcombine.low %v6877_v56, %v6881_v29 }
 0x48c   :  { %13117 = vmatpush1.bf16.msra.mxu1 %v15304_v53  ;;  %v6944_v53 = vld [vmem:[#allocation11 + $0x560] sm:$0xff] }
 0x48d   :  { %13127 = vmatprep.subr.bf16.mxu1 %v15313_v3  ;;  %v6885_v3 = vld [vmem:[#allocation11 + $0x388] sm:$0xff]  ;;  %v15353_v46 = vcombine.high %v6940_v24, %v6944_v53  ;;  %v15352_v18 = vcombine.low %v6940_v24, %v6944_v53 }
 0x48e   :  { %13431 = vmatpush1.bf16.msra.mxu0 %v15250_v50  ;;  %v6889_v50 = vld [vmem:[#allocation11 + $0x3a8] sm:$0xff] }
 0x48f   :  { %13119 = vmatmul.mubr.bf16.vlgmr.msra.gmra.mrb[16].mxu1 %v19045_v48  ;;  %13432 = vmatprep.subr.bf16.mxu0 %v15259_v51  ;;  %v6948_v51 = vld [vmem:[#allocation11 + $0x580] sm:$0xff]  ;;  %v15299_v5 = vcombine.high %v6885_v3, %v6889_v50  ;;  %v15298_v36 = vcombine.low %v6885_v3, %v6889_v50 }
 0x490   :  { %13128 = vmatpush1.bf16.msra.mxu1 %v15312_v22  ;;  %13159 = vmatprep.mubr.bf16.mxu1 %v19049_v13  ;;  %v6952_v22 = vld [vmem:[#allocation11 + $0x5a0] sm:$0xff] }
 0x491   :  { %13129 = vmatprep.subr.bf16.mxu1 %v15321_v30  ;;  %v6893_v30 = vld [vmem:[#allocation11 + $0x3c8] sm:$0xff]  ;;  %v15361_v12 = vcombine.high %v6948_v51, %v6952_v22  ;;  %v15360_v10 = vcombine.low %v6948_v51, %v6952_v22 }
 0x492   :  { %13433 = vmatpush1.bf16.msra.mxu0 %v15258_v6  ;;  %v6897_v6 = vld [vmem:[#allocation11 + $0x3e8] sm:$0xff] }
 0x493   :  { %13434 = vmatprep.subr.bf16.mxu0 %v15267_v52  ;;  %v6956_v52 = vld [vmem:[#allocation11 + $0x5c0] sm:$0xff]  ;;  %v15307_v41 = vcombine.high %v6893_v30, %v6897_v6  ;;  %v15306_v54 = vcombine.low %v6893_v30, %v6897_v6 }
 0x494   :  { %13130 = vmatpush1.bf16.msra.mxu1 %v15320_v45  ;;  %v6960_v45 = vld [vmem:[#allocation11 + $0x5e0] sm:$0xff] }
 0x495   :  { %13131 = vmatprep.subr.bf16.mxu1 %v15329_v25  ;;  %v6901_v25 = vld [vmem:[#allocation11 + $0x408] sm:$0xff]  ;;  %v15369_v16 = vcombine.high %v6956_v52, %v6960_v45  ;;  %v15368_v32 = vcombine.low %v6956_v52, %v6960_v45 }
 0x496   :  { %13435 = vmatpush1.bf16.msra.mxu0 %v15266_v21  ;;  %v6905_v21 = vld [vmem:[#allocation11 + $0x428] sm:$0xff] }
 0x497   :  { %13436 = vmatprep.subr.bf16.mxu0 %v15275_v23  ;;  %v6964_v23 = vld [vmem:[#allocation11 + $0x600] sm:$0xff]  ;;  %v15315_v38 = vcombine.high %v6901_v25, %v6905_v21  ;;  %v15314_v35 = vcombine.low %v6901_v25, %v6905_v21 }
 0x498   :  { %13132 = vmatpush1.bf16.msra.mxu1 %v15328_v59  ;;  %v6968_v59 = vld [vmem:[#allocation11 + $0x620] sm:$0xff] }
 0x499   :  { %13133 = vmatprep.subr.bf16.mxu1 %v15337_v37  ;;  %v6909_v37 = vld [vmem:[#allocation11 + $0x448] sm:$0xff]  ;;  %v15377_v1 = vcombine.high %v6964_v23, %v6968_v59  ;;  %v15376_v29 = vcombine.low %v6964_v23, %v6968_v59 }
 0x49a   :  { %13437 = vmatpush1.bf16.msra.mxu0 %v15274_v62  ;;  %v6913_v62 = vld [vmem:[#allocation11 + $0x468] sm:$0xff] }
 0x49b   :  { %13438 = vmatprep.subr.bf16.mxu0 %v15283_v61  ;;  %v6972_v61 = vld [vmem:[#allocation11 + $0x640] sm:$0xff]  ;;  %v15323_v56 = vcombine.high %v6909_v37, %v6913_v62  ;;  %v15322_v53 = vcombine.low %v6909_v37, %v6913_v62 }
 0x49c   :  { %13134 = vmatpush1.bf16.msra.mxu1 %v15336_v15  ;;  %v6976_v15 = vld [vmem:[#allocation11 + $0x660] sm:$0xff] }
 0x49d   :  { %13135 = vmatprep.subr.bf16.mxu1 %v15345_v42  ;;  %v6917_v42 = vld [vmem:[#allocation11 + $0x488] sm:$0xff]  ;;  %v15385_v24 = vcombine.high %v6972_v61, %v6976_v15  ;;  %v15384_v50 = vcombine.low %v6972_v61, %v6976_v15 }
 0x49e   :  { %13439 = vmatpush1.bf16.msra.mxu0 %v15282_v49  ;;  %v6921_v49 = vld [vmem:[#allocation11 + $0x4a8] sm:$0xff] }
 0x49f   :  { %13440 = vmatprep.subr.bf16.mxu0 %v15291_v60  ;;  %v6980_v60 = vld [vmem:[#allocation11 + $0x680] sm:$0xff]  ;;  %v15331_v3 = vcombine.high %v6917_v42, %v6921_v49  ;;  %v15330_v22 = vcombine.low %v6917_v42, %v6921_v49 }
 0x4a0   :  { %13136 = vmatpush1.bf16.msra.mxu1 %v15344_v31  ;;  %v6984_v31 = vld [vmem:[#allocation11 + $0x6a0] sm:$0xff] }
 0x4a1   :  { %13137 = vmatprep.subr.bf16.mxu1 %v15353_v46  ;;  %v6925_v46 = vld [vmem:[#allocation11 + $0x4c8] sm:$0xff]  ;;  %v15393_v51 = vcombine.high %v6980_v60, %v6984_v31  ;;  %v15392_v6 = vcombine.low %v6980_v60, %v6984_v31 }
 0x4a2   :  { %13441 = vmatpush1.bf16.msra.mxu0 %v15290_v20  ;;  %v6929_v20 = vld [vmem:[#allocation11 + $0x4e8] sm:$0xff] }
 0x4a3   :  { %13442 = vmatprep.subr.bf16.mxu0 %v15299_v5  ;;  %v6988_v5 = vld [vmem:[#allocation11 + $0x6c0] sm:$0xff]  ;;  %v15339_v30 = vcombine.high %v6925_v46, %v6929_v20  ;;  %v15338_v45 = vcombine.low %v6925_v46, %v6929_v20 }
 0x4a4   :  { %13138 = vmatpush1.bf16.msra.mxu1 %v15352_v18  ;;  %v6992_v18 = vld [vmem:[#allocation11 + $0x6e0] sm:$0xff] }
 0x4a5   :  { %13139 = vmatprep.subr.bf16.mxu1 %v15361_v12  ;;  %v6933_v12 = vld [vmem:[#allocation11 + $0x508] sm:$0xff]  ;;  %v15401_v52 = vcombine.high %v6988_v5, %v6992_v18  ;;  %v15400_v21 = vcombine.low %v6988_v5, %v6992_v18 }
 0x4a6   :  { %13443 = vmatpush1.bf16.msra.mxu0 %v15298_v36  ;;  %v6937_v36 = vld [vmem:[#allocation11 + $0x528] sm:$0xff] }
 0x4a7   :  { %13444 = vmatprep.subr.bf16.mxu0 %v15307_v41  ;;  %v6996_v41 = vld [vmem:[#allocation11 + $0x700] sm:$0xff]  ;;  %v15347_v25 = vcombine.high %v6933_v12, %v6937_v36  ;;  %v15346_v59 = vcombine.low %v6933_v12, %v6937_v36 }
 0x4a8   :  { %13140 = vmatpush1.bf16.msra.mxu1 %v15360_v10  ;;  %v7000_v10 = vld [vmem:[#allocation11 + $0x720] sm:$0xff] }
 0x4a9   :  { %13141 = vmatprep.subr.bf16.mxu1 %v15369_v16  ;;  %v6941_v16 = vld [vmem:[#allocation11 + $0x548] sm:$0xff]  ;;  %v15409_v23 = vcombine.high %v6996_v41, %v7000_v10  ;;  %v15408_v62 = vcombine.low %v6996_v41, %v7000_v10 }
 0x4aa   :  { %13445 = vmatpush1.bf16.msra.mxu0 %v15306_v54  ;;  %v6945_v54 = vld [vmem:[#allocation11 + $0x568] sm:$0xff] }
 0x4ab   :  { %13455 = vmatprep.subr.bf16.mxu0 %v15315_v38  ;;  %v7004_v38 = vld [vmem:[#allocation11 + $0x740] sm:$0xff]  ;;  %v15355_v37 = vcombine.high %v6941_v16, %v6945_v54  ;;  %v15354_v15 = vcombine.low %v6941_v16, %v6945_v54 }
 0x4ac   :  { %13142 = vmatpush1.bf16.msra.mxu1 %v15368_v32  ;;  %v7008_v32 = vld [vmem:[#allocation11 + $0x760] sm:$0xff] }
 0x4ad   :  { %13143 = vmatprep.subr.bf16.mxu1 %v15377_v1  ;;  %13447 = vmatmul.mubr.bf16.vlgmr.msra.gmra.mrb[12].mxu0 %v19045_v48  ;;  %v6949_v1 = vld [vmem:[#allocation11 + $0x588] sm:$0xff]  ;;  %v15417_v61 = vcombine.high %v7004_v38, %v7008_v32  ;;  %v15416_v49 = vcombine.low %v7004_v38, %v7008_v32  ;;  %v19057_v38 = vpack.c.b16 %v18905_v57, %v18905_v57 }
 0x4ae   :  { %13456 = vmatpush1.bf16.msra.mxu0 %v15314_v35  ;;  %13487 = vmatprep.mubr.bf16.mxu0 %v19049_v13  ;;  %v6953_v35 = vld [vmem:[#allocation11 + $0x5a8] sm:$0xff] }
 0x4af   :  { %13457 = vmatprep.subr.bf16.mxu0 %v15323_v56  ;;  %v7012_v56 = vld [vmem:[#allocation11 + $0x780] sm:$0xff]  ;;  %v15363_v42 = vcombine.high %v6949_v1, %v6953_v35  ;;  %v15362_v31 = vcombine.low %v6949_v1, %v6953_v35  ;;  %v6989_v57 = vld [vmem:[#allocation11 + $0x6c8] sm:$0xff] }
 0x4b0   :  { %13144 = vmatpush1.bf16.msra.mxu1 %v15376_v29  ;;  %v7016_v29 = vld [vmem:[#allocation11 + $0x7a0] sm:$0xff] }
 0x4b1   :  { %13145 = vmatprep.subr.bf16.mxu1 %v15385_v24  ;;  %v6957_v24 = vld [vmem:[#allocation11 + $0x5c8] sm:$0xff]  ;;  %v15425_v60 = vcombine.high %v7012_v56, %v7016_v29  ;;  %v15424_v20 = vcombine.low %v7012_v56, %v7016_v29  ;;  %v7044_v1 = vld [vmem:[#allocation11 + $0x880] sm:$0xff] }
 0x4b2   :  { %13458 = vmatpush1.bf16.msra.mxu0 %v15322_v53  ;;  %v6961_v53 = vld [vmem:[#allocation11 + $0x5e8] sm:$0xff]  ;;  %v7048_v35 = vld [vmem:[#allocation11 + $0x8a0] sm:$0xff] }
 0x4b3   :  { %13459 = vmatprep.subr.bf16.mxu0 %v15331_v3  ;;  %v7020_v3 = vld [vmem:[#allocation11 + $0x7c0] sm:$0xff]  ;;  %v15371_v46 = vcombine.high %v6957_v24, %v6961_v53  ;;  %v15370_v18 = vcombine.low %v6957_v24, %v6961_v53  ;;  %v6993_v56 = vld [vmem:[#allocation11 + $0x6e8] sm:$0xff]  ;;  %v15457_v29 = vcombine.high %v7044_v1, %v7048_v35  ;;  %v15456_v53 = vcombine.low %v7044_v1, %v7048_v35 }
 0x4b4   :  { %13146 = vmatpush1.bf16.msra.mxu1 %v15384_v50  ;;  %v7024_v50 = vld [vmem:[#allocation11 + $0x7e0] sm:$0xff]  ;;  %v15403_v24 = vcombine.high %v6989_v57, %v6993_v56 }
 0x4b5   :  { %13147 = vmatprep.subr.bf16.mxu1 %v15393_v51  ;;  %v6965_v51 = vld [vmem:[#allocation11 + $0x608] sm:$0xff]  ;;  %v15433_v5 = vcombine.high %v7020_v3, %v7024_v50  ;;  %v15432_v36 = vcombine.low %v7020_v3, %v7024_v50  ;;  %v15402_v50 = vcombine.low %v6989_v57, %v6993_v56 }
 0x4b6   :  { %13460 = vmatpush1.bf16.msra.mxu0 %v15330_v22  ;;  %v6969_v22 = vld [vmem:[#allocation11 + $0x628] sm:$0xff] }
 0x4b7   :  { %13461 = vmatprep.subr.bf16.mxu0 %v15339_v30  ;;  %v7028_v30 = vld [vmem:[#allocation11 + $0x800] sm:$0xff]  ;;  %v15379_v12 = vcombine.high %v6965_v51, %v6969_v22  ;;  %v15378_v10 = vcombine.low %v6965_v51, %v6969_v22 }
 0x4b8   :  { %13148 = vmatpush1.bf16.msra.mxu1 %v15392_v6  ;;  %v7032_v6 = vld [vmem:[#allocation11 + $0x820] sm:$0xff] }
 0x4b9   :  { %13149 = vmatprep.subr.bf16.mxu1 %v15401_v52  ;;  %v6973_v52 = vld [vmem:[#allocation11 + $0x648] sm:$0xff]  ;;  %v15441_v41 = vcombine.high %v7028_v30, %v7032_v6  ;;  %v15440_v54 = vcombine.low %v7028_v30, %v7032_v6 }
 0x4ba   :  { %13462 = vmatpush1.bf16.msra.mxu0 %v15338_v45  ;;  %v6977_v45 = vld [vmem:[#allocation11 + $0x668] sm:$0xff] }
 0x4bb   :  { %13463 = vmatprep.subr.bf16.mxu0 %v15347_v25  ;;  %v7036_v25 = vld [vmem:[#allocation11 + $0x840] sm:$0xff]  ;;  %v15387_v16 = vcombine.high %v6973_v52, %v6977_v45 }
 0x4bc   :  { %13150 = vmatpush1.bf16.msra.mxu1 %v15400_v21  ;;  %v7040_v21 = vld [vmem:[#allocation11 + $0x860] sm:$0xff] }
 0x4bd   :  { %13151 = vmatprep.subr.bf16.mxu1 %v15409_v23  ;;  %v6981_v23 = vld [vmem:[#allocation11 + $0x688] sm:$0xff]  ;;  %v15449_v32 = vcombine.high %v7036_v25, %v7040_v21 }
 0x4be   :  { %13464 = vmatpush1.bf16.msra.mxu0 %v15346_v59  ;;  %v6985_v59 = vld [vmem:[#allocation11 + $0x6a8] sm:$0xff] }
 0x4bf   :  { %13465 = vmatprep.subr.bf16.mxu0 %v15355_v37  ;;  %v19061_v37 = vpack.c.b16 %v18920_v43, %v18920_v43  ;;  %v7052_v43 = vld [vmem:[#allocation11 + $0x8c0] sm:$0xff] }
 0x4c0   :  { %13152 = vmatpush1.bf16.msra.mxu1 %v15408_v62  ;;  %v15386_v62 = vcombine.low %v6973_v52, %v6977_v45 }
 0x4c1   :  { %13153 = vmatprep.subr.bf16.mxu1 %v15417_v61  ;;  %v15395_v61 = vcombine.high %v6981_v23, %v6985_v59 }
 0x4c2   :  { %13466 = vmatpush1.bf16.msra.mxu0 %v15354_v15  ;;  %v15448_v15 = vcombine.low %v7036_v25, %v7040_v21 }
 0x4c3   :  { %13467 = vmatprep.subr.bf16.mxu0 %v15363_v42  ;;  %v15394_v42 = vcombine.low %v6981_v23, %v6985_v59 }
 0x4c4   :  { %13154 = vmatpush1.bf16.msra.mxu1 %v15416_v49  ;;  %v7056_v49 = vld [vmem:[#allocation11 + $0x8e0] sm:$0xff] }
 0x4c5   :  { %13155 = vmatprep.subr.bf16.mxu1 %v15425_v60  ;;  %v6997_v60 = vld [vmem:[#allocation11 + $0x708] sm:$0xff]  ;;  %v15465_v3 = vcombine.high %v7052_v43, %v7056_v49  ;;  %v15464_v22 = vcombine.low %v7052_v43, %v7056_v49 }
 0x4c6   :  { %13468 = vmatpush1.bf16.msra.mxu0 %v15362_v31  ;;  %v7001_v31 = vld [vmem:[#allocation11 + $0x728] sm:$0xff] }
 0x4c7   :  { %13469 = vmatprep.subr.bf16.mxu0 %v15371_v46  ;;  %v7060_v46 = vld [vmem:[#allocation11 + $0x900] sm:$0xff]  ;;  %v15411_v51 = vcombine.high %v6997_v60, %v7001_v31  ;;  %v15410_v6 = vcombine.low %v6997_v60, %v7001_v31 }
 0x4c8   :  { %13156 = vmatpush1.bf16.msra.mxu1 %v15424_v20  ;;  %v7064_v20 = vld [vmem:[#allocation11 + $0x920] sm:$0xff] }
 0x4c9   :  { %13157 = vmatprep.subr.bf16.mxu1 %v15433_v5  ;;  %v7005_v5 = vld [vmem:[#allocation11 + $0x748] sm:$0xff]  ;;  %v15473_v30 = vcombine.high %v7060_v46, %v7064_v20  ;;  %v15472_v45 = vcombine.low %v7060_v46, %v7064_v20 }
 0x4ca   :  { %13470 = vmatpush1.bf16.msra.mxu0 %v15370_v18  ;;  %v7009_v18 = vld [vmem:[#allocation11 + $0x768] sm:$0xff] }
 0x4cb   :  { %13471 = vmatprep.subr.bf16.mxu0 %v15379_v12  ;;  %v7068_v12 = vld [vmem:[#allocation11 + $0x940] sm:$0xff]  ;;  %v15419_v52 = vcombine.high %v7005_v5, %v7009_v18  ;;  %v15418_v21 = vcombine.low %v7005_v5, %v7009_v18 }
 0x4cc   :  { %13158 = vmatpush1.bf16.msra.mxu1 %v15432_v36  ;;  %v7072_v36 = vld [vmem:[#allocation11 + $0x960] sm:$0xff] }
 0x4cd   :  { %13168 = vmatprep.subr.bf16.mxu1 %v15441_v41  ;;  %v7013_v41 = vld [vmem:[#allocation11 + $0x788] sm:$0xff]  ;;  %v15481_v25 = vcombine.high %v7068_v12, %v7072_v36  ;;  %v15480_v59 = vcombine.low %v7068_v12, %v7072_v36 }
 0x4ce   :  { %13472 = vmatpush1.bf16.msra.mxu0 %v15378_v10  ;;  %v7017_v10 = vld [vmem:[#allocation11 + $0x7a8] sm:$0xff] }
 0x4cf   :  { %13160 = vmatmul.mubr.bf16.vlgmr.msra.gmra.mrb[16].mxu1 %v19057_v38  ;;  %13473 = vmatprep.subr.bf16.mxu0 %v15387_v16  ;;  %v7076_v16 = vld [vmem:[#allocation11 + $0x980] sm:$0xff]  ;;  %v15427_v23 = vcombine.high %v7013_v41, %v7017_v10  ;;  %v15426_v35 = vcombine.low %v7013_v41, %v7017_v10 }
 0x4d0   :  { %13169 = vmatpush1.bf16.msra.mxu1 %v15440_v54  ;;  %13200 = vmatprep.mubr.bf16.mxu1 %v19061_v37  ;;  %v7080_v54 = vld [vmem:[#allocation11 + $0x9a0] sm:$0xff] }
 0x4d1   :  { %13170 = vmatprep.subr.bf16.mxu1 %v15449_v32  ;;  %v7021_v32 = vld [vmem:[#allocation11 + $0x7c8] sm:$0xff]  ;;  %v15489_v1 = vcombine.high %v7076_v16, %v7080_v54  ;;  %v15488_v56 = vcombine.low %v7076_v16, %v7080_v54 }
 0x4d2   :  { %13474 = vmatpush1.bf16.msra.mxu0 %v15386_v62  ;;  %v7025_v62 = vld [vmem:[#allocation11 + $0x7e8] sm:$0xff] }
 0x4d3   :  { %13475 = vmatprep.subr.bf16.mxu0 %v15395_v61  ;;  %v7084_v61 = vld [vmem:[#allocation11 + $0x9c0] sm:$0xff]  ;;  %v15435_v57 = vcombine.high %v7021_v32, %v7025_v62  ;;  %v15434_v49 = vcombine.low %v7021_v32, %v7025_v62 }
 0x4d4   :  { %13171 = vmatpush1.bf16.msra.mxu1 %v15448_v15  ;;  %v7088_v15 = vld [vmem:[#allocation11 + $0x9e0] sm:$0xff] }
 0x4d5   :  { %13172 = vmatprep.subr.bf16.mxu1 %v15457_v29  ;;  %v7029_v29 = vld [vmem:[#allocation11 + $0x808] sm:$0xff]  ;;  %v15497_v43 = vcombine.high %v7084_v61, %v7088_v15  ;;  %v15496_v31 = vcombine.low %v7084_v61, %v7088_v15 }
 0x4d6   :  { %13476 = vmatpush1.bf16.msra.mxu0 %v15394_v42  ;;  %v7033_v42 = vld [vmem:[#allocation11 + $0x828] sm:$0xff] }
 0x4d7   :  { %13477 = vmatprep.subr.bf16.mxu0 %v15403_v24  ;;  %v7092_v24 = vld [vmem:[#allocation11 + $0xa00] sm:$0xff]  ;;  %v15443_v60 = vcombine.high %v7029_v29, %v7033_v42  ;;  %v15442_v20 = vcombine.low %v7029_v29, %v7033_v42 }
 0x4d8   :  { %13173 = vmatpush1.bf16.msra.mxu1 %v15456_v53  ;;  %v7096_v53 = vld [vmem:[#allocation11 + $0xa20] sm:$0xff] }
 0x4d9   :  { %13174 = vmatprep.subr.bf16.mxu1 %v15465_v3  ;;  %v7037_v3 = vld [vmem:[#allocation11 + $0x848] sm:$0xff]  ;;  %v15505_v46 = vcombine.high %v7092_v24, %v7096_v53  ;;  %v15504_v18 = vcombine.low %v7092_v24, %v7096_v53 }
 0x4da   :  { %13478 = vmatpush1.bf16.msra.mxu0 %v15402_v50  ;;  %v7041_v50 = vld [vmem:[#allocation11 + $0x868] sm:$0xff] }
 0x4db   :  { %13479 = vmatprep.subr.bf16.mxu0 %v15411_v51  ;;  %v7100_v51 = vld [vmem:[#allocation11 + $0xa40] sm:$0xff]  ;;  %v15451_v5 = vcombine.high %v7037_v3, %v7041_v50  ;;  %v15450_v36 = vcombine.low %v7037_v3, %v7041_v50 }
 0x4dc   :  { %13175 = vmatpush1.bf16.msra.mxu1 %v15464_v22  ;;  %v7104_v22 = vld [vmem:[#allocation11 + $0xa60] sm:$0xff] }
 0x4dd   :  { %13176 = vmatprep.subr.bf16.mxu1 %v15473_v30  ;;  %v7045_v30 = vld [vmem:[#allocation11 + $0x888] sm:$0xff]  ;;  %v15513_v12 = vcombine.high %v7100_v51, %v7104_v22  ;;  %v15512_v10 = vcombine.low %v7100_v51, %v7104_v22 }
 0x4de   :  { %13480 = vmatpush1.bf16.msra.mxu0 %v15410_v6  ;;  %v7049_v6 = vld [vmem:[#allocation11 + $0x8a8] sm:$0xff] }
 0x4df   :  { %13481 = vmatprep.subr.bf16.mxu0 %v15419_v52  ;;  %v7108_v52 = vld [vmem:[#allocation11 + $0xa80] sm:$0xff]  ;;  %v15459_v41 = vcombine.high %v7045_v30, %v7049_v6  ;;  %v15458_v54 = vcombine.low %v7045_v30, %v7049_v6 }
 0x4e0   :  { %13177 = vmatpush1.bf16.msra.mxu1 %v15472_v45  ;;  %v7112_v45 = vld [vmem:[#allocation11 + $0xaa0] sm:$0xff] }
 0x4e1   :  { %13178 = vmatprep.subr.bf16.mxu1 %v15481_v25  ;;  %v7053_v25 = vld [vmem:[#allocation11 + $0x8c8] sm:$0xff]  ;;  %v15521_v16 = vcombine.high %v7108_v52, %v7112_v45  ;;  %v15520_v62 = vcombine.low %v7108_v52, %v7112_v45 }
 0x4e2   :  { %13482 = vmatpush1.bf16.msra.mxu0 %v15418_v21  ;;  %v7057_v21 = vld [vmem:[#allocation11 + $0x8e8] sm:$0xff] }
 0x4e3   :  { %13483 = vmatprep.subr.bf16.mxu0 %v15427_v23  ;;  %v7116_v23 = vld [vmem:[#allocation11 + $0xac0] sm:$0xff]  ;;  %v15467_v32 = vcombine.high %v7053_v25, %v7057_v21  ;;  %v15466_v15 = vcombine.low %v7053_v25, %v7057_v21 }
 0x4e4   :  { %13179 = vmatpush1.bf16.msra.mxu1 %v15480_v59  ;;  %v7120_v59 = vld [vmem:[#allocation11 + $0xae0] sm:$0xff] }
 0x4e5   :  { %13180 = vmatprep.subr.bf16.mxu1 %v15489_v1  ;;  %v7061_v1 = vld [vmem:[#allocation11 + $0x908] sm:$0xff]  ;;  %v15529_v61 = vcombine.high %v7116_v23, %v7120_v59  ;;  %v15528_v42 = vcombine.low %v7116_v23, %v7120_v59 }
 0x4e6   :  { %13484 = vmatpush1.bf16.msra.mxu0 %v15426_v35  ;;  %v7065_v35 = vld [vmem:[#allocation11 + $0x928] sm:$0xff] }
 0x4e7   :  { %13485 = vmatprep.subr.bf16.mxu0 %v15435_v57  ;;  %v7124_v57 = vld [vmem:[#allocation11 + $0xb00] sm:$0xff]  ;;  %v15475_v29 = vcombine.high %v7061_v1, %v7065_v35  ;;  %v15474_v53 = vcombine.low %v7061_v1, %v7065_v35 }
 0x4e8   :  { %13181 = vmatpush1.bf16.msra.mxu1 %v15488_v56  ;;  %v7128_v56 = vld [vmem:[#allocation11 + $0xb20] sm:$0xff] }
 0x4e9   :  { %13182 = vmatprep.subr.bf16.mxu1 %v15497_v43  ;;  %v7069_v43 = vld [vmem:[#allocation11 + $0x948] sm:$0xff]  ;;  %v15537_v24 = vcombine.high %v7124_v57, %v7128_v56  ;;  %v15536_v50 = vcombine.low %v7124_v57, %v7128_v56 }
 0x4ea   :  { %13486 = vmatpush1.bf16.msra.mxu0 %v15434_v49  ;;  %v7073_v49 = vld [vmem:[#allocation11 + $0x968] sm:$0xff] }
 0x4eb   :  { %13496 = vmatprep.subr.bf16.mxu0 %v15443_v60  ;;  %v7132_v60 = vld [vmem:[#allocation11 + $0xb40] sm:$0xff]  ;;  %v15483_v3 = vcombine.high %v7069_v43, %v7073_v49  ;;  %v15482_v22 = vcombine.low %v7069_v43, %v7073_v49 }
 0x4ec   :  { %13183 = vmatpush1.bf16.msra.mxu1 %v15496_v31  ;;  %v7136_v31 = vld [vmem:[#allocation11 + $0xb60] sm:$0xff] }
 0x4ed   :  { %13184 = vmatprep.subr.bf16.mxu1 %v15505_v46  ;;  %13488 = vmatmul.mubr.bf16.vlgmr.msra.gmra.mrb[12].mxu0 %v19057_v38  ;;  %v7077_v46 = vld [vmem:[#allocation11 + $0x988] sm:$0xff]  ;;  %v15545_v51 = vcombine.high %v7132_v60, %v7136_v31  ;;  %v15544_v6 = vcombine.low %v7132_v60, %v7136_v31  ;;  %v19069_v60 = vpack.c.b16 %v18927_v17, %v18927_v17 }
 0x4ee   :  { %13497 = vmatpush1.bf16.msra.mxu0 %v15442_v20  ;;  %13528 = vmatprep.mubr.bf16.mxu0 %v19061_v37  ;;  %v7081_v20 = vld [vmem:[#allocation11 + $0x9a8] sm:$0xff] }
 0x4ef   :  { %13498 = vmatprep.subr.bf16.mxu0 %v15451_v5  ;;  %v7140_v5 = vld [vmem:[#allocation11 + $0xb80] sm:$0xff]  ;;  %v15491_v30 = vcombine.high %v7077_v46, %v7081_v20  ;;  %v15490_v45 = vcombine.low %v7077_v46, %v7081_v20  ;;  %v7117_v17 = vld [vmem:[#allocation11 + $0xac8] sm:$0xff] }
 0x4f0   :  { %13185 = vmatpush1.bf16.msra.mxu1 %v15504_v18  ;;  %v7144_v18 = vld [vmem:[#allocation11 + $0xba0] sm:$0xff] }
 0x4f1   :  { %13186 = vmatprep.subr.bf16.mxu1 %v15513_v12  ;;  %v7085_v12 = vld [vmem:[#allocation11 + $0x9c8] sm:$0xff]  ;;  %v15553_v52 = vcombine.high %v7140_v5, %v7144_v18  ;;  %v15552_v21 = vcombine.low %v7140_v5, %v7144_v18  ;;  %v7172_v46 = vld [vmem:[#allocation11 + $0xc80] sm:$0xff] }
 0x4f2   :  { %13499 = vmatpush1.bf16.msra.mxu0 %v15450_v36  ;;  %v7089_v36 = vld [vmem:[#allocation11 + $0x9e8] sm:$0xff]  ;;  %v7176_v20 = vld [vmem:[#allocation11 + $0xca0] sm:$0xff] }
 0x4f3   :  { %13500 = vmatprep.subr.bf16.mxu0 %v15459_v41  ;;  %v7148_v41 = vld [vmem:[#allocation11 + $0xbc0] sm:$0xff]  ;;  %v15499_v25 = vcombine.high %v7085_v12, %v7089_v36  ;;  %v15498_v59 = vcombine.low %v7085_v12, %v7089_v36  ;;  %v7121_v5 = vld [vmem:[#allocation11 + $0xae8] sm:$0xff]  ;;  %v15585_v18 = vcombine.high %v7172_v46, %v7176_v20  ;;  %v15584_v36 = vcombine.low %v7172_v46, %v7176_v20 }
 0x4f4   :  { %13187 = vmatpush1.bf16.msra.mxu1 %v15512_v10  ;;  %v7152_v10 = vld [vmem:[#allocation11 + $0xbe0] sm:$0xff]  ;;  %v15531_v12 = vcombine.high %v7117_v17, %v7121_v5 }
 0x4f5   :  { %13188 = vmatprep.subr.bf16.mxu1 %v15521_v16  ;;  %v7093_v16 = vld [vmem:[#allocation11 + $0xa08] sm:$0xff]  ;;  %v15561_v23 = vcombine.high %v7148_v41, %v7152_v10  ;;  %v15560_v35 = vcombine.low %v7148_v41, %v7152_v10  ;;  %v15530_v10 = vcombine.low %v7117_v17, %v7121_v5 }
 0x4f6   :  { %13501 = vmatpush1.bf16.msra.mxu0 %v15458_v54  ;;  %v7097_v54 = vld [vmem:[#allocation11 + $0xa28] sm:$0xff] }
 0x4f7   :  { %13502 = vmatprep.subr.bf16.mxu0 %v15467_v32  ;;  %v7156_v32 = vld [vmem:[#allocation11 + $0xc00] sm:$0xff]  ;;  %v15507_v1 = vcombine.high %v7093_v16, %v7097_v54  ;;  %v15506_v56 = vcombine.low %v7093_v16, %v7097_v54  ;;  %v7153_v17 = vld [vmem:[#allocation11 + $0xbe8] sm:$0xff] }
 0x4f8   :  { %13189 = vmatpush1.bf16.msra.mxu1 %v15520_v62  ;;  %v7160_v62 = vld [vmem:[#allocation11 + $0xc20] sm:$0xff] }
 0x4f9   :  { %13190 = vmatprep.subr.bf16.mxu1 %v15529_v61  ;;  %v7101_v61 = vld [vmem:[#allocation11 + $0xa48] sm:$0xff]  ;;  %v15569_v57 = vcombine.high %v7156_v32, %v7160_v62  ;;  %v15568_v49 = vcombine.low %v7156_v32, %v7160_v62 }
 0x4fa   :  { %13503 = vmatpush1.bf16.msra.mxu0 %v15466_v15  ;;  %v7105_v15 = vld [vmem:[#allocation11 + $0xa68] sm:$0xff] }
 0x4fb   :  { %13504 = vmatprep.subr.bf16.mxu0 %v15475_v29  ;;  %v7164_v29 = vld [vmem:[#allocation11 + $0xc40] sm:$0xff]  ;;  %v15515_v43 = vcombine.high %v7101_v61, %v7105_v15 }
 0x4fc   :  { %13191 = vmatpush1.bf16.msra.mxu1 %v15528_v42  ;;  %v7168_v42 = vld [vmem:[#allocation11 + $0xc60] sm:$0xff] }
 0x4fd   :  { %13192 = vmatprep.subr.bf16.mxu1 %v15537_v24  ;;  %v7109_v24 = vld [vmem:[#allocation11 + $0xa88] sm:$0xff]  ;;  %v15577_v31 = vcombine.high %v7164_v29, %v7168_v42 }
 0x4fe   :  { %13505 = vmatpush1.bf16.msra.mxu0 %v15474_v53  ;;  %v7113_v53 = vld [vmem:[#allocation11 + $0xaa8] sm:$0xff] }
 0x4ff   :  { %13506 = vmatprep.subr.bf16.mxu0 %v15483_v3  ;;  %v19073_v3 = vpack.c.b16 %v18938_v2, %v18938_v2  ;;  %v7180_v2 = vld [vmem:[#allocation11 + $0xcc0] sm:$0xff] }
 0x500   :  { %13193 = vmatpush1.bf16.msra.mxu1 %v15536_v50  ;;  %v15514_v50 = vcombine.low %v7101_v61, %v7105_v15  ;;  %v2440_v61 = vsub.s32 4, %v19714_v28 }
 0x501   :  { %13194 = vmatprep.subr.bf16.mxu1 %v15545_v51  ;;  %v15523_v51 = vcombine.high %v7109_v24, %v7113_v53 }
 0x502   :  { %13507 = vmatpush1.bf16.msra.mxu0 %v15482_v22  ;;  %v15576_v22 = vcombine.low %v7164_v29, %v7168_v42  ;;  %v7141_v29 = vld [vmem:[#allocation11 + $0xb88] sm:$0xff] }
 0x503   :  { %13508 = vmatprep.subr.bf16.mxu0 %v15491_v30  ;;  %v15522_v30 = vcombine.low %v7109_v24, %v7113_v53  ;;  %v7145_v42 = vld [vmem:[#allocation11 + $0xba8] sm:$0xff]  ;;  %v7204_v24 = vld [vmem:[#allocation11 + $0xd80] sm:$0xff] }
 0x504   :  { %13195 = vmatpush1.bf16.msra.mxu1 %v15544_v6  ;;  %v7184_v6 = vld [vmem:[#allocation11 + $0xce0] sm:$0xff]  ;;  %v15555_v46 = vcombine.high %v7141_v29, %v7145_v42 }
 0x505   :  { %13196 = vmatprep.subr.bf16.mxu1 %v15553_v52  ;;  %v7125_v52 = vld [vmem:[#allocation11 + $0xb08] sm:$0xff]  ;;  %v15593_v41 = vcombine.high %v7180_v2, %v7184_v6  ;;  %v15592_v54 = vcombine.low %v7180_v2, %v7184_v6  ;;  %v7208_v53 = vld [vmem:[#allocation11 + $0xda0] sm:$0xff] }
 0x506   :  { %13509 = vmatpush1.bf16.msra.mxu0 %v15490_v45  ;;  %v7129_v45 = vld [vmem:[#allocation11 + $0xb28] sm:$0xff]  ;;  %v15617_v5 = vcombine.high %v7204_v24, %v7208_v53  ;;  %v7212_v2 = vld [vmem:[#allocation11 + $0xdc0] sm:$0xff] }
 0x507   :  { %13510 = vmatprep.subr.bf16.mxu0 %v15499_v25  ;;  %v7188_v25 = vld [vmem:[#allocation11 + $0xd00] sm:$0xff]  ;;  %v15539_v16 = vcombine.high %v7125_v52, %v7129_v45  ;;  %v15538_v62 = vcombine.low %v7125_v52, %v7129_v45 }
 0x508   :  { %13197 = vmatpush1.bf16.msra.mxu1 %v15552_v21  ;;  %v7192_v21 = vld [vmem:[#allocation11 + $0xd20] sm:$0xff] }
 0x509   :  { %13198 = vmatprep.subr.bf16.mxu1 %v15561_v23  ;;  %v7133_v23 = vld [vmem:[#allocation11 + $0xb48] sm:$0xff]  ;;  %v15601_v32 = vcombine.high %v7188_v25, %v7192_v21  ;;  %v7216_v6 = vld [vmem:[#allocation11 + $0xde0] sm:$0xff] }
 0x50a   :  { %13511 = vmatpush1.bf16.msra.mxu0 %v15498_v59  ;;  %v7137_v59 = vld [vmem:[#allocation11 + $0xb68] sm:$0xff] }
 0x50b   :  { %13512 = vmatprep.subr.bf16.mxu0 %v15507_v1  ;;  %v7196_v1 = vld [vmem:[#allocation11 + $0xd40] sm:$0xff]  ;;  %v15547_v15 = vcombine.high %v7133_v23, %v7137_v59 }
 0x50c   :  { %13199 = vmatpush1.bf16.msra.mxu1 %v15560_v35  ;;  %v7200_v35 = vld [vmem:[#allocation11 + $0xd60] sm:$0xff] }
 0x50d   :  { %13209 = vmatprep.subr.bf16.mxu1 %v15569_v57  ;;  %v15600_v57 = vcombine.low %v7188_v25, %v7192_v21  ;;  %v7157_v25 = vld [vmem:[#allocation11 + $0xc08] sm:$0xff] }
 0x50e   :  { %13513 = vmatpush1.bf16.msra.mxu0 %v15506_v56  ;;  %v2444_v56 = vsub.s32 5, %v19714_v28  ;;  %v7161_v21 = vld [vmem:[#allocation11 + $0xc28] sm:$0xff] }
 0x50f   :  { %13201 = vmatmul.mubr.bf16.vlgmr.msra.gmra.mrb[16].mxu1 %v19069_v60  ;;  %13514 = vmatprep.subr.bf16.mxu0 %v15515_v43  ;;  %v15609_v43 = vcombine.high %v7196_v1, %v7200_v35 }
 0x510   :  { %13210 = vmatpush1.bf16.msra.mxu1 %v15568_v49  ;;  %13241 = vmatprep.mubr.bf16.mxu1 %v19073_v3  ;;  %v15546_v49 = vcombine.low %v7133_v23, %v7137_v59 }
 0x511   :  { %13211 = vmatprep.subr.bf16.mxu1 %v15577_v31  ;;  %v19079_v31 = vld [vmem:[#allocation14] sm:$0xff] }
 0x512   :  { %13515 = vmatpush1.bf16.msra.mxu0 %v15514_v50  ;;  %v2441_v50 = vrot.slane %v19079_v31, %v2440_v61  ;;  %v2445_v20 = vrot.slane %v19079_v31, %v2444_v56 }
 0x513   :  { %13516 = vmatprep.subr.bf16.mxu0 %v15523_v51  ;;  %v15608_v51 = vcombine.low %v7196_v1, %v7200_v35  ;;  %v15571_v1 = vcombine.high %v7157_v25, %v7161_v21  ;;  %v15624_v35 = vcombine.low %v7212_v2, %v7216_v6 }
 0x514   :  { %13212 = vmatpush1.bf16.msra.mxu1 %v15576_v22  ;;  %v7149_v22 = vld [vmem:[#allocation11 + $0xbc8] sm:$0xff] }
 0x515   :  { %13213 = vmatprep.subr.bf16.mxu1 %v15585_v18  ;;  %v15563_v52 = vcombine.high %v7149_v22, %v7153_v17  ;;  %v15562_v59 = vcombine.low %v7149_v22, %v7153_v17  ;;  %v7236_v22 = vld [vmem:[#allocation11 + $0xe80] sm:$0xff] }
 0x516   :  { %13517 = vmatpush1.bf16.msra.mxu0 %v15522_v30  ;;  %v15554_v30 = vcombine.low %v7141_v29, %v7145_v42  ;;  %v15570_v42 = vcombine.low %v7157_v25, %v7161_v21  ;;  %v7240_v17 = vld [vmem:[#allocation11 + $0xea0] sm:$0xff]  ;;  %v7189_v21 = vld [vmem:[#allocation11 + $0xd08] sm:$0xff] }
 0x517   :  { %13518 = vmatprep.subr.bf16.mxu0 %v15531_v12  ;;  %v15648_v25 = vcombine.low %v7236_v22, %v7240_v17 }
 0x518   :  { %13214 = vmatpush1.bf16.msra.mxu1 %v15584_v36 }
 0x519   :  { %13215 = vmatprep.subr.bf16.mxu1 %v15593_v41 }
 0x51a   :  { %13519 = vmatpush1.bf16.msra.mxu0 %v15530_v10  ;;  %v15616_v10 = vcombine.low %v7204_v24, %v7208_v53 }
 0x51b   :  { %13520 = vmatprep.subr.bf16.mxu0 %v15539_v16 }
 0x51c   :  { %13216 = vmatpush1.bf16.msra.mxu1 %v15592_v54  ;;  %v15625_v54 = vcombine.high %v7212_v2, %v7216_v6  ;;  %v7185_v2 = vld [vmem:[#allocation11 + $0xce8] sm:$0xff]  ;;  %v15649_v6 = vcombine.high %v7236_v22, %v7240_v17 }
 0x51d   :  { %13217 = vmatprep.subr.bf16.mxu1 %v15601_v32  ;;  %v7220_v32 = vld [vmem:[#allocation11 + $0xe00] sm:$0xff] }
 0x51e   :  { %13521 = vmatpush1.bf16.msra.mxu0 %v15538_v62  ;;  %v7224_v62 = vld [vmem:[#allocation11 + $0xe20] sm:$0xff] }
 0x51f   :  { %13522 = vmatprep.subr.bf16.mxu0 %v15547_v15  ;;  %v7165_v15 = vld [vmem:[#allocation11 + $0xc48] sm:$0xff]  ;;  %v15633_v29 = vcombine.high %v7220_v32, %v7224_v62  ;;  %v15632_v53 = vcombine.low %v7220_v32, %v7224_v62  ;;  %v7252_v32 = vld [vmem:[#allocation11 + $0xf00] sm:$0xff] }
 0x520   :  { %13218 = vmatpush1.bf16.msra.mxu1 %v15600_v57  ;;  %v7169_v57 = vld [vmem:[#allocation11 + $0xc68] sm:$0xff]  ;;  %v7256_v62 = vld [vmem:[#allocation11 + $0xf20] sm:$0xff] }
 0x521   :  { %13219 = vmatprep.subr.bf16.mxu1 %v15609_v43  ;;  %v7228_v43 = vld [vmem:[#allocation11 + $0xe40] sm:$0xff]  ;;  %v15579_v24 = vcombine.high %v7165_v15, %v7169_v57 }
 0x522   :  { %v5571_v18 = vpop.f32.mrb[12].mxu1  ;;  %13523 = vmatpush1.bf16.msra.mxu0 %v15546_v49  ;;  %v7232_v49 = vld [vmem:[#allocation11 + $0xe60] sm:$0xff] }
 0x523   :  { %v19087_v12 = vadd.f32 %v5571_v18, %v2441_v50  ;;  %v5573_v36 = vpop.f32.mrb[13].mxu1  ;;  %13524 = vmatprep.subr.bf16.mxu0 %v15555_v46  ;;  %v7173_v50 = vld [vmem:[#allocation11 + $0xc88] sm:$0xff]  ;;  %v15640_v18 = vcombine.low %v7228_v43, %v7232_v49 }
 0x524   :  { %v19089_v45 = vadd.f32 %v5573_v36, %v2445_v20  ;;  %v5575_v41 = vpop.f32.mrb[14].mxu1  ;;  %13220 = vmatpush1.bf16.msra.mxu1 %v15608_v51  ;;  %v7177_v46 = vld [vmem:[#allocation11 + $0xca8] sm:$0xff]  ;;  %v15641_v20 = vcombine.high %v7228_v43, %v7232_v49  ;;  %v15578_v51 = vcombine.low %v7165_v15, %v7169_v57  ;;  %v2452_v49 = vsub.s32 7, %v19714_v28 }
 0x525   :  { %v5576_v16 = vpop.f32.mrb[15].mxu1  ;;  %13221 = vmatprep.subr.bf16.mxu1 %v15617_v5  ;;  %v15587_v5 = vcombine.high %v7173_v50, %v7177_v46  ;;  %v15586_v36 = vcombine.low %v7173_v50, %v7177_v46  ;;  %v7248_v41 = vld [vmem:[#allocation11 + $0xee0] sm:$0xff]  ;;  %v7197_v15 = vld [vmem:[#allocation11 + $0xd48] sm:$0xff]  ;;  %v15664_v46 = vcombine.low %v7252_v32, %v7256_v62 }
 0x526   :  { %v5752_v23 = vcombine.low %v19087_v12, %v19089_v45  ;;  %13525 = vmatpush1.bf16.msra.mxu0 %v15554_v30  ;;  %v7181_v30 = vld [vmem:[#allocation11 + $0xcc8] sm:$0xff] }
 0x527   :  { %13526 = vmatprep.subr.bf16.mxu0 %v15563_v52  ;;  %v7244_v52 = vld [vmem:[#allocation11 + $0xec0] sm:$0xff]  ;;  %v7193_v16 = vld [vmem:[#allocation11 + $0xd28] sm:$0xff] }
 0x528   :  { %13222 = vmatpush1.bf16.msra.mxu1 %v15616_v10  ;;  %v15595_v10 = vcombine.high %v7181_v30, %v7185_v2  ;;  %v7201_v57 = vld [vmem:[#allocation11 + $0xd68] sm:$0xff]  ;;  %v15602_v43 = vcombine.low %v7189_v21, %v7193_v16 }
 0x529   :  { %13223 = vmatprep.subr.bf16.mxu1 %v15625_v54  ;;  %v15657_v54 = vcombine.high %v7244_v52, %v7248_v41  ;;  %v15611_v50 = vcombine.high %v7197_v15, %v7201_v57  ;;  %v7229_v12 = vld [vmem:[#allocation11 + $0xe48] sm:$0xff] }
 0x52a   :  { %13527 = vmatpush1.bf16.msra.mxu0 %v15562_v59  ;;  %v15594_v59 = vcombine.low %v7181_v30, %v7185_v2  ;;  %v7268_v30 = vld [vmem:[#allocation11 + $0xf80] sm:$0xff]  ;;  %v7233_v45 = vld [vmem:[#allocation11 + $0xe68] sm:$0xff] }
 0x52b   :  { %13537 = vmatprep.subr.bf16.mxu0 %v15571_v1  ;;  %v15603_v1 = vcombine.high %v7189_v21, %v7193_v16  ;;  %v7272_v2 = vld [vmem:[#allocation11 + $0xfa0] sm:$0xff] }
 0x52c   :  { %13224 = vmatpush1.bf16.msra.mxu1 %v15624_v35  ;;  %v15656_v35 = vcombine.low %v7244_v52, %v7248_v41  ;;  %v7213_v41 = vld [vmem:[#allocation11 + $0xdc8] sm:$0xff]  ;;  %v15681_v16 = vcombine.high %v7268_v30, %v7272_v2 }
 0x52d   :  { %13225 = vmatprep.subr.bf16.mxu1 %v15633_v29  ;;  %13529 = vmatmul.mubr.bf16.vlgmr.msra.gmra.mrb[12].mxu0 %v19069_v60  ;;  %v15665_v29 = vcombine.high %v7252_v32, %v7256_v62  ;;  %v7276_v62 = vld [vmem:[#allocation11 + $0xfc0] sm:$0xff] }
 0x52e   :  { %13538 = vmatpush1.bf16.msra.mxu0 %v15570_v42  ;;  %13569 = vmatprep.mubr.bf16.mxu0 %v19073_v3  ;;  %v2448_v42 = vsub.s32 6, %v19714_v28 }
 0x52f   :  { %13539 = vmatprep.subr.bf16.mxu0 %v15579_v24  ;;  %v7260_v24 = vld [vmem:[#allocation11 + $0xf40] sm:$0xff] }
 0x530   :  { %13226 = vmatpush1.bf16.msra.mxu1 %v15632_v53  ;;  %v7264_v53 = vld [vmem:[#allocation11 + $0xf60] sm:$0xff]  ;;  %v2449_v22 = vrot.slane %v19079_v31, %v2448_v42 }
 0x531   :  { %13227 = vmatprep.subr.bf16.mxu1 %v15641_v20  ;;  %v7205_v20 = vld [vmem:[#allocation11 + $0xd88] sm:$0xff]  ;;  %v15673_v17 = vcombine.high %v7260_v24, %v7264_v53  ;;  %v15672_v52 = vcombine.low %v7260_v24, %v7264_v53  ;;  %v19107_v53 = vrot.slane %v5752_v23, %v18360_v63 }
 0x532   :  { %13540 = vmatpush1.bf16.msra.mxu0 %v15578_v51  ;;  %v7209_v51 = vld [vmem:[#allocation11 + $0xda8] sm:$0xff] }
 0x533   :  { %13541 = vmatprep.subr.bf16.mxu0 %v15587_v5  ;;  %v2453_v5 = vrot.slane %v19079_v31, %v2452_v49  ;;  %v15618_v32 = vcombine.low %v7205_v20, %v7209_v51  ;;  %v7280_v31 = vld [vmem:[#allocation11 + $0xfe0] sm:$0xff] }
 0x534   :  { %13228 = vmatpush1.bf16.msra.mxu1 %v15640_v18  ;;  %v15610_v18 = vcombine.low %v7197_v15, %v7201_v57  ;;  %v15680_v57 = vcombine.low %v7268_v30, %v7272_v2  ;;  %v15689_v24 = vcombine.high %v7276_v62, %v7280_v31  ;;  %v7292_v2 = vld [vmem:[#allocation11 + $0x1040] sm:$0xff] }
 0x535   :  { %13229 = vmatprep.subr.bf16.mxu1 %v15649_v6  ;;  %v15619_v6 = vcombine.high %v7205_v20, %v7209_v51  ;;  %v7284_v20 = vld [vmem:[#allocation11 + $0x1000] sm:$0xff] }
 0x536   :  { %13542 = vmatpush1.bf16.msra.mxu0 %v15586_v36  ;;  %v7288_v51 = vld [vmem:[#allocation11 + $0x1020] sm:$0xff] }
 0x537   :  { %13543 = vmatprep.subr.bf16.mxu0 %v15595_v10  ;;  %v7217_v10 = vld [vmem:[#allocation11 + $0xde8] sm:$0xff]  ;;  %v15697_v23 = vcombine.high %v7284_v20, %v7288_v51 }
 0x538   :  { %13230 = vmatpush1.bf16.msra.mxu1 %v15648_v25 }
 0x539   :  { %13231 = vmatprep.subr.bf16.mxu1 %v15657_v54 }
 0x53a   :  { %13544 = vmatpush1.bf16.msra.mxu0 %v15594_v59 }
 0x53b   :  { %13545 = vmatprep.subr.bf16.mxu0 %v15603_v1 }
 0x53c   :  { %13232 = vmatpush1.bf16.msra.mxu1 %v15656_v35  ;;  %v15627_v35 = vcombine.high %v7213_v41, %v7217_v10 }
 0x53d   :  { %13233 = vmatprep.subr.bf16.mxu1 %v15665_v29  ;;  %v7221_v29 = vld [vmem:[#allocation11 + $0xe08] sm:$0xff] }
 0x53e   :  { %13546 = vmatpush1.bf16.msra.mxu0 %v15602_v43  ;;  %v7225_v43 = vld [vmem:[#allocation11 + $0xe28] sm:$0xff] }
 0x53f   :  { %13547 = vmatprep.subr.bf16.mxu0 %v15611_v50  ;;  %v15634_v30 = vcombine.low %v7221_v29, %v7225_v43 }
 0x540   :  { %13234 = vmatpush1.bf16.msra.mxu1 %v15664_v46  ;;  %v5735_v36 = vpop.f32.mrb[8].mxu0  ;;  %v15626_v46 = vcombine.low %v7213_v41, %v7217_v10  ;;  %v7237_v41 = vld [vmem:[#allocation11 + $0xe88] sm:$0xff] }
 0x541   :  { %v16260_v25 = vadd.f32 %v5735_v36, %v2449_v22  ;;  %v5737_v21 = vpop.f32.mrb[9].mxu0  ;;  %13235 = vmatprep.subr.bf16.mxu1 %v15673_v17  ;;  %v15635_v22 = vcombine.high %v7221_v29, %v7225_v43  ;;  %v15643_v36 = vcombine.high %v7229_v12, %v7233_v45  ;;  %v7241_v10 = vld [vmem:[#allocation11 + $0xea8] sm:$0xff] }
 0x542   :  { %v16261_v54 = vadd.f32 %v5737_v21, %v2453_v5  ;;  %v5739_v59 = vpop.f32.mrb[10].mxu0  ;;  %13548 = vmatpush1.bf16.msra.mxu0 %v15610_v18  ;;  %v15688_v18 = vcombine.low %v7276_v62, %v7280_v31  ;;  %v15651_v62 = vcombine.high %v7237_v41, %v7241_v10 }
 0x543   :  { %v5740_v1 = vpop.f32.mrb[11].mxu0  ;;  %13549 = vmatprep.subr.bf16.mxu0 %v15619_v6  ;;  %v7296_v6 = vld [vmem:[#allocation11 + $0x1060] sm:$0xff] }
 0x544   :  { %v5753_v15 = vcombine.low %v16260_v25, %v16261_v54  ;;  %13236 = vmatpush1.bf16.msra.mxu1 %v15672_v52  ;;  %v15696_v52 = vcombine.low %v7284_v20, %v7288_v51  ;;  %v19118_v25 = vpack.c.b16 %v18944_v7, %v18944_v7  ;;  %v15705_v21 = vcombine.high %v7292_v2, %v7296_v6  ;;  %v7300_v59 = vld [vmem:[#allocation11 + $0x1080] sm:$0xff]  ;;  %v7245_v7 = vld [vmem:[#allocation11 + $0xec8] sm:$0xff] }
 0x545   :  { %13237 = vmatprep.subr.bf16.mxu1 %v15681_v16  ;;  %v19122_v16 = vpack.c.b16 %v18964_v34, %v18964_v34  ;;  %v15642_v54 = vcombine.low %v7229_v12, %v7233_v45  ;;  %v15704_v31 = vcombine.low %v7292_v2, %v7296_v6  ;;  %v7249_v1 = vld [vmem:[#allocation11 + $0xee8] sm:$0xff]  ;;  %v7308_v34 = vld [vmem:[#allocation11 + $0x10c0] sm:$0xff] }
 0x546   :  { %v19110_v50 = vrot.slane %v5753_v15, %v18360_v63  ;;  %13550 = vmatpush1.bf16.msra.mxu0 %v15618_v32  ;;  %v7304_v32 = vld [vmem:[#allocation11 + $0x10a0] sm:$0xff]  ;;  %v15650_v15 = vcombine.low %v7237_v41, %v7241_v10  ;;  %v15659_v29 = vcombine.high %v7245_v7, %v7249_v1  ;;  %v15658_v51 = vcombine.low %v7245_v7, %v7249_v1 }
 0x547   :  { %13551 = vmatprep.subr.bf16.mxu0 %v15627_v35  ;;  %v15713_v35 = vcombine.high %v7300_v59, %v7304_v32  ;;  %v15712_v43 = vcombine.low %v7300_v59, %v7304_v32 }
 0x548   :  { %v5784_v17 = vcombine.low %v19107_v53, %v19110_v50  ;;  %v5785_v5 = vcombine.high %v19107_v53, %v19110_v50  ;;  %13238 = vmatpush1.bf16.msra.mxu1 %v15680_v57  ;;  %v7312_v57 = vld [vmem:[#allocation11 + $0x10e0] sm:$0xff] }
 0x549   :  { %13239 = vmatprep.subr.bf16.mxu1 %v15689_v24  ;;  %v7253_v24 = vld [vmem:[#allocation11 + $0xf08] sm:$0xff]  ;;  %v15721_v20 = vcombine.high %v7308_v34, %v7312_v57  ;;  %v15720_v45 = vcombine.low %v7308_v34, %v7312_v57  ;;  %v7340_v53 = vld [vmem:[#allocation11 + $0x11c0] sm:$0xff] }
 0x54a   :  { %13552 = vmatpush1.bf16.msra.mxu0 %v15626_v46  ;;  %v7257_v46 = vld [vmem:[#allocation11 + $0xf28] sm:$0xff]  ;;  %v5806_v1 = vrot.slane %v5784_v17, %v18360_v63  ;;  %v5799_v17 = vrot.slane %v5783_v14, %v18360_v63  ;;  %v7344_v50 = vld [vmem:[#allocation11 + $0x11e0] sm:$0xff] }
 0x54b   :  { %13553 = vmatprep.subr.bf16.mxu0 %v15635_v22  ;;  %v7316_v22 = vld [vmem:[#allocation11 + $0x1100] sm:$0xff]  ;;  %v15667_v12 = vcombine.high %v7253_v24, %v7257_v46  ;;  %v15666_v6 = vcombine.low %v7253_v24, %v7257_v46  ;;  %v7277_v34 = vld [vmem:[#allocation11 + $0xfc8] sm:$0xff]  ;;  %v15752_v11 = vcombine.low %v7340_v53, %v7344_v50 }
 0x54c   :  { %13240 = vmatpush1.bf16.msra.mxu1 %v15688_v18  ;;  %v7320_v18 = vld [vmem:[#allocation11 + $0x1120] sm:$0xff]  ;;  %v7281_v57 = vld [vmem:[#allocation11 + $0xfe8] sm:$0xff] }
 0x54d   :  { %13250 = vmatprep.subr.bf16.mxu1 %v15697_v23  ;;  %v7261_v23 = vld [vmem:[#allocation11 + $0xf48] sm:$0xff]  ;;  %v15729_v2 = vcombine.high %v7316_v22, %v7320_v18  ;;  %v15728_v10 = vcombine.low %v7316_v22, %v7320_v18 }
 0x54e   :  { %13554 = vmatpush1.bf16.msra.mxu0 %v15634_v30  ;;  %v7265_v30 = vld [vmem:[#allocation11 + $0xf68] sm:$0xff] }
 0x54f   :  { %13242 = vmatmul.mubr.bf16.vlgmr.msra.gmra.mrb[16].mxu1 %v19118_v25  ;;  %13555 = vmatprep.subr.bf16.mxu0 %v15643_v36  ;;  %v7324_v36 = vld [vmem:[#allocation11 + $0x1140] sm:$0xff]  ;;  %v15675_v41 = vcombine.high %v7261_v23, %v7265_v30  ;;  %v15674_v32 = vcombine.low %v7261_v23, %v7265_v30  ;;  %v7293_v14 = vld [vmem:[#allocation11 + $0x1048] sm:$0xff] }
 0x550   :  { %13251 = vmatpush1.bf16.msra.mxu1 %v15696_v52  ;;  %13282 = vmatprep.mubr.bf16.mxu1 %v19122_v16  ;;  %v7328_v52 = vld [vmem:[#allocation11 + $0x1160] sm:$0xff]  ;;  %v7297_v30 = vld [vmem:[#allocation11 + $0x1068] sm:$0xff] }
 0x551   :  { %13252 = vmatprep.subr.bf16.mxu1 %v15705_v21  ;;  %v7269_v21 = vld [vmem:[#allocation11 + $0xf88] sm:$0xff]  ;;  %v15737_v59 = vcombine.high %v7324_v36, %v7328_v52  ;;  %v7352_v23 = vld [vmem:[#allocation11 + $0x1220] sm:$0xff] }
 0x552   :  { %13556 = vmatpush1.bf16.msra.mxu0 %v15642_v54  ;;  %v7273_v54 = vld [vmem:[#allocation11 + $0xfa8] sm:$0xff] }
 0x553   :  { %13557 = vmatprep.subr.bf16.mxu0 %v15651_v62  ;;  %v7332_v62 = vld [vmem:[#allocation11 + $0x1180] sm:$0xff]  ;;  %v15683_v7 = vcombine.high %v7269_v21, %v7273_v54  ;;  %v15682_v24 = vcombine.low %v7269_v21, %v7273_v54  ;;  %v7301_v21 = vld [vmem:[#allocation11 + $0x1088] sm:$0xff] }
 0x554   :  { %13253 = vmatpush1.bf16.msra.mxu1 %v15704_v31  ;;  %v7336_v31 = vld [vmem:[#allocation11 + $0x11a0] sm:$0xff]  ;;  %v7305_v54 = vld [vmem:[#allocation11 + $0x10a8] sm:$0xff] }
 0x555   :  { %13254 = vmatprep.subr.bf16.mxu1 %v15713_v35  ;;  %v5813_v35 = vrot.slane %v5785_v5, %v18360_v63  ;;  %v15691_v5 = vcombine.high %v7277_v34, %v7281_v57  ;;  %v15744_v46 = vcombine.low %v7332_v62, %v7336_v31 }
 0x556   :  { %13558 = vmatpush1.bf16.msra.mxu0 %v15650_v15  ;;  %v15736_v15 = vcombine.low %v7324_v36, %v7328_v52  ;;  %v7356_v36 = vld [vmem:[#allocation11 + $0x1240] sm:$0xff] }
 0x557   :  { %13559 = vmatprep.subr.bf16.mxu0 %v15659_v29  ;;  %v15745_v29 = vcombine.high %v7332_v62, %v7336_v31  ;;  %v5815_v18 = vcombine.low %v5799_v17, %v5813_v35  ;;  %v7360_v52 = vld [vmem:[#allocation11 + $0x1260] sm:$0xff]  ;;  %v7309_v35 = vld [vmem:[#allocation11 + $0x10c8] sm:$0xff] }
 0x558   :  { %13255 = vmatpush1.bf16.msra.mxu1 %v15712_v43  ;;  %v5792_v43 = vrot.slane %v5782_v4, %v18360_v63  ;;  %v15690_v4 = vcombine.low %v7277_v34, %v7281_v57  ;;  %v7364_v62 = vld [vmem:[#allocation11 + $0x1280] sm:$0xff]  ;;  %v15714_v57 = vcombine.low %v7301_v21, %v7305_v54 }
 0x559   :  { %13256 = vmatprep.subr.bf16.mxu1 %v15721_v20  ;;  %v7285_v20 = vld [vmem:[#allocation11 + $0x1008] sm:$0xff]  ;;  %5819 = vst [vmem:[#allocation18 + $0x8] sm:$0xff] %v5815_v18  ;;  %v7368_v31 = vld [vmem:[#allocation11 + $0x12a0] sm:$0xff] }
 0x55a   :  { %13560 = vmatpush1.bf16.msra.mxu0 %v15658_v51  ;;  %v7289_v51 = vld [vmem:[#allocation11 + $0x1028] sm:$0xff]  ;;  %v5814_v22 = vcombine.low %v5792_v43, %v5806_v1  ;;  %v15768_v1 = vcombine.low %v7356_v36, %v7360_v52  ;;  %v15777_v34 = vcombine.high %v7364_v62, %v7368_v31  ;;  %v7376_v43 = vld [vmem:[#allocation11 + $0x12e0] sm:$0xff] }
 0x55b   :  { %13561 = vmatprep.subr.bf16.mxu0 %v15667_v12  ;;  %v15753_v12 = vcombine.high %v7340_v53, %v7344_v50  ;;  %v15699_v27 = vcombine.high %v7285_v20, %v7289_v51  ;;  %v7317_v53 = vld [vmem:[#allocation11 + $0x1108] sm:$0xff] }
 0x55c   :  { %13257 = vmatpush1.bf16.msra.mxu1 %v15720_v45  ;;  %v7348_v45 = vld [vmem:[#allocation11 + $0x1200] sm:$0xff]  ;;  %5818 = vst [vmem:[#allocation18] sm:$0xff] %v5814_v22  ;;  %v7321_v50 = vld [vmem:[#allocation11 + $0x1128] sm:$0xff] }
 0x55d   :  { %13258 = vmatprep.subr.bf16.mxu1 %v15729_v2  ;;  %v15761_v2 = vcombine.high %v7348_v45, %v7352_v23  ;;  %v15731_v22 = vcombine.high %v7317_v53, %v7321_v50 }
 0x55e   :  { %13562 = vmatpush1.bf16.msra.mxu0 %v15666_v6  ;;  %v15698_v6 = vcombine.low %v7285_v20, %v7289_v51  ;;  %v7380_v20 = vld [vmem:[#allocation11 + $0x1300] sm:$0xff] }
 0x55f   :  { %13563 = vmatprep.subr.bf16.mxu0 %v15675_v41  ;;  %v15707_v41 = vcombine.high %v7293_v14, %v7297_v30  ;;  %v7384_v51 = vld [vmem:[#allocation11 + $0x1320] sm:$0xff] }
 0x560   :  { %13259 = vmatpush1.bf16.msra.mxu1 %v15728_v10  ;;  %v15760_v10 = vcombine.low %v7348_v45, %v7352_v23  ;;  %v15793_v45 = vcombine.high %v7380_v20, %v7384_v51  ;;  %v15730_v23 = vcombine.low %v7317_v53, %v7321_v50 }
 0x561   :  { %13260 = vmatprep.subr.bf16.mxu1 %v15737_v59  ;;  %v15769_v59 = vcombine.high %v7356_v36, %v7360_v52 }
 0x562   :  { %13564 = vmatpush1.bf16.msra.mxu0 %v15674_v32  ;;  %v15706_v32 = vcombine.low %v7293_v14, %v7297_v30  ;;  %v15792_v30 = vcombine.low %v7380_v20, %v7384_v51 }
 0x563   :  { %13565 = vmatprep.subr.bf16.mxu0 %v15683_v7  ;;  %v15715_v7 = vcombine.high %v7301_v21, %v7305_v54 }
 0x564   :  { %13261 = vmatpush1.bf16.msra.mxu1 %v15736_v15  ;;  %v7313_v15 = vld [vmem:[#allocation11 + $0x10e8] sm:$0xff] }
 0x565   :  { %13262 = vmatprep.subr.bf16.mxu1 %v15745_v29  ;;  %v7372_v29 = vld [vmem:[#allocation11 + $0x12c0] sm:$0xff]  ;;  %v15723_v17 = vcombine.high %v7309_v35, %v7313_v15 }
 0x566   :  { %13566 = vmatpush1.bf16.msra.mxu0 %v15682_v24  ;;  %v15776_v24 = vcombine.low %v7364_v62, %v7368_v31  ;;  %v15784_v18 = vcombine.low %v7372_v29, %v7376_v43 }
 0x567   :  { %13567 = vmatprep.subr.bf16.mxu0 %v15691_v5  ;;  %v15785_v5 = vcombine.high %v7372_v29, %v7376_v43 }
 0x568   :  { %13263 = vmatpush1.bf16.msra.mxu1 %v15744_v46  ;;  %v15722_v46 = vcombine.low %v7309_v35, %v7313_v15 }
 0x569   :  { %13264 = vmatprep.subr.bf16.mxu1 %v15753_v12  ;;  %v7325_v12 = vld [vmem:[#allocation11 + $0x1148] sm:$0xff] }
 0x56a   :  { %13568 = vmatpush1.bf16.msra.mxu0 %v15690_v4  ;;  %v7329_v4 = vld [vmem:[#allocation11 + $0x1168] sm:$0xff] }
 0x56b   :  { %13578 = vmatprep.subr.bf16.mxu0 %v15699_v27  ;;  %v7388_v27 = vld [vmem:[#allocation11 + $0x1340] sm:$0xff]  ;;  %v15739_v14 = vcombine.high %v7325_v12, %v7329_v4  ;;  %v15738_v52 = vcombine.low %v7325_v12, %v7329_v4 }
 0x56c   :  { %13265 = vmatpush1.bf16.msra.mxu1 %v15752_v11  ;;  %v7392_v11 = vld [vmem:[#allocation11 + $0x1360] sm:$0xff] }
 0x56d   :  { %13266 = vmatprep.subr.bf16.mxu1 %v15761_v2  ;;  %13570 = vmatmul.mubr.bf16.vlgmr.msra.gmra.mrb[12].mxu0 %v19118_v25  ;;  %v7333_v2 = vld [vmem:[#allocation11 + $0x1188] sm:$0xff]  ;;  %v15801_v36 = vcombine.high %v7388_v27, %v7392_v11  ;;  %v15800_v54 = vcombine.low %v7388_v27, %v7392_v11  ;;  %v19146_v27 = vpack.c.b16 %v18971_v58, %v18971_v58 }
 0x56e   :  { %13579 = vmatpush1.bf16.msra.mxu0 %v15698_v6  ;;  %13610 = vmatprep.mubr.bf16.mxu0 %v19122_v16  ;;  %v7337_v6 = vld [vmem:[#allocation11 + $0x11a8] sm:$0xff] }
 0x56f   :  { %13580 = vmatprep.subr.bf16.mxu0 %v15707_v41  ;;  %v7396_v41 = vld [vmem:[#allocation11 + $0x1380] sm:$0xff]  ;;  %v15747_v21 = vcombine.high %v7333_v2, %v7337_v6  ;;  %v15746_v31 = vcombine.low %v7333_v2, %v7337_v6  ;;  %v7373_v58 = vld [vmem:[#allocation11 + $0x12c8] sm:$0xff] }
 0x570   :  { %13267 = vmatpush1.bf16.msra.mxu1 %v15760_v10  ;;  %v7400_v10 = vld [vmem:[#allocation11 + $0x13a0] sm:$0xff] }
 0x571   :  { %13268 = vmatprep.subr.bf16.mxu1 %v15769_v59  ;;  %v7341_v59 = vld [vmem:[#allocation11 + $0x11c8] sm:$0xff]  ;;  %v15809_v62 = vcombine.high %v7396_v41, %v7400_v10  ;;  %v15808_v15 = vcombine.low %v7396_v41, %v7400_v10  ;;  %v7428_v2 = vld [vmem:[#allocation11 + $0x1480] sm:$0xff] }
 0x572   :  { %13581 = vmatpush1.bf16.msra.mxu0 %v15706_v32  ;;  %v7345_v32 = vld [vmem:[#allocation11 + $0x11e8] sm:$0xff]  ;;  %v7432_v6 = vld [vmem:[#allocation11 + $0x14a0] sm:$0xff] }
 0x573   :  { %13582 = vmatprep.subr.bf16.mxu0 %v15715_v7  ;;  %v7404_v7 = vld [vmem:[#allocation11 + $0x13c0] sm:$0xff]  ;;  %v15755_v35 = vcombine.high %v7341_v59, %v7345_v32  ;;  %v15754_v43 = vcombine.low %v7341_v59, %v7345_v32  ;;  %v7377_v41 = vld [vmem:[#allocation11 + $0x12e8] sm:$0xff]  ;;  %v15841_v10 = vcombine.high %v7428_v2, %v7432_v6  ;;  %v15840_v32 = vcombine.low %v7428_v2, %v7432_v6 }
 0x574   :  { %13269 = vmatpush1.bf16.msra.mxu1 %v15768_v1  ;;  %v7408_v1 = vld [vmem:[#allocation11 + $0x13e0] sm:$0xff]  ;;  %v15787_v59 = vcombine.high %v7373_v58, %v7377_v41 }
 0x575   :  { %13270 = vmatprep.subr.bf16.mxu1 %v15777_v34  ;;  %v7349_v34 = vld [vmem:[#allocation11 + $0x1208] sm:$0xff]  ;;  %v15817_v29 = vcombine.high %v7404_v7, %v7408_v1  ;;  %v15816_v50 = vcombine.low %v7404_v7, %v7408_v1  ;;  %v15786_v1 = vcombine.low %v7373_v58, %v7377_v41 }
 0x576   :  { %13583 = vmatpush1.bf16.msra.mxu0 %v15714_v57  ;;  %v7353_v57 = vld [vmem:[#allocation11 + $0x1228] sm:$0xff] }
 0x577   :  { %13584 = vmatprep.subr.bf16.mxu0 %v15723_v17  ;;  %v7412_v17 = vld [vmem:[#allocation11 + $0x1400] sm:$0xff]  ;;  %v15763_v53 = vcombine.high %v7349_v34, %v7353_v57  ;;  %v15762_v51 = vcombine.low %v7349_v34, %v7353_v57 }
 0x578   :  { %13271 = vmatpush1.bf16.msra.mxu1 %v15776_v24  ;;  %v7416_v24 = vld [vmem:[#allocation11 + $0x1420] sm:$0xff] }
 0x579   :  { %13272 = vmatprep.subr.bf16.mxu1 %v15785_v5  ;;  %v7357_v5 = vld [vmem:[#allocation11 + $0x1248] sm:$0xff]  ;;  %v15825_v20 = vcombine.high %v7412_v17, %v7416_v24  ;;  %v15824_v4 = vcombine.low %v7412_v17, %v7416_v24 }
 0x57a   :  { %13585 = vmatpush1.bf16.msra.mxu0 %v15722_v46  ;;  %v7361_v46 = vld [vmem:[#allocation11 + $0x1268] sm:$0xff] }
 0x57b   :  { %13586 = vmatprep.subr.bf16.mxu0 %v15731_v22  ;;  %v7420_v22 = vld [vmem:[#allocation11 + $0x1440] sm:$0xff]  ;;  %v15771_v12 = vcombine.high %v7357_v5, %v7361_v46 }
 0x57c   :  { %13273 = vmatpush1.bf16.msra.mxu1 %v15784_v18  ;;  %v7424_v18 = vld [vmem:[#allocation11 + $0x1460] sm:$0xff] }
 0x57d   :  { %13274 = vmatprep.subr.bf16.mxu1 %v15793_v45  ;;  %v7365_v45 = vld [vmem:[#allocation11 + $0x1288] sm:$0xff]  ;;  %v15833_v11 = vcombine.high %v7420_v22, %v7424_v18 }
 0x57e   :  { %13587 = vmatpush1.bf16.msra.mxu0 %v15730_v23  ;;  %v7369_v23 = vld [vmem:[#allocation11 + $0x12a8] sm:$0xff] }
 0x57f   :  { %13588 = vmatprep.subr.bf16.mxu0 %v15739_v14  ;;  %v19150_v14 = vpack.c.b16 %v18980_v47, %v18980_v47  ;;  %v7436_v47 = vld [vmem:[#allocation11 + $0x14c0] sm:$0xff] }
 0x580   :  { %13275 = vmatpush1.bf16.msra.mxu1 %v15792_v30  ;;  %v15770_v30 = vcombine.low %v7357_v5, %v7361_v46 }
 0x581   :  { %13276 = vmatprep.subr.bf16.mxu1 %v15801_v36  ;;  %v15779_v36 = vcombine.high %v7365_v45, %v7369_v23 }
 0x582   :  { %13589 = vmatpush1.bf16.msra.mxu0 %v15738_v52  ;;  %v15832_v52 = vcombine.low %v7420_v22, %v7424_v18 }
 0x583   :  { %13590 = vmatprep.subr.bf16.mxu0 %v15747_v21  ;;  %v15778_v21 = vcombine.low %v7365_v45, %v7369_v23 }
 0x584   :  { %13277 = vmatpush1.bf16.msra.mxu1 %v15800_v54  ;;  %v7440_v54 = vld [vmem:[#allocation11 + $0x14e0] sm:$0xff] }
 0x585   :  { %13278 = vmatprep.subr.bf16.mxu1 %v15809_v62  ;;  %v7381_v62 = vld [vmem:[#allocation11 + $0x1308] sm:$0xff]  ;;  %v15849_v7 = vcombine.high %v7436_v47, %v7440_v54  ;;  %v15848_v57 = vcombine.low %v7436_v47, %v7440_v54 }
 0x586   :  { %13591 = vmatpush1.bf16.msra.mxu0 %v15746_v31  ;;  %v7385_v31 = vld [vmem:[#allocation11 + $0x1328] sm:$0xff] }
 0x587   :  { %13592 = vmatprep.subr.bf16.mxu0 %v15755_v35  ;;  %v7444_v35 = vld [vmem:[#allocation11 + $0x1500] sm:$0xff]  ;;  %v15795_v34 = vcombine.high %v7381_v62, %v7385_v31  ;;  %v15794_v24 = vcombine.low %v7381_v62, %v7385_v31 }
 0x588   :  { %13279 = vmatpush1.bf16.msra.mxu1 %v15808_v15  ;;  %v7448_v15 = vld [vmem:[#allocation11 + $0x1520] sm:$0xff] }
 0x589   :  { %13280 = vmatprep.subr.bf16.mxu1 %v15817_v29  ;;  %v7389_v29 = vld [vmem:[#allocation11 + $0x1348] sm:$0xff]  ;;  %v15857_v17 = vcombine.high %v7444_v35, %v7448_v15  ;;  %v15856_v46 = vcombine.low %v7444_v35, %v7448_v15 }
 0x58a   :  { %13593 = vmatpush1.bf16.msra.mxu0 %v15754_v43  ;;  %v7393_v43 = vld [vmem:[#allocation11 + $0x1368] sm:$0xff] }
 0x58b   :  { %13594 = vmatprep.subr.bf16.mxu0 %v15763_v53  ;;  %v7452_v53 = vld [vmem:[#allocation11 + $0x1540] sm:$0xff]  ;;  %v15803_v5 = vcombine.high %v7389_v29, %v7393_v43  ;;  %v15802_v18 = vcombine.low %v7389_v29, %v7393_v43 }
 0x58c   :  { %13281 = vmatpush1.bf16.msra.mxu1 %v15816_v50  ;;  %v7456_v50 = vld [vmem:[#allocation11 + $0x1560] sm:$0xff] }
 0x58d   :  { %13291 = vmatprep.subr.bf16.mxu1 %v15825_v20  ;;  %v7397_v20 = vld [vmem:[#allocation11 + $0x1388] sm:$0xff]  ;;  %v15865_v22 = vcombine.high %v7452_v53, %v7456_v50  ;;  %v15864_v23 = vcombine.low %v7452_v53, %v7456_v50 }
 0x58e   :  { %13595 = vmatpush1.bf16.msra.mxu0 %v15762_v51  ;;  %v7401_v51 = vld [vmem:[#allocation11 + $0x13a8] sm:$0xff] }
 0x58f   :  { %13283 = vmatmul.mubr.bf16.vlgmr.msra.gmra.mrb[16].mxu1 %v19146_v27  ;;  %13596 = vmatprep.subr.bf16.mxu0 %v15771_v12  ;;  %v7460_v12 = vld [vmem:[#allocation11 + $0x1580] sm:$0xff]  ;;  %v15811_v45 = vcombine.high %v7397_v20, %v7401_v51  ;;  %v15810_v6 = vcombine.low %v7397_v20, %v7401_v51 }
 0x590   :  { %13292 = vmatpush1.bf16.msra.mxu1 %v15824_v4  ;;  %13323 = vmatprep.mubr.bf16.mxu1 %v19150_v14  ;;  %v7464_v4 = vld [vmem:[#allocation11 + $0x15a0] sm:$0xff] }
 0x591   :  { %13293 = vmatprep.subr.bf16.mxu1 %v15833_v11  ;;  %v7405_v11 = vld [vmem:[#allocation11 + $0x13c8] sm:$0xff]  ;;  %v15873_v2 = vcombine.high %v7460_v12, %v7464_v4  ;;  %v15872_v41 = vcombine.low %v7460_v12, %v7464_v4 }
 0x592   :  { %13597 = vmatpush1.bf16.msra.mxu0 %v15770_v30  ;;  %v7409_v30 = vld [vmem:[#allocation11 + $0x13e8] sm:$0xff] }
 0x593   :  { %13598 = vmatprep.subr.bf16.mxu0 %v15779_v36  ;;  %v7468_v36 = vld [vmem:[#allocation11 + $0x15c0] sm:$0xff]  ;;  %v15819_v58 = vcombine.high %v7405_v11, %v7409_v30  ;;  %v15818_v54 = vcombine.low %v7405_v11, %v7409_v30 }
 0x594   :  { %13294 = vmatpush1.bf16.msra.mxu1 %v15832_v52  ;;  %v7472_v52 = vld [vmem:[#allocation11 + $0x15e0] sm:$0xff] }
 0x595   :  { %13295 = vmatprep.subr.bf16.mxu1 %v15841_v10  ;;  %v7413_v10 = vld [vmem:[#allocation11 + $0x1408] sm:$0xff]  ;;  %v15881_v47 = vcombine.high %v7468_v36, %v7472_v52  ;;  %v15880_v31 = vcombine.low %v7468_v36, %v7472_v52 }
 0x596   :  { %13599 = vmatpush1.bf16.msra.mxu0 %v15778_v21  ;;  %v7417_v21 = vld [vmem:[#allocation11 + $0x1428] sm:$0xff] }
 0x597   :  { %13600 = vmatprep.subr.bf16.mxu0 %v15787_v59  ;;  %v7476_v59 = vld [vmem:[#allocation11 + $0x1600] sm:$0xff]  ;;  %v15827_v62 = vcombine.high %v7413_v10, %v7417_v21  ;;  %v15826_v15 = vcombine.low %v7413_v10, %v7417_v21 }
 0x598   :  { %13296 = vmatpush1.bf16.msra.mxu1 %v15840_v32  ;;  %v7480_v32 = vld [vmem:[#allocation11 + $0x1620] sm:$0xff] }
 0x599   :  { %13297 = vmatprep.subr.bf16.mxu1 %v15849_v7  ;;  %v7421_v7 = vld [vmem:[#allocation11 + $0x1448] sm:$0xff]  ;;  %v15889_v35 = vcombine.high %v7476_v59, %v7480_v32  ;;  %v15888_v43 = vcombine.low %v7476_v59, %v7480_v32 }
 0x59a   :  { %13601 = vmatpush1.bf16.msra.mxu0 %v15786_v1  ;;  %v7425_v1 = vld [vmem:[#allocation11 + $0x1468] sm:$0xff] }
 0x59b   :  { %13602 = vmatprep.subr.bf16.mxu0 %v15795_v34  ;;  %v7484_v34 = vld [vmem:[#allocation11 + $0x1640] sm:$0xff]  ;;  %v15835_v29 = vcombine.high %v7421_v7, %v7425_v1  ;;  %v15834_v50 = vcombine.low %v7421_v7, %v7425_v1 }
 0x59c   :  { %13298 = vmatpush1.bf16.msra.mxu1 %v15848_v57  ;;  %v7488_v57 = vld [vmem:[#allocation11 + $0x1660] sm:$0xff] }
 0x59d   :  { %13299 = vmatprep.subr.bf16.mxu1 %v15857_v17  ;;  %v7429_v17 = vld [vmem:[#allocation11 + $0x1488] sm:$0xff]  ;;  %v15897_v53 = vcombine.high %v7484_v34, %v7488_v57  ;;  %v15896_v51 = vcombine.low %v7484_v34, %v7488_v57 }
 0x59e   :  { %13603 = vmatpush1.bf16.msra.mxu0 %v15794_v24  ;;  %v7433_v24 = vld [vmem:[#allocation11 + $0x14a8] sm:$0xff] }
 0x59f   :  { %13604 = vmatprep.subr.bf16.mxu0 %v15803_v5  ;;  %v7492_v5 = vld [vmem:[#allocation11 + $0x1680] sm:$0xff]  ;;  %v15843_v20 = vcombine.high %v7429_v17, %v7433_v24  ;;  %v15842_v4 = vcombine.low %v7429_v17, %v7433_v24 }
 0x5a0   :  { %13300 = vmatpush1.bf16.msra.mxu1 %v15856_v46  ;;  %v7496_v46 = vld [vmem:[#allocation11 + $0x16a0] sm:$0xff] }
 0x5a1   :  { %13301 = vmatprep.subr.bf16.mxu1 %v15865_v22  ;;  %v7437_v22 = vld [vmem:[#allocation11 + $0x14c8] sm:$0xff]  ;;  %v15905_v12 = vcombine.high %v7492_v5, %v7496_v46  ;;  %v15904_v30 = vcombine.low %v7492_v5, %v7496_v46 }
 0x5a2   :  { %13605 = vmatpush1.bf16.msra.mxu0 %v15802_v18  ;;  %v7441_v18 = vld [vmem:[#allocation11 + $0x14e8] sm:$0xff] }
 0x5a3   :  { %13606 = vmatprep.subr.bf16.mxu0 %v15811_v45  ;;  %v7500_v45 = vld [vmem:[#allocation11 + $0x16c0] sm:$0xff]  ;;  %v15851_v11 = vcombine.high %v7437_v22, %v7441_v18  ;;  %v15850_v52 = vcombine.low %v7437_v22, %v7441_v18 }
 0x5a4   :  { %13302 = vmatpush1.bf16.msra.mxu1 %v15864_v23  ;;  %v7504_v23 = vld [vmem:[#allocation11 + $0x16e0] sm:$0xff] }
 0x5a5   :  { %13303 = vmatprep.subr.bf16.mxu1 %v15873_v2  ;;  %v7445_v2 = vld [vmem:[#allocation11 + $0x1508] sm:$0xff]  ;;  %v15913_v36 = vcombine.high %v7500_v45, %v7504_v23  ;;  %v15912_v21 = vcombine.low %v7500_v45, %v7504_v23 }
 0x5a6   :  { %13607 = vmatpush1.bf16.msra.mxu0 %v15810_v6  ;;  %v7449_v6 = vld [vmem:[#allocation11 + $0x1528] sm:$0xff] }
 0x5a7   :  { %13608 = vmatprep.subr.bf16.mxu0 %v15819_v58  ;;  %v7508_v58 = vld [vmem:[#allocation11 + $0x1700] sm:$0xff]  ;;  %v15859_v10 = vcombine.high %v7445_v2, %v7449_v6  ;;  %v15858_v32 = vcombine.low %v7445_v2, %v7449_v6 }
 0x5a8   :  { %13304 = vmatpush1.bf16.msra.mxu1 %v15872_v41  ;;  %v7512_v41 = vld [vmem:[#allocation11 + $0x1720] sm:$0xff] }
 0x5a9   :  { %13305 = vmatprep.subr.bf16.mxu1 %v15881_v47  ;;  %v7453_v47 = vld [vmem:[#allocation11 + $0x1548] sm:$0xff]  ;;  %v15921_v59 = vcombine.high %v7508_v58, %v7512_v41  ;;  %v15920_v1 = vcombine.low %v7508_v58, %v7512_v41 }
 0x5aa   :  { %13609 = vmatpush1.bf16.msra.mxu0 %v15818_v54  ;;  %v7457_v54 = vld [vmem:[#allocation11 + $0x1568] sm:$0xff] }
 0x5ab   :  { %13619 = vmatprep.subr.bf16.mxu0 %v15827_v62  ;;  %v7516_v62 = vld [vmem:[#allocation11 + $0x1740] sm:$0xff]  ;;  %v15867_v7 = vcombine.high %v7453_v47, %v7457_v54  ;;  %v15866_v57 = vcombine.low %v7453_v47, %v7457_v54 }
 0x5ac   :  { %13306 = vmatpush1.bf16.msra.mxu1 %v15880_v31  ;;  %v7520_v31 = vld [vmem:[#allocation11 + $0x1760] sm:$0xff] }
 0x5ad   :  { %13307 = vmatprep.subr.bf16.mxu1 %v15889_v35  ;;  %13611 = vmatmul.mubr.bf16.vlgmr.msra.gmra.mrb[12].mxu0 %v19146_v27  ;;  %v7461_v35 = vld [vmem:[#allocation11 + $0x1588] sm:$0xff]  ;;  %v15929_v34 = vcombine.high %v7516_v62, %v7520_v31  ;;  %v15928_v24 = vcombine.low %v7516_v62, %v7520_v31  ;;  %v19158_v62 = vpack.c.b16 %v18985_v39, %v18985_v39 }
 0x5ae   :  { %13620 = vmatpush1.bf16.msra.mxu0 %v15826_v15  ;;  %13651 = vmatprep.mubr.bf16.mxu0 %v19150_v14  ;;  %v7465_v15 = vld [vmem:[#allocation11 + $0x15a8] sm:$0xff] }
 0x5af   :  { %13621 = vmatprep.subr.bf16.mxu0 %v15835_v29  ;;  %v7524_v29 = vld [vmem:[#allocation11 + $0x1780] sm:$0xff]  ;;  %v15875_v17 = vcombine.high %v7461_v35, %v7465_v15  ;;  %v15874_v46 = vcombine.low %v7461_v35, %v7465_v15  ;;  %v7501_v39 = vld [vmem:[#allocation11 + $0x16c8] sm:$0xff] }
 0x5b0   :  { %13308 = vmatpush1.bf16.msra.mxu1 %v15888_v43  ;;  %v7528_v43 = vld [vmem:[#allocation11 + $0x17a0] sm:$0xff] }
 0x5b1   :  { %13309 = vmatprep.subr.bf16.mxu1 %v15897_v53  ;;  %v7469_v53 = vld [vmem:[#allocation11 + $0x15c8] sm:$0xff]  ;;  %v15937_v5 = vcombine.high %v7524_v29, %v7528_v43  ;;  %v15936_v18 = vcombine.low %v7524_v29, %v7528_v43  ;;  %v7556_v35 = vld [vmem:[#allocation11 + $0x1880] sm:$0xff] }
 0x5b2   :  { %13622 = vmatpush1.bf16.msra.mxu0 %v15834_v50  ;;  %v7473_v50 = vld [vmem:[#allocation11 + $0x15e8] sm:$0xff]  ;;  %v7560_v15 = vld [vmem:[#allocation11 + $0x18a0] sm:$0xff] }
 0x5b3   :  { %13623 = vmatprep.subr.bf16.mxu0 %v15843_v20  ;;  %v7532_v20 = vld [vmem:[#allocation11 + $0x17c0] sm:$0xff]  ;;  %v15883_v22 = vcombine.high %v7469_v53, %v7473_v50  ;;  %v15882_v23 = vcombine.low %v7469_v53, %v7473_v50  ;;  %v7505_v29 = vld [vmem:[#allocation11 + $0x16e8] sm:$0xff]  ;;  %v15969_v43 = vcombine.high %v7556_v35, %v7560_v15  ;;  %v15968_v50 = vcombine.low %v7556_v35, %v7560_v15 }
 0x5b4   :  { %13310 = vmatpush1.bf16.msra.mxu1 %v15896_v51  ;;  %v7536_v51 = vld [vmem:[#allocation11 + $0x17e0] sm:$0xff]  ;;  %v15915_v53 = vcombine.high %v7501_v39, %v7505_v29 }
 0x5b5   :  { %13311 = vmatprep.subr.bf16.mxu1 %v15905_v12  ;;  %v7477_v12 = vld [vmem:[#allocation11 + $0x1608] sm:$0xff]  ;;  %v15945_v45 = vcombine.high %v7532_v20, %v7536_v51  ;;  %v15944_v6 = vcombine.low %v7532_v20, %v7536_v51  ;;  %v15914_v51 = vcombine.low %v7501_v39, %v7505_v29 }
 0x5b6   :  { %13624 = vmatpush1.bf16.msra.mxu0 %v15842_v4  ;;  %v7481_v4 = vld [vmem:[#allocation11 + $0x1628] sm:$0xff] }
 0x5b7   :  { %13625 = vmatprep.subr.bf16.mxu0 %v15851_v11  ;;  %v7540_v11 = vld [vmem:[#allocation11 + $0x1800] sm:$0xff]  ;;  %v15891_v2 = vcombine.high %v7477_v12, %v7481_v4  ;;  %v15890_v41 = vcombine.low %v7477_v12, %v7481_v4 }
 0x5b8   :  { %13312 = vmatpush1.bf16.msra.mxu1 %v15904_v30  ;;  %v7544_v30 = vld [vmem:[#allocation11 + $0x1820] sm:$0xff] }
 0x5b9   :  { %13313 = vmatprep.subr.bf16.mxu1 %v15913_v36  ;;  %v7485_v36 = vld [vmem:[#allocation11 + $0x1648] sm:$0xff]  ;;  %v15953_v58 = vcombine.high %v7540_v11, %v7544_v30  ;;  %v15952_v54 = vcombine.low %v7540_v11, %v7544_v30 }
 0x5ba   :  { %13626 = vmatpush1.bf16.msra.mxu0 %v15850_v52  ;;  %v7489_v52 = vld [vmem:[#allocation11 + $0x1668] sm:$0xff] }
 0x5bb   :  { %13627 = vmatprep.subr.bf16.mxu0 %v15859_v10  ;;  %v7548_v10 = vld [vmem:[#allocation11 + $0x1840] sm:$0xff]  ;;  %v15899_v47 = vcombine.high %v7485_v36, %v7489_v52 }
 0x5bc   :  { %13314 = vmatpush1.bf16.msra.mxu1 %v15912_v21  ;;  %v7552_v21 = vld [vmem:[#allocation11 + $0x1860] sm:$0xff] }
 0x5bd   :  { %13315 = vmatprep.subr.bf16.mxu1 %v15921_v59  ;;  %v7493_v59 = vld [vmem:[#allocation11 + $0x1688] sm:$0xff]  ;;  %v15961_v31 = vcombine.high %v7548_v10, %v7552_v21 }
 0x5be   :  { %13628 = vmatpush1.bf16.msra.mxu0 %v15858_v32  ;;  %v7497_v32 = vld [vmem:[#allocation11 + $0x16a8] sm:$0xff] }
 0x5bf   :  { %13629 = vmatprep.subr.bf16.mxu0 %v15867_v7  ;;  %v19162_v7 = vpack.c.b16 %v19001_v44, %v19001_v44  ;;  %v7564_v44 = vld [vmem:[#allocation11 + $0x18c0] sm:$0xff] }
 0x5c0   :  { %13316 = vmatpush1.bf16.msra.mxu1 %v15920_v1  ;;  %v15898_v1 = vcombine.low %v7485_v36, %v7489_v52 }
 0x5c1   :  { %13317 = vmatprep.subr.bf16.mxu1 %v15929_v34  ;;  %v15907_v34 = vcombine.high %v7493_v59, %v7497_v32 }
 0x5c2   :  { %13630 = vmatpush1.bf16.msra.mxu0 %v15866_v57  ;;  %v15960_v57 = vcombine.low %v7548_v10, %v7552_v21 }
 0x5c3   :  { %13631 = vmatprep.subr.bf16.mxu0 %v15875_v17  ;;  %v15906_v17 = vcombine.low %v7493_v59, %v7497_v32 }
 0x5c4   :  { %13318 = vmatpush1.bf16.msra.mxu1 %v15928_v24  ;;  %v7568_v24 = vld [vmem:[#allocation11 + $0x18e0] sm:$0xff] }
 0x5c5   :  { %13319 = vmatprep.subr.bf16.mxu1 %v15937_v5  ;;  %v7509_v5 = vld [vmem:[#allocation11 + $0x1708] sm:$0xff]  ;;  %v15977_v20 = vcombine.high %v7564_v44, %v7568_v24  ;;  %v15976_v4 = vcombine.low %v7564_v44, %v7568_v24 }
 0x5c6   :  { %13632 = vmatpush1.bf16.msra.mxu0 %v15874_v46  ;;  %v7513_v46 = vld [vmem:[#allocation11 + $0x1728] sm:$0xff] }
 0x5c7   :  { %13633 = vmatprep.subr.bf16.mxu0 %v15883_v22  ;;  %v7572_v22 = vld [vmem:[#allocation11 + $0x1900] sm:$0xff]  ;;  %v15923_v12 = vcombine.high %v7509_v5, %v7513_v46  ;;  %v15922_v30 = vcombine.low %v7509_v5, %v7513_v46 }
 0x5c8   :  { %13320 = vmatpush1.bf16.msra.mxu1 %v15936_v18  ;;  %v7576_v18 = vld [vmem:[#allocation11 + $0x1920] sm:$0xff] }
 0x5c9   :  { %13321 = vmatprep.subr.bf16.mxu1 %v15945_v45  ;;  %v7517_v45 = vld [vmem:[#allocation11 + $0x1748] sm:$0xff]  ;;  %v15985_v11 = vcombine.high %v7572_v22, %v7576_v18  ;;  %v15984_v52 = vcombine.low %v7572_v22, %v7576_v18 }
 0x5ca   :  { %13634 = vmatpush1.bf16.msra.mxu0 %v15882_v23  ;;  %v7521_v23 = vld [vmem:[#allocation11 + $0x1768] sm:$0xff] }
 0x5cb   :  { %13635 = vmatprep.subr.bf16.mxu0 %v15891_v2  ;;  %v7580_v2 = vld [vmem:[#allocation11 + $0x1940] sm:$0xff]  ;;  %v15931_v36 = vcombine.high %v7517_v45, %v7521_v23  ;;  %v15930_v21 = vcombine.low %v7517_v45, %v7521_v23 }
 0x5cc   :  { %13322 = vmatpush1.bf16.msra.mxu1 %v15944_v6  ;;  %v7584_v6 = vld [vmem:[#allocation11 + $0x1960] sm:$0xff] }
 0x5cd   :  { %13332 = vmatprep.subr.bf16.mxu1 %v15953_v58  ;;  %v7525_v58 = vld [vmem:[#allocation11 + $0x1788] sm:$0xff]  ;;  %v15993_v10 = vcombine.high %v7580_v2, %v7584_v6  ;;  %v15992_v32 = vcombine.low %v7580_v2, %v7584_v6 }
 0x5ce   :  { %13636 = vmatpush1.bf16.msra.mxu0 %v15890_v41  ;;  %v7529_v41 = vld [vmem:[#allocation11 + $0x17a8] sm:$0xff] }
 0x5cf   :  { %13324 = vmatmul.mubr.bf16.vlgmr.msra.gmra.mrb[16].mxu1 %v19158_v62  ;;  %13637 = vmatprep.subr.bf16.mxu0 %v15899_v47  ;;  %v7588_v47 = vld [vmem:[#allocation11 + $0x1980] sm:$0xff]  ;;  %v15939_v59 = vcombine.high %v7525_v58, %v7529_v41  ;;  %v15938_v15 = vcombine.low %v7525_v58, %v7529_v41 }
 0x5d0   :  { %13333 = vmatpush1.bf16.msra.mxu1 %v15952_v54  ;;  %13364 = vmatprep.mubr.bf16.mxu1 %v19162_v7  ;;  %v7592_v54 = vld [vmem:[#allocation11 + $0x19a0] sm:$0xff] }
 0x5d1   :  { %13334 = vmatprep.subr.bf16.mxu1 %v15961_v31  ;;  %v7533_v31 = vld [vmem:[#allocation11 + $0x17c8] sm:$0xff]  ;;  %v16001_v35 = vcombine.high %v7588_v47, %v7592_v54  ;;  %v16000_v29 = vcombine.low %v7588_v47, %v7592_v54 }
 0x5d2   :  { %13638 = vmatpush1.bf16.msra.mxu0 %v15898_v1  ;;  %v7537_v1 = vld [vmem:[#allocation11 + $0x17e8] sm:$0xff] }
 0x5d3   :  { %13639 = vmatprep.subr.bf16.mxu0 %v15907_v34  ;;  %v7596_v34 = vld [vmem:[#allocation11 + $0x19c0] sm:$0xff]  ;;  %v15947_v39 = vcombine.high %v7533_v31, %v7537_v1  ;;  %v15946_v24 = vcombine.low %v7533_v31, %v7537_v1 }
 0x5d4   :  { %13335 = vmatpush1.bf16.msra.mxu1 %v15960_v57  ;;  %v7600_v57 = vld [vmem:[#allocation11 + $0x19e0] sm:$0xff] }
 0x5d5   :  { %13336 = vmatprep.subr.bf16.mxu1 %v15969_v43  ;;  %v7541_v43 = vld [vmem:[#allocation11 + $0x1808] sm:$0xff]  ;;  %v16009_v44 = vcombine.high %v7596_v34, %v7600_v57  ;;  %v16008_v46 = vcombine.low %v7596_v34, %v7600_v57 }
 0x5d6   :  { %13640 = vmatpush1.bf16.msra.mxu0 %v15906_v17  ;;  %v7545_v17 = vld [vmem:[#allocation11 + $0x1828] sm:$0xff] }
 0x5d7   :  { %13641 = vmatprep.subr.bf16.mxu0 %v15915_v53  ;;  %v7604_v53 = vld [vmem:[#allocation11 + $0x1a00] sm:$0xff]  ;;  %v15955_v5 = vcombine.high %v7541_v43, %v7545_v17  ;;  %v15954_v18 = vcombine.low %v7541_v43, %v7545_v17 }
 0x5d8   :  { %13337 = vmatpush1.bf16.msra.mxu1 %v15968_v50  ;;  %v7608_v50 = vld [vmem:[#allocation11 + $0x1a20] sm:$0xff] }
 0x5d9   :  { %13338 = vmatprep.subr.bf16.mxu1 %v15977_v20  ;;  %v7549_v20 = vld [vmem:[#allocation11 + $0x1848] sm:$0xff]  ;;  %v16017_v22 = vcombine.high %v7604_v53, %v7608_v50  ;;  %v16016_v23 = vcombine.low %v7604_v53, %v7608_v50 }
 0x5da   :  { %13642 = vmatpush1.bf16.msra.mxu0 %v15914_v51  ;;  %v7553_v51 = vld [vmem:[#allocation11 + $0x1868] sm:$0xff] }
 0x5db   :  { %13643 = vmatprep.subr.bf16.mxu0 %v15923_v12  ;;  %v7612_v12 = vld [vmem:[#allocation11 + $0x1a40] sm:$0xff]  ;;  %v15963_v45 = vcombine.high %v7549_v20, %v7553_v51  ;;  %v15962_v6 = vcombine.low %v7549_v20, %v7553_v51 }
 0x5dc   :  { %13339 = vmatpush1.bf16.msra.mxu1 %v15976_v4  ;;  %v7616_v4 = vld [vmem:[#allocation11 + $0x1a60] sm:$0xff] }
 0x5dd   :  { %13340 = vmatprep.subr.bf16.mxu1 %v15985_v11  ;;  %v7557_v11 = vld [vmem:[#allocation11 + $0x1888] sm:$0xff]  ;;  %v16025_v2 = vcombine.high %v7612_v12, %v7616_v4  ;;  %v16024_v41 = vcombine.low %v7612_v12, %v7616_v4 }
 0x5de   :  { %13644 = vmatpush1.bf16.msra.mxu0 %v15922_v30  ;;  %v7561_v30 = vld [vmem:[#allocation11 + $0x18a8] sm:$0xff] }
 0x5df   :  { %13645 = vmatprep.subr.bf16.mxu0 %v15931_v36  ;;  %v7620_v36 = vld [vmem:[#allocation11 + $0x1a80] sm:$0xff]  ;;  %v15971_v58 = vcombine.high %v7557_v11, %v7561_v30  ;;  %v15970_v54 = vcombine.low %v7557_v11, %v7561_v30 }
 0x5e0   :  { %13341 = vmatpush1.bf16.msra.mxu1 %v15984_v52  ;;  %v7624_v52 = vld [vmem:[#allocation11 + $0x1aa0] sm:$0xff] }
 0x5e1   :  { %13342 = vmatprep.subr.bf16.mxu1 %v15993_v10  ;;  %v7565_v10 = vld [vmem:[#allocation11 + $0x18c8] sm:$0xff]  ;;  %v16033_v47 = vcombine.high %v7620_v36, %v7624_v52  ;;  %v16032_v1 = vcombine.low %v7620_v36, %v7624_v52 }
 0x5e2   :  { %13646 = vmatpush1.bf16.msra.mxu0 %v15930_v21  ;;  %v7569_v21 = vld [vmem:[#allocation11 + $0x18e8] sm:$0xff] }
 0x5e3   :  { %13647 = vmatprep.subr.bf16.mxu0 %v15939_v59  ;;  %v7628_v59 = vld [vmem:[#allocation11 + $0x1ac0] sm:$0xff]  ;;  %v15979_v31 = vcombine.high %v7565_v10, %v7569_v21  ;;  %v15978_v57 = vcombine.low %v7565_v10, %v7569_v21 }
 0x5e4   :  { %13343 = vmatpush1.bf16.msra.mxu1 %v15992_v32  ;;  %v7632_v32 = vld [vmem:[#allocation11 + $0x1ae0] sm:$0xff] }
 0x5e5   :  { %13344 = vmatprep.subr.bf16.mxu1 %v16001_v35  ;;  %v7573_v35 = vld [vmem:[#allocation11 + $0x1908] sm:$0xff]  ;;  %v16041_v34 = vcombine.high %v7628_v59, %v7632_v32  ;;  %v16040_v17 = vcombine.low %v7628_v59, %v7632_v32 }
 0x5e6   :  { %13648 = vmatpush1.bf16.msra.mxu0 %v15938_v15  ;;  %v7577_v15 = vld [vmem:[#allocation11 + $0x1928] sm:$0xff] }
 0x5e7   :  { %13649 = vmatprep.subr.bf16.mxu0 %v15947_v39  ;;  %v7636_v39 = vld [vmem:[#allocation11 + $0x1b00] sm:$0xff]  ;;  %v15987_v43 = vcombine.high %v7573_v35, %v7577_v15  ;;  %v15986_v50 = vcombine.low %v7573_v35, %v7577_v15 }
 0x5e8   :  { %13345 = vmatpush1.bf16.msra.mxu1 %v16000_v29  ;;  %v7640_v29 = vld [vmem:[#allocation11 + $0x1b20] sm:$0xff] }
 0x5e9   :  { %13346 = vmatprep.subr.bf16.mxu1 %v16009_v44  ;;  %v7581_v44 = vld [vmem:[#allocation11 + $0x1948] sm:$0xff]  ;;  %v16049_v53 = vcombine.high %v7636_v39, %v7640_v29  ;;  %v16048_v51 = vcombine.low %v7636_v39, %v7640_v29 }
 0x5ea   :  { %13650 = vmatpush1.bf16.msra.mxu0 %v15946_v24  ;;  %v7585_v24 = vld [vmem:[#allocation11 + $0x1968] sm:$0xff] }
 0x5eb   :  { %13660 = vmatprep.subr.bf16.mxu0 %v15955_v5  ;;  %v7644_v5 = vld [vmem:[#allocation11 + $0x1b40] sm:$0xff]  ;;  %v15995_v20 = vcombine.high %v7581_v44, %v7585_v24  ;;  %v15994_v4 = vcombine.low %v7581_v44, %v7585_v24 }
 0x5ec   :  { %13347 = vmatpush1.bf16.msra.mxu1 %v16008_v46  ;;  %v7648_v46 = vld [vmem:[#allocation11 + $0x1b60] sm:$0xff] }
 0x5ed   :  { %13348 = vmatprep.subr.bf16.mxu1 %v16017_v22  ;;  %13652 = vmatmul.mubr.bf16.vlgmr.msra.gmra.mrb[12].mxu0 %v19158_v62  ;;  %v7589_v22 = vld [vmem:[#allocation11 + $0x1988] sm:$0xff]  ;;  %v16057_v12 = vcombine.high %v7644_v5, %v7648_v46  ;;  %v16056_v30 = vcombine.low %v7644_v5, %v7648_v46  ;;  %v19170_v5 = vpack.c.b16 %v19005_v55, %v19005_v55 }
 0x5ee   :  { %13661 = vmatpush1.bf16.msra.mxu0 %v15954_v18  ;;  %13692 = vmatprep.mubr.bf16.mxu0 %v19162_v7  ;;  %v7593_v18 = vld [vmem:[#allocation11 + $0x19a8] sm:$0xff] }
 0x5ef   :  { %13662 = vmatprep.subr.bf16.mxu0 %v15963_v45  ;;  %v7652_v45 = vld [vmem:[#allocation11 + $0x1b80] sm:$0xff]  ;;  %v16003_v11 = vcombine.high %v7589_v22, %v7593_v18  ;;  %v16002_v52 = vcombine.low %v7589_v22, %v7593_v18  ;;  %v7629_v55 = vld [vmem:[#allocation11 + $0x1ac8] sm:$0xff] }
 0x5f0   :  { %13349 = vmatpush1.bf16.msra.mxu1 %v16016_v23  ;;  %v7656_v23 = vld [vmem:[#allocation11 + $0x1ba0] sm:$0xff] }
 0x5f1   :  { %13350 = vmatprep.subr.bf16.mxu1 %v16025_v2  ;;  %v7597_v2 = vld [vmem:[#allocation11 + $0x19c8] sm:$0xff]  ;;  %v16065_v36 = vcombine.high %v7652_v45, %v7656_v23  ;;  %v16064_v21 = vcombine.low %v7652_v45, %v7656_v23  ;;  %v7684_v22 = vld [vmem:[#allocation11 + $0x1c80] sm:$0xff] }
 0x5f2   :  { %13663 = vmatpush1.bf16.msra.mxu0 %v15962_v6  ;;  %v7601_v6 = vld [vmem:[#allocation11 + $0x19e8] sm:$0xff]  ;;  %v7688_v18 = vld [vmem:[#allocation11 + $0x1ca0] sm:$0xff] }
 0x5f3   :  { %13664 = vmatprep.subr.bf16.mxu0 %v15971_v58  ;;  %v7660_v58 = vld [vmem:[#allocation11 + $0x1bc0] sm:$0xff]  ;;  %v16011_v10 = vcombine.high %v7597_v2, %v7601_v6  ;;  %v16010_v32 = vcombine.low %v7597_v2, %v7601_v6  ;;  %v7633_v45 = vld [vmem:[#allocation11 + $0x1ae8] sm:$0xff]  ;;  %v16097_v23 = vcombine.high %v7684_v22, %v7688_v18  ;;  %v16096_v6 = vcombine.low %v7684_v22, %v7688_v18 }
 0x5f4   :  { %13351 = vmatpush1.bf16.msra.mxu1 %v16024_v41  ;;  %v7664_v41 = vld [vmem:[#allocation11 + $0x1be0] sm:$0xff]  ;;  %v16043_v2 = vcombine.high %v7629_v55, %v7633_v45 }
 0x5f5   :  { %13352 = vmatprep.subr.bf16.mxu1 %v16033_v47  ;;  %v7605_v47 = vld [vmem:[#allocation11 + $0x1a08] sm:$0xff]  ;;  %v16073_v59 = vcombine.high %v7660_v58, %v7664_v41  ;;  %v16072_v15 = vcombine.low %v7660_v58, %v7664_v41  ;;  %v16042_v41 = vcombine.low %v7629_v55, %v7633_v45 }
 0x5f6   :  { %13665 = vmatpush1.bf16.msra.mxu0 %v15970_v54  ;;  %v7609_v54 = vld [vmem:[#allocation11 + $0x1a28] sm:$0xff] }
 0x5f7   :  { %13666 = vmatprep.subr.bf16.mxu0 %v15979_v31  ;;  %v7668_v31 = vld [vmem:[#allocation11 + $0x1c00] sm:$0xff]  ;;  %v16019_v35 = vcombine.high %v7605_v47, %v7609_v54  ;;  %v16018_v29 = vcombine.low %v7605_v47, %v7609_v54 }
 0x5f8   :  { %13353 = vmatpush1.bf16.msra.mxu1 %v16032_v1  ;;  %v7672_v1 = vld [vmem:[#allocation11 + $0x1c20] sm:$0xff] }
 0x5f9   :  { %13354 = vmatprep.subr.bf16.mxu1 %v16041_v34  ;;  %v7613_v34 = vld [vmem:[#allocation11 + $0x1a48] sm:$0xff]  ;;  %v16081_v39 = vcombine.high %v7668_v31, %v7672_v1  ;;  %v16080_v24 = vcombine.low %v7668_v31, %v7672_v1 }
 0x5fa   :  { %13667 = vmatpush1.bf16.msra.mxu0 %v15978_v57  ;;  %v7617_v57 = vld [vmem:[#allocation11 + $0x1a68] sm:$0xff] }
 0x5fb   :  { %13668 = vmatprep.subr.bf16.mxu0 %v15987_v43  ;;  %v7676_v43 = vld [vmem:[#allocation11 + $0x1c40] sm:$0xff]  ;;  %v16027_v44 = vcombine.high %v7613_v34, %v7617_v57 }
 0x5fc   :  { %13355 = vmatpush1.bf16.msra.mxu1 %v16040_v17  ;;  %v7680_v17 = vld [vmem:[#allocation11 + $0x1c60] sm:$0xff] }
 0x5fd   :  { %13356 = vmatprep.subr.bf16.mxu1 %v16049_v53  ;;  %v7621_v53 = vld [vmem:[#allocation11 + $0x1a88] sm:$0xff]  ;;  %v16089_v46 = vcombine.high %v7676_v43, %v7680_v17 }
 0x5fe   :  { %13669 = vmatpush1.bf16.msra.mxu0 %v15986_v50  ;;  %v7625_v50 = vld [vmem:[#allocation11 + $0x1aa8] sm:$0xff] }
 0x5ff   :  { %13670 = vmatprep.subr.bf16.mxu0 %v15995_v20  ;;  %v19174_v20 = vpack.c.b16 %v19008_v40, %v19008_v40  ;;  %v7692_v40 = vld [vmem:[#allocation11 + $0x1cc0] sm:$0xff] }
 0x600   :  { %13357 = vmatpush1.bf16.msra.mxu1 %v16048_v51  ;;  %v16026_v51 = vcombine.low %v7613_v34, %v7617_v57 }
 0x601   :  { %13358 = vmatprep.subr.bf16.mxu1 %v16057_v12  ;;  %v16035_v12 = vcombine.high %v7621_v53, %v7625_v50 }
 0x602   :  { %13671 = vmatpush1.bf16.msra.mxu0 %v15994_v4  ;;  %v16088_v4 = vcombine.low %v7676_v43, %v7680_v17 }
 0x603   :  { %13672 = vmatprep.subr.bf16.mxu0 %v16003_v11  ;;  %v16034_v11 = vcombine.low %v7621_v53, %v7625_v50 }
 0x604   :  { %13359 = vmatpush1.bf16.msra.mxu1 %v16056_v30  ;;  %v7696_v30 = vld [vmem:[#allocation11 + $0x1ce0] sm:$0xff] }
 0x605   :  { %13360 = vmatprep.subr.bf16.mxu1 %v16065_v36  ;;  %v7637_v36 = vld [vmem:[#allocation11 + $0x1b08] sm:$0xff]  ;;  %v16105_v58 = vcombine.high %v7692_v40, %v7696_v30  ;;  %v16104_v54 = vcombine.low %v7692_v40, %v7696_v30 }
 0x606   :  { %13673 = vmatpush1.bf16.msra.mxu0 %v16002_v52  ;;  %v7641_v52 = vld [vmem:[#allocation11 + $0x1b28] sm:$0xff] }
 0x607   :  { %13674 = vmatprep.subr.bf16.mxu0 %v16011_v10  ;;  %v7700_v10 = vld [vmem:[#allocation11 + $0x1d00] sm:$0xff]  ;;  %v16051_v47 = vcombine.high %v7637_v36, %v7641_v52  ;;  %v16050_v1 = vcombine.low %v7637_v36, %v7641_v52 }
 0x608   :  { %13361 = vmatpush1.bf16.msra.mxu1 %v16064_v21  ;;  %v7704_v21 = vld [vmem:[#allocation11 + $0x1d20] sm:$0xff] }
 0x609   :  { %13362 = vmatprep.subr.bf16.mxu1 %v16073_v59  ;;  %v7645_v59 = vld [vmem:[#allocation11 + $0x1b48] sm:$0xff]  ;;  %v16113_v31 = vcombine.high %v7700_v10, %v7704_v21  ;;  %v16112_v57 = vcombine.low %v7700_v10, %v7704_v21 }
 0x60a   :  { %13675 = vmatpush1.bf16.msra.mxu0 %v16010_v32  ;;  %v7649_v32 = vld [vmem:[#allocation11 + $0x1b68] sm:$0xff] }
 0x60b   :  { %13676 = vmatprep.subr.bf16.mxu0 %v16019_v35  ;;  %v7708_v35 = vld [vmem:[#allocation11 + $0x1d40] sm:$0xff]  ;;  %v16059_v34 = vcombine.high %v7645_v59, %v7649_v32  ;;  %v16058_v17 = vcombine.low %v7645_v59, %v7649_v32 }
 0x60c   :  { %13363 = vmatpush1.bf16.msra.mxu1 %v16072_v15  ;;  %v7712_v15 = vld [vmem:[#allocation11 + $0x1d60] sm:$0xff] }
 0x60d   :  { %13373 = vmatprep.subr.bf16.mxu1 %v16081_v39  ;;  %v7653_v39 = vld [vmem:[#allocation11 + $0x1b88] sm:$0xff]  ;;  %v16121_v43 = vcombine.high %v7708_v35, %v7712_v15  ;;  %v16120_v50 = vcombine.low %v7708_v35, %v7712_v15 }
 0x60e   :  { %13677 = vmatpush1.bf16.msra.mxu0 %v16018_v29  ;;  %v7657_v29 = vld [vmem:[#allocation11 + $0x1ba8] sm:$0xff] }
 0x60f   :  { %13365 = vmatmul.mubr.bf16.vlgmr.msra.gmra.mrb[16].mxu1 %v19170_v5  ;;  %13678 = vmatprep.subr.bf16.mxu0 %v16027_v44  ;;  %v7716_v44 = vld [vmem:[#allocation11 + $0x1d80] sm:$0xff]  ;;  %v16067_v53 = vcombine.high %v7653_v39, %v7657_v29  ;;  %v16066_v18 = vcombine.low %v7653_v39, %v7657_v29 }
 0x610   :  { %13374 = vmatpush1.bf16.msra.mxu1 %v16080_v24  ;;  %13405 = vmatprep.mubr.bf16.mxu1 %v19174_v20  ;;  %v7720_v24 = vld [vmem:[#allocation11 + $0x1da0] sm:$0xff] }
 0x611   :  { %13375 = vmatprep.subr.bf16.mxu1 %v16089_v46  ;;  %v7661_v46 = vld [vmem:[#allocation11 + $0x1bc8] sm:$0xff]  ;;  %v16129_v22 = vcombine.high %v7716_v44, %v7720_v24  ;;  %v16128_v45 = vcombine.low %v7716_v44, %v7720_v24 }
 0x612   :  { %13679 = vmatpush1.bf16.msra.mxu0 %v16026_v51  ;;  %v7665_v51 = vld [vmem:[#allocation11 + $0x1be8] sm:$0xff] }
 0x613   :  { %13680 = vmatprep.subr.bf16.mxu0 %v16035_v12  ;;  %v7724_v12 = vld [vmem:[#allocation11 + $0x1dc0] sm:$0xff]  ;;  %v16075_v55 = vcombine.high %v7661_v46, %v7665_v51  ;;  %v16074_v30 = vcombine.low %v7661_v46, %v7665_v51 }
 0x614   :  { %13376 = vmatpush1.bf16.msra.mxu1 %v16088_v4  ;;  %v7728_v4 = vld [vmem:[#allocation11 + $0x1de0] sm:$0xff] }
 0x615   :  { %13377 = vmatprep.subr.bf16.mxu1 %v16097_v23  ;;  %v7669_v23 = vld [vmem:[#allocation11 + $0x1c08] sm:$0xff]  ;;  %v16137_v40 = vcombine.high %v7724_v12, %v7728_v4  ;;  %v16136_v52 = vcombine.low %v7724_v12, %v7728_v4 }
 0x616   :  { %13681 = vmatpush1.bf16.msra.mxu0 %v16034_v11  ;;  %v7673_v11 = vld [vmem:[#allocation11 + $0x1c28] sm:$0xff] }
 0x617   :  { %13682 = vmatprep.subr.bf16.mxu0 %v16043_v2  ;;  %v7732_v2 = vld [vmem:[#allocation11 + $0x1e00] sm:$0xff]  ;;  %v16083_v36 = vcombine.high %v7669_v23, %v7673_v11  ;;  %v16082_v21 = vcombine.low %v7669_v23, %v7673_v11 }
 0x618   :  { %13378 = vmatpush1.bf16.msra.mxu1 %v16096_v6  ;;  %v7736_v6 = vld [vmem:[#allocation11 + $0x1e20] sm:$0xff] }
 0x619   :  { %13379 = vmatprep.subr.bf16.mxu1 %v16105_v58  ;;  %v7677_v58 = vld [vmem:[#allocation11 + $0x1c48] sm:$0xff]  ;;  %v16145_v10 = vcombine.high %v7732_v2, %v7736_v6  ;;  %v16144_v32 = vcombine.low %v7732_v2, %v7736_v6 }
 0x61a   :  { %13683 = vmatpush1.bf16.msra.mxu0 %v16042_v41  ;;  %v7681_v41 = vld [vmem:[#allocation11 + $0x1c68] sm:$0xff] }
 0x61b   :  { %13684 = vmatprep.subr.bf16.mxu0 %v16051_v47  ;;  %v7740_v47 = vld [vmem:[#allocation11 + $0x1e40] sm:$0xff]  ;;  %v16091_v59 = vcombine.high %v7677_v58, %v7681_v41  ;;  %v16090_v15 = vcombine.low %v7677_v58, %v7681_v41 }
 0x61c   :  { %13380 = vmatpush1.bf16.msra.mxu1 %v16104_v54  ;;  %v7744_v54 = vld [vmem:[#allocation11 + $0x1e60] sm:$0xff] }
 0x61d   :  { %13381 = vmatprep.subr.bf16.mxu1 %v16113_v31  ;;  %v7685_v31 = vld [vmem:[#allocation11 + $0x1c88] sm:$0xff]  ;;  %v16153_v35 = vcombine.high %v7740_v47, %v7744_v54  ;;  %v16152_v29 = vcombine.low %v7740_v47, %v7744_v54 }
 0x61e   :  { %13685 = vmatpush1.bf16.msra.mxu0 %v16050_v1  ;;  %v7689_v1 = vld [vmem:[#allocation11 + $0x1ca8] sm:$0xff] }
 0x61f   :  { %13686 = vmatprep.subr.bf16.mxu0 %v16059_v34  ;;  %v7748_v34 = vld [vmem:[#allocation11 + $0x1e80] sm:$0xff]  ;;  %v16099_v39 = vcombine.high %v7685_v31, %v7689_v1  ;;  %v16098_v24 = vcombine.low %v7685_v31, %v7689_v1 }
 0x620   :  { %13382 = vmatpush1.bf16.msra.mxu1 %v16112_v57  ;;  %v7752_v57 = vld [vmem:[#allocation11 + $0x1ea0] sm:$0xff] }
 0x621   :  { %13383 = vmatprep.subr.bf16.mxu1 %v16121_v43  ;;  %v7693_v43 = vld [vmem:[#allocation11 + $0x1cc8] sm:$0xff]  ;;  %v16161_v44 = vcombine.high %v7748_v34, %v7752_v57  ;;  %v16160_v51 = vcombine.low %v7748_v34, %v7752_v57 }
 0x622   :  { %13687 = vmatpush1.bf16.msra.mxu0 %v16058_v17  ;;  %v7697_v17 = vld [vmem:[#allocation11 + $0x1ce8] sm:$0xff] }
 0x623   :  { %13688 = vmatprep.subr.bf16.mxu0 %v16067_v53  ;;  %v7756_v53 = vld [vmem:[#allocation11 + $0x1ec0] sm:$0xff]  ;;  %v16107_v46 = vcombine.high %v7693_v43, %v7697_v17  ;;  %v16106_v4 = vcombine.low %v7693_v43, %v7697_v17 }
 0x624   :  { %13384 = vmatpush1.bf16.msra.mxu1 %v16120_v50  ;;  %v7760_v50 = vld [vmem:[#allocation11 + $0x1ee0] sm:$0xff] }
 0x625   :  { %13385 = vmatprep.subr.bf16.mxu1 %v16129_v22  ;;  %v7701_v22 = vld [vmem:[#allocation11 + $0x1d08] sm:$0xff]  ;;  %v16169_v12 = vcombine.high %v7756_v53, %v7760_v50  ;;  %v16168_v11 = vcombine.low %v7756_v53, %v7760_v50 }
 0x626   :  { %13689 = vmatpush1.bf16.msra.mxu0 %v16066_v18  ;;  %v7705_v18 = vld [vmem:[#allocation11 + $0x1d28] sm:$0xff] }
 0x627   :  { %13690 = vmatprep.subr.bf16.mxu0 %v16075_v55  ;;  %v7764_v55 = vld [vmem:[#allocation11 + $0x1f00] sm:$0xff]  ;;  %v16115_v23 = vcombine.high %v7701_v22, %v7705_v18  ;;  %v16114_v6 = vcombine.low %v7701_v22, %v7705_v18 }
 0x628   :  { %13386 = vmatpush1.bf16.msra.mxu1 %v16128_v45  ;;  %v7768_v45 = vld [vmem:[#allocation11 + $0x1f20] sm:$0xff] }
 0x629   :  { %13387 = vmatprep.subr.bf16.mxu1 %v16137_v40  ;;  %v7709_v40 = vld [vmem:[#allocation11 + $0x1d48] sm:$0xff]  ;;  %v16177_v2 = vcombine.high %v7764_v55, %v7768_v45  ;;  %v16176_v41 = vcombine.low %v7764_v55, %v7768_v45 }
 0x62a   :  { %13691 = vmatpush1.bf16.msra.mxu0 %v16074_v30  ;;  %v7713_v30 = vld [vmem:[#allocation11 + $0x1d68] sm:$0xff] }
 0x62b   :  { %13701 = vmatprep.subr.bf16.mxu0 %v16083_v36  ;;  %v7772_v36 = vld [vmem:[#allocation11 + $0x1f40] sm:$0xff]  ;;  %v16123_v58 = vcombine.high %v7709_v40, %v7713_v30  ;;  %v16122_v54 = vcombine.low %v7709_v40, %v7713_v30 }
 0x62c   :  { %13388 = vmatpush1.bf16.msra.mxu1 %v16136_v52  ;;  %v7776_v52 = vld [vmem:[#allocation11 + $0x1f60] sm:$0xff] }
 0x62d   :  { %13389 = vmatprep.subr.bf16.mxu1 %v16145_v10  ;;  %13693 = vmatmul.mubr.bf16.vlgmr.msra.gmra.mrb[12].mxu0 %v19170_v5  ;;  %v7717_v10 = vld [vmem:[#allocation11 + $0x1d88] sm:$0xff]  ;;  %v16185_v47 = vcombine.high %v7772_v36, %v7776_v52  ;;  %v16184_v1 = vcombine.low %v7772_v36, %v7776_v52  ;;  %v19182_v36 = vpack.c.b16 %v19011_v0, %v19011_v0 }
 0x62e   :  { %13702 = vmatpush1.bf16.msra.mxu0 %v16082_v21  ;;  %13733 = vmatprep.mubr.bf16.mxu0 %v19174_v20  ;;  %v7721_v21 = vld [vmem:[#allocation11 + $0x1da8] sm:$0xff] }
 0x62f   :  { %13703 = vmatprep.subr.bf16.mxu0 %v16091_v59  ;;  %v7780_v59 = vld [vmem:[#allocation11 + $0x1f80] sm:$0xff]  ;;  %v16131_v31 = vcombine.high %v7717_v10, %v7721_v21  ;;  %v16130_v57 = vcombine.low %v7717_v10, %v7721_v21  ;;  %v6794_v10 = vld [vmem:[#allocation11 + $0xb0] sm:$0xff] }
 0x630   :  { %13390 = vmatpush1.bf16.msra.mxu1 %v16144_v32  ;;  %v7784_v32 = vld [vmem:[#allocation11 + $0x1fa0] sm:$0xff] }
 0x631   :  { %13391 = vmatprep.subr.bf16.mxu1 %v16153_v35  ;;  %v7725_v35 = vld [vmem:[#allocation11 + $0x1dc8] sm:$0xff]  ;;  %v16193_v34 = vcombine.high %v7780_v59, %v7784_v32  ;;  %v16192_v17 = vcombine.low %v7780_v59, %v7784_v32 }
 0x632   :  { %13704 = vmatpush1.bf16.msra.mxu0 %v16090_v15  ;;  %v7729_v15 = vld [vmem:[#allocation11 + $0x1de8] sm:$0xff] }
 0x633   :  { %13705 = vmatprep.subr.bf16.mxu0 %v16099_v39  ;;  %v7788_v39 = vld [vmem:[#allocation11 + $0x1fc0] sm:$0xff]  ;;  %v16139_v43 = vcombine.high %v7725_v35, %v7729_v15  ;;  %v16138_v50 = vcombine.low %v7725_v35, %v7729_v15  ;;  %v7761_v59 = vld [vmem:[#allocation11 + $0x1ee8] sm:$0xff] }
 0x634   :  { %13392 = vmatpush1.bf16.msra.mxu1 %v16152_v29  ;;  %v7792_v29 = vld [vmem:[#allocation11 + $0x1fe0] sm:$0xff] }
 0x635   :  { %13393 = vmatprep.subr.bf16.mxu1 %v16161_v44  ;;  %v7733_v44 = vld [vmem:[#allocation11 + $0x1e08] sm:$0xff]  ;;  %v16201_v53 = vcombine.high %v7788_v39, %v7792_v29  ;;  %v16200_v18 = vcombine.low %v7788_v39, %v7792_v29 }
 0x636   :  { %13706 = vmatpush1.bf16.msra.mxu0 %v16098_v24  ;;  %v7737_v24 = vld [vmem:[#allocation11 + $0x1e28] sm:$0xff] }
 0x637   :  { %13707 = vmatprep.subr.bf16.mxu0 %v16107_v46  ;;  %v6774_v46 = vld [vmem:[#allocation11 + $0x10] sm:$0xff]  ;;  %v16147_v22 = vcombine.high %v7733_v44, %v7737_v24  ;;  %v16146_v45 = vcombine.low %v7733_v44, %v7737_v24 }
 0x638   :  { %13394 = vmatpush1.bf16.msra.mxu1 %v16160_v51  ;;  %v6778_v51 = vld [vmem:[#allocation11 + $0x30] sm:$0xff] }
 0x639   :  { %13395 = vmatprep.subr.bf16.mxu1 %v16169_v12  ;;  %v7741_v12 = vld [vmem:[#allocation11 + $0x1e48] sm:$0xff]  ;;  %v15189_v55 = vcombine.high %v6774_v46, %v6778_v51  ;;  %v15188_v30 = vcombine.low %v6774_v46, %v6778_v51 }
 0x63a   :  { %13708 = vmatpush1.bf16.msra.mxu0 %v16106_v4  ;;  %v7745_v4 = vld [vmem:[#allocation11 + $0x1e68] sm:$0xff] }
 0x63b   :  { %13709 = vmatprep.subr.bf16.mxu0 %v16115_v23  ;;  %v6782_v23 = vld [vmem:[#allocation11 + $0x50] sm:$0xff]  ;;  %v16155_v40 = vcombine.high %v7741_v12, %v7745_v4 }
 0x63c   :  { %13396 = vmatpush1.bf16.msra.mxu1 %v16168_v11  ;;  %v6786_v11 = vld [vmem:[#allocation11 + $0x70] sm:$0xff] }
 0x63d   :  { %13397 = vmatprep.subr.bf16.mxu1 %v16177_v2  ;;  %v7749_v2 = vld [vmem:[#allocation11 + $0x1e88] sm:$0xff]  ;;  %v15197_v52 = vcombine.high %v6782_v23, %v6786_v11 }
 0x63e   :  { %13710 = vmatpush1.bf16.msra.mxu0 %v16114_v6  ;;  %v7753_v6 = vld [vmem:[#allocation11 + $0x1ea8] sm:$0xff] }
 0x63f   :  { %13711 = vmatprep.subr.bf16.mxu0 %v16123_v58  ;;  %v16154_v58 = vcombine.low %v7741_v12, %v7745_v4  ;;  %v16163_v21 = vcombine.high %v7749_v2, %v7753_v6  ;;  %v16162_v0 = vcombine.low %v7749_v2, %v7753_v6 }
 0x640   :  { %13398 = vmatpush1.bf16.msra.mxu1 %v16176_v41  ;;  %v6790_v41 = vld [vmem:[#allocation11 + $0x90] sm:$0xff] }
 0x641   :  { %13399 = vmatprep.subr.bf16.mxu1 %v16185_v47  ;;  %v15196_v47 = vcombine.low %v6782_v23, %v6786_v11  ;;  %v15205_v32 = vcombine.high %v6790_v41, %v6794_v10  ;;  %v15204_v15 = vcombine.low %v6790_v41, %v6794_v10 }
 0x642   :  { %13712 = vmatpush1.bf16.msra.mxu0 %v16122_v54  ;;  %v7757_v54 = vld [vmem:[#allocation11 + $0x1ec8] sm:$0xff] }
 0x643   :  { %13713 = vmatprep.subr.bf16.mxu0 %v16131_v31  ;;  %v6798_v31 = vld [vmem:[#allocation11 + $0xd0] sm:$0xff]  ;;  %v16171_v35 = vcombine.high %v7757_v54, %v7761_v59  ;;  %v16170_v29 = vcombine.low %v7757_v54, %v7761_v59 }
 0x644   :  { %13400 = vmatpush1.bf16.msra.mxu1 %v16184_v1  ;;  %v6802_v1 = vld [vmem:[#allocation11 + $0xf0] sm:$0xff] }
 0x645   :  { %13401 = vmatprep.subr.bf16.mxu1 %v16193_v34  ;;  %v7765_v34 = vld [vmem:[#allocation11 + $0x1f08] sm:$0xff]  ;;  %v15213_v39 = vcombine.high %v6798_v31, %v6802_v1  ;;  %v15212_v24 = vcombine.low %v6798_v31, %v6802_v1 }
 0x646   :  { %13714 = vmatpush1.bf16.msra.mxu0 %v16130_v57  ;;  %v7769_v57 = vld [vmem:[#allocation11 + $0x1f28] sm:$0xff] }
 0x647   :  { %13715 = vmatprep.subr.bf16.mxu0 %v16139_v43  ;;  %v6806_v43 = vld [vmem:[#allocation11 + $0x110] sm:$0xff]  ;;  %v16179_v44 = vcombine.high %v7765_v34, %v7769_v57  ;;  %v16178_v51 = vcombine.low %v7765_v34, %v7769_v57 }
 0x648   :  { %13402 = vmatpush1.bf16.msra.mxu1 %v16192_v17  ;;  %v6810_v17 = vld [vmem:[#allocation11 + $0x130] sm:$0xff] }
 0x649   :  { %13403 = vmatprep.subr.bf16.mxu1 %v16201_v53  ;;  %v7773_v53 = vld [vmem:[#allocation11 + $0x1f48] sm:$0xff]  ;;  %v15221_v46 = vcombine.high %v6806_v43, %v6810_v17  ;;  %v15220_v4 = vcombine.low %v6806_v43, %v6810_v17 }
 0x64a   :  { %13716 = vmatpush1.bf16.msra.mxu0 %v16138_v50  ;;  %v7777_v50 = vld [vmem:[#allocation11 + $0x1f68] sm:$0xff] }
 0x64b   :  { %13717 = vmatprep.subr.bf16.mxu0 %v16147_v22  ;;  %v6814_v22 = vld [vmem:[#allocation11 + $0x150] sm:$0xff]  ;;  %v16187_v12 = vcombine.high %v7773_v53, %v7777_v50  ;;  %v16186_v11 = vcombine.low %v7773_v53, %v7777_v50 }
 0x64c   :  { %13404 = vmatpush1.bf16.msra.mxu1 %v16200_v18  ;;  %v6818_v18 = vld [vmem:[#allocation11 + $0x170] sm:$0xff] }
 0x64d   :  { %13742 = vmatprep.subr.bf16.mxu1 %v15189_v55  ;;  %v7781_v55 = vld [vmem:[#allocation11 + $0x1f88] sm:$0xff]  ;;  %v15229_v23 = vcombine.high %v6814_v22, %v6818_v18  ;;  %v15228_v6 = vcombine.low %v6814_v22, %v6818_v18 }
 0x64e   :  { %13718 = vmatpush1.bf16.msra.mxu0 %v16146_v45  ;;  %v7785_v45 = vld [vmem:[#allocation11 + $0x1fa8] sm:$0xff] }
 0x64f   :  { %13406 = vmatmul.mubr.bf16.vlgmr.msra.gmra.mrb[16].mxu1 %v19182_v36  ;;  %13719 = vmatprep.subr.bf16.mxu0 %v16155_v40  ;;  %v6822_v40 = vld [vmem:[#allocation11 + $0x190] sm:$0xff]  ;;  %v16195_v2 = vcombine.high %v7781_v55, %v7785_v45  ;;  %v16194_v10 = vcombine.low %v7781_v55, %v7785_v45 }
 0x650   :  { %13743 = vmatpush1.bf16.msra.mxu1 %v15188_v30  ;;  %13774 = vmatprep.mubr.bf16.mxu1 %v19037_v9  ;;  %v6826_v30 = vld [vmem:[#allocation11 + $0x1b0] sm:$0xff] }
 0x651   :  { %13744 = vmatprep.subr.bf16.mxu1 %v15197_v52  ;;  %v7789_v52 = vld [vmem:[#allocation11 + $0x1fc8] sm:$0xff]  ;;  %v15237_v41 = vcombine.high %v6822_v40, %v6826_v30  ;;  %v15236_v59 = vcombine.low %v6822_v40, %v6826_v30 }
 0x652   :  { %13720 = vmatpush1.bf16.msra.mxu0 %v16154_v58  ;;  %v7793_v58 = vld [vmem:[#allocation11 + $0x1fe8] sm:$0xff] }
 0x653   :  { %13721 = vmatprep.subr.bf16.mxu0 %v16163_v21  ;;  %v6830_v21 = vld [vmem:[#allocation11 + $0x1d0] sm:$0xff]  ;;  %v16203_v54 = vcombine.high %v7789_v52, %v7793_v58  ;;  %v16202_v1 = vcombine.low %v7789_v52, %v7793_v58 }
 0x654   :  { %13745 = vmatpush1.bf16.msra.mxu1 %v15196_v47  ;;  %v6834_v47 = vld [vmem:[#allocation11 + $0x1f0] sm:$0xff] }
 0x655   :  { %13746 = vmatprep.subr.bf16.mxu1 %v15205_v32  ;;  %v6775_v32 = vld [vmem:[#allocation11 + $0x18] sm:$0xff]  ;;  %v15245_v31 = vcombine.high %v6830_v21, %v6834_v47  ;;  %v15244_v57 = vcombine.low %v6830_v21, %v6834_v47  ;;  %v6870_v47 = vld [vmem:[#allocation11 + $0x310] sm:$0xff] }
 0x656   :  { %13722 = vmatpush1.bf16.msra.mxu0 %v16162_v0  ;;  %v6779_v0 = vld [vmem:[#allocation11 + $0x38] sm:$0xff] }
 0x657   :  { %13723 = vmatprep.subr.bf16.mxu0 %v16171_v35  ;;  %v6838_v35 = vld [vmem:[#allocation11 + $0x210] sm:$0xff]  ;;  %v15191_v34 = vcombine.high %v6775_v32, %v6779_v0  ;;  %v15190_v17 = vcombine.low %v6775_v32, %v6779_v0  ;;  %v6815_v0 = vld [vmem:[#allocation11 + $0x158] sm:$0xff] }
 0x658   :  { %13747 = vmatpush1.bf16.msra.mxu1 %v15204_v15  ;;  %v6842_v15 = vld [vmem:[#allocation11 + $0x230] sm:$0xff] }
 0x659   :  { %13748 = vmatprep.subr.bf16.mxu1 %v15213_v39  ;;  %v6783_v39 = vld [vmem:[#allocation11 + $0x58] sm:$0xff]  ;;  %v15253_v43 = vcombine.high %v6838_v35, %v6842_v15  ;;  %v15252_v50 = vcombine.low %v6838_v35, %v6842_v15  ;;  %v6878_v15 = vld [vmem:[#allocation11 + $0x350] sm:$0xff] }
 0x65a   :  { %13724 = vmatpush1.bf16.msra.mxu0 %v16170_v29  ;;  %v6787_v29 = vld [vmem:[#allocation11 + $0x78] sm:$0xff] }
 0x65b   :  { %13725 = vmatprep.subr.bf16.mxu0 %v16179_v44  ;;  %v6846_v44 = vld [vmem:[#allocation11 + $0x250] sm:$0xff]  ;;  %v15199_v53 = vcombine.high %v6783_v39, %v6787_v29  ;;  %v15198_v18 = vcombine.low %v6783_v39, %v6787_v29  ;;  %v6823_v29 = vld [vmem:[#allocation11 + $0x198] sm:$0xff] }
 0x65c   :  { %13749 = vmatpush1.bf16.msra.mxu1 %v15212_v24  ;;  %v6850_v24 = vld [vmem:[#allocation11 + $0x270] sm:$0xff] }
 0x65d   :  { %13750 = vmatprep.subr.bf16.mxu1 %v15221_v46  ;;  %v6791_v46 = vld [vmem:[#allocation11 + $0x98] sm:$0xff]  ;;  %v15261_v22 = vcombine.high %v6846_v44, %v6850_v24  ;;  %v15260_v45 = vcombine.low %v6846_v44, %v6850_v24  ;;  %v6886_v24 = vld [vmem:[#allocation11 + $0x390] sm:$0xff] }
 0x65e   :  { %13726 = vmatpush1.bf16.msra.mxu0 %v16178_v51  ;;  %v6795_v51 = vld [vmem:[#allocation11 + $0xb8] sm:$0xff] }
 0x65f   :  { %13727 = vmatprep.subr.bf16.mxu0 %v16187_v12  ;;  %v6854_v12 = vld [vmem:[#allocation11 + $0x290] sm:$0xff]  ;;  %v15207_v55 = vcombine.high %v6791_v46, %v6795_v51  ;;  %v15206_v30 = vcombine.low %v6791_v46, %v6795_v51  ;;  %v6831_v51 = vld [vmem:[#allocation11 + $0x1d8] sm:$0xff] }
 0x660   :  { %13751 = vmatpush1.bf16.msra.mxu1 %v15220_v4  ;;  %v6858_v4 = vld [vmem:[#allocation11 + $0x2b0] sm:$0xff] }
 0x661   :  { %13752 = vmatprep.subr.bf16.mxu1 %v15229_v23  ;;  %v6799_v23 = vld [vmem:[#allocation11 + $0xd8] sm:$0xff]  ;;  %v15269_v40 = vcombine.high %v6854_v12, %v6858_v4  ;;  %v15268_v58 = vcombine.low %v6854_v12, %v6858_v4  ;;  %v6894_v4 = vld [vmem:[#allocation11 + $0x3d0] sm:$0xff] }
 0x662   :  { %13728 = vmatpush1.bf16.msra.mxu0 %v16186_v11  ;;  %v6803_v11 = vld [vmem:[#allocation11 + $0xf8] sm:$0xff] }
 0x663   :  { %13729 = vmatprep.subr.bf16.mxu0 %v16195_v2  ;;  %v6862_v2 = vld [vmem:[#allocation11 + $0x2d0] sm:$0xff]  ;;  %v15215_v52 = vcombine.high %v6799_v23, %v6803_v11  ;;  %v15214_v21 = vcombine.low %v6799_v23, %v6803_v11  ;;  %v6839_v11 = vld [vmem:[#allocation11 + $0x218] sm:$0xff] }
 0x664   :  { %13753 = vmatpush1.bf16.msra.mxu1 %v15228_v6  ;;  %v6866_v6 = vld [vmem:[#allocation11 + $0x2f0] sm:$0xff] }
 0x665   :  { %13754 = vmatprep.subr.bf16.mxu1 %v15237_v41  ;;  %v6811_v41 = vld [vmem:[#allocation11 + $0x138] sm:$0xff]  ;;  %v15276_v32 = vcombine.low %v6862_v2, %v6866_v6 }
 0x666   :  { %13730 = vmatpush1.bf16.msra.mxu0 %v16194_v10  ;;  %v15277_v10 = vcombine.high %v6862_v2, %v6866_v6  ;;  %v6902_v6 = vld [vmem:[#allocation11 + $0x410] sm:$0xff] }
 0x667   :  { %13731 = vmatprep.subr.bf16.mxu0 %v16203_v54  ;;  %v6874_v54 = vld [vmem:[#allocation11 + $0x330] sm:$0xff] }
 0x668   :  { %13755 = vmatpush1.bf16.msra.mxu1 %v15236_v59  ;;  %v15284_v39 = vcombine.low %v6870_v47, %v6874_v54 }
 0x669   :  { %13756 = vmatprep.subr.bf16.mxu1 %v15245_v31  ;;  %v6819_v31 = vld [vmem:[#allocation11 + $0x178] sm:$0xff] }
 0x66a   :  { %13732 = vmatpush1.bf16.msra.mxu0 %v16202_v1  ;;  %v15285_v1 = vcombine.high %v6870_v47, %v6874_v54  ;;  %v15230_v44 = vcombine.low %v6815_v0, %v6819_v31  ;;  %v6910_v54 = vld [vmem:[#allocation11 + $0x450] sm:$0xff] }
 0x66b   :  { %14070 = vmatprep.subr.bf16.mxu0 %v15191_v34  ;;  %v6882_v34 = vld [vmem:[#allocation11 + $0x370] sm:$0xff] }
 0x66c   :  { %13757 = vmatpush1.bf16.msra.mxu1 %v15244_v57  ;;  %v15231_v57 = vcombine.high %v6815_v0, %v6819_v31  ;;  %v15292_v46 = vcombine.low %v6878_v15, %v6882_v34  ;;  %v6855_v31 = vld [vmem:[#allocation11 + $0x298] sm:$0xff] }
 0x66d   :  { %13734 = vmatmul.mubr.bf16.vlgmr.msra.gmra.mrb[12].mxu0 %v19182_v36  ;;  %13758 = vmatprep.subr.bf16.mxu1 %v15253_v43  ;;  %v6827_v43 = vld [vmem:[#allocation11 + $0x1b8] sm:$0xff] }
 0x66e   :  { %14071 = vmatpush1.bf16.msra.mxu0 %v15190_v17  ;;  %14102 = vmatprep.mubr.bf16.mxu0 %v19037_v9  ;;  %v6807_v9 = vld [vmem:[#allocation11 + $0x118] sm:$0xff]  ;;  %v15293_v17 = vcombine.high %v6878_v15, %v6882_v34  ;;  %v15238_v12 = vcombine.low %v6823_v29, %v6827_v43  ;;  %v6918_v34 = vld [vmem:[#allocation11 + $0x490] sm:$0xff] }
 0x66f   :  { %14072 = vmatprep.subr.bf16.mxu0 %v15199_v53  ;;  %v15223_v59 = vcombine.high %v6807_v9, %v6811_v41  ;;  %v15222_v35 = vcombine.low %v6807_v9, %v6811_v41  ;;  %v6890_v53 = vld [vmem:[#allocation11 + $0x3b0] sm:$0xff]  ;;  %v6847_v41 = vld [vmem:[#allocation11 + $0x258] sm:$0xff] }
 0x670   :  { %13759 = vmatpush1.bf16.msra.mxu1 %v15252_v50  ;;  %v15239_v50 = vcombine.high %v6823_v29, %v6827_v43  ;;  %v15300_v23 = vcombine.low %v6886_v24, %v6890_v53  ;;  %v6863_v43 = vld [vmem:[#allocation11 + $0x2d8] sm:$0xff] }
 0x671   :  { %13760 = vmatprep.subr.bf16.mxu1 %v15261_v22  ;;  %v6835_v22 = vld [vmem:[#allocation11 + $0x1f8] sm:$0xff] }
 0x672   :  { %14073 = vmatpush1.bf16.msra.mxu0 %v15198_v18  ;;  %v15301_v18 = vcombine.high %v6886_v24, %v6890_v53  ;;  %v15246_v2 = vcombine.low %v6831_v51, %v6835_v22  ;;  %v6926_v53 = vld [vmem:[#allocation11 + $0x4d0] sm:$0xff] }
 0x673   :  { %14074 = vmatprep.subr.bf16.mxu0 %v15207_v55  ;;  %v6898_v55 = vld [vmem:[#allocation11 + $0x3f0] sm:$0xff] }
 0x674   :  { %13761 = vmatpush1.bf16.msra.mxu1 %v15260_v45  ;;  %v15247_v45 = vcombine.high %v6831_v51, %v6835_v22  ;;  %v15308_v9 = vcombine.low %v6894_v4, %v6898_v55  ;;  %v6871_v22 = vld [vmem:[#allocation11 + $0x318] sm:$0xff] }
 0x675   :  { %13762 = vmatprep.subr.bf16.mxu1 %v15269_v40  ;;  %v6843_v40 = vld [vmem:[#allocation11 + $0x238] sm:$0xff] }
 0x676   :  { %14075 = vmatpush1.bf16.msra.mxu0 %v15206_v30  ;;  %v15309_v30 = vcombine.high %v6894_v4, %v6898_v55  ;;  %v15254_v47 = vcombine.low %v6839_v11, %v6843_v40  ;;  %v6934_v55 = vld [vmem:[#allocation11 + $0x510] sm:$0xff] }
 0x677   :  { %14076 = vmatprep.subr.bf16.mxu0 %v15215_v52  ;;  %v6906_v52 = vld [vmem:[#allocation11 + $0x430] sm:$0xff] }
 0x678   :  { %13763 = vmatpush1.bf16.msra.mxu1 %v15268_v58  ;;  %v15255_v58 = vcombine.high %v6839_v11, %v6843_v40  ;;  %v15316_v0 = vcombine.low %v6902_v6, %v6906_v52  ;;  %v6879_v40 = vld [vmem:[#allocation11 + $0x358] sm:$0xff] }
 0x679   :  { %13764 = vmatprep.subr.bf16.mxu1 %v15277_v10  ;;  %v6851_v10 = vld [vmem:[#allocation11 + $0x278] sm:$0xff] }
 0x67a   :  { %14077 = vmatpush1.bf16.msra.mxu0 %v15214_v21  ;;  %v15317_v21 = vcombine.high %v6902_v6, %v6906_v52  ;;  %v15262_v15 = vcombine.low %v6847_v41, %v6851_v10  ;;  %v6942_v52 = vld [vmem:[#allocation11 + $0x550] sm:$0xff] }
 0x67b   :  { %14078 = vmatprep.subr.bf16.mxu0 %v15223_v59  ;;  %v6914_v59 = vld [vmem:[#allocation11 + $0x470] sm:$0xff] }
 0x67c   :  { %13765 = vmatpush1.bf16.msra.mxu1 %v15276_v32  ;;  %v15263_v32 = vcombine.high %v6847_v41, %v6851_v10  ;;  %v15324_v29 = vcombine.low %v6910_v54, %v6914_v59  ;;  %v6887_v10 = vld [vmem:[#allocation11 + $0x398] sm:$0xff] }
 0x67d   :  { %13766 = vmatprep.subr.bf16.mxu1 %v15285_v1  ;;  %v6859_v1 = vld [vmem:[#allocation11 + $0x2b8] sm:$0xff] }
 0x67e   :  { %14079 = vmatpush1.bf16.msra.mxu0 %v15222_v35  ;;  %v15325_v35 = vcombine.high %v6910_v54, %v6914_v59  ;;  %v15270_v24 = vcombine.low %v6855_v31, %v6859_v1  ;;  %v6950_v59 = vld [vmem:[#allocation11 + $0x590] sm:$0xff] }
 0x67f   :  { %14080 = vmatprep.subr.bf16.mxu0 %v15231_v57  ;;  %v6922_v57 = vld [vmem:[#allocation11 + $0x4b0] sm:$0xff] }
 0x680   :  { %13767 = vmatpush1.bf16.msra.mxu1 %v15284_v39  ;;  %v15271_v39 = vcombine.high %v6855_v31, %v6859_v1  ;;  %v15332_v51 = vcombine.low %v6918_v34, %v6922_v57  ;;  %v6895_v1 = vld [vmem:[#allocation11 + $0x3d8] sm:$0xff] }
 0x681   :  { %13768 = vmatprep.subr.bf16.mxu1 %v15293_v17  ;;  %v6867_v17 = vld [vmem:[#allocation11 + $0x2f8] sm:$0xff] }
 0x682   :  { %14081 = vmatpush1.bf16.msra.mxu0 %v15230_v44  ;;  %v15333_v44 = vcombine.high %v6918_v34, %v6922_v57  ;;  %v15278_v4 = vcombine.low %v6863_v43, %v6867_v17  ;;  %v6958_v57 = vld [vmem:[#allocation11 + $0x5d0] sm:$0xff] }
 0x683   :  { %14082 = vmatprep.subr.bf16.mxu0 %v15239_v50  ;;  %v6930_v50 = vld [vmem:[#allocation11 + $0x4f0] sm:$0xff] }
 0x684   :  { %13769 = vmatpush1.bf16.msra.mxu1 %v15292_v46  ;;  %v15279_v46 = vcombine.high %v6863_v43, %v6867_v17  ;;  %v15340_v11 = vcombine.low %v6926_v53, %v6930_v50  ;;  %v6903_v17 = vld [vmem:[#allocation11 + $0x418] sm:$0xff] }
 0x685   :  { %13770 = vmatprep.subr.bf16.mxu1 %v15301_v18  ;;  %v6875_v18 = vld [vmem:[#allocation11 + $0x338] sm:$0xff] }
 0x686   :  { %14083 = vmatpush1.bf16.msra.mxu0 %v15238_v12  ;;  %v15341_v12 = vcombine.high %v6926_v53, %v6930_v50  ;;  %v15286_v6 = vcombine.low %v6871_v22, %v6875_v18  ;;  %v6966_v50 = vld [vmem:[#allocation11 + $0x610] sm:$0xff] }
 0x687   :  { %14084 = vmatprep.subr.bf16.mxu0 %v15247_v45  ;;  %v6938_v45 = vld [vmem:[#allocation11 + $0x530] sm:$0xff] }
 0x688   :  { %13771 = vmatpush1.bf16.msra.mxu1 %v15300_v23  ;;  %v15287_v23 = vcombine.high %v6871_v22, %v6875_v18  ;;  %v15348_v41 = vcombine.low %v6934_v55, %v6938_v45  ;;  %v6911_v18 = vld [vmem:[#allocation11 + $0x458] sm:$0xff] }
 0x689   :  { %13772 = vmatprep.subr.bf16.mxu1 %v15309_v30  ;;  %v6883_v30 = vld [vmem:[#allocation11 + $0x378] sm:$0xff] }
 0x68a   :  { %14085 = vmatpush1.bf16.msra.mxu0 %v15246_v2  ;;  %v15349_v2 = vcombine.high %v6934_v55, %v6938_v45  ;;  %v15294_v54 = vcombine.low %v6879_v40, %v6883_v30  ;;  %v6974_v45 = vld [vmem:[#allocation11 + $0x650] sm:$0xff] }
 0x68b   :  { %14086 = vmatprep.subr.bf16.mxu0 %v15255_v58  ;;  %v6946_v58 = vld [vmem:[#allocation11 + $0x570] sm:$0xff] }
 0x68c   :  { %13773 = vmatpush1.bf16.msra.mxu1 %v15308_v9  ;;  %v15295_v9 = vcombine.high %v6879_v40, %v6883_v30  ;;  %v15356_v31 = vcombine.low %v6942_v52, %v6946_v58  ;;  %v6919_v30 = vld [vmem:[#allocation11 + $0x498] sm:$0xff] }
 0x68d   :  { %13783 = vmatprep.subr.bf16.mxu1 %v15317_v21  ;;  %v6891_v21 = vld [vmem:[#allocation11 + $0x3b8] sm:$0xff] }
 0x68e   :  { %14087 = vmatpush1.bf16.msra.mxu0 %v15254_v47  ;;  %v15357_v47 = vcombine.high %v6942_v52, %v6946_v58  ;;  %v15302_v34 = vcombine.low %v6887_v10, %v6891_v21  ;;  %v6982_v58 = vld [vmem:[#allocation11 + $0x690] sm:$0xff] }
 0x68f   :  { %13775 = vmatmul.mubr.bf16.vlgmr.msra.gmra.mrb[20].mxu1 %v19045_v48  ;;  %14088 = vmatprep.subr.bf16.mxu0 %v15263_v32  ;;  %v6954_v32 = vld [vmem:[#allocation11 + $0x5b0] sm:$0xff] }
 0x690   :  { %13784 = vmatpush1.bf16.msra.mxu1 %v15316_v0  ;;  %13815 = vmatprep.mubr.bf16.mxu1 %v19049_v13  ;;  %v15303_v0 = vcombine.high %v6887_v10, %v6891_v21  ;;  %v15364_v43 = vcombine.low %v6950_v59, %v6954_v32  ;;  %v6927_v21 = vld [vmem:[#allocation11 + $0x4d8] sm:$0xff] }
 0x691   :  { %13785 = vmatprep.subr.bf16.mxu1 %v15325_v35  ;;  %v6899_v35 = vld [vmem:[#allocation11 + $0x3f8] sm:$0xff] }
 0x692   :  { %14089 = vmatpush1.bf16.msra.mxu0 %v15262_v15  ;;  %v15365_v15 = vcombine.high %v6950_v59, %v6954_v32  ;;  %v15310_v53 = vcombine.low %v6895_v1, %v6899_v35  ;;  %v6990_v32 = vld [vmem:[#allocation11 + $0x6d0] sm:$0xff] }
 0x693   :  { %14090 = vmatprep.subr.bf16.mxu0 %v15271_v39  ;;  %v6962_v39 = vld [vmem:[#allocation11 + $0x5f0] sm:$0xff] }
 0x694   :  { %13786 = vmatpush1.bf16.msra.mxu1 %v15324_v29  ;;  %v15311_v29 = vcombine.high %v6895_v1, %v6899_v35  ;;  %v15372_v22 = vcombine.low %v6958_v57, %v6962_v39  ;;  %v6939_v1 = vld [vmem:[#allocation11 + $0x538] sm:$0xff] }
 0x695   :  { %13787 = vmatprep.subr.bf16.mxu1 %v15333_v44  ;;  %v6907_v44 = vld [vmem:[#allocation11 + $0x438] sm:$0xff] }
 0x696   :  { %14091 = vmatpush1.bf16.msra.mxu0 %v15270_v24  ;;  %v15373_v24 = vcombine.high %v6958_v57, %v6962_v39  ;;  %v15318_v55 = vcombine.low %v6903_v17, %v6907_v44  ;;  %v7002_v57 = vld [vmem:[#allocation11 + $0x730] sm:$0xff] }
 0x697   :  { %14092 = vmatprep.subr.bf16.mxu0 %v15279_v46  ;;  %v6970_v46 = vld [vmem:[#allocation11 + $0x630] sm:$0xff] }
 0x698   :  { %13788 = vmatpush1.bf16.msra.mxu1 %v15332_v51  ;;  %v15319_v51 = vcombine.high %v6903_v17, %v6907_v44  ;;  %v15380_v40 = vcombine.low %v6966_v50, %v6970_v46  ;;  %v6947_v17 = vld [vmem:[#allocation11 + $0x578] sm:$0xff] }
 0x699   :  { %13789 = vmatprep.subr.bf16.mxu1 %v15341_v12  ;;  %v6915_v12 = vld [vmem:[#allocation11 + $0x478] sm:$0xff] }
 0x69a   :  { %14093 = vmatpush1.bf16.msra.mxu0 %v15278_v4  ;;  %v15381_v4 = vcombine.high %v6966_v50, %v6970_v46  ;;  %v15326_v52 = vcombine.low %v6911_v18, %v6915_v12  ;;  %v7010_v50 = vld [vmem:[#allocation11 + $0x770] sm:$0xff] }
 0x69b   :  { %14094 = vmatprep.subr.bf16.mxu0 %v15287_v23  ;;  %v6978_v23 = vld [vmem:[#allocation11 + $0x670] sm:$0xff] }
 0x69c   :  { %13790 = vmatpush1.bf16.msra.mxu1 %v15340_v11  ;;  %v15327_v11 = vcombine.high %v6911_v18, %v6915_v12  ;;  %v15388_v10 = vcombine.low %v6974_v45, %v6978_v23  ;;  %v6955_v18 = vld [vmem:[#allocation11 + $0x5b8] sm:$0xff] }
 0x69d   :  { %13791 = vmatprep.subr.bf16.mxu1 %v15349_v2  ;;  %v6923_v2 = vld [vmem:[#allocation11 + $0x4b8] sm:$0xff] }
 0x69e   :  { %14095 = vmatpush1.bf16.msra.mxu0 %v15286_v6  ;;  %v15389_v6 = vcombine.high %v6974_v45, %v6978_v23  ;;  %v15334_v59 = vcombine.low %v6919_v30, %v6923_v2  ;;  %v7018_v45 = vld [vmem:[#allocation11 + $0x7b0] sm:$0xff] }
 0x69f   :  { %14096 = vmatprep.subr.bf16.mxu0 %v15295_v9  ;;  %v6986_v9 = vld [vmem:[#allocation11 + $0x6b0] sm:$0xff] }
 0x6a0   :  { %13792 = vmatpush1.bf16.msra.mxu1 %v15348_v41  ;;  %v15335_v41 = vcombine.high %v6919_v30, %v6923_v2  ;;  %v6963_v30 = vld [vmem:[#allocation11 + $0x5f8] sm:$0xff] }
 0x6a1   :  { %13793 = vmatprep.subr.bf16.mxu1 %v15357_v47  ;;  %v6931_v47 = vld [vmem:[#allocation11 + $0x4f8] sm:$0xff] }
 0x6a2   :  { %14097 = vmatpush1.bf16.msra.mxu0 %v15294_v54  ;;  %v15397_v54 = vcombine.high %v6982_v58, %v6986_v9 }
 0x6a3   :  { %14098 = vmatprep.subr.bf16.mxu0 %v15303_v0  ;;  %v6994_v0 = vld [vmem:[#allocation11 + $0x6f0] sm:$0xff] }
 0x6a4   :  { %13794 = vmatpush1.bf16.msra.mxu1 %v15356_v31  ;;  %v15396_v31 = vcombine.low %v6982_v58, %v6986_v9  ;;  %v15405_v35 = vcombine.high %v6990_v32, %v6994_v0  ;;  %v7026_v58 = vld [vmem:[#allocation11 + $0x7f0] sm:$0xff] }
 0x6a5   :  { %13795 = vmatprep.subr.bf16.mxu1 %v15365_v15  ;;  %v15342_v15 = vcombine.low %v6927_v21, %v6931_v47 }
 0x6a6   :  { %14099 = vmatpush1.bf16.msra.mxu0 %v15302_v34  ;;  %v6998_v34 = vld [vmem:[#allocation11 + $0x710] sm:$0xff] }
 0x6a7   :  { %14100 = vmatprep.subr.bf16.mxu0 %v15311_v29  ;;  %v15404_v29 = vcombine.low %v6990_v32, %v6994_v0  ;;  %v15413_v44 = vcombine.high %v6998_v34, %v7002_v57  ;;  %v7034_v32 = vld [vmem:[#allocation11 + $0x830] sm:$0xff] }
 0x6a8   :  { %13796 = vmatpush1.bf16.msra.mxu1 %v15364_v43  ;;  %v6943_v43 = vld [vmem:[#allocation11 + $0x558] sm:$0xff] }
 0x6a9   :  { %13797 = vmatprep.subr.bf16.mxu1 %v15373_v24  ;;  %v15359_v46 = vcombine.high %v6943_v43, %v6947_v17 }
 0x6aa   :  { %14101 = vmatpush1.bf16.msra.mxu0 %v15310_v53  ;;  %v7006_v53 = vld [vmem:[#allocation11 + $0x750] sm:$0xff] }
 0x6ab   :  { %14111 = vmatprep.subr.bf16.mxu0 %v15319_v51  ;;  %v15412_v51 = vcombine.low %v6998_v34, %v7002_v57  ;;  %v15421_v12 = vcombine.high %v7006_v53, %v7010_v50  ;;  %v7042_v34 = vld [vmem:[#allocation11 + $0x870] sm:$0xff] }
 0x6ac   :  { %13798 = vmatpush1.bf16.msra.mxu1 %v15372_v22  ;;  %v6951_v22 = vld [vmem:[#allocation11 + $0x598] sm:$0xff] }
 0x6ad   :  { %13799 = vmatprep.subr.bf16.mxu1 %v15381_v4  ;;  %14103 = vmatmul.mubr.bf16.vlgmr.msra.gmra.mrb[16].mxu0 %v19045_v48  ;;  %v15343_v48 = vcombine.high %v6927_v21, %v6931_v47  ;;  %v15358_v4 = vcombine.low %v6943_v43, %v6947_v17  ;;  %v15367_v23 = vcombine.high %v6951_v22, %v6955_v18  ;;  %v6971_v21 = vld [vmem:[#allocation11 + $0x638] sm:$0xff] }
 0x6ae   :  { %14112 = vmatpush1.bf16.msra.mxu0 %v15318_v55  ;;  %14143 = vmatprep.mubr.bf16.mxu0 %v19049_v13  ;;  %v6935_v13 = vld [vmem:[#allocation11 + $0x518] sm:$0xff]  ;;  %v7014_v55 = vld [vmem:[#allocation11 + $0x790] sm:$0xff] }
 0x6af   :  { %14113 = vmatprep.subr.bf16.mxu0 %v15327_v11  ;;  %v15351_v39 = vcombine.high %v6935_v13, %v6939_v1  ;;  %v15350_v24 = vcombine.low %v6935_v13, %v6939_v1  ;;  %v15420_v11 = vcombine.low %v7006_v53, %v7010_v50  ;;  %v15429_v2 = vcombine.high %v7014_v55, %v7018_v45  ;;  %v6979_v13 = vld [vmem:[#allocation11 + $0x678] sm:$0xff]  ;;  %v7050_v53 = vld [vmem:[#allocation11 + $0x8b0] sm:$0xff] }
 0x6b0   :  { %13800 = vmatpush1.bf16.msra.mxu1 %v15380_v40  ;;  %v6959_v40 = vld [vmem:[#allocation11 + $0x5d8] sm:$0xff] }
 0x6b1   :  { %13801 = vmatprep.subr.bf16.mxu1 %v15389_v6  ;;  %v15366_v6 = vcombine.low %v6951_v22, %v6955_v18  ;;  %v15375_v9 = vcombine.high %v6959_v40, %v6963_v30  ;;  %v6987_v43 = vld [vmem:[#allocation11 + $0x6b8] sm:$0xff] }
 0x6b2   :  { %14114 = vmatpush1.bf16.msra.mxu0 %v15326_v52  ;;  %v7022_v52 = vld [vmem:[#allocation11 + $0x7d0] sm:$0xff]  ;;  %v6995_v22 = vld [vmem:[#allocation11 + $0x6f8] sm:$0xff] }
 0x6b3   :  { %14115 = vmatprep.subr.bf16.mxu0 %v15335_v41  ;;  %v15428_v41 = vcombine.low %v7014_v55, %v7018_v45  ;;  %v15437_v47 = vcombine.high %v7022_v52, %v7026_v58  ;;  %v7058_v55 = vld [vmem:[#allocation11 + $0x8f0] sm:$0xff] }
 0x6b4   :  { %13802 = vmatpush1.bf16.msra.mxu1 %v15388_v10  ;;  %v6967_v10 = vld [vmem:[#allocation11 + $0x618] sm:$0xff] }
 0x6b5   :  { %13803 = vmatprep.subr.bf16.mxu1 %v15397_v54  ;;  %v15374_v54 = vcombine.low %v6959_v40, %v6963_v30  ;;  %v15383_v0 = vcombine.high %v6967_v10, %v6971_v21  ;;  %v7003_v40 = vld [vmem:[#allocation11 + $0x738] sm:$0xff] }
 0x6b6   :  { %14116 = vmatpush1.bf16.msra.mxu0 %v15334_v59  ;;  %v7030_v59 = vld [vmem:[#allocation11 + $0x810] sm:$0xff] }
 0x6b7   :  { %14117 = vmatprep.subr.bf16.mxu0 %v15343_v48  ;;  %v15436_v48 = vcombine.low %v7022_v52, %v7026_v58  ;;  %v15445_v1 = vcombine.high %v7030_v59, %v7034_v32  ;;  %v7066_v52 = vld [vmem:[#allocation11 + $0x930] sm:$0xff] }
 0x6b8   :  { %13804 = vmatpush1.bf16.msra.mxu1 %v15396_v31  ;;  %v6975_v31 = vld [vmem:[#allocation11 + $0x658] sm:$0xff] }
 0x6b9   :  { %13805 = vmatprep.subr.bf16.mxu1 %v15405_v35  ;;  %v15382_v35 = vcombine.low %v6967_v10, %v6971_v21  ;;  %v15391_v57 = vcombine.high %v6975_v31, %v6979_v13  ;;  %v7011_v10 = vld [vmem:[#allocation11 + $0x778] sm:$0xff] }
 0x6ba   :  { %14118 = vmatpush1.bf16.msra.mxu0 %v15342_v15  ;;  %v7038_v15 = vld [vmem:[#allocation11 + $0x850] sm:$0xff] }
 0x6bb   :  { %14119 = vmatprep.subr.bf16.mxu0 %v15351_v39  ;;  %v15444_v39 = vcombine.low %v7030_v59, %v7034_v32  ;;  %v15453_v17 = vcombine.high %v7038_v15, %v7042_v34  ;;  %v7074_v59 = vld [vmem:[#allocation11 + $0x970] sm:$0xff] }
 0x6bc   :  { %13806 = vmatpush1.bf16.msra.mxu1 %v15404_v29  ;;  %v6983_v29 = vld [vmem:[#allocation11 + $0x698] sm:$0xff] }
 0x6bd   :  { %13807 = vmatprep.subr.bf16.mxu1 %v15413_v44  ;;  %v15390_v44 = vcombine.low %v6975_v31, %v6979_v13  ;;  %v15399_v50 = vcombine.high %v6983_v29, %v6987_v43  ;;  %v7019_v31 = vld [vmem:[#allocation11 + $0x7b8] sm:$0xff] }
 0x6be   :  { %14120 = vmatpush1.bf16.msra.mxu0 %v15350_v24  ;;  %v7046_v24 = vld [vmem:[#allocation11 + $0x890] sm:$0xff] }
 0x6bf   :  { %14121 = vmatprep.subr.bf16.mxu0 %v15359_v46  ;;  %v15452_v46 = vcombine.low %v7038_v15, %v7042_v34  ;;  %v15461_v18 = vcombine.high %v7046_v24, %v7050_v53  ;;  %v7082_v15 = vld [vmem:[#allocation11 + $0x9b0] sm:$0xff] }
 0x6c0   :  { %13808 = vmatpush1.bf16.msra.mxu1 %v15412_v51  ;;  %v6991_v51 = vld [vmem:[#allocation11 + $0x6d8] sm:$0xff] }
 0x6c1   :  { %13809 = vmatprep.subr.bf16.mxu1 %v15421_v12  ;;  %v15398_v12 = vcombine.low %v6983_v29, %v6987_v43  ;;  %v15407_v45 = vcombine.high %v6991_v51, %v6995_v22  ;;  %v7027_v29 = vld [vmem:[#allocation11 + $0x7f8] sm:$0xff] }
 0x6c2   :  { %14122 = vmatpush1.bf16.msra.mxu0 %v15358_v4  ;;  %v7054_v4 = vld [vmem:[#allocation11 + $0x8d0] sm:$0xff] }
 0x6c3   :  { %14123 = vmatprep.subr.bf16.mxu0 %v15367_v23  ;;  %v15460_v23 = vcombine.low %v7046_v24, %v7050_v53  ;;  %v15469_v30 = vcombine.high %v7054_v4, %v7058_v55  ;;  %v7090_v24 = vld [vmem:[#allocation11 + $0x9f0] sm:$0xff] }
 0x6c4   :  { %13810 = vmatpush1.bf16.msra.mxu1 %v15420_v11  ;;  %v6999_v11 = vld [vmem:[#allocation11 + $0x718] sm:$0xff] }
 0x6c5   :  { %13811 = vmatprep.subr.bf16.mxu1 %v15429_v2  ;;  %v15406_v2 = vcombine.low %v6991_v51, %v6995_v22  ;;  %v15415_v58 = vcombine.high %v6999_v11, %v7003_v40  ;;  %v7035_v51 = vld [vmem:[#allocation11 + $0x838] sm:$0xff] }
 0x6c6   :  { %14124 = vmatpush1.bf16.msra.mxu0 %v15366_v6  ;;  %v7062_v6 = vld [vmem:[#allocation11 + $0x910] sm:$0xff] }
 0x6c7   :  { %14125 = vmatprep.subr.bf16.mxu0 %v15375_v9  ;;  %v15468_v9 = vcombine.low %v7054_v4, %v7058_v55  ;;  %v15477_v21 = vcombine.high %v7062_v6, %v7066_v52  ;;  %v7098_v4 = vld [vmem:[#allocation11 + $0xa30] sm:$0xff] }
 0x6c8   :  { %13812 = vmatpush1.bf16.msra.mxu1 %v15428_v41  ;;  %v7007_v41 = vld [vmem:[#allocation11 + $0x758] sm:$0xff] }
 0x6c9   :  { %13813 = vmatprep.subr.bf16.mxu1 %v15437_v47  ;;  %v15414_v47 = vcombine.low %v6999_v11, %v7003_v40  ;;  %v15423_v32 = vcombine.high %v7007_v41, %v7011_v10  ;;  %v7043_v11 = vld [vmem:[#allocation11 + $0x878] sm:$0xff] }
 0x6ca   :  { %14126 = vmatpush1.bf16.msra.mxu0 %v15374_v54  ;;  %v7070_v54 = vld [vmem:[#allocation11 + $0x950] sm:$0xff] }
 0x6cb   :  { %14127 = vmatprep.subr.bf16.mxu0 %v15383_v0  ;;  %v15476_v0 = vcombine.low %v7062_v6, %v7066_v52  ;;  %v15485_v13 = vcombine.high %v7070_v54, %v7074_v59  ;;  %v7106_v6 = vld [vmem:[#allocation11 + $0xa70] sm:$0xff] }
 0x6cc   :  { %13814 = vmatpush1.bf16.msra.mxu1 %v15436_v48  ;;  %v7015_v48 = vld [vmem:[#allocation11 + $0x798] sm:$0xff] }
 0x6cd   :  { %13824 = vmatprep.subr.bf16.mxu1 %v15445_v1  ;;  %v15422_v1 = vcombine.low %v7007_v41, %v7011_v10  ;;  %v15431_v34 = vcombine.high %v7015_v48, %v7019_v31  ;;  %v7051_v41 = vld [vmem:[#allocation11 + $0x8b8] sm:$0xff] }
 0x6ce   :  { %14128 = vmatpush1.bf16.msra.mxu0 %v15382_v35  ;;  %v7078_v35 = vld [vmem:[#allocation11 + $0x990] sm:$0xff] }
 0x6cf   :  { %13816 = vmatmul.mubr.bf16.vlgmr.msra.gmra.mrb[20].mxu1 %v19057_v38  ;;  %14129 = vmatprep.subr.bf16.mxu0 %v15391_v57  ;;  %v15484_v57 = vcombine.low %v7070_v54, %v7074_v59  ;;  %v15493_v43 = vcombine.high %v7078_v35, %v7082_v15  ;;  %v7114_v54 = vld [vmem:[#allocation11 + $0xab0] sm:$0xff] }
 0x6d0   :  { %13825 = vmatpush1.bf16.msra.mxu1 %v15444_v39  ;;  %13856 = vmatprep.mubr.bf16.mxu1 %v19061_v37  ;;  %v7023_v39 = vld [vmem:[#allocation11 + $0x7d8] sm:$0xff] }
 0x6d1   :  { %13826 = vmatprep.subr.bf16.mxu1 %v15453_v17  ;;  %v15430_v17 = vcombine.low %v7015_v48, %v7019_v31  ;;  %v15439_v53 = vcombine.high %v7023_v39, %v7027_v29  ;;  %v7059_v48 = vld [vmem:[#allocation11 + $0x8f8] sm:$0xff] }
 0x6d2   :  { %14130 = vmatpush1.bf16.msra.mxu0 %v15390_v44  ;;  %v7086_v44 = vld [vmem:[#allocation11 + $0x9d0] sm:$0xff] }
 0x6d3   :  { %14131 = vmatprep.subr.bf16.mxu0 %v15399_v50  ;;  %v15492_v50 = vcombine.low %v7078_v35, %v7082_v15  ;;  %v15501_v22 = vcombine.high %v7086_v44, %v7090_v24  ;;  %v7122_v35 = vld [vmem:[#allocation11 + $0xaf0] sm:$0xff] }
 0x6d4   :  { %13827 = vmatpush1.bf16.msra.mxu1 %v15452_v46  ;;  %v7031_v46 = vld [vmem:[#allocation11 + $0x818] sm:$0xff] }
 0x6d5   :  { %13828 = vmatprep.subr.bf16.mxu1 %v15461_v18  ;;  %v15438_v18 = vcombine.low %v7023_v39, %v7027_v29  ;;  %v15447_v55 = vcombine.high %v7031_v46, %v7035_v51  ;;  %v7126_v29 = vld [vmem:[#allocation11 + $0xb10] sm:$0xff] }
 0x6d6   :  { %14132 = vmatpush1.bf16.msra.mxu0 %v15398_v12  ;;  %v7094_v12 = vld [vmem:[#allocation11 + $0xa10] sm:$0xff] }
 0x6d7   :  { %14133 = vmatprep.subr.bf16.mxu0 %v15407_v45  ;;  %v15500_v45 = vcombine.low %v7086_v44, %v7090_v24  ;;  %v15509_v40 = vcombine.high %v7094_v12, %v7098_v4  ;;  %v7071_v24 = vld [vmem:[#allocation11 + $0x958] sm:$0xff] }
 0x6d8   :  { %13829 = vmatpush1.bf16.msra.mxu1 %v15460_v23  ;;  %v7039_v23 = vld [vmem:[#allocation11 + $0x858] sm:$0xff] }
 0x6d9   :  { %13830 = vmatprep.subr.bf16.mxu1 %v15469_v30  ;;  %v15446_v30 = vcombine.low %v7031_v46, %v7035_v51  ;;  %v15455_v52 = vcombine.high %v7039_v23, %v7043_v11  ;;  %v7134_v51 = vld [vmem:[#allocation11 + $0xb50] sm:$0xff] }
 0x6da   :  { %14134 = vmatpush1.bf16.msra.mxu0 %v15406_v2  ;;  %v7102_v2 = vld [vmem:[#allocation11 + $0xa50] sm:$0xff] }
 0x6db   :  { %14135 = vmatprep.subr.bf16.mxu0 %v15415_v58  ;;  %v15508_v58 = vcombine.low %v7094_v12, %v7098_v4  ;;  %v15517_v10 = vcombine.high %v7102_v2, %v7106_v6  ;;  %v7079_v4 = vld [vmem:[#allocation11 + $0x998] sm:$0xff] }
 0x6dc   :  { %13831 = vmatpush1.bf16.msra.mxu1 %v15468_v9  ;;  %v7047_v9 = vld [vmem:[#allocation11 + $0x898] sm:$0xff] }
 0x6dd   :  { %13832 = vmatprep.subr.bf16.mxu1 %v15477_v21  ;;  %v15454_v21 = vcombine.low %v7039_v23, %v7043_v11  ;;  %v15463_v59 = vcombine.high %v7047_v9, %v7051_v41  ;;  %v7142_v11 = vld [vmem:[#allocation11 + $0xb90] sm:$0xff] }
 0x6de   :  { %14136 = vmatpush1.bf16.msra.mxu0 %v15414_v47  ;;  %v7110_v47 = vld [vmem:[#allocation11 + $0xa90] sm:$0xff] }
 0x6df   :  { %14137 = vmatprep.subr.bf16.mxu0 %v15423_v32  ;;  %v15516_v32 = vcombine.low %v7102_v2, %v7106_v6  ;;  %v15525_v31 = vcombine.high %v7110_v47, %v7114_v54  ;;  %v15524_v15 = vcombine.low %v7110_v47, %v7114_v54  ;;  %v7087_v6 = vld [vmem:[#allocation11 + $0x9d8] sm:$0xff] }
 0x6e0   :  { %13833 = vmatpush1.bf16.msra.mxu1 %v15476_v0  ;;  %v7055_v0 = vld [vmem:[#allocation11 + $0x8d8] sm:$0xff] }
 0x6e1   :  { %13834 = vmatprep.subr.bf16.mxu1 %v15485_v13  ;;  %v15462_v13 = vcombine.low %v7047_v9, %v7051_v41  ;;  %v15470_v39 = vcombine.low %v7055_v0, %v7059_v48  ;;  %v7150_v41 = vld [vmem:[#allocation11 + $0xbd0] sm:$0xff]  ;;  %v7095_v54 = vld [vmem:[#allocation11 + $0xa18] sm:$0xff] }
 0x6e2   :  { %14138 = vmatpush1.bf16.msra.mxu0 %v15422_v1  ;;  %v7118_v1 = vld [vmem:[#allocation11 + $0xad0] sm:$0xff] }
 0x6e3   :  { %14139 = vmatprep.subr.bf16.mxu0 %v15431_v34  ;;  %v7067_v34 = vld [vmem:[#allocation11 + $0x938] sm:$0xff]  ;;  %v15532_v44 = vcombine.low %v7118_v1, %v7122_v35 }
 0x6e4   :  { %13835 = vmatpush1.bf16.msra.mxu1 %v15484_v57  ;;  %v15533_v57 = vcombine.high %v7118_v1, %v7122_v35  ;;  %v7103_v35 = vld [vmem:[#allocation11 + $0xa58] sm:$0xff] }
 0x6e5   :  { %13836 = vmatprep.subr.bf16.mxu1 %v15493_v43  ;;  %v7130_v43 = vld [vmem:[#allocation11 + $0xb30] sm:$0xff] }
 0x6e6   :  { %14140 = vmatpush1.bf16.msra.mxu0 %v15430_v17  ;;  %v15540_v12 = vcombine.low %v7126_v29, %v7130_v43 }
 0x6e7   :  { %14141 = vmatprep.subr.bf16.mxu0 %v15439_v53  ;;  %v7075_v53 = vld [vmem:[#allocation11 + $0x978] sm:$0xff] }
 0x6e8   :  { %13837 = vmatpush1.bf16.msra.mxu1 %v15492_v50  ;;  %v15541_v50 = vcombine.high %v7126_v29, %v7130_v43  ;;  %v15486_v23 = vcombine.low %v7071_v24, %v7075_v53  ;;  %v7111_v43 = vld [vmem:[#allocation11 + $0xa98] sm:$0xff] }
 0x6e9   :  { %13838 = vmatprep.subr.bf16.mxu1 %v15501_v22  ;;  %v7138_v22 = vld [vmem:[#allocation11 + $0xb70] sm:$0xff] }
 0x6ea   :  { %14142 = vmatpush1.bf16.msra.mxu0 %v15438_v18  ;;  %v15487_v18 = vcombine.high %v7071_v24, %v7075_v53  ;;  %v15548_v2 = vcombine.low %v7134_v51, %v7138_v22  ;;  %v7174_v53 = vld [vmem:[#allocation11 + $0xc90] sm:$0xff] }
 0x6eb   :  { %14152 = vmatprep.subr.bf16.mxu0 %v15447_v55  ;;  %v7083_v55 = vld [vmem:[#allocation11 + $0x9b8] sm:$0xff] }
 0x6ec   :  { %13839 = vmatpush1.bf16.msra.mxu1 %v15500_v45  ;;  %v15549_v45 = vcombine.high %v7134_v51, %v7138_v22  ;;  %v15494_v9 = vcombine.low %v7079_v4, %v7083_v55  ;;  %v7119_v22 = vld [vmem:[#allocation11 + $0xad8] sm:$0xff] }
 0x6ed   :  { %13840 = vmatprep.subr.bf16.mxu1 %v15509_v40  ;;  %14144 = vmatmul.mubr.bf16.vlgmr.msra.gmra.mrb[16].mxu0 %v19057_v38  ;;  %v15471_v38 = vcombine.high %v7055_v0, %v7059_v48  ;;  %v7146_v40 = vld [vmem:[#allocation11 + $0xbb0] sm:$0xff] }
 0x6ee   :  { %14153 = vmatpush1.bf16.msra.mxu0 %v15446_v30  ;;  %14184 = vmatprep.mubr.bf16.mxu0 %v19061_v37  ;;  %v7063_v37 = vld [vmem:[#allocation11 + $0x918] sm:$0xff]  ;;  %v15495_v30 = vcombine.high %v7079_v4, %v7083_v55  ;;  %v15556_v47 = vcombine.low %v7142_v11, %v7146_v40  ;;  %v7158_v48 = vld [vmem:[#allocation11 + $0xc10] sm:$0xff] }
 0x6ef   :  { %14154 = vmatprep.subr.bf16.mxu0 %v15455_v52  ;;  %v15479_v17 = vcombine.high %v7063_v37, %v7067_v34  ;;  %v15478_v46 = vcombine.low %v7063_v37, %v7067_v34  ;;  %v7091_v52 = vld [vmem:[#allocation11 + $0x9f8] sm:$0xff]  ;;  %v7166_v34 = vld [vmem:[#allocation11 + $0xc50] sm:$0xff] }
 0x6f0   :  { %13841 = vmatpush1.bf16.msra.mxu1 %v15508_v58  ;;  %v15557_v58 = vcombine.high %v7142_v11, %v7146_v40  ;;  %v15502_v0 = vcombine.low %v7087_v6, %v7091_v52  ;;  %v7182_v55 = vld [vmem:[#allocation11 + $0xcd0] sm:$0xff]  ;;  %v7127_v40 = vld [vmem:[#allocation11 + $0xb18] sm:$0xff] }
 0x6f1   :  { %13842 = vmatprep.subr.bf16.mxu1 %v15517_v10  ;;  %v7154_v10 = vld [vmem:[#allocation11 + $0xbf0] sm:$0xff] }
 0x6f2   :  { %14155 = vmatpush1.bf16.msra.mxu0 %v15454_v21  ;;  %v15503_v21 = vcombine.high %v7087_v6, %v7091_v52  ;;  %v15564_v1 = vcombine.low %v7150_v41, %v7154_v10  ;;  %v7190_v52 = vld [vmem:[#allocation11 + $0xd10] sm:$0xff] }
 0x6f3   :  { %14156 = vmatprep.subr.bf16.mxu0 %v15463_v59  ;;  %v7099_v59 = vld [vmem:[#allocation11 + $0xa38] sm:$0xff] }
 0x6f4   :  { %13843 = vmatpush1.bf16.msra.mxu1 %v15516_v32  ;;  %v15565_v32 = vcombine.high %v7150_v41, %v7154_v10  ;;  %v15510_v37 = vcombine.low %v7095_v54, %v7099_v59  ;;  %v7135_v10 = vld [vmem:[#allocation11 + $0xb58] sm:$0xff] }
 0x6f5   :  { %13844 = vmatprep.subr.bf16.mxu1 %v15525_v31  ;;  %v7162_v31 = vld [vmem:[#allocation11 + $0xc30] sm:$0xff] }
 0x6f6   :  { %14157 = vmatpush1.bf16.msra.mxu0 %v15462_v13  ;;  %v15511_v13 = vcombine.high %v7095_v54, %v7099_v59  ;;  %v15572_v29 = vcombine.low %v7158_v48, %v7162_v31  ;;  %v7198_v59 = vld [vmem:[#allocation11 + $0xd50] sm:$0xff] }
 0x6f7   :  { %14158 = vmatprep.subr.bf16.mxu0 %v15471_v38  ;;  %v7107_v38 = vld [vmem:[#allocation11 + $0xa78] sm:$0xff] }
 0x6f8   :  { %13845 = vmatpush1.bf16.msra.mxu1 %v15524_v15  ;;  %v15573_v15 = vcombine.high %v7158_v48, %v7162_v31  ;;  %v15518_v24 = vcombine.low %v7103_v35, %v7107_v38  ;;  %v19198_v31 = vld [vmem:[#allocation16] sm:$0xff] }
 0x6f9   :  { %13846 = vmatprep.subr.bf16.mxu1 %v15533_v57  ;;  %v7170_v57 = vld [vmem:[#allocation11 + $0xc70] sm:$0xff] }
 0x6fa   :  { %14159 = vmatpush1.bf16.msra.mxu0 %v15470_v39  ;;  %v15519_v39 = vcombine.high %v7103_v35, %v7107_v38  ;;  %v15580_v51 = vcombine.low %v7166_v34, %v7170_v57 }
 0x6fb   :  { %14160 = vmatprep.subr.bf16.mxu0 %v15479_v17  ;;  %v7115_v17 = vld [vmem:[#allocation11 + $0xab8] sm:$0xff] }
 0x6fc   :  { %13847 = vmatpush1.bf16.msra.mxu1 %v15532_v44  ;;  %v15581_v44 = vcombine.high %v7166_v34, %v7170_v57  ;;  %v15526_v4 = vcombine.low %v7111_v43, %v7115_v17  ;;  %v7801_v34 = vrot.slane %v19198_v31, %v19673_v8 }
 0x6fd   :  { %13848 = vmatprep.subr.bf16.mxu1 %v15541_v50  ;;  %v7178_v50 = vld [vmem:[#allocation11 + $0xcb0] sm:$0xff] }
 0x6fe   :  { %14161 = vmatpush1.bf16.msra.mxu0 %v15478_v46  ;;  %v15527_v46 = vcombine.high %v7111_v43, %v7115_v17  ;;  %v15588_v11 = vcombine.low %v7174_v53, %v7178_v50  ;;  %v7151_v43 = vld [vmem:[#allocation11 + $0xbd8] sm:$0xff] }
 0x6ff   :  { %14162 = vmatprep.subr.bf16.mxu0 %v15487_v18  ;;  %v7123_v18 = vld [vmem:[#allocation11 + $0xaf8] sm:$0xff] }
 0x700   :  { %13849 = vmatpush1.bf16.msra.mxu1 %v15540_v12  ;;  %v15589_v12 = vcombine.high %v7174_v53, %v7178_v50  ;;  %v15534_v6 = vcombine.low %v7119_v22, %v7123_v18  ;;  %v7155_v17 = vld [vmem:[#allocation11 + $0xbf8] sm:$0xff]  ;;  %v7214_v50 = vld [vmem:[#allocation11 + $0xdd0] sm:$0xff] }
 0x701   :  { %13850 = vmatprep.subr.bf16.mxu1 %v15549_v45  ;;  %v7186_v45 = vld [vmem:[#allocation11 + $0xcf0] sm:$0xff]  ;;  %v15567_v8 = vcombine.high %v7151_v43, %v7155_v17 }
 0x702   :  { %14163 = vmatpush1.bf16.msra.mxu0 %v15486_v23  ;;  %v15535_v23 = vcombine.high %v7119_v22, %v7123_v18  ;;  %v15596_v41 = vcombine.low %v7182_v55, %v7186_v45 }
 0x703   :  { %14164 = vmatprep.subr.bf16.mxu0 %v15495_v30  ;;  %v7131_v30 = vld [vmem:[#allocation11 + $0xb38] sm:$0xff] }
 0x704   :  { %13851 = vmatpush1.bf16.msra.mxu1 %v15548_v2  ;;  %v15597_v2 = vcombine.high %v7182_v55, %v7186_v45  ;;  %v15542_v54 = vcombine.low %v7127_v40, %v7131_v30  ;;  %v7163_v55 = vld [vmem:[#allocation11 + $0xc38] sm:$0xff] }
 0x705   :  { %13852 = vmatprep.subr.bf16.mxu1 %v15557_v58  ;;  %v7194_v58 = vld [vmem:[#allocation11 + $0xd30] sm:$0xff] }
 0x706   :  { %14165 = vmatpush1.bf16.msra.mxu0 %v15494_v9  ;;  %v15543_v9 = vcombine.high %v7127_v40, %v7131_v30  ;;  %v15604_v48 = vcombine.low %v7190_v52, %v7194_v58  ;;  %v15566_v40 = vcombine.low %v7151_v43, %v7155_v17  ;;  %v7222_v30 = vld [vmem:[#allocation11 + $0xe10] sm:$0xff] }
 0x707   :  { %14166 = vmatprep.subr.bf16.mxu0 %v15503_v21  ;;  %v7139_v21 = vld [vmem:[#allocation11 + $0xb78] sm:$0xff]  ;;  %v7250_v43 = vld [vmem:[#allocation11 + $0xef0] sm:$0xff] }
 0x708   :  { %13853 = vmatpush1.bf16.msra.mxu1 %v15556_v47  ;;  %v15605_v47 = vcombine.high %v7190_v52, %v7194_v58  ;;  %v15550_v38 = vcombine.low %v7135_v10, %v7139_v21  ;;  %v7167_v58 = vld [vmem:[#allocation11 + $0xc58] sm:$0xff] }
 0x709   :  { %13854 = vmatprep.subr.bf16.mxu1 %v15565_v32  ;;  %v7202_v32 = vld [vmem:[#allocation11 + $0xd70] sm:$0xff] }
 0x70a   :  { %14167 = vmatpush1.bf16.msra.mxu0 %v15502_v0  ;;  %v15551_v0 = vcombine.high %v7135_v10, %v7139_v21  ;;  %v15613_v35 = vcombine.high %v7198_v59, %v7202_v32  ;;  %v7230_v21 = vld [vmem:[#allocation11 + $0xe50] sm:$0xff] }
 0x70b   :  { %14168 = vmatprep.subr.bf16.mxu0 %v15511_v13  ;;  %v7143_v13 = vld [vmem:[#allocation11 + $0xb98] sm:$0xff] }
 0x70c   :  { %13855 = vmatpush1.bf16.msra.mxu1 %v15564_v1  ;;  %v7147_v1 = vld [vmem:[#allocation11 + $0xbb8] sm:$0xff] }
 0x70d   :  { %13865 = vmatprep.subr.bf16.mxu1 %v15573_v15  ;;  %v7206_v15 = vld [vmem:[#allocation11 + $0xd90] sm:$0xff]  ;;  %v15559_v57 = vcombine.high %v7143_v13, %v7147_v1  ;;  %v15558_v53 = vcombine.low %v7143_v13, %v7147_v1 }
 0x70e   :  { %14169 = vmatpush1.bf16.msra.mxu0 %v15510_v37  ;;  %v7210_v37 = vld [vmem:[#allocation11 + $0xdb0] sm:$0xff] }
 0x70f   :  { %13857 = vmatmul.mubr.bf16.vlgmr.msra.gmra.mrb[20].mxu1 %v19069_v60  ;;  %14170 = vmatprep.subr.bf16.mxu0 %v15519_v39  ;;  %v7805_v39 = vrot.slane %v19198_v31, %v19675_v33  ;;  %v15620_v33 = vcombine.low %v7206_v15, %v7210_v37  ;;  %v7238_v1 = vld [vmem:[#allocation11 + $0xe90] sm:$0xff] }
 0x710   :  { %13866 = vmatpush1.bf16.msra.mxu1 %v15572_v29  ;;  %13897 = vmatprep.mubr.bf16.mxu1 %v19073_v3  ;;  %v15612_v29 = vcombine.low %v7198_v59, %v7202_v32  ;;  %v7175_v32 = vld [vmem:[#allocation11 + $0xc98] sm:$0xff] }
 0x711   :  { %13867 = vmatprep.subr.bf16.mxu1 %v15581_v44  ;;  %v15621_v44 = vcombine.high %v7206_v15, %v7210_v37  ;;  %v7183_v37 = vld [vmem:[#allocation11 + $0xcd8] sm:$0xff] }
 0x712   :  { %14171 = vmatpush1.bf16.msra.mxu0 %v15518_v24 }
 0x713   :  { %14172 = vmatprep.subr.bf16.mxu0 %v15527_v46  ;;  %v7218_v46 = vld [vmem:[#allocation11 + $0xdf0] sm:$0xff] }
 0x714   :  { %13868 = vmatpush1.bf16.msra.mxu1 %v15580_v51  ;;  %v15628_v52 = vcombine.low %v7214_v50, %v7218_v46 }
 0x715   :  { %13869 = vmatprep.subr.bf16.mxu1 %v15589_v12 }
 0x716   :  { %14173 = vmatpush1.bf16.msra.mxu0 %v15526_v4  ;;  %v7159_v4 = vld [vmem:[#allocation11 + $0xc18] sm:$0xff] }
 0x717   :  { %14174 = vmatprep.subr.bf16.mxu0 %v15535_v23  ;;  %v15629_v23 = vcombine.high %v7214_v50, %v7218_v46  ;;  %v15574_v10 = vcombine.low %v7159_v4, %v7163_v55  ;;  %v7254_v50 = vld [vmem:[#allocation11 + $0xf10] sm:$0xff] }
 0x718   :  { %13870 = vmatpush1.bf16.msra.mxu1 %v15588_v11  ;;  %v7258_v46 = vld [vmem:[#allocation11 + $0xf30] sm:$0xff] }
 0x719   :  { %13871 = vmatprep.subr.bf16.mxu1 %v15597_v2  ;;  %v7226_v2 = vld [vmem:[#allocation11 + $0xe30] sm:$0xff] }
 0x71a   :  { %14175 = vmatpush1.bf16.msra.mxu0 %v15534_v6  ;;  %v15575_v6 = vcombine.high %v7159_v4, %v7163_v55  ;;  %v15636_v59 = vcombine.low %v7222_v30, %v7226_v2  ;;  %v15669_v4 = vcombine.high %v7254_v50, %v7258_v46 }
 0x71b   :  { %14176 = vmatprep.subr.bf16.mxu0 %v15543_v9  ;;  %v7171_v9 = vld [vmem:[#allocation11 + $0xc78] sm:$0xff] }
 0x71c   :  { %13872 = vmatpush1.bf16.msra.mxu1 %v15596_v41  ;;  %v15637_v41 = vcombine.high %v7222_v30, %v7226_v2  ;;  %v15582_v13 = vcombine.low %v7167_v58, %v7171_v9  ;;  %v15668_v30 = vcombine.low %v7254_v50, %v7258_v46  ;;  %v7207_v2 = vld [vmem:[#allocation11 + $0xd98] sm:$0xff] }
 0x71d   :  { %13873 = vmatprep.subr.bf16.mxu1 %v15605_v47  ;;  %v7234_v47 = vld [vmem:[#allocation11 + $0xe70] sm:$0xff] }
 0x71e   :  { %14177 = vmatpush1.bf16.msra.mxu0 %v15542_v54  ;;  %v15583_v54 = vcombine.high %v7167_v58, %v7171_v9  ;;  %v15644_v15 = vcombine.low %v7230_v21, %v7234_v47  ;;  %v7813_v9 = vrot.slane %v19198_v31, %v2436_v19  ;;  %v7282_v19 = vld [vmem:[#allocation11 + $0xff0] sm:$0xff] }
 0x71f   :  { %14178 = vmatprep.subr.bf16.mxu0 %v15551_v0  ;;  %v7179_v0 = vld [vmem:[#allocation11 + $0xcb8] sm:$0xff] }
 0x720   :  { %13874 = vmatpush1.bf16.msra.mxu1 %v15604_v48  ;;  %v15645_v48 = vcombine.high %v7230_v21, %v7234_v47  ;;  %v7274_v21 = vld [vmem:[#allocation11 + $0xfb0] sm:$0xff] }
 0x721   :  { %13875 = vmatprep.subr.bf16.mxu1 %v15613_v35  ;;  %v7242_v35 = vld [vmem:[#allocation11 + $0xeb0] sm:$0xff] }
 0x722   :  { %v13407_v24 = vpop.f32.mrb[16].mxu1  ;;  %14179 = vmatpush1.bf16.msra.mxu0 %v15550_v38  ;;  %v15591_v38 = vcombine.high %v7175_v32, %v7179_v0  ;;  %v15652_v17 = vcombine.low %v7238_v1, %v7242_v35 }
 0x723   :  { %v19204_v51 = vadd.f32 %v13407_v24, %v7801_v34  ;;  %v13409_v22 = vpop.f32.mrb[17].mxu1  ;;  %14180 = vmatprep.subr.bf16.mxu0 %v15559_v57  ;;  %v7187_v34 = vld [vmem:[#allocation11 + $0xcf8] sm:$0xff]  ;;  %v15653_v57 = vcombine.high %v7238_v1, %v7242_v35 }
 0x724   :  { %v19206_v18 = vadd.f32 %v13409_v22, %v7805_v39  ;;  %v13411_v12 = vpop.f32.mrb[18].mxu1  ;;  %13876 = vmatpush1.bf16.msra.mxu1 %v15612_v29  ;;  %v15590_v39 = vcombine.low %v7175_v32, %v7179_v0  ;;  %v7246_v29 = vld [vmem:[#allocation11 + $0xed0] sm:$0xff]  ;;  %v7215_v32 = vld [vmem:[#allocation11 + $0xdd8] sm:$0xff] }
 0x725   :  { %v13412_v45 = vpop.f32.mrb[19].mxu1  ;;  %13877 = vmatprep.subr.bf16.mxu1 %v15621_v44  ;;  %v7195_v44 = vld [vmem:[#allocation11 + $0xd38] sm:$0xff]  ;;  %v15661_v24 = vcombine.high %v7246_v29, %v7250_v43 }
 0x726   :  { %v14406_v11 = vcombine.low %v19204_v51, %v19206_v18  ;;  %14181 = vmatpush1.bf16.msra.mxu0 %v15558_v53  ;;  %v15598_v53 = vcombine.low %v7183_v37, %v7187_v34  ;;  %v7199_v12 = vld [vmem:[#allocation11 + $0xd58] sm:$0xff]  ;;  %v7262_v45 = vld [vmem:[#allocation11 + $0xf50] sm:$0xff] }
 0x727   :  { %14182 = vmatprep.subr.bf16.mxu0 %v15567_v8  ;;  %v15660_v8 = vcombine.low %v7246_v29, %v7250_v43  ;;  %v7219_v0 = vld [vmem:[#allocation11 + $0xdf8] sm:$0xff] }
 0x728   :  { %13878 = vmatpush1.bf16.msra.mxu1 %v15620_v33  ;;  %v7203_v33 = vld [vmem:[#allocation11 + $0xd78] sm:$0xff] }
 0x729   :  { %13879 = vmatprep.subr.bf16.mxu1 %v15629_v23  ;;  %v7266_v23 = vld [vmem:[#allocation11 + $0xf70] sm:$0xff]  ;;  %v7227_v29 = vld [vmem:[#allocation11 + $0xe38] sm:$0xff] }
 0x72a   :  { %14183 = vmatpush1.bf16.msra.mxu0 %v15566_v40  ;;  %v15615_v40 = vcombine.high %v7199_v12, %v7203_v33  ;;  %v15677_v58 = vcombine.high %v7262_v45, %v7266_v23  ;;  %v7231_v51 = vld [vmem:[#allocation11 + $0xe58] sm:$0xff] }
 0x72b   :  { %14193 = vmatprep.subr.bf16.mxu0 %v15575_v6  ;;  %v7211_v6 = vld [vmem:[#allocation11 + $0xdb8] sm:$0xff] }
 0x72c   :  { %13880 = vmatpush1.bf16.msra.mxu1 %v15628_v52  ;;  %v7809_v52 = vrot.slane %v19198_v31, %v19716_v26  ;;  %v15623_v47 = vcombine.high %v7207_v2, %v7211_v6  ;;  %v7235_v18 = vld [vmem:[#allocation11 + $0xe78] sm:$0xff] }
 0x72d   :  { %13881 = vmatprep.subr.bf16.mxu1 %v15637_v41  ;;  %14185 = vmatmul.mubr.bf16.vlgmr.msra.gmra.mrb[16].mxu0 %v19069_v60  ;;  %v15599_v60 = vcombine.high %v7183_v37, %v7187_v34  ;;  %v15614_v41 = vcombine.low %v7199_v12, %v7203_v33  ;;  %v15631_v37 = vcombine.high %v7215_v32, %v7219_v0  ;;  %v7294_v12 = vld [vmem:[#allocation11 + $0x1050] sm:$0xff] }
 0x72e   :  { %14194 = vmatpush1.bf16.msra.mxu0 %v15574_v10  ;;  %14225 = vmatprep.mubr.bf16.mxu0 %v19073_v3  ;;  %v7191_v3 = vld [vmem:[#allocation11 + $0xd18] sm:$0xff]  ;;  %v7270_v10 = vld [vmem:[#allocation11 + $0xf90] sm:$0xff] }
 0x72f   :  { %14195 = vmatprep.subr.bf16.mxu0 %v15583_v54  ;;  %v15607_v22 = vcombine.high %v7191_v3, %v7195_v44  ;;  %v15606_v55 = vcombine.low %v7191_v3, %v7195_v44  ;;  %v15685_v26 = vcombine.high %v7270_v10, %v7274_v21  ;;  %v15630_v3 = vcombine.low %v7215_v32, %v7219_v0  ;;  %v7286_v44 = vld [vmem:[#allocation11 + $0x1010] sm:$0xff]  ;;  %v7255_v0 = vld [vmem:[#allocation11 + $0xf18] sm:$0xff] }
 0x730   :  { %13882 = vmatpush1.bf16.msra.mxu1 %v15636_v59  ;;  %v15676_v59 = vcombine.low %v7262_v45, %v7266_v23  ;;  %v7298_v33 = vld [vmem:[#allocation11 + $0x1070] sm:$0xff]  ;;  %v7239_v45 = vld [vmem:[#allocation11 + $0xe98] sm:$0xff] }
 0x731   :  { %13883 = vmatprep.subr.bf16.mxu1 %v15645_v48  ;;  %v7243_v23 = vld [vmem:[#allocation11 + $0xeb8] sm:$0xff] }
 0x732   :  { %14196 = vmatpush1.bf16.msra.mxu0 %v15582_v13 }
 0x733   :  { %14197 = vmatprep.subr.bf16.mxu0 %v15591_v38  ;;  %v15622_v38 = vcombine.low %v7207_v2, %v7211_v6  ;;  %v7302_v2 = vld [vmem:[#allocation11 + $0x1090] sm:$0xff] }
 0x734   :  { %13884 = vmatpush1.bf16.msra.mxu1 %v15644_v15  ;;  %v7278_v15 = vld [vmem:[#allocation11 + $0xfd0] sm:$0xff] }
 0x735   :  { %13885 = vmatprep.subr.bf16.mxu1 %v15653_v57  ;;  %v15684_v57 = vcombine.low %v7270_v10, %v7274_v21  ;;  %v15693_v43 = vcombine.high %v7278_v15, %v7282_v19  ;;  %v7306_v6 = vld [vmem:[#allocation11 + $0x10b0] sm:$0xff]  ;;  %v15654_v21 = vcombine.low %v7239_v45, %v7243_v23 }
 0x736   :  { %14198 = vmatpush1.bf16.msra.mxu0 %v15590_v39  ;;  %v7223_v39 = vld [vmem:[#allocation11 + $0xe18] sm:$0xff]  ;;  %v15717_v10 = vcombine.high %v7302_v2, %v7306_v6  ;;  %v15716_v32 = vcombine.low %v7302_v2, %v7306_v6 }
 0x737   :  { %14199 = vmatprep.subr.bf16.mxu0 %v15599_v60  ;;  %v19221_v60 = vrot.slane %v14406_v11, %v18360_v63  ;;  %v7291_v2 = vld [vmem:[#allocation11 + $0x1038] sm:$0xff] }
 0x738   :  { %13886 = vmatpush1.bf16.msra.mxu1 %v15652_v17 }
 0x739   :  { %13887 = vmatprep.subr.bf16.mxu1 %v15661_v24  ;;  %v7290_v24 = vld [vmem:[#allocation11 + $0x1030] sm:$0xff] }
 0x73a   :  { %14200 = vmatpush1.bf16.msra.mxu0 %v15598_v53  ;;  %v15639_v53 = vcombine.high %v7223_v39, %v7227_v29  ;;  %v15701_v11 = vcombine.high %v7286_v44, %v7290_v24 }
 0x73b   :  { %14201 = vmatprep.subr.bf16.mxu0 %v15607_v22  ;;  %v15692_v22 = vcombine.low %v7278_v15, %v7282_v19  ;;  %v7263_v19 = vld [vmem:[#allocation11 + $0xf58] sm:$0xff] }
 0x73c   :  { %13888 = vmatpush1.bf16.msra.mxu1 %v15660_v8  ;;  %v15638_v8 = vcombine.low %v7223_v39, %v7227_v29  ;;  %v7330_v39 = vld [vmem:[#allocation11 + $0x1170] sm:$0xff] }
 0x73d   :  { %13889 = vmatprep.subr.bf16.mxu1 %v15669_v4  ;;  %v15647_v4 = vcombine.high %v7231_v51, %v7235_v18 }
 0x73e   :  { %14202 = vmatpush1.bf16.msra.mxu0 %v15606_v55  ;;  %v15700_v55 = vcombine.low %v7286_v44, %v7290_v24  ;;  %v7275_v44 = vld [vmem:[#allocation11 + $0xfb8] sm:$0xff] }
 0x73f   :  { %14203 = vmatprep.subr.bf16.mxu0 %v15615_v40  ;;  %v15709_v40 = vcombine.high %v7294_v12, %v7298_v33 }
 0x740   :  { %13890 = vmatpush1.bf16.msra.mxu1 %v15668_v30  ;;  %v13735_v54 = vpop.f32.mrb[12].mxu0  ;;  %v15646_v30 = vcombine.low %v7231_v51, %v7235_v18  ;;  %v7338_v51 = vld [vmem:[#allocation11 + $0x11b0] sm:$0xff] }
 0x741   :  { %v16264_v48 = vadd.f32 %v13735_v54, %v7809_v52  ;;  %v13737_v13 = vpop.f32.mrb[13].mxu0  ;;  %13891 = vmatprep.subr.bf16.mxu1 %v15677_v58  ;;  %v15655_v52 = vcombine.high %v7239_v45, %v7243_v23  ;;  %v15708_v58 = vcombine.low %v7294_v12, %v7298_v33  ;;  %v7314_v54 = vld [vmem:[#allocation11 + $0x10f0] sm:$0xff]  ;;  %v7283_v12 = vld [vmem:[#allocation11 + $0xff8] sm:$0xff] }
 0x742   :  { %v16265_v1 = vadd.f32 %v13737_v13, %v7813_v9  ;;  %v13739_v35 = vpop.f32.mrb[14].mxu0  ;;  %14204 = vmatpush1.bf16.msra.mxu0 %v15614_v41  ;;  %v7247_v9 = vld [vmem:[#allocation11 + $0xed8] sm:$0xff]  ;;  %v7346_v45 = vld [vmem:[#allocation11 + $0x11f0] sm:$0xff] }
 0x743   :  { %v13740_v31 = vpop.f32.mrb[15].mxu0  ;;  %14205 = vmatprep.subr.bf16.mxu0 %v15623_v47  ;;  %v7251_v41 = vld [vmem:[#allocation11 + $0xef8] sm:$0xff]  ;;  %v7310_v47 = vld [vmem:[#allocation11 + $0x10d0] sm:$0xff] }
 0x744   :  { %v14407_v34 = vcombine.low %v16264_v48, %v16265_v1  ;;  %13892 = vmatpush1.bf16.msra.mxu1 %v15676_v59  ;;  %v15663_v59 = vcombine.high %v7247_v9, %v7251_v41  ;;  %v7259_v48 = vld [vmem:[#allocation11 + $0xf38] sm:$0xff]  ;;  %v15725_v13 = vcombine.high %v7310_v47, %v7314_v54  ;;  %v7318_v1 = vld [vmem:[#allocation11 + $0x1110] sm:$0xff]  ;;  %v15724_v15 = vcombine.low %v7310_v47, %v7314_v54 }
 0x745   :  { %13893 = vmatprep.subr.bf16.mxu1 %v15685_v26  ;;  %v15662_v26 = vcombine.low %v7247_v9, %v7251_v41  ;;  %v7322_v35 = vld [vmem:[#allocation11 + $0x1130] sm:$0xff]  ;;  %v7267_v31 = vld [vmem:[#allocation11 + $0xf78] sm:$0xff] }
 0x746   :  { %v19224_v17 = vrot.slane %v14407_v34, %v18360_v63  ;;  %14206 = vmatpush1.bf16.msra.mxu0 %v15622_v38  ;;  %v15671_v38 = vcombine.high %v7255_v0, %v7259_v48  ;;  %v15670_v34 = vcombine.low %v7255_v0, %v7259_v48  ;;  %v15679_v29 = vcombine.high %v7263_v19, %v7267_v31  ;;  %v7354_v9 = vld [vmem:[#allocation11 + $0x1230] sm:$0xff]  ;;  %v7299_v47 = vld [vmem:[#allocation11 + $0x1078] sm:$0xff] }
 0x747   :  { %14207 = vmatprep.subr.bf16.mxu0 %v15631_v37  ;;  %v15733_v37 = vcombine.high %v7318_v1, %v7322_v35  ;;  %v7362_v0 = vld [vmem:[#allocation11 + $0x1270] sm:$0xff] }
 0x748   :  { %v14438_v50 = vcombine.low %v19221_v60, %v19224_v17  ;;  %v14439_v46 = vcombine.high %v19221_v60, %v19224_v17  ;;  %13894 = vmatpush1.bf16.msra.mxu1 %v15684_v57  ;;  %v7326_v57 = vld [vmem:[#allocation11 + $0x1150] sm:$0xff] }
 0x749   :  { %13895 = vmatprep.subr.bf16.mxu1 %v15693_v43  ;;  %v15732_v43 = vcombine.low %v7318_v1, %v7322_v35  ;;  %v15741_v24 = vcombine.high %v7326_v57, %v7330_v39  ;;  %v7307_v1 = vld [vmem:[#allocation11 + $0x10b8] sm:$0xff] }
 0x74a   :  { %14208 = vmatpush1.bf16.msra.mxu0 %v15630_v3  ;;  %v7271_v3 = vld [vmem:[#allocation11 + $0xf98] sm:$0xff] }
 0x74b   :  { %14209 = vmatprep.subr.bf16.mxu0 %v15639_v53  ;;  %v15678_v53 = vcombine.low %v7263_v19, %v7267_v31  ;;  %v15687_v18 = vcombine.high %v7271_v3, %v7275_v44  ;;  %v7370_v19 = vld [vmem:[#allocation11 + $0x12b0] sm:$0xff] }
 0x74c   :  { %13896 = vmatpush1.bf16.msra.mxu1 %v15692_v22  ;;  %v7334_v22 = vld [vmem:[#allocation11 + $0x1190] sm:$0xff] }
 0x74d   :  { %13906 = vmatprep.subr.bf16.mxu1 %v15701_v11  ;;  %v15740_v11 = vcombine.low %v7326_v57, %v7330_v39  ;;  %v15749_v33 = vcombine.high %v7334_v22, %v7338_v51  ;;  %v7315_v57 = vld [vmem:[#allocation11 + $0x10f8] sm:$0xff] }
 0x74e   :  { %14210 = vmatpush1.bf16.msra.mxu0 %v15638_v8  ;;  %v7279_v8 = vld [vmem:[#allocation11 + $0xfd8] sm:$0xff] }
 0x74f   :  { %13898 = vmatmul.mubr.bf16.vlgmr.msra.gmra.mrb[20].mxu1 %v19118_v25  ;;  %14211 = vmatprep.subr.bf16.mxu0 %v15647_v4  ;;  %v15686_v4 = vcombine.low %v7271_v3, %v7275_v44  ;;  %v15695_v23 = vcombine.high %v7279_v8, %v7283_v12  ;;  %v7378_v3 = vld [vmem:[#allocation11 + $0x12f0] sm:$0xff] }
 0x750   :  { %13907 = vmatpush1.bf16.msra.mxu1 %v15700_v55  ;;  %13938 = vmatprep.mubr.bf16.mxu1 %v19122_v16  ;;  %v7342_v55 = vld [vmem:[#allocation11 + $0x11d0] sm:$0xff] }
 0x751   :  { %13908 = vmatprep.subr.bf16.mxu1 %v15709_v40  ;;  %v15748_v40 = vcombine.low %v7334_v22, %v7338_v51  ;;  %v15757_v6 = vcombine.high %v7342_v55, %v7346_v45  ;;  %v7382_v51 = vld [vmem:[#allocation11 + $0x1310] sm:$0xff] }
 0x752   :  { %14212 = vmatpush1.bf16.msra.mxu0 %v15646_v30  ;;  %v7287_v30 = vld [vmem:[#allocation11 + $0x1018] sm:$0xff] }
 0x753   :  { %14213 = vmatprep.subr.bf16.mxu0 %v15655_v52  ;;  %v15694_v52 = vcombine.low %v7279_v8, %v7283_v12  ;;  %v15703_v41 = vcombine.high %v7287_v30, %v7291_v2  ;;  %v7327_v12 = vld [vmem:[#allocation11 + $0x1158] sm:$0xff] }
 0x754   :  { %13909 = vmatpush1.bf16.msra.mxu1 %v15708_v58  ;;  %v7350_v58 = vld [vmem:[#allocation11 + $0x1210] sm:$0xff] }
 0x755   :  { %13910 = vmatprep.subr.bf16.mxu1 %v15717_v10  ;;  %v15756_v10 = vcombine.low %v7342_v55, %v7346_v45  ;;  %v15765_v54 = vcombine.high %v7350_v58, %v7354_v9  ;;  %v7390_v45 = vld [vmem:[#allocation11 + $0x1350] sm:$0xff] }
 0x756   :  { %14214 = vmatpush1.bf16.msra.mxu0 %v15654_v21  ;;  %v7295_v21 = vld [vmem:[#allocation11 + $0x1058] sm:$0xff] }
 0x757   :  { %14215 = vmatprep.subr.bf16.mxu0 %v15663_v59  ;;  %v15702_v59 = vcombine.low %v7287_v30, %v7291_v2  ;;  %v15711_v48 = vcombine.high %v7295_v21, %v7299_v47  ;;  %v7335_v2 = vld [vmem:[#allocation11 + $0x1198] sm:$0xff] }
 0x758   :  { %13911 = vmatpush1.bf16.msra.mxu1 %v15716_v32  ;;  %v7358_v32 = vld [vmem:[#allocation11 + $0x1250] sm:$0xff] }
 0x759   :  { %13912 = vmatprep.subr.bf16.mxu1 %v15725_v13  ;;  %v15764_v13 = vcombine.low %v7350_v58, %v7354_v9  ;;  %v15773_v35 = vcombine.high %v7358_v32, %v7362_v0  ;;  %v7398_v9 = vld [vmem:[#allocation11 + $0x1390] sm:$0xff] }
 0x75a   :  { %14216 = vmatpush1.bf16.msra.mxu0 %v15662_v26  ;;  %v7303_v26 = vld [vmem:[#allocation11 + $0x1098] sm:$0xff] }
 0x75b   :  { %14217 = vmatprep.subr.bf16.mxu0 %v15671_v38  ;;  %v15710_v38 = vcombine.low %v7295_v21, %v7299_v47  ;;  %v15719_v31 = vcombine.high %v7303_v26, %v7307_v1  ;;  %v7343_v47 = vld [vmem:[#allocation11 + $0x11d8] sm:$0xff] }
 0x75c   :  { %13913 = vmatpush1.bf16.msra.mxu1 %v15724_v15  ;;  %v7366_v15 = vld [vmem:[#allocation11 + $0x1290] sm:$0xff] }
 0x75d   :  { %13914 = vmatprep.subr.bf16.mxu1 %v15733_v37  ;;  %v15772_v37 = vcombine.low %v7358_v32, %v7362_v0  ;;  %v15781_v39 = vcombine.high %v7366_v15, %v7370_v19  ;;  %v15780_v44 = vcombine.low %v7366_v15, %v7370_v19  ;;  %v7406_v0 = vld [vmem:[#allocation11 + $0x13d0] sm:$0xff] }
 0x75e   :  { %14218 = vmatpush1.bf16.msra.mxu0 %v15670_v34  ;;  %v7311_v34 = vld [vmem:[#allocation11 + $0x10d8] sm:$0xff]  ;;  %v7414_v19 = vld [vmem:[#allocation11 + $0x1410] sm:$0xff] }
 0x75f   :  { %14219 = vmatprep.subr.bf16.mxu0 %v15679_v29  ;;  %v15718_v29 = vcombine.low %v7303_v26, %v7307_v1  ;;  %v15726_v22 = vcombine.low %v7311_v34, %v7315_v57  ;;  %v7351_v1 = vld [vmem:[#allocation11 + $0x1218] sm:$0xff] }
 0x760   :  { %13915 = vmatpush1.bf16.msra.mxu1 %v15732_v43  ;;  %v7374_v43 = vld [vmem:[#allocation11 + $0x12d0] sm:$0xff] }
 0x761   :  { %13916 = vmatprep.subr.bf16.mxu1 %v15741_v24  ;;  %v7323_v24 = vld [vmem:[#allocation11 + $0x1138] sm:$0xff]  ;;  %v15788_v8 = vcombine.low %v7374_v43, %v7378_v3 }
 0x762   :  { %14220 = vmatpush1.bf16.msra.mxu0 %v15678_v53  ;;  %v15789_v53 = vcombine.high %v7374_v43, %v7378_v3  ;;  %v7422_v3 = vld [vmem:[#allocation11 + $0x1450] sm:$0xff] }
 0x763   :  { %14221 = vmatprep.subr.bf16.mxu0 %v15687_v18  ;;  %v7386_v18 = vld [vmem:[#allocation11 + $0x1330] sm:$0xff] }
 0x764   :  { %13917 = vmatpush1.bf16.msra.mxu1 %v15740_v11  ;;  %v15796_v30 = vcombine.low %v7382_v51, %v7386_v18 }
 0x765   :  { %13918 = vmatprep.subr.bf16.mxu1 %v15749_v33  ;;  %v7331_v33 = vld [vmem:[#allocation11 + $0x1178] sm:$0xff] }
 0x766   :  { %14222 = vmatpush1.bf16.msra.mxu0 %v15686_v4  ;;  %v15797_v4 = vcombine.high %v7382_v51, %v7386_v18  ;;  %v15742_v58 = vcombine.low %v7327_v12, %v7331_v33  ;;  %v7430_v18 = vld [vmem:[#allocation11 + $0x1490] sm:$0xff] }
 0x767   :  { %14223 = vmatprep.subr.bf16.mxu0 %v15695_v23  ;;  %v7394_v23 = vld [vmem:[#allocation11 + $0x1370] sm:$0xff] }
 0x768   :  { %13919 = vmatpush1.bf16.msra.mxu1 %v15748_v40  ;;  %v15743_v40 = vcombine.high %v7327_v12, %v7331_v33  ;;  %v15804_v21 = vcombine.low %v7390_v45, %v7394_v23  ;;  %v7375_v33 = vld [vmem:[#allocation11 + $0x12d8] sm:$0xff] }
 0x769   :  { %13920 = vmatprep.subr.bf16.mxu1 %v15757_v6  ;;  %v7339_v6 = vld [vmem:[#allocation11 + $0x11b8] sm:$0xff] }
 0x76a   :  { %14224 = vmatpush1.bf16.msra.mxu0 %v15694_v52  ;;  %v15805_v52 = vcombine.high %v7390_v45, %v7394_v23  ;;  %v15750_v32 = vcombine.low %v7335_v2, %v7339_v6  ;;  %v7438_v23 = vld [vmem:[#allocation11 + $0x14d0] sm:$0xff] }
 0x76b   :  { %14234 = vmatprep.subr.bf16.mxu0 %v15703_v41  ;;  %v7402_v41 = vld [vmem:[#allocation11 + $0x13b0] sm:$0xff] }
 0x76c   :  { %13921 = vmatpush1.bf16.msra.mxu1 %v15756_v10  ;;  %v15751_v10 = vcombine.high %v7335_v2, %v7339_v6  ;;  %v15812_v26 = vcombine.low %v7398_v9, %v7402_v41  ;;  %v7383_v6 = vld [vmem:[#allocation11 + $0x1318] sm:$0xff] }
 0x76d   :  { %13922 = vmatprep.subr.bf16.mxu1 %v15765_v54  ;;  %14226 = vmatmul.mubr.bf16.vlgmr.msra.gmra.mrb[16].mxu0 %v19118_v25  ;;  %v15727_v25 = vcombine.high %v7311_v34, %v7315_v57  ;;  %v7347_v54 = vld [vmem:[#allocation11 + $0x11f8] sm:$0xff] }
 0x76e   :  { %14235 = vmatpush1.bf16.msra.mxu0 %v15702_v59  ;;  %14266 = vmatprep.mubr.bf16.mxu0 %v19122_v16  ;;  %v7319_v16 = vld [vmem:[#allocation11 + $0x1118] sm:$0xff]  ;;  %v15813_v59 = vcombine.high %v7398_v9, %v7402_v41  ;;  %v15758_v15 = vcombine.low %v7343_v47, %v7347_v54  ;;  %v7446_v41 = vld [vmem:[#allocation11 + $0x1510] sm:$0xff] }
 0x76f   :  { %14236 = vmatprep.subr.bf16.mxu0 %v15711_v48  ;;  %v15735_v11 = vcombine.high %v7319_v16, %v7323_v24  ;;  %v15734_v55 = vcombine.low %v7319_v16, %v7323_v24  ;;  %v7410_v48 = vld [vmem:[#allocation11 + $0x13f0] sm:$0xff]  ;;  %v7359_v57 = vld [vmem:[#allocation11 + $0x1258] sm:$0xff] }
 0x770   :  { %13923 = vmatpush1.bf16.msra.mxu1 %v15764_v13  ;;  %v15759_v13 = vcombine.high %v7343_v47, %v7347_v54  ;;  %v15820_v34 = vcombine.low %v7406_v0, %v7410_v48  ;;  %v7367_v24 = vld [vmem:[#allocation11 + $0x1298] sm:$0xff] }
 0x771   :  { %13924 = vmatprep.subr.bf16.mxu1 %v15773_v35  ;;  %v7355_v35 = vld [vmem:[#allocation11 + $0x1238] sm:$0xff] }
 0x772   :  { %14237 = vmatpush1.bf16.msra.mxu0 %v15710_v38  ;;  %v15821_v38 = vcombine.high %v7406_v0, %v7410_v48  ;;  %v15766_v43 = vcombine.low %v7351_v1, %v7355_v35  ;;  %v7391_v54 = vld [vmem:[#allocation11 + $0x1358] sm:$0xff]  ;;  %v7454_v48 = vld [vmem:[#allocation11 + $0x1550] sm:$0xff] }
 0x773   :  { %14238 = vmatprep.subr.bf16.mxu0 %v15719_v31  ;;  %v7418_v31 = vld [vmem:[#allocation11 + $0x1430] sm:$0xff] }
 0x774   :  { %13925 = vmatpush1.bf16.msra.mxu1 %v15772_v37  ;;  %v15767_v37 = vcombine.high %v7351_v1, %v7355_v35  ;;  %v15828_v16 = vcombine.low %v7414_v19, %v7418_v31  ;;  %v7399_v35 = vld [vmem:[#allocation11 + $0x1398] sm:$0xff] }
 0x775   :  { %13926 = vmatprep.subr.bf16.mxu1 %v15781_v39  ;;  %v7363_v39 = vld [vmem:[#allocation11 + $0x1278] sm:$0xff] }
 0x776   :  { %14239 = vmatpush1.bf16.msra.mxu0 %v15718_v29  ;;  %v15829_v29 = vcombine.high %v7414_v19, %v7418_v31  ;;  %v15774_v51 = vcombine.low %v7359_v57, %v7363_v39  ;;  %v7462_v31 = vld [vmem:[#allocation11 + $0x1590] sm:$0xff] }
 0x777   :  { %14240 = vmatprep.subr.bf16.mxu0 %v15727_v25  ;;  %v7426_v25 = vld [vmem:[#allocation11 + $0x1470] sm:$0xff] }
 0x778   :  { %13927 = vmatpush1.bf16.msra.mxu1 %v15780_v44  ;;  %v15775_v44 = vcombine.high %v7359_v57, %v7363_v39  ;;  %v15836_v12 = vcombine.low %v7422_v3, %v7426_v25  ;;  %v7407_v39 = vld [vmem:[#allocation11 + $0x13d8] sm:$0xff] }
 0x779   :  { %13928 = vmatprep.subr.bf16.mxu1 %v15789_v53  ;;  %v7371_v53 = vld [vmem:[#allocation11 + $0x12b8] sm:$0xff] }
 0x77a   :  { %14241 = vmatpush1.bf16.msra.mxu0 %v15726_v22  ;;  %v15837_v22 = vcombine.high %v7422_v3, %v7426_v25  ;;  %v15782_v45 = vcombine.low %v7367_v24, %v7371_v53  ;;  %v7470_v25 = vld [vmem:[#allocation11 + $0x15d0] sm:$0xff] }
 0x77b   :  { %14242 = vmatprep.subr.bf16.mxu0 %v15735_v11  ;;  %v7434_v11 = vld [vmem:[#allocation11 + $0x14b0] sm:$0xff] }
 0x77c   :  { %13929 = vmatpush1.bf16.msra.mxu1 %v15788_v8  ;;  %v15783_v8 = vcombine.high %v7367_v24, %v7371_v53  ;;  %v15844_v2 = vcombine.low %v7430_v18, %v7434_v11  ;;  %v7415_v53 = vld [vmem:[#allocation11 + $0x1418] sm:$0xff] }
 0x77d   :  { %13930 = vmatprep.subr.bf16.mxu1 %v15797_v4  ;;  %v7379_v4 = vld [vmem:[#allocation11 + $0x12f8] sm:$0xff] }
 0x77e   :  { %14243 = vmatpush1.bf16.msra.mxu0 %v15734_v55  ;;  %v15845_v55 = vcombine.high %v7430_v18, %v7434_v11  ;;  %v15790_v9 = vcombine.low %v7375_v33, %v7379_v4  ;;  %v7478_v11 = vld [vmem:[#allocation11 + $0x1610] sm:$0xff] }
 0x77f   :  { %14244 = vmatprep.subr.bf16.mxu0 %v15743_v40  ;;  %v7442_v40 = vld [vmem:[#allocation11 + $0x14f0] sm:$0xff] }
 0x780   :  { %13931 = vmatpush1.bf16.msra.mxu1 %v15796_v30  ;;  %v15791_v30 = vcombine.high %v7375_v33, %v7379_v4  ;;  %v15852_v47 = vcombine.low %v7438_v23, %v7442_v40  ;;  %v7423_v4 = vld [vmem:[#allocation11 + $0x1458] sm:$0xff] }
 0x781   :  { %13932 = vmatprep.subr.bf16.mxu1 %v15805_v52  ;;  %v7387_v52 = vld [vmem:[#allocation11 + $0x1338] sm:$0xff] }
 0x782   :  { %14245 = vmatpush1.bf16.msra.mxu0 %v15742_v58  ;;  %v15853_v58 = vcombine.high %v7438_v23, %v7442_v40  ;;  %v15798_v0 = vcombine.low %v7383_v6, %v7387_v52  ;;  %v7486_v40 = vld [vmem:[#allocation11 + $0x1650] sm:$0xff] }
 0x783   :  { %14246 = vmatprep.subr.bf16.mxu0 %v15751_v10  ;;  %v7450_v10 = vld [vmem:[#allocation11 + $0x1530] sm:$0xff] }
 0x784   :  { %13933 = vmatpush1.bf16.msra.mxu1 %v15804_v21  ;;  %v15799_v21 = vcombine.high %v7383_v6, %v7387_v52  ;;  %v15860_v1 = vcombine.low %v7446_v41, %v7450_v10  ;;  %v7431_v52 = vld [vmem:[#allocation11 + $0x1498] sm:$0xff] }
 0x785   :  { %13934 = vmatprep.subr.bf16.mxu1 %v15813_v59  ;;  %v7395_v59 = vld [vmem:[#allocation11 + $0x1378] sm:$0xff] }
 0x786   :  { %14247 = vmatpush1.bf16.msra.mxu0 %v15750_v32  ;;  %v15861_v32 = vcombine.high %v7446_v41, %v7450_v10  ;;  %v15806_v19 = vcombine.low %v7391_v54, %v7395_v59  ;;  %v7494_v10 = vld [vmem:[#allocation11 + $0x1690] sm:$0xff] }
 0x787   :  { %14248 = vmatprep.subr.bf16.mxu0 %v15759_v13  ;;  %v7458_v13 = vld [vmem:[#allocation11 + $0x1570] sm:$0xff] }
 0x788   :  { %13935 = vmatpush1.bf16.msra.mxu1 %v15812_v26  ;;  %v15807_v26 = vcombine.high %v7391_v54, %v7395_v59  ;;  %v15868_v57 = vcombine.low %v7454_v48, %v7458_v13  ;;  %v7439_v59 = vld [vmem:[#allocation11 + $0x14d8] sm:$0xff] }
 0x789   :  { %13936 = vmatprep.subr.bf16.mxu1 %v15821_v38  ;;  %v7403_v38 = vld [vmem:[#allocation11 + $0x13b8] sm:$0xff] }
 0x78a   :  { %14249 = vmatpush1.bf16.msra.mxu0 %v15758_v15  ;;  %v15869_v15 = vcombine.high %v7454_v48, %v7458_v13  ;;  %v15814_v3 = vcombine.low %v7399_v35, %v7403_v38  ;;  %v7502_v13 = vld [vmem:[#allocation11 + $0x16d0] sm:$0xff] }
 0x78b   :  { %14250 = vmatprep.subr.bf16.mxu0 %v15767_v37  ;;  %v7466_v37 = vld [vmem:[#allocation11 + $0x15b0] sm:$0xff] }
 0x78c   :  { %13937 = vmatpush1.bf16.msra.mxu1 %v15820_v34  ;;  %v15815_v34 = vcombine.high %v7399_v35, %v7403_v38  ;;  %v15876_v24 = vcombine.low %v7462_v31, %v7466_v37  ;;  %v7451_v35 = vld [vmem:[#allocation11 + $0x1538] sm:$0xff] }
 0x78d   :  { %13947 = vmatprep.subr.bf16.mxu1 %v15829_v29  ;;  %v7411_v29 = vld [vmem:[#allocation11 + $0x13f8] sm:$0xff] }
 0x78e   :  { %14251 = vmatpush1.bf16.msra.mxu0 %v15766_v43  ;;  %v15877_v43 = vcombine.high %v7462_v31, %v7466_v37  ;;  %v15822_v18 = vcombine.low %v7407_v39, %v7411_v29  ;;  %v7514_v31 = vld [vmem:[#allocation11 + $0x1730] sm:$0xff] }
 0x78f   :  { %13939 = vmatmul.mubr.bf16.vlgmr.msra.gmra.mrb[20].mxu1 %v19146_v27  ;;  %14252 = vmatprep.subr.bf16.mxu0 %v15775_v44  ;;  %v7474_v44 = vld [vmem:[#allocation11 + $0x15f0] sm:$0xff] }
 0x790   :  { %13948 = vmatpush1.bf16.msra.mxu1 %v15828_v16  ;;  %13979 = vmatprep.mubr.bf16.mxu1 %v19150_v14  ;;  %v15823_v16 = vcombine.high %v7407_v39, %v7411_v29  ;;  %v15884_v33 = vcombine.low %v7470_v25, %v7474_v44  ;;  %v7459_v39 = vld [vmem:[#allocation11 + $0x1578] sm:$0xff] }
 0x791   :  { %13949 = vmatprep.subr.bf16.mxu1 %v15837_v22  ;;  %v7419_v22 = vld [vmem:[#allocation11 + $0x1438] sm:$0xff] }
 0x792   :  { %14253 = vmatpush1.bf16.msra.mxu0 %v15774_v51  ;;  %v15885_v51 = vcombine.high %v7470_v25, %v7474_v44  ;;  %v15830_v23 = vcombine.low %v7415_v53, %v7419_v22  ;;  %v7522_v25 = vld [vmem:[#allocation11 + $0x1770] sm:$0xff] }
 0x793   :  { %14254 = vmatprep.subr.bf16.mxu0 %v15783_v8  ;;  %v7482_v8 = vld [vmem:[#allocation11 + $0x1630] sm:$0xff] }
 0x794   :  { %13950 = vmatpush1.bf16.msra.mxu1 %v15836_v12  ;;  %v15831_v12 = vcombine.high %v7415_v53, %v7419_v22  ;;  %v15892_v6 = vcombine.low %v7478_v11, %v7482_v8  ;;  %v7467_v53 = vld [vmem:[#allocation11 + $0x15b8] sm:$0xff] }
 0x795   :  { %13951 = vmatprep.subr.bf16.mxu1 %v15845_v55  ;;  %v7427_v55 = vld [vmem:[#allocation11 + $0x1478] sm:$0xff] }
 0x796   :  { %14255 = vmatpush1.bf16.msra.mxu0 %v15782_v45  ;;  %v15893_v45 = vcombine.high %v7478_v11, %v7482_v8  ;;  %v15838_v41 = vcombine.low %v7423_v4, %v7427_v55  ;;  %v7530_v11 = vld [vmem:[#allocation11 + $0x17b0] sm:$0xff] }
 0x797   :  { %14256 = vmatprep.subr.bf16.mxu0 %v15791_v30  ;;  %v7490_v30 = vld [vmem:[#allocation11 + $0x1670] sm:$0xff] }
 0x798   :  { %13952 = vmatpush1.bf16.msra.mxu1 %v15844_v2  ;;  %v15839_v2 = vcombine.high %v7423_v4, %v7427_v55  ;;  %v15900_v54 = vcombine.low %v7486_v40, %v7490_v30  ;;  %v7475_v4 = vld [vmem:[#allocation11 + $0x15f8] sm:$0xff] }
 0x799   :  { %13953 = vmatprep.subr.bf16.mxu1 %v15853_v58  ;;  %v7435_v58 = vld [vmem:[#allocation11 + $0x14b8] sm:$0xff] }
 0x79a   :  { %14257 = vmatpush1.bf16.msra.mxu0 %v15790_v9  ;;  %v15901_v9 = vcombine.high %v7486_v40, %v7490_v30  ;;  %v15846_v48 = vcombine.low %v7431_v52, %v7435_v58  ;;  %v7538_v40 = vld [vmem:[#allocation11 + $0x17f0] sm:$0xff] }
 0x79b   :  { %14258 = vmatprep.subr.bf16.mxu0 %v15799_v21  ;;  %v7498_v21 = vld [vmem:[#allocation11 + $0x16b0] sm:$0xff] }
 0x79c   :  { %13954 = vmatpush1.bf16.msra.mxu1 %v15852_v47  ;;  %v15847_v47 = vcombine.high %v7431_v52, %v7435_v58  ;;  %v7483_v52 = vld [vmem:[#allocation11 + $0x1638] sm:$0xff] }
 0x79d   :  { %13955 = vmatprep.subr.bf16.mxu1 %v15861_v32  ;;  %v7443_v32 = vld [vmem:[#allocation11 + $0x14f8] sm:$0xff] }
 0x79e   :  { %14259 = vmatpush1.bf16.msra.mxu0 %v15798_v0  ;;  %v15909_v0 = vcombine.high %v7494_v10, %v7498_v21 }
 0x79f   :  { %14260 = vmatprep.subr.bf16.mxu0 %v15807_v26  ;;  %v7506_v26 = vld [vmem:[#allocation11 + $0x16f0] sm:$0xff] }
 0x7a0   :  { %13956 = vmatpush1.bf16.msra.mxu1 %v15860_v1  ;;  %v15908_v1 = vcombine.low %v7494_v10, %v7498_v21  ;;  %v15917_v38 = vcombine.high %v7502_v13, %v7506_v26  ;;  %v7546_v10 = vld [vmem:[#allocation11 + $0x1830] sm:$0xff] }
 0x7a1   :  { %13957 = vmatprep.subr.bf16.mxu1 %v15869_v15  ;;  %v15854_v15 = vcombine.low %v7439_v59, %v7443_v32 }
 0x7a2   :  { %14261 = vmatpush1.bf16.msra.mxu0 %v15806_v19  ;;  %v7510_v19 = vld [vmem:[#allocation11 + $0x1710] sm:$0xff] }
 0x7a3   :  { %14262 = vmatprep.subr.bf16.mxu0 %v15815_v34  ;;  %v15916_v34 = vcombine.low %v7502_v13, %v7506_v26  ;;  %v15925_v29 = vcombine.high %v7510_v19, %v7514_v31  ;;  %v7554_v13 = vld [vmem:[#allocation11 + $0x1870] sm:$0xff] }
 0x7a4   :  { %13958 = vmatpush1.bf16.msra.mxu1 %v15868_v57  ;;  %v7455_v57 = vld [vmem:[#allocation11 + $0x1558] sm:$0xff] }
 0x7a5   :  { %13959 = vmatprep.subr.bf16.mxu1 %v15877_v43  ;;  %v15871_v44 = vcombine.high %v7455_v57, %v7459_v39 }
 0x7a6   :  { %14263 = vmatpush1.bf16.msra.mxu0 %v15814_v3  ;;  %v7518_v3 = vld [vmem:[#allocation11 + $0x1750] sm:$0xff] }
 0x7a7   :  { %14264 = vmatprep.subr.bf16.mxu0 %v15823_v16  ;;  %v15924_v16 = vcombine.low %v7510_v19, %v7514_v31  ;;  %v15933_v22 = vcombine.high %v7518_v3, %v7522_v25  ;;  %v7562_v19 = vld [vmem:[#allocation11 + $0x18b0] sm:$0xff] }
 0x7a8   :  { %13960 = vmatpush1.bf16.msra.mxu1 %v15876_v24  ;;  %v7463_v24 = vld [vmem:[#allocation11 + $0x1598] sm:$0xff] }
 0x7a9   :  { %13961 = vmatprep.subr.bf16.mxu1 %v15885_v51  ;;  %v15870_v51 = vcombine.low %v7455_v57, %v7459_v39  ;;  %v15879_v8 = vcombine.high %v7463_v24, %v7467_v53  ;;  %v7507_v57 = vld [vmem:[#allocation11 + $0x16f8] sm:$0xff] }
 0x7aa   :  { %14265 = vmatpush1.bf16.msra.mxu0 %v15822_v18  ;;  %v7526_v18 = vld [vmem:[#allocation11 + $0x1790] sm:$0xff] }
 0x7ab   :  { %14275 = vmatprep.subr.bf16.mxu0 %v15831_v12  ;;  %v15932_v12 = vcombine.low %v7518_v3, %v7522_v25  ;;  %v15941_v55 = vcombine.high %v7526_v18, %v7530_v11  ;;  %v7570_v3 = vld [vmem:[#allocation11 + $0x18f0] sm:$0xff] }
 0x7ac   :  { %13962 = vmatpush1.bf16.msra.mxu1 %v15884_v33  ;;  %v7471_v33 = vld [vmem:[#allocation11 + $0x15d8] sm:$0xff] }
 0x7ad   :  { %13963 = vmatprep.subr.bf16.mxu1 %v15893_v45  ;;  %14267 = vmatmul.mubr.bf16.vlgmr.msra.gmra.mrb[16].mxu0 %v19146_v27  ;;  %v15855_v27 = vcombine.high %v7439_v59, %v7443_v32  ;;  %v15878_v45 = vcombine.low %v7463_v24, %v7467_v53  ;;  %v15887_v30 = vcombine.high %v7471_v33, %v7475_v4  ;;  %v7491_v59 = vld [vmem:[#allocation11 + $0x1678] sm:$0xff] }
 0x7ae   :  { %14276 = vmatpush1.bf16.msra.mxu0 %v15830_v23  ;;  %14307 = vmatprep.mubr.bf16.mxu0 %v19150_v14  ;;  %v7447_v14 = vld [vmem:[#allocation11 + $0x1518] sm:$0xff]  ;;  %v7534_v23 = vld [vmem:[#allocation11 + $0x17d0] sm:$0xff] }
 0x7af   :  { %14277 = vmatprep.subr.bf16.mxu0 %v15839_v2  ;;  %v15863_v37 = vcombine.high %v7447_v14, %v7451_v35  ;;  %v15862_v43 = vcombine.low %v7447_v14, %v7451_v35  ;;  %v15940_v2 = vcombine.low %v7526_v18, %v7530_v11  ;;  %v15949_v58 = vcombine.high %v7534_v23, %v7538_v40  ;;  %v7499_v14 = vld [vmem:[#allocation11 + $0x16b8] sm:$0xff]  ;;  %v7578_v18 = vld [vmem:[#allocation11 + $0x1930] sm:$0xff] }
 0x7b0   :  { %13964 = vmatpush1.bf16.msra.mxu1 %v15892_v6  ;;  %v7479_v6 = vld [vmem:[#allocation11 + $0x1618] sm:$0xff] }
 0x7b1   :  { %13965 = vmatprep.subr.bf16.mxu1 %v15901_v9  ;;  %v15886_v9 = vcombine.low %v7471_v33, %v7475_v4  ;;  %v15895_v21 = vcombine.high %v7479_v6, %v7483_v52  ;;  %v7515_v24 = vld [vmem:[#allocation11 + $0x1738] sm:$0xff] }
 0x7b2   :  { %14278 = vmatpush1.bf16.msra.mxu0 %v15838_v41  ;;  %v7542_v41 = vld [vmem:[#allocation11 + $0x1810] sm:$0xff]  ;;  %v7523_v33 = vld [vmem:[#allocation11 + $0x1778] sm:$0xff] }
 0x7b3   :  { %14279 = vmatprep.subr.bf16.mxu0 %v15847_v47  ;;  %v15948_v47 = vcombine.low %v7534_v23, %v7538_v40  ;;  %v15957_v32 = vcombine.high %v7542_v41, %v7546_v10  ;;  %v7586_v23 = vld [vmem:[#allocation11 + $0x1970] sm:$0xff] }
 0x7b4   :  { %13966 = vmatpush1.bf16.msra.mxu1 %v15900_v54  ;;  %v7487_v54 = vld [vmem:[#allocation11 + $0x1658] sm:$0xff] }
 0x7b5   :  { %13967 = vmatprep.subr.bf16.mxu1 %v15909_v0  ;;  %v15894_v0 = vcombine.low %v7479_v6, %v7483_v52  ;;  %v15903_v26 = vcombine.high %v7487_v54, %v7491_v59  ;;  %v7531_v6 = vld [vmem:[#allocation11 + $0x17b8] sm:$0xff] }
 0x7b6   :  { %14280 = vmatpush1.bf16.msra.mxu0 %v15846_v48  ;;  %v7550_v48 = vld [vmem:[#allocation11 + $0x1850] sm:$0xff] }
 0x7b7   :  { %14281 = vmatprep.subr.bf16.mxu0 %v15855_v27  ;;  %v15956_v27 = vcombine.low %v7542_v41, %v7546_v10  ;;  %v15965_v35 = vcombine.high %v7550_v48, %v7554_v13  ;;  %v7594_v41 = vld [vmem:[#allocation11 + $0x19b0] sm:$0xff] }
 0x7b8   :  { %13968 = vmatpush1.bf16.msra.mxu1 %v15908_v1  ;;  %v7495_v1 = vld [vmem:[#allocation11 + $0x1698] sm:$0xff] }
 0x7b9   :  { %13969 = vmatprep.subr.bf16.mxu1 %v15917_v38  ;;  %v15902_v38 = vcombine.low %v7487_v54, %v7491_v59  ;;  %v15911_v31 = vcombine.high %v7495_v1, %v7499_v14  ;;  %v7539_v54 = vld [vmem:[#allocation11 + $0x17f8] sm:$0xff] }
 0x7ba   :  { %14282 = vmatpush1.bf16.msra.mxu0 %v15854_v15  ;;  %v7558_v15 = vld [vmem:[#allocation11 + $0x1890] sm:$0xff] }
 0x7bb   :  { %14283 = vmatprep.subr.bf16.mxu0 %v15863_v37  ;;  %v15964_v37 = vcombine.low %v7550_v48, %v7554_v13  ;;  %v15973_v39 = vcombine.high %v7558_v15, %v7562_v19  ;;  %v7602_v48 = vld [vmem:[#allocation11 + $0x19f0] sm:$0xff] }
 0x7bc   :  { %13970 = vmatpush1.bf16.msra.mxu1 %v15916_v34  ;;  %v7503_v34 = vld [vmem:[#allocation11 + $0x16d8] sm:$0xff] }
 0x7bd   :  { %13971 = vmatprep.subr.bf16.mxu1 %v15925_v29  ;;  %v15910_v29 = vcombine.low %v7495_v1, %v7499_v14  ;;  %v15919_v25 = vcombine.high %v7503_v34, %v7507_v57  ;;  %v7547_v1 = vld [vmem:[#allocation11 + $0x1838] sm:$0xff] }
 0x7be   :  { %14284 = vmatpush1.bf16.msra.mxu0 %v15862_v43  ;;  %v7566_v43 = vld [vmem:[#allocation11 + $0x18d0] sm:$0xff] }
 0x7bf   :  { %14285 = vmatprep.subr.bf16.mxu0 %v15871_v44  ;;  %v15972_v44 = vcombine.low %v7558_v15, %v7562_v19  ;;  %v15981_v53 = vcombine.high %v7566_v43, %v7570_v3  ;;  %v7610_v15 = vld [vmem:[#allocation11 + $0x1a30] sm:$0xff] }
 0x7c0   :  { %13972 = vmatpush1.bf16.msra.mxu1 %v15924_v16  ;;  %v7511_v16 = vld [vmem:[#allocation11 + $0x1718] sm:$0xff] }
 0x7c1   :  { %13973 = vmatprep.subr.bf16.mxu1 %v15933_v22  ;;  %v15918_v22 = vcombine.low %v7503_v34, %v7507_v57  ;;  %v15927_v11 = vcombine.high %v7511_v16, %v7515_v24  ;;  %v7555_v34 = vld [vmem:[#allocation11 + $0x1878] sm:$0xff] }
 0x7c2   :  { %14286 = vmatpush1.bf16.msra.mxu0 %v15870_v51  ;;  %v7574_v51 = vld [vmem:[#allocation11 + $0x1910] sm:$0xff] }
 0x7c3   :  { %14287 = vmatprep.subr.bf16.mxu0 %v15879_v8  ;;  %v15980_v8 = vcombine.low %v7566_v43, %v7570_v3  ;;  %v15989_v4 = vcombine.high %v7574_v51, %v7578_v18  ;;  %v7618_v43 = vld [vmem:[#allocation11 + $0x1a70] sm:$0xff] }
 0x7c4   :  { %13974 = vmatpush1.bf16.msra.mxu1 %v15932_v12  ;;  %v7519_v12 = vld [vmem:[#allocation11 + $0x1758] sm:$0xff] }
 0x7c5   :  { %13975 = vmatprep.subr.bf16.mxu1 %v15941_v55  ;;  %v15926_v55 = vcombine.low %v7511_v16, %v7515_v24  ;;  %v15935_v40 = vcombine.high %v7519_v12, %v7523_v33  ;;  %v7563_v16 = vld [vmem:[#allocation11 + $0x18b8] sm:$0xff] }
 0x7c6   :  { %14288 = vmatpush1.bf16.msra.mxu0 %v15878_v45  ;;  %v7582_v45 = vld [vmem:[#allocation11 + $0x1950] sm:$0xff] }
 0x7c7   :  { %14289 = vmatprep.subr.bf16.mxu0 %v15887_v30  ;;  %v15988_v30 = vcombine.low %v7574_v51, %v7578_v18  ;;  %v15997_v52 = vcombine.high %v7582_v45, %v7586_v23  ;;  %v7626_v51 = vld [vmem:[#allocation11 + $0x1ab0] sm:$0xff] }
 0x7c8   :  { %13976 = vmatpush1.bf16.msra.mxu1 %v15940_v2  ;;  %v7527_v2 = vld [vmem:[#allocation11 + $0x1798] sm:$0xff] }
 0x7c9   :  { %13977 = vmatprep.subr.bf16.mxu1 %v15949_v58  ;;  %v15934_v58 = vcombine.low %v7519_v12, %v7523_v33  ;;  %v15943_v10 = vcombine.high %v7527_v2, %v7531_v6  ;;  %v7571_v12 = vld [vmem:[#allocation11 + $0x18f8] sm:$0xff] }
 0x7ca   :  { %14290 = vmatpush1.bf16.msra.mxu0 %v15886_v9  ;;  %v7590_v9 = vld [vmem:[#allocation11 + $0x1990] sm:$0xff] }
 0x7cb   :  { %14291 = vmatprep.subr.bf16.mxu0 %v15895_v21  ;;  %v15996_v21 = vcombine.low %v7582_v45, %v7586_v23  ;;  %v16005_v59 = vcombine.high %v7590_v9, %v7594_v41  ;;  %v7634_v45 = vld [vmem:[#allocation11 + $0x1af0] sm:$0xff] }
 0x7cc   :  { %13978 = vmatpush1.bf16.msra.mxu1 %v15948_v47  ;;  %v7535_v47 = vld [vmem:[#allocation11 + $0x17d8] sm:$0xff] }
 0x7cd   :  { %13988 = vmatprep.subr.bf16.mxu1 %v15957_v32  ;;  %v15942_v32 = vcombine.low %v7527_v2, %v7531_v6  ;;  %v15951_v13 = vcombine.high %v7535_v47, %v7539_v54  ;;  %v7638_v6 = vld [vmem:[#allocation11 + $0x1b10] sm:$0xff] }
 0x7ce   :  { %14292 = vmatpush1.bf16.msra.mxu0 %v15894_v0  ;;  %v7598_v0 = vld [vmem:[#allocation11 + $0x19d0] sm:$0xff] }
 0x7cf   :  { %13980 = vmatmul.mubr.bf16.vlgmr.msra.gmra.mrb[20].mxu1 %v19158_v62  ;;  %14293 = vmatprep.subr.bf16.mxu0 %v15903_v26  ;;  %v16004_v26 = vcombine.low %v7590_v9, %v7594_v41  ;;  %v16013_v14 = vcombine.high %v7598_v0, %v7602_v48  ;;  %v7583_v41 = vld [vmem:[#allocation11 + $0x1958] sm:$0xff] }
 0x7d0   :  { %13989 = vmatpush1.bf16.msra.mxu1 %v15956_v27  ;;  %14020 = vmatprep.mubr.bf16.mxu1 %v19162_v7  ;;  %v7543_v27 = vld [vmem:[#allocation11 + $0x1818] sm:$0xff] }
 0x7d1   :  { %13990 = vmatprep.subr.bf16.mxu1 %v15965_v35  ;;  %v15950_v35 = vcombine.low %v7535_v47, %v7539_v54  ;;  %v15959_v19 = vcombine.high %v7543_v27, %v7547_v1  ;;  %v7646_v54 = vld [vmem:[#allocation11 + $0x1b50] sm:$0xff] }
 0x7d2   :  { %14294 = vmatpush1.bf16.msra.mxu0 %v15902_v38  ;;  %v7606_v38 = vld [vmem:[#allocation11 + $0x1a10] sm:$0xff] }
 0x7d3   :  { %14295 = vmatprep.subr.bf16.mxu0 %v15911_v31  ;;  %v16012_v31 = vcombine.low %v7598_v0, %v7602_v48  ;;  %v16021_v57 = vcombine.high %v7606_v38, %v7610_v15  ;;  %v7591_v48 = vld [vmem:[#allocation11 + $0x1998] sm:$0xff] }
 0x7d4   :  { %13991 = vmatpush1.bf16.msra.mxu1 %v15964_v37  ;;  %v7551_v37 = vld [vmem:[#allocation11 + $0x1858] sm:$0xff] }
 0x7d5   :  { %13992 = vmatprep.subr.bf16.mxu1 %v15973_v39  ;;  %v15958_v39 = vcombine.low %v7543_v27, %v7547_v1  ;;  %v15967_v3 = vcombine.high %v7551_v37, %v7555_v34  ;;  %v7654_v1 = vld [vmem:[#allocation11 + $0x1b90] sm:$0xff] }
 0x7d6   :  { %14296 = vmatpush1.bf16.msra.mxu0 %v15910_v29  ;;  %v7614_v29 = vld [vmem:[#allocation11 + $0x1a50] sm:$0xff] }
 0x7d7   :  { %14297 = vmatprep.subr.bf16.mxu0 %v15919_v25  ;;  %v16020_v25 = vcombine.low %v7606_v38, %v7610_v15  ;;  %v16029_v24 = vcombine.high %v7614_v29, %v7618_v43  ;;  %v7599_v15 = vld [vmem:[#allocation11 + $0x19d8] sm:$0xff] }
 0x7d8   :  { %13993 = vmatpush1.bf16.msra.mxu1 %v15972_v44  ;;  %v7559_v44 = vld [vmem:[#allocation11 + $0x1898] sm:$0xff] }
 0x7d9   :  { %13994 = vmatprep.subr.bf16.mxu1 %v15981_v53  ;;  %v15966_v53 = vcombine.low %v7551_v37, %v7555_v34  ;;  %v15975_v18 = vcombine.high %v7559_v44, %v7563_v16  ;;  %v7662_v34 = vld [vmem:[#allocation11 + $0x1bd0] sm:$0xff] }
 0x7da   :  { %14298 = vmatpush1.bf16.msra.mxu0 %v15918_v22  ;;  %v7622_v22 = vld [vmem:[#allocation11 + $0x1a90] sm:$0xff] }
 0x7db   :  { %14299 = vmatprep.subr.bf16.mxu0 %v15927_v11  ;;  %v16028_v11 = vcombine.low %v7614_v29, %v7618_v43  ;;  %v16037_v33 = vcombine.high %v7622_v22, %v7626_v51  ;;  %v16036_v23 = vcombine.low %v7622_v22, %v7626_v51  ;;  %v7607_v43 = vld [vmem:[#allocation11 + $0x1a18] sm:$0xff] }
 0x7dc   :  { %13995 = vmatpush1.bf16.msra.mxu1 %v15980_v8  ;;  %v7567_v8 = vld [vmem:[#allocation11 + $0x18d8] sm:$0xff] }
 0x7dd   :  { %13996 = vmatprep.subr.bf16.mxu1 %v15989_v4  ;;  %v15974_v4 = vcombine.low %v7559_v44, %v7563_v16  ;;  %v15982_v2 = vcombine.low %v7567_v8, %v7571_v12  ;;  %v7670_v16 = vld [vmem:[#allocation11 + $0x1c10] sm:$0xff]  ;;  %v7615_v51 = vld [vmem:[#allocation11 + $0x1a58] sm:$0xff] }
 0x7de   :  { %14300 = vmatpush1.bf16.msra.mxu0 %v15926_v55  ;;  %v7630_v55 = vld [vmem:[#allocation11 + $0x1ad0] sm:$0xff] }
 0x7df   :  { %14301 = vmatprep.subr.bf16.mxu0 %v15935_v40  ;;  %v7579_v40 = vld [vmem:[#allocation11 + $0x1938] sm:$0xff]  ;;  %v16044_v9 = vcombine.low %v7630_v55, %v7634_v45 }
 0x7e0   :  { %13997 = vmatpush1.bf16.msra.mxu1 %v15988_v30  ;;  %v16045_v30 = vcombine.high %v7630_v55, %v7634_v45  ;;  %v7623_v45 = vld [vmem:[#allocation11 + $0x1a98] sm:$0xff] }
 0x7e1   :  { %13998 = vmatprep.subr.bf16.mxu1 %v15997_v52  ;;  %v7642_v52 = vld [vmem:[#allocation11 + $0x1b30] sm:$0xff] }
 0x7e2   :  { %14302 = vmatpush1.bf16.msra.mxu0 %v15934_v58  ;;  %v16052_v0 = vcombine.low %v7638_v6, %v7642_v52 }
 0x7e3   :  { %14303 = vmatprep.subr.bf16.mxu0 %v15943_v10  ;;  %v7587_v10 = vld [vmem:[#allocation11 + $0x1978] sm:$0xff] }
 0x7e4   :  { %13999 = vmatpush1.bf16.msra.mxu1 %v15996_v21  ;;  %v16053_v21 = vcombine.high %v7638_v6, %v7642_v52  ;;  %v15998_v27 = vcombine.low %v7583_v41, %v7587_v10  ;;  %v7631_v52 = vld [vmem:[#allocation11 + $0x1ad8] sm:$0xff] }
 0x7e5   :  { %14000 = vmatprep.subr.bf16.mxu1 %v16005_v59  ;;  %v7650_v59 = vld [vmem:[#allocation11 + $0x1b70] sm:$0xff] }
 0x7e6   :  { %14304 = vmatpush1.bf16.msra.mxu0 %v15942_v32  ;;  %v15999_v32 = vcombine.high %v7583_v41, %v7587_v10  ;;  %v16060_v38 = vcombine.low %v7646_v54, %v7650_v59  ;;  %v7694_v10 = vld [vmem:[#allocation11 + $0x1cd0] sm:$0xff] }
 0x7e7   :  { %14305 = vmatprep.subr.bf16.mxu0 %v15951_v13  ;;  %v7595_v13 = vld [vmem:[#allocation11 + $0x19b8] sm:$0xff] }
 0x7e8   :  { %14001 = vmatpush1.bf16.msra.mxu1 %v16004_v26  ;;  %v16061_v26 = vcombine.high %v7646_v54, %v7650_v59  ;;  %v16006_v37 = vcombine.low %v7591_v48, %v7595_v13  ;;  %v7639_v59 = vld [vmem:[#allocation11 + $0x1b18] sm:$0xff] }
 0x7e9   :  { %14002 = vmatprep.subr.bf16.mxu1 %v16013_v14  ;;  %v7658_v14 = vld [vmem:[#allocation11 + $0x1bb0] sm:$0xff] }
 0x7ea   :  { %14306 = vmatpush1.bf16.msra.mxu0 %v15950_v35  ;;  %v16007_v35 = vcombine.high %v7591_v48, %v7595_v13  ;;  %v16068_v29 = vcombine.low %v7654_v1, %v7658_v14  ;;  %v7702_v13 = vld [vmem:[#allocation11 + $0x1d10] sm:$0xff] }
 0x7eb   :  { %14316 = vmatprep.subr.bf16.mxu0 %v15959_v19  ;;  %v7603_v19 = vld [vmem:[#allocation11 + $0x19f8] sm:$0xff] }
 0x7ec   :  { %14003 = vmatpush1.bf16.msra.mxu1 %v16012_v31  ;;  %v16069_v31 = vcombine.high %v7654_v1, %v7658_v14  ;;  %v16014_v44 = vcombine.low %v7599_v15, %v7603_v19  ;;  %v7647_v14 = vld [vmem:[#allocation11 + $0x1b58] sm:$0xff] }
 0x7ed   :  { %14004 = vmatprep.subr.bf16.mxu1 %v16021_v57  ;;  %14308 = vmatmul.mubr.bf16.vlgmr.msra.gmra.mrb[16].mxu0 %v19158_v62  ;;  %v15983_v62 = vcombine.high %v7567_v8, %v7571_v12  ;;  %v7666_v57 = vld [vmem:[#allocation11 + $0x1bf0] sm:$0xff] }
 0x7ee   :  { %14317 = vmatpush1.bf16.msra.mxu0 %v15958_v39  ;;  %14348 = vmatprep.mubr.bf16.mxu0 %v19162_v7  ;;  %v7575_v7 = vld [vmem:[#allocation11 + $0x1918] sm:$0xff]  ;;  %v16015_v39 = vcombine.high %v7599_v15, %v7603_v19  ;;  %v16076_v22 = vcombine.low %v7662_v34, %v7666_v57  ;;  %v7678_v12 = vld [vmem:[#allocation11 + $0x1c50] sm:$0xff] }
 0x7ef   :  { %14318 = vmatprep.subr.bf16.mxu0 %v15967_v3  ;;  %v15991_v58 = vcombine.high %v7575_v7, %v7579_v40  ;;  %v15990_v47 = vcombine.low %v7575_v7, %v7579_v40  ;;  %v7611_v3 = vld [vmem:[#allocation11 + $0x1a38] sm:$0xff]  ;;  %v7686_v40 = vld [vmem:[#allocation11 + $0x1c90] sm:$0xff] }
 0x7f0   :  { %14005 = vmatpush1.bf16.msra.mxu1 %v16020_v25  ;;  %v16077_v25 = vcombine.high %v7662_v34, %v7666_v57  ;;  %v16022_v8 = vcombine.low %v7607_v43, %v7611_v3  ;;  %v7710_v19 = vld [vmem:[#allocation11 + $0x1d50] sm:$0xff]  ;;  %v7655_v57 = vld [vmem:[#allocation11 + $0x1b98] sm:$0xff] }
 0x7f1   :  { %14006 = vmatprep.subr.bf16.mxu1 %v16029_v24  ;;  %v7674_v24 = vld [vmem:[#allocation11 + $0x1c30] sm:$0xff] }
 0x7f2   :  { %14319 = vmatpush1.bf16.msra.mxu0 %v15966_v53  ;;  %v16023_v53 = vcombine.high %v7607_v43, %v7611_v3  ;;  %v16084_v55 = vcombine.low %v7670_v16, %v7674_v24  ;;  %v7718_v3 = vld [vmem:[#allocation11 + $0x1d90] sm:$0xff] }
 0x7f3   :  { %14320 = vmatprep.subr.bf16.mxu0 %v15975_v18  ;;  %v7619_v18 = vld [vmem:[#allocation11 + $0x1a78] sm:$0xff] }
 0x7f4   :  { %14007 = vmatpush1.bf16.msra.mxu1 %v16028_v11  ;;  %v16085_v11 = vcombine.high %v7670_v16, %v7674_v24  ;;  %v16030_v7 = vcombine.low %v7615_v51, %v7619_v18  ;;  %v7663_v24 = vld [vmem:[#allocation11 + $0x1bd8] sm:$0xff] }
 0x7f5   :  { %14008 = vmatprep.subr.bf16.mxu1 %v16037_v33  ;;  %v7682_v33 = vld [vmem:[#allocation11 + $0x1c70] sm:$0xff] }
 0x7f6   :  { %14321 = vmatpush1.bf16.msra.mxu0 %v15974_v4  ;;  %v16031_v4 = vcombine.high %v7615_v51, %v7619_v18  ;;  %v16092_v6 = vcombine.low %v7678_v12, %v7682_v33  ;;  %v7726_v18 = vld [vmem:[#allocation11 + $0x1dd0] sm:$0xff] }
 0x7f7   :  { %14322 = vmatprep.subr.bf16.mxu0 %v15983_v62  ;;  %v7627_v62 = vld [vmem:[#allocation11 + $0x1ab8] sm:$0xff] }
 0x7f8   :  { %14009 = vmatpush1.bf16.msra.mxu1 %v16036_v23  ;;  %v16093_v23 = vcombine.high %v7678_v12, %v7682_v33  ;;  %v16038_v41 = vcombine.low %v7623_v45, %v7627_v62  ;;  %v7671_v33 = vld [vmem:[#allocation11 + $0x1c18] sm:$0xff] }
 0x7f9   :  { %14010 = vmatprep.subr.bf16.mxu1 %v16045_v30  ;;  %v7690_v30 = vld [vmem:[#allocation11 + $0x1cb0] sm:$0xff] }
 0x7fa   :  { %14323 = vmatpush1.bf16.msra.mxu0 %v15982_v2  ;;  %v16039_v2 = vcombine.high %v7623_v45, %v7627_v62  ;;  %v16100_v54 = vcombine.low %v7686_v40, %v7690_v30  ;;  %v7734_v62 = vld [vmem:[#allocation11 + $0x1e10] sm:$0xff] }
 0x7fb   :  { %14324 = vmatprep.subr.bf16.mxu0 %v15991_v58  ;;  %v7635_v58 = vld [vmem:[#allocation11 + $0x1af8] sm:$0xff] }
 0x7fc   :  { %14011 = vmatpush1.bf16.msra.mxu1 %v16044_v9  ;;  %v16101_v9 = vcombine.high %v7686_v40, %v7690_v30  ;;  %v16046_v48 = vcombine.low %v7631_v52, %v7635_v58  ;;  %v7679_v30 = vld [vmem:[#allocation11 + $0x1c58] sm:$0xff] }
 0x7fd   :  { %14012 = vmatprep.subr.bf16.mxu1 %v16053_v21  ;;  %v7698_v21 = vld [vmem:[#allocation11 + $0x1cf0] sm:$0xff] }
 0x7fe   :  { %14325 = vmatpush1.bf16.msra.mxu0 %v15990_v47  ;;  %v16047_v47 = vcombine.high %v7631_v52, %v7635_v58  ;;  %v16108_v1 = vcombine.low %v7694_v10, %v7698_v21  ;;  %v7742_v58 = vld [vmem:[#allocation11 + $0x1e50] sm:$0xff] }
 0x7ff   :  { %14326 = vmatprep.subr.bf16.mxu0 %v15999_v32  ;;  %v7643_v32 = vld [vmem:[#allocation11 + $0x1b38] sm:$0xff] }
 0x800   :  { %14013 = vmatpush1.bf16.msra.mxu1 %v16052_v0  ;;  %v16109_v0 = vcombine.high %v7694_v10, %v7698_v21  ;;  %v16054_v15 = vcombine.low %v7639_v59, %v7643_v32  ;;  %v7687_v21 = vld [vmem:[#allocation11 + $0x1c98] sm:$0xff] }
 0x801   :  { %14014 = vmatprep.subr.bf16.mxu1 %v16061_v26  ;;  %v7706_v26 = vld [vmem:[#allocation11 + $0x1d30] sm:$0xff] }
 0x802   :  { %14327 = vmatpush1.bf16.msra.mxu0 %v15998_v27  ;;  %v16055_v27 = vcombine.high %v7639_v59, %v7643_v32  ;;  %v16116_v34 = vcombine.low %v7702_v13, %v7706_v26  ;;  %v7750_v32 = vld [vmem:[#allocation11 + $0x1e90] sm:$0xff] }
 0x803   :  { %14328 = vmatprep.subr.bf16.mxu0 %v16007_v35  ;;  %v7651_v35 = vld [vmem:[#allocation11 + $0x1b78] sm:$0xff] }
 0x804   :  { %14015 = vmatpush1.bf16.msra.mxu1 %v16060_v38  ;;  %v16117_v38 = vcombine.high %v7702_v13, %v7706_v26  ;;  %v16062_v43 = vcombine.low %v7647_v14, %v7651_v35  ;;  %v7695_v26 = vld [vmem:[#allocation11 + $0x1cd8] sm:$0xff] }
 0x805   :  { %14016 = vmatprep.subr.bf16.mxu1 %v16069_v31  ;;  %v7714_v31 = vld [vmem:[#allocation11 + $0x1d70] sm:$0xff] }
 0x806   :  { %14329 = vmatpush1.bf16.msra.mxu0 %v16006_v37  ;;  %v16063_v37 = vcombine.high %v7647_v14, %v7651_v35  ;;  %v16124_v16 = vcombine.low %v7710_v19, %v7714_v31  ;;  %v7758_v35 = vld [vmem:[#allocation11 + $0x1ed0] sm:$0xff] }
 0x807   :  { %14330 = vmatprep.subr.bf16.mxu0 %v16015_v39  ;;  %v7659_v39 = vld [vmem:[#allocation11 + $0x1bb8] sm:$0xff] }
 0x808   :  { %14017 = vmatpush1.bf16.msra.mxu1 %v16068_v29  ;;  %v16125_v29 = vcombine.high %v7710_v19, %v7714_v31  ;;  %v16070_v51 = vcombine.low %v7655_v57, %v7659_v39  ;;  %v7707_v19 = vld [vmem:[#allocation11 + $0x1d38] sm:$0xff] }
 0x809   :  { %14018 = vmatprep.subr.bf16.mxu1 %v16077_v25  ;;  %v7722_v25 = vld [vmem:[#allocation11 + $0x1db0] sm:$0xff] }
 0x80a   :  { %14331 = vmatpush1.bf16.msra.mxu0 %v16014_v44  ;;  %v16071_v44 = vcombine.high %v7655_v57, %v7659_v39  ;;  %v16132_v12 = vcombine.low %v7718_v3, %v7722_v25  ;;  %v7770_v57 = vld [vmem:[#allocation11 + $0x1f30] sm:$0xff] }
 0x80b   :  { %14332 = vmatprep.subr.bf16.mxu0 %v16023_v53  ;;  %v7667_v53 = vld [vmem:[#allocation11 + $0x1bf8] sm:$0xff] }
 0x80c   :  { %14019 = vmatpush1.bf16.msra.mxu1 %v16076_v22  ;;  %v16133_v22 = vcombine.high %v7718_v3, %v7722_v25  ;;  %v16078_v45 = vcombine.low %v7663_v24, %v7667_v53  ;;  %v7715_v3 = vld [vmem:[#allocation11 + $0x1d78] sm:$0xff] }
 0x80d   :  { %14029 = vmatprep.subr.bf16.mxu1 %v16085_v11  ;;  %v7730_v11 = vld [vmem:[#allocation11 + $0x1df0] sm:$0xff] }
 0x80e   :  { %14333 = vmatpush1.bf16.msra.mxu0 %v16022_v8  ;;  %v16079_v8 = vcombine.high %v7663_v24, %v7667_v53  ;;  %v16140_v40 = vcombine.low %v7726_v18, %v7730_v11  ;;  %v7778_v24 = vld [vmem:[#allocation11 + $0x1f70] sm:$0xff] }
 0x80f   :  { %14021 = vmatmul.mubr.bf16.vlgmr.msra.gmra.mrb[20].mxu1 %v19170_v5  ;;  %14334 = vmatprep.subr.bf16.mxu0 %v16031_v4  ;;  %v7675_v4 = vld [vmem:[#allocation11 + $0x1c38] sm:$0xff] }
 0x810   :  { %14030 = vmatpush1.bf16.msra.mxu1 %v16084_v55  ;;  %14061 = vmatprep.mubr.bf16.mxu1 %v19174_v20  ;;  %v16141_v55 = vcombine.high %v7726_v18, %v7730_v11  ;;  %v16086_v52 = vcombine.low %v7671_v33, %v7675_v4  ;;  %v7723_v18 = vld [vmem:[#allocation11 + $0x1db8] sm:$0xff] }
 0x811   :  { %14031 = vmatprep.subr.bf16.mxu1 %v16093_v23  ;;  %v7738_v23 = vld [vmem:[#allocation11 + $0x1e30] sm:$0xff] }
 0x812   :  { %14335 = vmatpush1.bf16.msra.mxu0 %v16030_v7  ;;  %v16087_v7 = vcombine.high %v7671_v33, %v7675_v4  ;;  %v16148_v10 = vcombine.low %v7734_v62, %v7738_v23  ;;  %v7786_v33 = vld [vmem:[#allocation11 + $0x1fb0] sm:$0xff] }
 0x813   :  { %14336 = vmatprep.subr.bf16.mxu0 %v16039_v2  ;;  %v7683_v2 = vld [vmem:[#allocation11 + $0x1c78] sm:$0xff] }
 0x814   :  { %14032 = vmatpush1.bf16.msra.mxu1 %v16092_v6  ;;  %v16149_v6 = vcombine.high %v7734_v62, %v7738_v23  ;;  %v16094_v59 = vcombine.low %v7679_v30, %v7683_v2  ;;  %v7731_v62 = vld [vmem:[#allocation11 + $0x1df8] sm:$0xff] }
 0x815   :  { %14033 = vmatprep.subr.bf16.mxu1 %v16101_v9  ;;  %v7746_v9 = vld [vmem:[#allocation11 + $0x1e70] sm:$0xff] }
 0x816   :  { %14337 = vmatpush1.bf16.msra.mxu0 %v16038_v41  ;;  %v16095_v41 = vcombine.high %v7679_v30, %v7683_v2  ;;  %v16156_v13 = vcombine.low %v7742_v58, %v7746_v9  ;;  %v7794_v30 = vld [vmem:[#allocation11 + $0x1ff0] sm:$0xff] }
 0x817   :  { %14338 = vmatprep.subr.bf16.mxu0 %v16047_v47  ;;  %v7691_v47 = vld [vmem:[#allocation11 + $0x1cb8] sm:$0xff] }
 0x818   :  { %14034 = vmatpush1.bf16.msra.mxu1 %v16100_v54  ;;  %v16157_v54 = vcombine.high %v7742_v58, %v7746_v9  ;;  %v16102_v14 = vcombine.low %v7687_v21, %v7691_v47  ;;  %v7739_v58 = vld [vmem:[#allocation11 + $0x1e38] sm:$0xff] }
 0x819   :  { %14035 = vmatprep.subr.bf16.mxu1 %v16109_v0  ;;  %v7754_v0 = vld [vmem:[#allocation11 + $0x1eb0] sm:$0xff] }
 0x81a   :  { %14339 = vmatpush1.bf16.msra.mxu0 %v16046_v48  ;;  %v16103_v48 = vcombine.high %v7687_v21, %v7691_v47  ;;  %v7743_v47 = vld [vmem:[#allocation11 + $0x1e58] sm:$0xff] }
 0x81b   :  { %14340 = vmatprep.subr.bf16.mxu0 %v16055_v27  ;;  %v7699_v27 = vld [vmem:[#allocation11 + $0x1cf8] sm:$0xff] }
 0x81c   :  { %14036 = vmatpush1.bf16.msra.mxu1 %v16108_v1  ;;  %v16165_v1 = vcombine.high %v7750_v32, %v7754_v0 }
 0x81d   :  { %14037 = vmatprep.subr.bf16.mxu1 %v16117_v38  ;;  %v7762_v38 = vld [vmem:[#allocation11 + $0x1ef0] sm:$0xff] }
 0x81e   :  { %14341 = vmatpush1.bf16.msra.mxu0 %v16054_v15  ;;  %v16164_v15 = vcombine.low %v7750_v32, %v7754_v0  ;;  %v16173_v31 = vcombine.high %v7758_v35, %v7762_v38  ;;  %v7751_v0 = vld [vmem:[#allocation11 + $0x1e98] sm:$0xff] }
 0x81f   :  { %14342 = vmatprep.subr.bf16.mxu0 %v16063_v37  ;;  %v16110_v37 = vcombine.low %v7695_v26, %v7699_v27 }
 0x820   :  { %14038 = vmatpush1.bf16.msra.mxu1 %v16116_v34  ;;  %v7766_v34 = vld [vmem:[#allocation11 + $0x1f10] sm:$0xff] }
 0x821   :  { %14039 = vmatprep.subr.bf16.mxu1 %v16125_v29  ;;  %v16172_v29 = vcombine.low %v7758_v35, %v7762_v38  ;;  %v16181_v25 = vcombine.high %v7766_v34, %v7770_v57  ;;  %v7767_v38 = vld [vmem:[#allocation11 + $0x1f18] sm:$0xff] }
 0x822   :  { %14343 = vmatpush1.bf16.msra.mxu0 %v16062_v43  ;;  %v7711_v43 = vld [vmem:[#allocation11 + $0x1d58] sm:$0xff] }
 0x823   :  { %14344 = vmatprep.subr.bf16.mxu0 %v16071_v44  ;;  %v16127_v53 = vcombine.high %v7711_v43, %v7715_v3 }
 0x824   :  { %14040 = vmatpush1.bf16.msra.mxu1 %v16124_v16  ;;  %v7774_v16 = vld [vmem:[#allocation11 + $0x1f50] sm:$0xff] }
 0x825   :  { %14041 = vmatprep.subr.bf16.mxu1 %v16133_v22  ;;  %v16180_v22 = vcombine.low %v7766_v34, %v7770_v57  ;;  %v16189_v11 = vcombine.high %v7774_v16, %v7778_v24  ;;  %v7783_v57 = vld [vmem:[#allocation11 + $0x1f98] sm:$0xff] }
 0x826   :  { %14345 = vmatpush1.bf16.msra.mxu0 %v16070_v51  ;;  %v7719_v51 = vld [vmem:[#allocation11 + $0x1d98] sm:$0xff] }
 0x827   :  { %14346 = vmatprep.subr.bf16.mxu0 %v16079_v8  ;;  %v16126_v8 = vcombine.low %v7711_v43, %v7715_v3  ;;  %v16135_v4 = vcombine.high %v7719_v51, %v7723_v18  ;;  %v7791_v3 = vld [vmem:[#allocation11 + $0x1fd8] sm:$0xff] }
 0x828   :  { %14042 = vmatpush1.bf16.msra.mxu1 %v16132_v12  ;;  %v7782_v12 = vld [vmem:[#allocation11 + $0x1f90] sm:$0xff] }
 0x829   :  { %14043 = vmatprep.subr.bf16.mxu1 %v16141_v55  ;;  %v16188_v55 = vcombine.low %v7774_v16, %v7778_v24  ;;  %v16197_v23 = vcombine.high %v7782_v12, %v7786_v33 }
 0x82a   :  { %14347 = vmatpush1.bf16.msra.mxu0 %v16078_v45  ;;  %v7727_v45 = vld [vmem:[#allocation11 + $0x1dd8] sm:$0xff] }
 0x82b   :  { %14357 = vmatprep.subr.bf16.mxu0 %v16087_v7  ;;  %v16134_v7 = vcombine.low %v7719_v51, %v7723_v18  ;;  %v16143_v2 = vcombine.high %v7727_v45, %v7731_v62 }
 0x82c   :  { %14044 = vmatpush1.bf16.msra.mxu1 %v16140_v40  ;;  %v7790_v40 = vld [vmem:[#allocation11 + $0x1fd0] sm:$0xff] }
 0x82d   :  { %14045 = vmatprep.subr.bf16.mxu1 %v16149_v6  ;;  %14349 = vmatmul.mubr.bf16.vlgmr.msra.gmra.mrb[16].mxu0 %v19170_v5  ;;  %v16111_v5 = vcombine.high %v7695_v26, %v7699_v27  ;;  %v16196_v6 = vcombine.low %v7782_v12, %v7786_v33  ;;  %v16205_v9 = vcombine.high %v7790_v40, %v7794_v30  ;;  %v7759_v27 = vld [vmem:[#allocation11 + $0x1ed8] sm:$0xff] }
 0x82e   :  { %14358 = vmatpush1.bf16.msra.mxu0 %v16086_v52  ;;  %14389 = vmatprep.mubr.bf16.mxu0 %v19174_v20  ;;  %v7703_v20 = vld [vmem:[#allocation11 + $0x1d18] sm:$0xff]  ;;  %v16204_v21 = vcombine.low %v7790_v40, %v7794_v30 }
 0x82f   :  { %14359 = vmatprep.subr.bf16.mxu0 %v16095_v41  ;;  %v16119_v39 = vcombine.high %v7703_v20, %v7707_v19  ;;  %v16118_v44 = vcombine.low %v7703_v20, %v7707_v19  ;;  %v7735_v52 = vld [vmem:[#allocation11 + $0x1e18] sm:$0xff]  ;;  %v16142_v41 = vcombine.low %v7727_v45, %v7731_v62 }
 0x830   :  { %14046 = vmatpush1.bf16.msra.mxu1 %v16148_v10  ;;  %v16151_v10 = vcombine.high %v7735_v52, %v7739_v58  ;;  %v7775_v19 = vld [vmem:[#allocation11 + $0x1f58] sm:$0xff] }
 0x831   :  { %14047 = vmatprep.subr.bf16.mxu1 %v16157_v54  ;;  %v7747_v54 = vld [vmem:[#allocation11 + $0x1e78] sm:$0xff] }
 0x832   :  { %14360 = vmatpush1.bf16.msra.mxu0 %v16094_v59  ;;  %v16150_v59 = vcombine.low %v7735_v52, %v7739_v58  ;;  %v16159_v32 = vcombine.high %v7743_v47, %v7747_v54 }
 0x833   :  { %14361 = vmatprep.subr.bf16.mxu0 %v16103_v48  ;;  %v7755_v48 = vld [vmem:[#allocation11 + $0x1eb8] sm:$0xff] }
 0x834   :  { %14048 = vmatpush1.bf16.msra.mxu1 %v16156_v13  ;;  %v16158_v13 = vcombine.low %v7743_v47, %v7747_v54  ;;  %v16167_v26 = vcombine.high %v7751_v0, %v7755_v48 }
 0x835   :  { %14049 = vmatprep.subr.bf16.mxu1 %v16165_v1  ;;  %v7763_v1 = vld [vmem:[#allocation11 + $0x1ef8] sm:$0xff] }
 0x836   :  { %14362 = vmatpush1.bf16.msra.mxu0 %v16102_v14  ;;  %v16166_v14 = vcombine.low %v7751_v0, %v7755_v48  ;;  %v16175_v35 = vcombine.high %v7759_v27, %v7763_v1 }
 0x837   :  { %14363 = vmatprep.subr.bf16.mxu0 %v16111_v5  ;;  %v7771_v5 = vld [vmem:[#allocation11 + $0x1f38] sm:$0xff] }
 0x838   :  { %14050 = vmatpush1.bf16.msra.mxu1 %v16164_v15  ;;  %v16174_v15 = vcombine.low %v7759_v27, %v7763_v1  ;;  %v16183_v20 = vcombine.high %v7767_v38, %v7771_v5 }
 0x839   :  { %14051 = vmatprep.subr.bf16.mxu1 %v16173_v31  ;;  %v7779_v31 = vld [vmem:[#allocation11 + $0x1f78] sm:$0xff] }
 0x83a   :  { %14364 = vmatpush1.bf16.msra.mxu0 %v16110_v37  ;;  %v16182_v37 = vcombine.low %v7767_v38, %v7771_v5  ;;  %v16191_v34 = vcombine.high %v7775_v19, %v7779_v31 }
 0x83b   :  { %14365 = vmatprep.subr.bf16.mxu0 %v16119_v39  ;;  %v7787_v39 = vld [vmem:[#allocation11 + $0x1fb8] sm:$0xff] }
 0x83c   :  { %14052 = vmatpush1.bf16.msra.mxu1 %v16172_v29  ;;  %v16190_v29 = vcombine.low %v7775_v19, %v7779_v31  ;;  %v16199_v43 = vcombine.high %v7783_v57, %v7787_v39 }
 0x83d   :  { %14053 = vmatprep.subr.bf16.mxu1 %v16181_v25  ;;  %v7795_v25 = vld [vmem:[#allocation11 + $0x1ff8] sm:$0xff] }
 0x83e   :  { %14366 = vmatpush1.bf16.msra.mxu0 %v16118_v44  ;;  %v16198_v44 = vcombine.low %v7783_v57, %v7787_v39  ;;  %v16207_v16 = vcombine.high %v7791_v3, %v7795_v25  ;;  %v16206_v24 = vcombine.low %v7791_v3, %v7795_v25 }
 0x83f   :  { %14367 = vmatprep.subr.bf16.mxu0 %v16127_v53 }
 0x840   :  { %14054 = vmatpush1.bf16.msra.mxu1 %v16180_v22 }
 0x841   :  { %14055 = vmatprep.subr.bf16.mxu1 %v16189_v11 }
 0x842   :  { %14368 = vmatpush1.bf16.msra.mxu0 %v16126_v8 }
 0x843   :  { %14369 = vmatprep.subr.bf16.mxu0 %v16135_v4 }
 0x844   :  { %14056 = vmatpush1.bf16.msra.mxu1 %v16188_v55 }
 0x845   :  { %14057 = vmatprep.subr.bf16.mxu1 %v16197_v23 }
 0x846   :  { %14370 = vmatpush1.bf16.msra.mxu0 %v16134_v7 }
 0x847   :  { %14371 = vmatprep.subr.bf16.mxu0 %v16143_v2 }
 0x848   :  { %14058 = vmatpush1.bf16.msra.mxu1 %v16196_v6 }
 0x849   :  { %14059 = vmatprep.subr.bf16.mxu1 %v16205_v9 }
 0x84a   :  { %14372 = vmatpush1.bf16.msra.mxu0 %v16142_v41 }
 0x84b   :  { %14373 = vmatprep.subr.bf16.mxu0 %v16151_v10 }
 0x84c   :  { %14060 = vmatpush1.bf16.msra.mxu1 %v16204_v21 }
 0x84e   :  { %14374 = vmatpush1.bf16.msra.mxu0 %v16150_v59 }
 0x84f   :  { %14062 = vmatmul.mubr.bf16.vlgmr.msra.gmra.mrb[20].mxu1 %v19182_v36  ;;  %14375 = vmatprep.subr.bf16.mxu0 %v16159_v32 }
 0x852   :  { %14376 = vmatpush1.bf16.msra.mxu0 %v16158_v13 }
 0x853   :  { %14377 = vmatprep.subr.bf16.mxu0 %v16167_v26 }
 0x856   :  { %14378 = vmatpush1.bf16.msra.mxu0 %v16166_v14 }
 0x857   :  { %14379 = vmatprep.subr.bf16.mxu0 %v16175_v35 }
 0x85a   :  { %14380 = vmatpush1.bf16.msra.mxu0 %v16174_v15 }
 0x85b   :  { %14381 = vmatprep.subr.bf16.mxu0 %v16183_v20 }
 0x85e   :  { %14382 = vmatpush1.bf16.msra.mxu0 %v16182_v37 }
 0x85f   :  { %14383 = vmatprep.subr.bf16.mxu0 %v16191_v34 }
 0x862   :  { %14384 = vmatpush1.bf16.msra.mxu0 %v16190_v29 }
 0x863   :  { %14385 = vmatprep.subr.bf16.mxu0 %v16199_v43 }
 0x866   :  { %14386 = vmatpush1.bf16.msra.mxu0 %v16198_v44 }
 0x867   :  { %14387 = vmatprep.subr.bf16.mxu0 %v16207_v16 }
 0x86a   :  { %14388 = vmatpush1.bf16.msra.mxu0 %v16206_v24 }
 0x86d   :  { %14390 = vmatmul.mubr.bf16.vlgmr.msra.gmra.mrb[16].mxu0 %v19182_v36 }
 0x86e   :  { %16859 = shalt.err (!%p16856_p6)
}
 0x86f   :  { %s16860_s12 = scalar_lea.hbm %s19320_s10, 256 }
 0x870   :  { %p16861_p7 = scmp.ne.s32.totalorder %s19320_s10, %s16860_s12  ;;  %p16864_p8 = scmp.lt.u32.totalorder %s16860_s12, %s19320_s10 }
 0x872   :  { %p16866_p9 = pnand %p16864_p8, %p16861_p7 }
 0x874   :  { %16869 = shalt.err (!%p16866_p9)
}
 0x875   :  { %s16946_s17 = smov 128   ;;  %s16947_s19 = smov 8  }
 0x876   :  { %14499 = dma.vmem_to_hbm [thread:$0]  %s14494_s2, 256, %s19320_s10, [#allocation19], %s16946_s17, %s16946_s17, %s16947_s19  }
 0x877   :  { %s16948_s4 = smov [#allocation17]  }
 0x878   :  { %s14481_s27 = sshll.u32 %s16948_s4, 4  ;;  %s14482_s27 = int_to_ptr.vmem [resolvable:$true] %s14481_s27 }
 0x879   :  { %s16870_s28 = scalar_lea.vmem %s14482_s27, 96  ;;  %p16875_p11 = scmp.lt.s32.totalorder %s14482_s27, %s14482_s27 }
 0x87a   :  { %p16871_p10 = scmp.ne.s32.totalorder %s14482_s27, %s16870_s28  ;;  %p16876_p12 = scmp.lt.s32.totalorder %s16870_s28, %s16870_s28 }
 0x87c   :  { %p16877_p13 = por %p16876_p12, %p16875_p11 }
 0x87e   :  { %p16878_p0 = pnand %p16877_p13, %p16871_p10 }
 0x880   :  { %16881 = shalt.err (!%p16878_p0)
}
 0x881   :  { %s16882_s3 = scalar_lea.hbm %s19319_s9, 96 }
 0x882   :  { %p16883_p1 = scmp.ne.s32.totalorder %s19319_s9, %s16882_s3  ;;  %p16886_p2 = scmp.lt.u32.totalorder %s16882_s3, %s19319_s9 }
 0x884   :  { %p16888_p3 = pnand %p16886_p2, %p16883_p1 }
 0x886   :  { %16891 = shalt.err (!%p16888_p3)
}
 0x887   :  { %s16949_s7 = smov 48   ;;  %s16950_s30 = smov 3   ;;  %v16649_v36 = vld [vmem:[#allocation16] sm:$0xff]  ;;  %v14448_v28 = vrot.slane %v14438_v50, %v18360_v63 }
 0x888   :  { %14487 = dma.vmem_to_hbm [thread:$0]  %s14482_s27, 96, %s19319_s9, [#allocation4], %s16949_s7, %s16949_s7, %s16950_s30   ;;  %v7817_v53 = vrot.slane %v16649_v36, %v2440_v61  ;;  %v7821_v22 = vrot.slane %v16649_v36, %v2444_v56  ;;  %v7825_v55 = vrot.slane %v16649_v36, %v2448_v42  ;;  %v7829_v45 = vrot.slane %v16649_v36, %v2452_v49 }
 0x889   :  { %s16951_s9 = smov [#allocation20]   ;;  %v14455_v42 = vrot.slane %v14439_v46, %v18360_v63 }
 0x88a   :  { %s14505_s18 = sshll.u32 %s16951_s9, 4  ;;  %s14506_s18 = int_to_ptr.vmem [resolvable:$true] %s14505_s18 }
 0x88b   :  { %s16892_s8 = scalar_lea.vmem %s14506_s18, 256  ;;  %p16897_p5 = scmp.lt.s32.totalorder %s14506_s18, %s14506_s18 }
 0x88c   :  { %p16893_p4 = scmp.ne.s32.totalorder %s14506_s18, %s16892_s8  ;;  %p16898_p6 = scmp.lt.s32.totalorder %s16892_s8, %s16892_s8 }
 0x88e   :  { %p16899_p7 = por %p16898_p6, %p16897_p5 }
 0x890   :  { %p16900_p8 = pnand %p16899_p7, %p16893_p4 }
 0x922   :  { %v14063_v51 = vpop.f32.mrb[20].mxu1 }
 0x923   :  { %v16266_v18 = vadd.f32 %v14063_v51, %v7817_v53  ;;  %v14065_v11 = vpop.f32.mrb[21].mxu1 }
 0x924   :  { %v16267_v8 = vadd.f32 %v14065_v11, %v7821_v22  ;;  %v14067_v12 = vpop.f32.mrb[22].mxu1 }
 0x925   :  { %v14068_v33 = vpop.f32.mrb[23].mxu1 }
 0x926   :  { %v14408_v4 = vcombine.low %v16266_v18, %v16267_v8 }
 0x928   :  { %v14430_v2 = vrot.slane %v14408_v4, %v18360_v63 }
 0x940   :  { %v14391_v62 = vpop.f32.mrb[16].mxu0 }
 0x941   :  { %v16268_v23 = vadd.f32 %v14391_v62, %v7825_v55  ;;  %v14393_v7 = vpop.f32.mrb[17].mxu0 }
 0x942   :  { %v16269_v61 = vadd.f32 %v14393_v7, %v7829_v45  ;;  %v14395_v40 = vpop.f32.mrb[18].mxu0 }
 0x943   :  { %v14396_v30 = vpop.f32.mrb[19].mxu0 }
 0x944   :  { %v14409_v56 = vcombine.low %v16268_v23, %v16269_v61 }
 0x946   :  { %v14437_v6 = vrot.slane %v14409_v56, %v18360_v63 }
 0x948   :  { %v14440_v52 = vcombine.low %v14430_v2, %v14437_v6  ;;  %v14441_v58 = vcombine.high %v14430_v2, %v14437_v6 }
 0x94a   :  { %v14462_v49 = vrot.slane %v14440_v52, %v18360_v63  ;;  %v14469_v9 = vrot.slane %v14441_v58, %v18360_v63 }
 0x94c   :  { %v14470_v41 = vcombine.low %v14448_v28, %v14462_v49  ;;  %v14471_v10 = vcombine.low %v14455_v42, %v14469_v9 }
 0x94e   :  { %14474 = vst [vmem:[#allocation20] sm:$0xff] %v14470_v41  ;;  %14475 = vst [vmem:[#allocation20 + $0x8] sm:$0xff] %v14471_v10 }
 0x94f   :  { %16903 = shalt.err (!%p16900_p8)
}
 0x950   :  { %s16904_s24 = scalar_lea.hbm %s19321_s11, 256 }
 0x951   :  { %p16905_p9 = scmp.ne.s32.totalorder %s19321_s11, %s16904_s24  ;;  %p16908_p10 = scmp.lt.u32.totalorder %s16904_s24, %s19321_s11 }
 0x953   :  { %p16910_p11 = pnand %p16908_p10, %p16905_p9 }
 0x955   :  { %16913 = shalt.err (!%p16910_p11)
}
 0x956   :  { %14511 = dma.vmem_to_hbm [thread:$0]  %s14506_s18, 256, %s19321_s11, [#allocation19], %s16946_s17, %s16946_s17, %s16947_s19  }
 0x957   :  { %16924 = dma.done.wait [#allocation4], 96  }
 0x958   :  { %16925 = vsyncadd [#allocation4], 4294967200 }
 0x959   :  { %16926 = dma.done.wait [#allocation19], 512  }
 0x95a   :  { %16927 = vsyncadd [#allocation19], 4294966784 }
 0x95b   :  { %14521 = vsyncpa [#allocation3], 1 }
 0x95c   :  { %14522 = vsyncpa [#allocation6], 1 }
 0x95d   :  { %14523 = vsyncpa [#allocation9], 1 }
 0x95e   :  { %14524 = vsyncpa [#allocation12], 1 }
 0x95f   :  { %14525 = vsyncpa [#allocation15], 1 }
 0x960   :  { %14526 = vsyncpa [#allocation4], 1 }
 0x961   :  { %14527 = vsyncpa [#allocation19], 1 }

</bundles_post_ra>
